<compile_context>
chip_gen: v7x
topology: tpu7x:2x2x1
jax: 0.10.0
libtpu: 0.0.40
codegen_flags: <defaults>
</compile_context>

<pallas_src>
import functools

import numpy as np
import jax
import jax.numpy as jnp
from jax import lax
from jax.experimental import pallas as pl
from jax.experimental.pallas import tpu as pltpu


# ---------------------------------------------------------------------------
# Fused Pallas kernel: the whole res_conv_block forward for one batch element
# ---------------------------------------------------------------------------
def fused_res_block_kernel(x_ref, wc1_ref, sha_ref, wg_ref, sh0_ref,
                           w1_ref, b1_ref, w2_ref, b2_ref, wd_ref, shd_ref,
                           o_ref, y1p_ref, *, H, W, C, R, PAD):
    HW = H * W

    xv = x_ref[0]                                   # (HW + 2*PAD, Cin) f32, zero-padded

    # Column-validity masks for horizontal taps (dx = -1 / +1).  Vertically
    # out-of-range taps land in the zero-pad rows and need no mask.
    col = lax.broadcasted_iota(jnp.int32, (HW, 1), 0) % W
    mask_m = col >= 1              # dx = -1 valid
    mask_p = col <= W - 2          # dx = +1 valid

    def conv3x3(src, w_taps_ref):
        """3x3 'same' conv as 9 shifted flat taps (in-kernel im2col).

        src        : (HW + 2*PAD, Cin') f32, flat rows zero-padded PAD rows top/bottom.
        w_taps_ref : (9, Cin', Cout) bf16 ref, BN scale already folded in.
        Returns f32 (HW, Cout).
        """
        acc = None
        for t in range(9):
            dy, dx = t // 3 - 1, t % 3 - 1
            s = PAD + dy * W + dx                   # static slice start
            tap = src[s:s + HW, :]
            if dx == -1:
                tap = jnp.where(mask_m, tap, 0.0)
            elif dx == 1:
                tap = jnp.where(mask_p, tap, 0.0)
            c = jnp.dot(tap.astype(jnp.bfloat16), w_taps_ref[t],
                        preferred_element_type=jnp.float32)
            acc = c if acc is None else acc + c
        return acc

    # ---- conv.0 : 3x3 conv (BN folded into weights) + ReLU -------------------
    y1 = jnp.maximum(conv3x3(xv, wc1_ref) + sha_ref[...], 0.0)          # (HW, C) f32

    # Stage y1 into a zero-padded VMEM scratch (aligned stores; no in-kernel concat).
    y1p_ref[0:PAD, :] = jnp.zeros((PAD, C), jnp.float32)
    y1p_ref[PAD + HW:PAD + HW + PAD, :] = jnp.zeros((PAD, C), jnp.float32)
    y1p_ref[PAD:PAD + HW, :] = y1
    y1p = y1p_ref[...]

    # ---- SplAt grouped 3x3 conv (block-diag dense, bias+BN0 folded) + ReLU ---
    x2 = jnp.maximum(conv3x3(y1p, wg_ref) + sh0_ref[...], 0.0)          # (HW, R*C) f32

    # ---- split-attention tail ------------------------------------------------
    splits = [x2[:, r * C:(r + 1) * C] for r in range(R)]               # (HW, C) each
    rsum = splits[0]
    for r in range(1, R):
        rsum = rsum + splits[r]
    gap = jnp.sum(rsum, axis=0, keepdims=True) * (1.0 / HW)             # GAP -> (1, C)

    a1 = jnp.dot(gap, w1_ref[...], preferred_element_type=jnp.float32) + b1_ref[...]
    a1 = jnp.maximum(a1, 0.0)                                           # fc1 + BN1 + ReLU

    att = jnp.dot(a1, w2_ref[...], preferred_element_type=jnp.float32) + b2_ref[...]
    logits = [att[:, r * C:(r + 1) * C] for r in range(R)]              # (1, C) per radix

    m = logits[0]
    for r in range(1, R):
        m = jnp.maximum(m, logits[r])
    exps = [jnp.exp(l - m) for l in logits]
    denom = exps[0]
    for r in range(1, R):
        denom = denom + exps[r]
    inv = pl.reciprocal(denom, approx=True)                             # EUP, not VALU

    out = (exps[0] * inv) * splits[0]
    for r in range(1, R):
        out = out + (exps[r] * inv) * splits[r]
    out = jnp.maximum(out, 0.0)                                         # ReLU after SplAt

    # ---- downsample residual (1x1 conv + BN, folded) and final ReLU ----------
    xin = xv[PAD:PAD + HW, :]                                           # un-padded rows
    resid = jnp.dot(xin, wd_ref[...], preferred_element_type=jnp.float32) + shd_ref[...]
    o_ref[0] = jnp.maximum(out + resid, 0.0).astype(o_ref.dtype)


# ---------------------------------------------------------------------------
# Wrapper
# ---------------------------------------------------------------------------
def res_conv_block_forward(x_nchw, KP):
    """x_nchw: (B, Cin, H, W) f32 -> (B, C, H, W) f32."""
    B, Cin, H, W = x_nchw.shape
    HW = H * W
    C = KP["wc1"].shape[2]
    RC = KP["wg"].shape[2]
    R = RC // C
    I = KP["w1"].shape[1]
    PAD = ((W + 1 + 7) // 8) * 8          # >= W+1, sublane-aligned pad rows

    # NCHW -> flat NHWC rows, zero-padded with PAD rows top/bottom (stays f32; the
    # kernel casts conv operands to bf16 per tap for the MXU).
    xf = jnp.transpose(x_nchw, (0, 2, 3, 1)).reshape(B, HW, Cin)
    xf = jnp.pad(xf, ((0, 0), (PAD, PAD), (0, 0)))

    kern = functools.partial(fused_res_block_kernel, H=H, W=W, C=C, R=R, PAD=PAD)
    out = pl.pallas_call(
        kern,
        out_shape=jax.ShapeDtypeStruct((B, HW, C), jnp.float32),
        grid_spec=pltpu.PrefetchScalarGridSpec(
            num_scalar_prefetch=0,
            grid=(B,),
            in_specs=[
                pl.BlockSpec((1, HW + 2 * PAD, Cin), lambda b: (b, 0, 0)),
                pl.BlockSpec((9, Cin, C), lambda b: (0, 0, 0)),
                pl.BlockSpec((1, C), lambda b: (0, 0)),
                pl.BlockSpec((9, C, RC), lambda b: (0, 0, 0)),
                pl.BlockSpec((1, RC), lambda b: (0, 0)),
                pl.BlockSpec((C, I), lambda b: (0, 0)),
                pl.BlockSpec((1, I), lambda b: (0, 0)),
                pl.BlockSpec((I, RC), lambda b: (0, 0)),
                pl.BlockSpec((1, RC), lambda b: (0, 0)),
                pl.BlockSpec((Cin, C), lambda b: (0, 0)),
                pl.BlockSpec((1, C), lambda b: (0, 0)),
            ],
            out_specs=pl.BlockSpec((1, HW, C), lambda b: (b, 0, 0)),
            scratch_shapes=[pltpu.VMEM((HW + 2 * PAD, C), jnp.float32)],
        ),
        compiler_params=pltpu.CompilerParams(
            dimension_semantics=("parallel",),          # shards batch across TCs on v7x
            vmem_limit_bytes=32 * 1024 * 1024),
    )(xf, KP["wc1"], KP["sh_a"], KP["wg"], KP["sh_0"], KP["w1"], KP["b1"],
      KP["w2"], KP["b2"], KP["wd"], KP["sh_d"])

    # NHWC -> NCHW (output only; every intermediate stayed in VMEM).
    return out.reshape(B, H, W, C).transpose(0, 3, 1, 2)


# ---------------------------------------------------------------------------
# Parameter folding: BN running stats + biases folded into weights / shifts
# ---------------------------------------------------------------------------
def prepare_kernel_params(P, eps=1e-5):
    C, R, G = P["C"], P["R"], P["G"]
    Cin = P["Wc1"].shape[2]
    RC = R * C
    Cg = C // G
    I = P["Wfc1"].shape[1]

    def fold(gamma, beta, mean, var, bias=None):
        s = gamma / jnp.sqrt(var + eps)
        sh = beta - mean * s
        if bias is not None:
            sh = sh + bias * s
        return s, sh

    s_a, sh_a = fold(P["g_a"], P["b_a"], P["m_a"], P["v_a"])
    s_0, sh_0 = fold(P["g_0"], P["b_0"], P["m_0"], P["v_0"], bias=P["bg"])
    s_1, sh_1 = fold(P["g_1"], P["b_1"], P["m_1"], P["v_1"], bias=P["bfc1"])
    s_d, sh_d = fold(P["g_d"], P["b_d"], P["m_d"], P["v_d"])

    wc1 = (P["Wc1"] * s_a[None, None, None, :]).reshape(9, Cin, C).astype(jnp.bfloat16)
    wg = (P["Wg"] * s_0[None, None, None, :]).reshape(9, C, RC).astype(jnp.bfloat16)
    w1 = (P["Wfc1"] * s_1[None, :]).astype(jnp.float32)
    b1 = sh_1.reshape(1, I).astype(jnp.float32)

    # Permute fc2 output columns from PyTorch's grouped (g, r, k) order to the
    # radix-major (r, g, k) order produced by rSoftMax's view/transpose/reshape,
    # so the kernel's per-radix attention chunks line up with the conv splits.
    perm = np.zeros(RC, dtype=np.int32)
    for g in range(G):
        for r in range(R):
            for k in range(Cg):
                perm[r * C + g * Cg + k] = g * (R * Cg) + r * Cg + k
    w2 = P["Wfc2"][:, perm].astype(jnp.float32)               # (I, RC), radix-major cols
    b2 = P["bfc2"][perm].reshape(1, RC).astype(jnp.float32)

    wd = (P["Wd"] * s_d[None, :]).astype(jnp.float32)

    return dict(wc1=wc1, sh_a=sh_a.reshape(1, C), wg=wg, sh_0=sh_0.reshape(1, RC),
                w1=w1, b1=b1, w2=w2, b2=b2, wd=wd, sh_d=sh_d.reshape(1, C))


# ---------------------------------------------------------------------------
# Pure-JAX reference (mirrors the PyTorch graph op-by-op) for verification
# ---------------------------------------------------------------------------
def reference_forward(x_nchw, P):
    eps = 1e-5
    bn = lambda z, g, b, m, v: (z - m) * (g / jnp.sqrt(v + eps)) + b
    C, R, G = P["C"], P["R"], P["G"]
    Cg = C // G
    dn = ("NHWC", "HWIO", "NHWC")
    x = jnp.transpose(x_nchw, (0, 2, 3, 1))
    B = x.shape[0]

    y = lax.conv_general_dilated(x, P["Wc1"], (1, 1), ((1, 1), (1, 1)), dimension_numbers=dn)
    y = jnp.maximum(bn(y, P["g_a"], P["b_a"], P["m_a"], P["v_a"]), 0.0)

    xs = lax.conv_general_dilated(y, P["Wg"], (1, 1), ((1, 1), (1, 1)), dimension_numbers=dn) + P["bg"]
    xs = jnp.maximum(bn(xs, P["g_0"], P["b_0"], P["m_0"], P["v_0"]), 0.0)

    splits = [xs[..., r * C:(r + 1) * C] for r in range(R)]
    gap = sum(splits).mean(axis=(1, 2))                           # (B, C)
    a1 = gap @ P["Wfc1"] + P["bfc1"]
    a1 = jnp.maximum(bn(a1, P["g_1"], P["b_1"], P["m_1"], P["v_1"]), 0.0)
    att = a1 @ P["Wfc2"] + P["bfc2"]                              # (B, R*C) grouped order
    att = att.reshape(B, G, R, Cg).transpose(0, 2, 1, 3)          # rSoftMax
    att = jax.nn.softmax(att, axis=1).reshape(B, R * C)
    out = sum(att[:, r * C:(r + 1) * C][:, None, None, :] * splits[r] for r in range(R))
    out = jnp.maximum(out, 0.0)

    resid = lax.conv_general_dilated(x, P["Wd"][None, None], (1, 1), "VALID", dimension_numbers=dn)
    resid = bn(resid, P["g_d"], P["b_d"], P["m_d"], P["v_d"])
    y_out = jnp.maximum(out + resid, 0.0)
    return jnp.transpose(y_out, (0, 3, 1, 2))


# ---------------------------------------------------------------------------
if __name__ == "__main__":
    B, Cin, H, W = 2, 4, 16, 16
    C, R, G = 32, 4, 4          # ch_out, radix, groups (cardinality)
    RC = R * C
    I = max(C * R // 4, 32)     # SplAtConv2d inter_channels (reduction_factor=4)

    key = jax.random.PRNGKey(0)
    ks = jax.random.split(key, 16)

    def nrm(k, shape, s=0.1):
        return s * jax.random.normal(k, shape, jnp.float32)

    def bn_params(k, c):
        k1, k2, k3, k4 = jax.random.split(k, 4)
        return (1.0 + 0.1 * jax.random.normal(k1, (c,), jnp.float32),   # gamma
                0.1 * jax.random.normal(k2, (c,), jnp.float32),         # beta
                0.1 * jax.random.normal(k3, (c,), jnp.float32),         # running mean
                jax.random.uniform(k4, (c,), jnp.float32, 0.5, 1.5))    # running var

    def group_mask(cin, cout, groups):
        m = np.zeros((cin, cout), np.float32)
        ci, co = cin // groups, cout // groups
        for g in range(groups):
            m[g * ci:(g + 1) * ci, g * co:(g + 1) * co] = 1.0
        return jnp.asarray(m)

    # conv.0 (3x3, no bias) + BN
    Wc1 = nrm(ks[0], (3, 3, Cin, C))
    g_a, b_a, m_a, v_a = bn_params(ks[1], C)

    # SplAt grouped 3x3 conv (groups=G*R) + bias + BN0  (block-diagonal dense weight)
    Wg = nrm(ks[2], (3, 3, C, RC)) * group_mask(C, RC, G * R)[None, None]
    bg = nrm(ks[3], (RC,))
    g_0, b_0, m_0, v_0 = bn_params(ks[4], RC)

    # fc1 (1x1 grouped) + BN1
    Wfc1 = nrm(ks[5], (C, I)) * group_mask(C, I, G)
    bfc1 = nrm(ks[6], (I,))
    g_1, b_1, m_1, v_1 = bn_params(ks[7], I)

    # fc2 (1x1 grouped) + bias
    Wfc2 = nrm(ks[8], (I, RC)) * group_mask(I, RC, G)
    bfc2 = nrm(ks[9], (RC,))

    # downsample 1x1 conv (no bias) + BN
    Wd = nrm(ks[10], (Cin, C))
    g_d, b_d, m_d, v_d = bn_params(ks[11], C)

    P = dict(C=C, R=R, G=G, I=I,
             Wc1=Wc1, g_a=g_a, b_a=b_a, m_a=m_a, v_a=v_a,
             Wg=Wg, bg=bg, g_0=g_0, b_0=b_0, m_0=m_0, v_0=v_0,
             Wfc1=Wfc1, bfc1=bfc1, g_1=g_1, b_1=b_1, m_1=m_1, v_1=v_1,
             Wfc2=Wfc2, bfc2=bfc2,
             Wd=Wd, g_d=g_d, b_d=b_d, m_d=m_d, v_d=v_d)

    KP = prepare_kernel_params(P)
    x = jax.random.normal(ks[12], (B, Cin, H, W), jnp.float32)

    forward = jax.jit(res_conv_block_forward)
    out = jax.block_until_ready(forward(x, KP))
    ref = jax.block_until_ready(reference_forward(x, P))

    assert out.shape == (B, C, H, W) and out.dtype == jnp.float32
    # bf16 MXU conv operands (f32 accumulation) vs. the all-f32 XLA reference.
    np.testing.assert_allclose(np.asarray(out), np.asarray(ref), rtol=2e-2, atol=2e-2)
    print("KERNEL_OK")
</pallas_src>

<mosaic_0001>
module attributes {stable_mosaic.version = 11 : i64} {
  func.func @fused_res_block_kernel(%arg0: i32, %arg1: memref<1x304x4xf32, #tpu.memory_space<vmem>>, %arg2: memref<9x4x32xbf16, #tpu.memory_space<vmem>>, %arg3: memref<1x32xf32, #tpu.memory_space<vmem>>, %arg4: memref<9x32x128xbf16, #tpu.memory_space<vmem>>, %arg5: memref<1x128xf32, #tpu.memory_space<vmem>>, %arg6: memref<32x32xf32, #tpu.memory_space<vmem>>, %arg7: memref<1x32xf32, #tpu.memory_space<vmem>>, %arg8: memref<32x128xf32, #tpu.memory_space<vmem>>, %arg9: memref<1x128xf32, #tpu.memory_space<vmem>>, %arg10: memref<4x32xf32, #tpu.memory_space<vmem>>, %arg11: memref<1x32xf32, #tpu.memory_space<vmem>>, %arg12: memref<1x256x32xf32, #tpu.memory_space<vmem>>, %arg13: memref<304x32xf32, #tpu.memory_space<vmem>>) attributes {dimension_semantics = [#tpu.dimension_semantics<parallel>], iteration_bounds = array<i64: 2>, scalar_prefetch = 0 : i64, scratch_operands = 1 : i64, tpu.core_type = #tpu.core_type<tc>, window_params = [{transform_indices = @transform_0, window_bounds = array<i64: 1, 304, 4>}, {pipeline_mode = #tpu.pipeline_mode<synchronous>, transform_indices = @transform_1, window_bounds = array<i64: 9, 4, 32>}, {pipeline_mode = #tpu.pipeline_mode<synchronous>, transform_indices = @transform_2, window_bounds = array<i64: 1, 32>}, {pipeline_mode = #tpu.pipeline_mode<synchronous>, transform_indices = @transform_3, window_bounds = array<i64: 9, 32, 128>}, {pipeline_mode = #tpu.pipeline_mode<synchronous>, transform_indices = @transform_4, window_bounds = array<i64: 1, 128>}, {pipeline_mode = #tpu.pipeline_mode<synchronous>, transform_indices = @transform_5, window_bounds = array<i64: 32, 32>}, {pipeline_mode = #tpu.pipeline_mode<synchronous>, transform_indices = @transform_6, window_bounds = array<i64: 1, 32>}, {pipeline_mode = #tpu.pipeline_mode<synchronous>, transform_indices = @transform_7, window_bounds = array<i64: 32, 128>}, {pipeline_mode = #tpu.pipeline_mode<synchronous>, transform_indices = @transform_8, window_bounds = array<i64: 1, 128>}, {pipeline_mode = #tpu.pipeline_mode<synchronous>, transform_indices = @transform_9, window_bounds = array<i64: 4, 32>}, {pipeline_mode = #tpu.pipeline_mode<synchronous>, transform_indices = @transform_10, window_bounds = array<i64: 1, 32>}, {transform_indices = @transform_11, window_bounds = array<i64: 1, 256, 32>}]} {
    %c0 = arith.constant 0 : index
    %c0_0 = arith.constant 0 : index
    %c0_1 = arith.constant 0 : index
    %0 = vector.load %arg1[%c0, %c0_0, %c0_1] : memref<1x304x4xf32, #tpu.memory_space<vmem>>, vector<1x304x4xf32>
    %1 = vector.shape_cast %0 : vector<1x304x4xf32> to vector<304x4xf32>
    %2 = tpu.iota {dimensions = array<i32: 0>} : vector<256x1xi32>
    %c16_i32 = arith.constant 16 : i32
    %c0_i32 = arith.constant 0 : i32
    %3 = arith.cmpi eq, %c16_i32, %c0_i32 : i32
    %c1_i32 = arith.constant 1 : i32
    %4 = arith.select %3, %c1_i32, %c16_i32 : i32
    %5 = vector.broadcast %4 : i32 to vector<256x1xi32>
    %6 = arith.remsi %2, %5 : vector<256x1xi32>
    %c0_i32_2 = arith.constant 0 : i32
    %7 = vector.broadcast %c0_i32_2 : i32 to vector<256x1xi32>
    %8 = arith.cmpi ne, %6, %7 : vector<256x1xi32>
    %c0_i32_3 = arith.constant 0 : i32
    %9 = vector.broadcast %c0_i32_3 : i32 to vector<256x1xi32>
    %10 = arith.cmpi slt, %6, %9 : vector<256x1xi32>
    %c0_i32_4 = arith.constant 0 : i32
    %11 = arith.cmpi slt, %4, %c0_i32_4 : i32
    %12 = vector.broadcast %11 : i1 to vector<256x1xi1>
    %13 = vector.broadcast %12 : vector<256x1xi1> to vector<256x1xi1>
    %14 = arith.xori %10, %13 : vector<256x1xi1>
    %15 = arith.andi %14, %8 : vector<256x1xi1>
    %16 = vector.broadcast %4 : i32 to vector<256x1xi32>
    %17 = arith.addi %6, %16 : vector<256x1xi32>
    %18 = arith.select %15, %17, %6 : vector<256x1xi1>, vector<256x1xi32>
    %c1_i32_5 = arith.constant 1 : i32
    %19 = vector.broadcast %c1_i32_5 : i32 to vector<256x1xi32>
    %20 = arith.cmpi sge, %18, %19 : vector<256x1xi32>
    %c14_i32 = arith.constant 14 : i32
    %21 = vector.broadcast %c14_i32 : i32 to vector<256x1xi32>
    %22 = arith.cmpi sle, %18, %21 : vector<256x1xi32>
    %23 = vector.extract_strided_slice %1 {offsets = [7, 0], sizes = [256, 4], strides = [1, 1]} : vector<304x4xf32> to vector<256x4xf32>
    %cst = arith.constant 0.000000e+00 : f32
    %24 = vector.shape_cast %20 : vector<256x1xi1> to vector<256x1xi1>
    %25 = vector.broadcast %24 : vector<256x1xi1> to vector<256x4xi1>
    %26 = vector.broadcast %cst : f32 to vector<256x4xf32>
    %27 = arith.select %25, %23, %26 : vector<256x4xi1>, vector<256x4xf32>
    %28 = arith.truncf %27 : vector<256x4xf32> to vector<256x4xbf16>
    %c0_6 = arith.constant 0 : index
    %c0_7 = arith.constant 0 : index
    %c0_8 = arith.constant 0 : index
    %29 = vector.load %arg2[%c0_6, %c0_7, %c0_8] : memref<9x4x32xbf16, #tpu.memory_space<vmem>>, vector<1x4x32xbf16>
    %30 = vector.shape_cast %29 : vector<1x4x32xbf16> to vector<4x32xbf16>
    %cst_9 = arith.constant dense<0.000000e+00> : vector<256x32xf32>
    %31 = tpu.matmul %28, %30, %cst_9 {dimension_numbers = #tpu.dot_dimension_numbers<[1], [0], [0], [1], [0, 0, 1, 1], [], []>} : vector<256x4xbf16>, vector<4x32xbf16>, vector<256x32xf32> -> vector<256x32xf32>
    %32 = vector.extract_strided_slice %1 {offsets = [8, 0], sizes = [256, 4], strides = [1, 1]} : vector<304x4xf32> to vector<256x4xf32>
    %33 = arith.truncf %32 : vector<256x4xf32> to vector<256x4xbf16>
    %c1 = arith.constant 1 : index
    %c0_10 = arith.constant 0 : index
    %c0_11 = arith.constant 0 : index
    %34 = vector.load %arg2[%c1, %c0_10, %c0_11] : memref<9x4x32xbf16, #tpu.memory_space<vmem>>, vector<1x4x32xbf16>
    %35 = vector.shape_cast %34 : vector<1x4x32xbf16> to vector<4x32xbf16>
    %cst_12 = arith.constant dense<0.000000e+00> : vector<256x32xf32>
    %36 = tpu.matmul %33, %35, %cst_12 {dimension_numbers = #tpu.dot_dimension_numbers<[1], [0], [0], [1], [0, 0, 1, 1], [], []>} : vector<256x4xbf16>, vector<4x32xbf16>, vector<256x32xf32> -> vector<256x32xf32>
    %37 = arith.addf %31, %36 : vector<256x32xf32>
    %38 = vector.extract_strided_slice %1 {offsets = [9, 0], sizes = [256, 4], strides = [1, 1]} : vector<304x4xf32> to vector<256x4xf32>
    %cst_13 = arith.constant 0.000000e+00 : f32
    %39 = vector.shape_cast %22 : vector<256x1xi1> to vector<256x1xi1>
    %40 = vector.broadcast %39 : vector<256x1xi1> to vector<256x4xi1>
    %41 = vector.broadcast %cst_13 : f32 to vector<256x4xf32>
    %42 = arith.select %40, %38, %41 : vector<256x4xi1>, vector<256x4xf32>
    %43 = arith.truncf %42 : vector<256x4xf32> to vector<256x4xbf16>
    %c2 = arith.constant 2 : index
    %c0_14 = arith.constant 0 : index
    %c0_15 = arith.constant 0 : index
    %44 = vector.load %arg2[%c2, %c0_14, %c0_15] : memref<9x4x32xbf16, #tpu.memory_space<vmem>>, vector<1x4x32xbf16>
    %45 = vector.shape_cast %44 : vector<1x4x32xbf16> to vector<4x32xbf16>
    %cst_16 = arith.constant dense<0.000000e+00> : vector<256x32xf32>
    %46 = tpu.matmul %43, %45, %cst_16 {dimension_numbers = #tpu.dot_dimension_numbers<[1], [0], [0], [1], [0, 0, 1, 1], [], []>} : vector<256x4xbf16>, vector<4x32xbf16>, vector<256x32xf32> -> vector<256x32xf32>
    %47 = arith.addf %37, %46 : vector<256x32xf32>
    %48 = vector.extract_strided_slice %1 {offsets = [23, 0], sizes = [256, 4], strides = [1, 1]} : vector<304x4xf32> to vector<256x4xf32>
    %cst_17 = arith.constant 0.000000e+00 : f32
    %49 = vector.shape_cast %20 : vector<256x1xi1> to vector<256x1xi1>
    %50 = vector.broadcast %49 : vector<256x1xi1> to vector<256x4xi1>
    %51 = vector.broadcast %cst_17 : f32 to vector<256x4xf32>
    %52 = arith.select %50, %48, %51 : vector<256x4xi1>, vector<256x4xf32>
    %53 = arith.truncf %52 : vector<256x4xf32> to vector<256x4xbf16>
    %c3 = arith.constant 3 : index
    %c0_18 = arith.constant 0 : index
    %c0_19 = arith.constant 0 : index
    %54 = vector.load %arg2[%c3, %c0_18, %c0_19] : memref<9x4x32xbf16, #tpu.memory_space<vmem>>, vector<1x4x32xbf16>
    %55 = vector.shape_cast %54 : vector<1x4x32xbf16> to vector<4x32xbf16>
    %cst_20 = arith.constant dense<0.000000e+00> : vector<256x32xf32>
    %56 = tpu.matmul %53, %55, %cst_20 {dimension_numbers = #tpu.dot_dimension_numbers<[1], [0], [0], [1], [0, 0, 1, 1], [], []>} : vector<256x4xbf16>, vector<4x32xbf16>, vector<256x32xf32> -> vector<256x32xf32>
    %57 = arith.addf %47, %56 : vector<256x32xf32>
    %58 = vector.extract_strided_slice %1 {offsets = [24, 0], sizes = [256, 4], strides = [1, 1]} : vector<304x4xf32> to vector<256x4xf32>
    %59 = arith.truncf %58 : vector<256x4xf32> to vector<256x4xbf16>
    %c4 = arith.constant 4 : index
    %c0_21 = arith.constant 0 : index
    %c0_22 = arith.constant 0 : index
    %60 = vector.load %arg2[%c4, %c0_21, %c0_22] : memref<9x4x32xbf16, #tpu.memory_space<vmem>>, vector<1x4x32xbf16>
    %61 = vector.shape_cast %60 : vector<1x4x32xbf16> to vector<4x32xbf16>
    %cst_23 = arith.constant dense<0.000000e+00> : vector<256x32xf32>
    %62 = tpu.matmul %59, %61, %cst_23 {dimension_numbers = #tpu.dot_dimension_numbers<[1], [0], [0], [1], [0, 0, 1, 1], [], []>} : vector<256x4xbf16>, vector<4x32xbf16>, vector<256x32xf32> -> vector<256x32xf32>
    %63 = arith.addf %57, %62 : vector<256x32xf32>
    %64 = vector.extract_strided_slice %1 {offsets = [25, 0], sizes = [256, 4], strides = [1, 1]} : vector<304x4xf32> to vector<256x4xf32>
    %cst_24 = arith.constant 0.000000e+00 : f32
    %65 = vector.shape_cast %22 : vector<256x1xi1> to vector<256x1xi1>
    %66 = vector.broadcast %65 : vector<256x1xi1> to vector<256x4xi1>
    %67 = vector.broadcast %cst_24 : f32 to vector<256x4xf32>
    %68 = arith.select %66, %64, %67 : vector<256x4xi1>, vector<256x4xf32>
    %69 = arith.truncf %68 : vector<256x4xf32> to vector<256x4xbf16>
    %c5 = arith.constant 5 : index
    %c0_25 = arith.constant 0 : index
    %c0_26 = arith.constant 0 : index
    %70 = vector.load %arg2[%c5, %c0_25, %c0_26] : memref<9x4x32xbf16, #tpu.memory_space<vmem>>, vector<1x4x32xbf16>
    %71 = vector.shape_cast %70 : vector<1x4x32xbf16> to vector<4x32xbf16>
    %cst_27 = arith.constant dense<0.000000e+00> : vector<256x32xf32>
    %72 = tpu.matmul %69, %71, %cst_27 {dimension_numbers = #tpu.dot_dimension_numbers<[1], [0], [0], [1], [0, 0, 1, 1], [], []>} : vector<256x4xbf16>, vector<4x32xbf16>, vector<256x32xf32> -> vector<256x32xf32>
    %73 = arith.addf %63, %72 : vector<256x32xf32>
    %74 = vector.extract_strided_slice %1 {offsets = [39, 0], sizes = [256, 4], strides = [1, 1]} : vector<304x4xf32> to vector<256x4xf32>
    %cst_28 = arith.constant 0.000000e+00 : f32
    %75 = vector.shape_cast %20 : vector<256x1xi1> to vector<256x1xi1>
    %76 = vector.broadcast %75 : vector<256x1xi1> to vector<256x4xi1>
    %77 = vector.broadcast %cst_28 : f32 to vector<256x4xf32>
    %78 = arith.select %76, %74, %77 : vector<256x4xi1>, vector<256x4xf32>
    %79 = arith.truncf %78 : vector<256x4xf32> to vector<256x4xbf16>
    %c6 = arith.constant 6 : index
    %c0_29 = arith.constant 0 : index
    %c0_30 = arith.constant 0 : index
    %80 = vector.load %arg2[%c6, %c0_29, %c0_30] : memref<9x4x32xbf16, #tpu.memory_space<vmem>>, vector<1x4x32xbf16>
    %81 = vector.shape_cast %80 : vector<1x4x32xbf16> to vector<4x32xbf16>
    %cst_31 = arith.constant dense<0.000000e+00> : vector<256x32xf32>
    %82 = tpu.matmul %79, %81, %cst_31 {dimension_numbers = #tpu.dot_dimension_numbers<[1], [0], [0], [1], [0, 0, 1, 1], [], []>} : vector<256x4xbf16>, vector<4x32xbf16>, vector<256x32xf32> -> vector<256x32xf32>
    %83 = arith.addf %73, %82 : vector<256x32xf32>
    %84 = vector.extract_strided_slice %1 {offsets = [40, 0], sizes = [256, 4], strides = [1, 1]} : vector<304x4xf32> to vector<256x4xf32>
    %85 = arith.truncf %84 : vector<256x4xf32> to vector<256x4xbf16>
    %c7 = arith.constant 7 : index
    %c0_32 = arith.constant 0 : index
    %c0_33 = arith.constant 0 : index
    %86 = vector.load %arg2[%c7, %c0_32, %c0_33] : memref<9x4x32xbf16, #tpu.memory_space<vmem>>, vector<1x4x32xbf16>
    %87 = vector.shape_cast %86 : vector<1x4x32xbf16> to vector<4x32xbf16>
    %cst_34 = arith.constant dense<0.000000e+00> : vector<256x32xf32>
    %88 = tpu.matmul %85, %87, %cst_34 {dimension_numbers = #tpu.dot_dimension_numbers<[1], [0], [0], [1], [0, 0, 1, 1], [], []>} : vector<256x4xbf16>, vector<4x32xbf16>, vector<256x32xf32> -> vector<256x32xf32>
    %89 = arith.addf %83, %88 : vector<256x32xf32>
    %90 = vector.extract_strided_slice %1 {offsets = [41, 0], sizes = [256, 4], strides = [1, 1]} : vector<304x4xf32> to vector<256x4xf32>
    %cst_35 = arith.constant 0.000000e+00 : f32
    %91 = vector.shape_cast %22 : vector<256x1xi1> to vector<256x1xi1>
    %92 = vector.broadcast %91 : vector<256x1xi1> to vector<256x4xi1>
    %93 = vector.broadcast %cst_35 : f32 to vector<256x4xf32>
    %94 = arith.select %92, %90, %93 : vector<256x4xi1>, vector<256x4xf32>
    %95 = arith.truncf %94 : vector<256x4xf32> to vector<256x4xbf16>
    %c8 = arith.constant 8 : index
    %c0_36 = arith.constant 0 : index
    %c0_37 = arith.constant 0 : index
    %96 = vector.load %arg2[%c8, %c0_36, %c0_37] : memref<9x4x32xbf16, #tpu.memory_space<vmem>>, vector<1x4x32xbf16>
    %97 = vector.shape_cast %96 : vector<1x4x32xbf16> to vector<4x32xbf16>
    %cst_38 = arith.constant dense<0.000000e+00> : vector<256x32xf32>
    %98 = tpu.matmul %95, %97, %cst_38 {dimension_numbers = #tpu.dot_dimension_numbers<[1], [0], [0], [1], [0, 0, 1, 1], [], []>} : vector<256x4xbf16>, vector<4x32xbf16>, vector<256x32xf32> -> vector<256x32xf32>
    %99 = arith.addf %89, %98 : vector<256x32xf32>
    %c0_39 = arith.constant 0 : index
    %c0_40 = arith.constant 0 : index
    %100 = vector.load %arg3[%c0_39, %c0_40] : memref<1x32xf32, #tpu.memory_space<vmem>>, vector<1x32xf32>
    %101 = vector.broadcast %100 : vector<1x32xf32> to vector<256x32xf32>
    %102 = arith.addf %99, %101 : vector<256x32xf32>
    %cst_41 = arith.constant 0.000000e+00 : f32
    %103 = vector.broadcast %cst_41 : f32 to vector<256x32xf32>
    %104 = arith.maximumf %102, %103 : vector<256x32xf32>
    %cst_42 = arith.constant 0.000000e+00 : f32
    %105 = vector.broadcast %cst_42 : f32 to vector<24x32xf32>
    %c0_43 = arith.constant 0 : index
    %c0_44 = arith.constant 0 : index
    %106 = vector.load %arg13[%c0_43, %c0_44] : memref<304x32xf32, #tpu.memory_space<vmem>>, vector<24x32xf32>
    tpu.vector_store %arg13[%c0_43, %c0_44], %105 {strides = array<i32>} : memref<304x32xf32, #tpu.memory_space<vmem>>, vector<24x32xf32>,
    %cst_45 = arith.constant 0.000000e+00 : f32
    %107 = vector.broadcast %cst_45 : f32 to vector<24x32xf32>
    %c280 = arith.constant 280 : index
    %c0_46 = arith.constant 0 : index
    %108 = vector.load %arg13[%c280, %c0_46] : memref<304x32xf32, #tpu.memory_space<vmem>>, vector<24x32xf32>
    tpu.vector_store %arg13[%c280, %c0_46], %107 {strides = array<i32>} : memref<304x32xf32, #tpu.memory_space<vmem>>, vector<24x32xf32>,
    %c24 = arith.constant 24 : index
    %c0_47 = arith.constant 0 : index
    %109 = vector.load %arg13[%c24, %c0_47] : memref<304x32xf32, #tpu.memory_space<vmem>>, vector<256x32xf32>
    tpu.vector_store %arg13[%c24, %c0_47], %104 {strides = array<i32>} : memref<304x32xf32, #tpu.memory_space<vmem>>, vector<256x32xf32>,
    %c0_48 = arith.constant 0 : index
    %c0_49 = arith.constant 0 : index
    %110 = vector.load %arg13[%c0_48, %c0_49] : memref<304x32xf32, #tpu.memory_space<vmem>>, vector<304x32xf32>
    %111 = vector.extract_strided_slice %110 {offsets = [7, 0], sizes = [256, 32], strides = [1, 1]} : vector<304x32xf32> to vector<256x32xf32>
    %cst_50 = arith.constant 0.000000e+00 : f32
    %112 = vector.shape_cast %20 : vector<256x1xi1> to vector<256x1xi1>
    %113 = vector.broadcast %112 : vector<256x1xi1> to vector<256x32xi1>
    %114 = vector.broadcast %cst_50 : f32 to vector<256x32xf32>
    %115 = arith.select %113, %111, %114 : vector<256x32xi1>, vector<256x32xf32>
    %116 = arith.truncf %115 : vector<256x32xf32> to vector<256x32xbf16>
    %c0_51 = arith.constant 0 : index
    %c0_52 = arith.constant 0 : index
    %c0_53 = arith.constant 0 : index
    %117 = vector.load %arg4[%c0_51, %c0_52, %c0_53] : memref<9x32x128xbf16, #tpu.memory_space<vmem>>, vector<1x32x128xbf16>
    %118 = vector.shape_cast %117 : vector<1x32x128xbf16> to vector<32x128xbf16>
    %cst_54 = arith.constant dense<0.000000e+00> : vector<256x128xf32>
    %119 = tpu.matmul %116, %118, %cst_54 {dimension_numbers = #tpu.dot_dimension_numbers<[1], [0], [0], [1], [0, 0, 1, 1], [], []>} : vector<256x32xbf16>, vector<32x128xbf16>, vector<256x128xf32> -> vector<256x128xf32>
    %120 = vector.extract_strided_slice %110 {offsets = [8, 0], sizes = [256, 32], strides = [1, 1]} : vector<304x32xf32> to vector<256x32xf32>
    %121 = arith.truncf %120 : vector<256x32xf32> to vector<256x32xbf16>
    %c1_55 = arith.constant 1 : index
    %c0_56 = arith.constant 0 : index
    %c0_57 = arith.constant 0 : index
    %122 = vector.load %arg4[%c1_55, %c0_56, %c0_57] : memref<9x32x128xbf16, #tpu.memory_space<vmem>>, vector<1x32x128xbf16>
    %123 = vector.shape_cast %122 : vector<1x32x128xbf16> to vector<32x128xbf16>
    %cst_58 = arith.constant dense<0.000000e+00> : vector<256x128xf32>
    %124 = tpu.matmul %121, %123, %cst_58 {dimension_numbers = #tpu.dot_dimension_numbers<[1], [0], [0], [1], [0, 0, 1, 1], [], []>} : vector<256x32xbf16>, vector<32x128xbf16>, vector<256x128xf32> -> vector<256x128xf32>
    %125 = arith.addf %119, %124 : vector<256x128xf32>
    %126 = vector.extract_strided_slice %110 {offsets = [9, 0], sizes = [256, 32], strides = [1, 1]} : vector<304x32xf32> to vector<256x32xf32>
    %cst_59 = arith.constant 0.000000e+00 : f32
    %127 = vector.shape_cast %22 : vector<256x1xi1> to vector<256x1xi1>
    %128 = vector.broadcast %127 : vector<256x1xi1> to vector<256x32xi1>
    %129 = vector.broadcast %cst_59 : f32 to vector<256x32xf32>
    %130 = arith.select %128, %126, %129 : vector<256x32xi1>, vector<256x32xf32>
    %131 = arith.truncf %130 : vector<256x32xf32> to vector<256x32xbf16>
    %c2_60 = arith.constant 2 : index
    %c0_61 = arith.constant 0 : index
    %c0_62 = arith.constant 0 : index
    %132 = vector.load %arg4[%c2_60, %c0_61, %c0_62] : memref<9x32x128xbf16, #tpu.memory_space<vmem>>, vector<1x32x128xbf16>
    %133 = vector.shape_cast %132 : vector<1x32x128xbf16> to vector<32x128xbf16>
    %cst_63 = arith.constant dense<0.000000e+00> : vector<256x128xf32>
    %134 = tpu.matmul %131, %133, %cst_63 {dimension_numbers = #tpu.dot_dimension_numbers<[1], [0], [0], [1], [0, 0, 1, 1], [], []>} : vector<256x32xbf16>, vector<32x128xbf16>, vector<256x128xf32> -> vector<256x128xf32>
    %135 = arith.addf %125, %134 : vector<256x128xf32>
    %136 = vector.extract_strided_slice %110 {offsets = [23, 0], sizes = [256, 32], strides = [1, 1]} : vector<304x32xf32> to vector<256x32xf32>
    %cst_64 = arith.constant 0.000000e+00 : f32
    %137 = vector.shape_cast %20 : vector<256x1xi1> to vector<256x1xi1>
    %138 = vector.broadcast %137 : vector<256x1xi1> to vector<256x32xi1>
    %139 = vector.broadcast %cst_64 : f32 to vector<256x32xf32>
    %140 = arith.select %138, %136, %139 : vector<256x32xi1>, vector<256x32xf32>
    %141 = arith.truncf %140 : vector<256x32xf32> to vector<256x32xbf16>
    %c3_65 = arith.constant 3 : index
    %c0_66 = arith.constant 0 : index
    %c0_67 = arith.constant 0 : index
    %142 = vector.load %arg4[%c3_65, %c0_66, %c0_67] : memref<9x32x128xbf16, #tpu.memory_space<vmem>>, vector<1x32x128xbf16>
    %143 = vector.shape_cast %142 : vector<1x32x128xbf16> to vector<32x128xbf16>
    %cst_68 = arith.constant dense<0.000000e+00> : vector<256x128xf32>
    %144 = tpu.matmul %141, %143, %cst_68 {dimension_numbers = #tpu.dot_dimension_numbers<[1], [0], [0], [1], [0, 0, 1, 1], [], []>} : vector<256x32xbf16>, vector<32x128xbf16>, vector<256x128xf32> -> vector<256x128xf32>
    %145 = arith.addf %135, %144 : vector<256x128xf32>
    %146 = vector.extract_strided_slice %110 {offsets = [24, 0], sizes = [256, 32], strides = [1, 1]} : vector<304x32xf32> to vector<256x32xf32>
    %147 = arith.truncf %146 : vector<256x32xf32> to vector<256x32xbf16>
    %c4_69 = arith.constant 4 : index
    %c0_70 = arith.constant 0 : index
    %c0_71 = arith.constant 0 : index
    %148 = vector.load %arg4[%c4_69, %c0_70, %c0_71] : memref<9x32x128xbf16, #tpu.memory_space<vmem>>, vector<1x32x128xbf16>
    %149 = vector.shape_cast %148 : vector<1x32x128xbf16> to vector<32x128xbf16>
    %cst_72 = arith.constant dense<0.000000e+00> : vector<256x128xf32>
    %150 = tpu.matmul %147, %149, %cst_72 {dimension_numbers = #tpu.dot_dimension_numbers<[1], [0], [0], [1], [0, 0, 1, 1], [], []>} : vector<256x32xbf16>, vector<32x128xbf16>, vector<256x128xf32> -> vector<256x128xf32>
    %151 = arith.addf %145, %150 : vector<256x128xf32>
    %152 = vector.extract_strided_slice %110 {offsets = [25, 0], sizes = [256, 32], strides = [1, 1]} : vector<304x32xf32> to vector<256x32xf32>
    %cst_73 = arith.constant 0.000000e+00 : f32
    %153 = vector.shape_cast %22 : vector<256x1xi1> to vector<256x1xi1>
    %154 = vector.broadcast %153 : vector<256x1xi1> to vector<256x32xi1>
    %155 = vector.broadcast %cst_73 : f32 to vector<256x32xf32>
    %156 = arith.select %154, %152, %155 : vector<256x32xi1>, vector<256x32xf32>
    %157 = arith.truncf %156 : vector<256x32xf32> to vector<256x32xbf16>
    %c5_74 = arith.constant 5 : index
    %c0_75 = arith.constant 0 : index
    %c0_76 = arith.constant 0 : index
    %158 = vector.load %arg4[%c5_74, %c0_75, %c0_76] : memref<9x32x128xbf16, #tpu.memory_space<vmem>>, vector<1x32x128xbf16>
    %159 = vector.shape_cast %158 : vector<1x32x128xbf16> to vector<32x128xbf16>
    %cst_77 = arith.constant dense<0.000000e+00> : vector<256x128xf32>
    %160 = tpu.matmul %157, %159, %cst_77 {dimension_numbers = #tpu.dot_dimension_numbers<[1], [0], [0], [1], [0, 0, 1, 1], [], []>} : vector<256x32xbf16>, vector<32x128xbf16>, vector<256x128xf32> -> vector<256x128xf32>
    %161 = arith.addf %151, %160 : vector<256x128xf32>
    %162 = vector.extract_strided_slice %110 {offsets = [39, 0], sizes = [256, 32], strides = [1, 1]} : vector<304x32xf32> to vector<256x32xf32>
    %cst_78 = arith.constant 0.000000e+00 : f32
    %163 = vector.shape_cast %20 : vector<256x1xi1> to vector<256x1xi1>
    %164 = vector.broadcast %163 : vector<256x1xi1> to vector<256x32xi1>
    %165 = vector.broadcast %cst_78 : f32 to vector<256x32xf32>
    %166 = arith.select %164, %162, %165 : vector<256x32xi1>, vector<256x32xf32>
    %167 = arith.truncf %166 : vector<256x32xf32> to vector<256x32xbf16>
    %c6_79 = arith.constant 6 : index
    %c0_80 = arith.constant 0 : index
    %c0_81 = arith.constant 0 : index
    %168 = vector.load %arg4[%c6_79, %c0_80, %c0_81] : memref<9x32x128xbf16, #tpu.memory_space<vmem>>, vector<1x32x128xbf16>
    %169 = vector.shape_cast %168 : vector<1x32x128xbf16> to vector<32x128xbf16>
    %cst_82 = arith.constant dense<0.000000e+00> : vector<256x128xf32>
    %170 = tpu.matmul %167, %169, %cst_82 {dimension_numbers = #tpu.dot_dimension_numbers<[1], [0], [0], [1], [0, 0, 1, 1], [], []>} : vector<256x32xbf16>, vector<32x128xbf16>, vector<256x128xf32> -> vector<256x128xf32>
    %171 = arith.addf %161, %170 : vector<256x128xf32>
    %172 = vector.extract_strided_slice %110 {offsets = [40, 0], sizes = [256, 32], strides = [1, 1]} : vector<304x32xf32> to vector<256x32xf32>
    %173 = arith.truncf %172 : vector<256x32xf32> to vector<256x32xbf16>
    %c7_83 = arith.constant 7 : index
    %c0_84 = arith.constant 0 : index
    %c0_85 = arith.constant 0 : index
    %174 = vector.load %arg4[%c7_83, %c0_84, %c0_85] : memref<9x32x128xbf16, #tpu.memory_space<vmem>>, vector<1x32x128xbf16>
    %175 = vector.shape_cast %174 : vector<1x32x128xbf16> to vector<32x128xbf16>
    %cst_86 = arith.constant dense<0.000000e+00> : vector<256x128xf32>
    %176 = tpu.matmul %173, %175, %cst_86 {dimension_numbers = #tpu.dot_dimension_numbers<[1], [0], [0], [1], [0, 0, 1, 1], [], []>} : vector<256x32xbf16>, vector<32x128xbf16>, vector<256x128xf32> -> vector<256x128xf32>
    %177 = arith.addf %171, %176 : vector<256x128xf32>
    %178 = vector.extract_strided_slice %110 {offsets = [41, 0], sizes = [256, 32], strides = [1, 1]} : vector<304x32xf32> to vector<256x32xf32>
    %cst_87 = arith.constant 0.000000e+00 : f32
    %179 = vector.shape_cast %22 : vector<256x1xi1> to vector<256x1xi1>
    %180 = vector.broadcast %179 : vector<256x1xi1> to vector<256x32xi1>
    %181 = vector.broadcast %cst_87 : f32 to vector<256x32xf32>
    %182 = arith.select %180, %178, %181 : vector<256x32xi1>, vector<256x32xf32>
    %183 = arith.truncf %182 : vector<256x32xf32> to vector<256x32xbf16>
    %c8_88 = arith.constant 8 : index
    %c0_89 = arith.constant 0 : index
    %c0_90 = arith.constant 0 : index
    %184 = vector.load %arg4[%c8_88, %c0_89, %c0_90] : memref<9x32x128xbf16, #tpu.memory_space<vmem>>, vector<1x32x128xbf16>
    %185 = vector.shape_cast %184 : vector<1x32x128xbf16> to vector<32x128xbf16>
    %cst_91 = arith.constant dense<0.000000e+00> : vector<256x128xf32>
    %186 = tpu.matmul %183, %185, %cst_91 {dimension_numbers = #tpu.dot_dimension_numbers<[1], [0], [0], [1], [0, 0, 1, 1], [], []>} : vector<256x32xbf16>, vector<32x128xbf16>, vector<256x128xf32> -> vector<256x128xf32>
    %187 = arith.addf %177, %186 : vector<256x128xf32>
    %c0_92 = arith.constant 0 : index
    %c0_93 = arith.constant 0 : index
    %188 = vector.load %arg5[%c0_92, %c0_93] : memref<1x128xf32, #tpu.memory_space<vmem>>, vector<1x128xf32>
    %189 = vector.broadcast %188 : vector<1x128xf32> to vector<256x128xf32>
    %190 = arith.addf %187, %189 : vector<256x128xf32>
    %cst_94 = arith.constant 0.000000e+00 : f32
    %191 = vector.broadcast %cst_94 : f32 to vector<256x128xf32>
    %192 = arith.maximumf %190, %191 : vector<256x128xf32>
    %193 = vector.extract_strided_slice %192 {offsets = [0, 0], sizes = [256, 32], strides = [1, 1]} : vector<256x128xf32> to vector<256x32xf32>
    %194 = vector.extract_strided_slice %192 {offsets = [0, 32], sizes = [256, 32], strides = [1, 1]} : vector<256x128xf32> to vector<256x32xf32>
    %195 = vector.extract_strided_slice %192 {offsets = [0, 64], sizes = [256, 32], strides = [1, 1]} : vector<256x128xf32> to vector<256x32xf32>
    %196 = vector.extract_strided_slice %192 {offsets = [0, 96], sizes = [256, 32], strides = [1, 1]} : vector<256x128xf32> to vector<256x32xf32>
    %197 = arith.addf %193, %194 : vector<256x32xf32>
    %198 = arith.addf %197, %195 : vector<256x32xf32>
    %199 = arith.addf %198, %196 : vector<256x32xf32>
    %cst_95 = arith.constant dense<0.000000e+00> : vector<32xf32>
    %200 = vector.multi_reduction <add>, %199, %cst_95 [0] : vector<256x32xf32> to vector<32xf32>
    %201 = vector.shape_cast %200 : vector<32xf32> to vector<1x32xf32>
    %cst_96 = arith.constant 3.906250e-03 : f32
    %202 = vector.broadcast %cst_96 : f32 to vector<1x32xf32>
    %203 = arith.mulf %201, %202 : vector<1x32xf32>
    %c0_97 = arith.constant 0 : index
    %c0_98 = arith.constant 0 : index
    %204 = vector.load %arg6[%c0_97, %c0_98] : memref<32x32xf32, #tpu.memory_space<vmem>>, vector<32x32xf32>
    %cst_99 = arith.constant dense<0.000000e+00> : vector<1x32xf32>
    %205 = tpu.matmul %203, %204, %cst_99 {dimension_numbers = #tpu.dot_dimension_numbers<[1], [0], [0], [1], [0, 0, 1, 1], [], []>} : vector<1x32xf32>, vector<32x32xf32>, vector<1x32xf32> -> vector<1x32xf32>
    %c0_100 = arith.constant 0 : index
    %c0_101 = arith.constant 0 : index
    %206 = vector.load %arg7[%c0_100, %c0_101] : memref<1x32xf32, #tpu.memory_space<vmem>>, vector<1x32xf32>
    %207 = arith.addf %205, %206 : vector<1x32xf32>
    %cst_102 = arith.constant 0.000000e+00 : f32
    %208 = vector.broadcast %cst_102 : f32 to vector<1x32xf32>
    %209 = arith.maximumf %207, %208 : vector<1x32xf32>
    %c0_103 = arith.constant 0 : index
    %c0_104 = arith.constant 0 : index
    %210 = vector.load %arg8[%c0_103, %c0_104] : memref<32x128xf32, #tpu.memory_space<vmem>>, vector<32x128xf32>
    %cst_105 = arith.constant dense<0.000000e+00> : vector<1x128xf32>
    %211 = tpu.matmul %209, %210, %cst_105 {dimension_numbers = #tpu.dot_dimension_numbers<[1], [0], [0], [1], [0, 0, 1, 1], [], []>} : vector<1x32xf32>, vector<32x128xf32>, vector<1x128xf32> -> vector<1x128xf32>
    %c0_106 = arith.constant 0 : index
    %c0_107 = arith.constant 0 : index
    %212 = vector.load %arg9[%c0_106, %c0_107] : memref<1x128xf32, #tpu.memory_space<vmem>>, vector<1x128xf32>
    %213 = arith.addf %211, %212 : vector<1x128xf32>
    %214 = vector.extract_strided_slice %213 {offsets = [0, 0], sizes = [1, 32], strides = [1, 1]} : vector<1x128xf32> to vector<1x32xf32>
    %215 = vector.extract_strided_slice %213 {offsets = [0, 32], sizes = [1, 32], strides = [1, 1]} : vector<1x128xf32> to vector<1x32xf32>
    %216 = vector.extract_strided_slice %213 {offsets = [0, 64], sizes = [1, 32], strides = [1, 1]} : vector<1x128xf32> to vector<1x32xf32>
    %217 = vector.extract_strided_slice %213 {offsets = [0, 96], sizes = [1, 32], strides = [1, 1]} : vector<1x128xf32> to vector<1x32xf32>
    %218 = arith.maximumf %214, %215 : vector<1x32xf32>
    %219 = arith.maximumf %218, %216 : vector<1x32xf32>
    %220 = arith.maximumf %219, %217 : vector<1x32xf32>
    %221 = arith.subf %214, %220 : vector<1x32xf32>
    %222 = math.exp %221 : vector<1x32xf32>
    %223 = arith.subf %215, %220 : vector<1x32xf32>
    %224 = math.exp %223 : vector<1x32xf32>
    %225 = arith.subf %216, %220 : vector<1x32xf32>
    %226 = math.exp %225 : vector<1x32xf32>
    %227 = arith.subf %217, %220 : vector<1x32xf32>
    %228 = math.exp %227 : vector<1x32xf32>
    %229 = arith.addf %222, %224 : vector<1x32xf32>
    %230 = arith.addf %229, %226 : vector<1x32xf32>
    %231 = arith.addf %230, %228 : vector<1x32xf32>
    %232 = tpu.reciprocal %231 {approx = true} : vector<1x32xf32> -> vector<1x32xf32>
    %233 = arith.mulf %222, %232 : vector<1x32xf32>
    %234 = vector.broadcast %233 : vector<1x32xf32> to vector<256x32xf32>
    %235 = arith.mulf %234, %193 : vector<256x32xf32>
    %236 = arith.mulf %224, %232 : vector<1x32xf32>
    %237 = vector.broadcast %236 : vector<1x32xf32> to vector<256x32xf32>
    %238 = arith.mulf %237, %194 : vector<256x32xf32>
    %239 = arith.addf %235, %238 : vector<256x32xf32>
    %240 = arith.mulf %226, %232 : vector<1x32xf32>
    %241 = vector.broadcast %240 : vector<1x32xf32> to vector<256x32xf32>
    %242 = arith.mulf %241, %195 : vector<256x32xf32>
    %243 = arith.addf %239, %242 : vector<256x32xf32>
    %244 = arith.mulf %228, %232 : vector<1x32xf32>
    %245 = vector.broadcast %244 : vector<1x32xf32> to vector<256x32xf32>
    %246 = arith.mulf %245, %196 : vector<256x32xf32>
    %247 = arith.addf %243, %246 : vector<256x32xf32>
    %cst_108 = arith.constant 0.000000e+00 : f32
    %248 = vector.broadcast %cst_108 : f32 to vector<256x32xf32>
    %249 = arith.maximumf %247, %248 : vector<256x32xf32>
    %250 = vector.extract_strided_slice %1 {offsets = [24, 0], sizes = [256, 4], strides = [1, 1]} : vector<304x4xf32> to vector<256x4xf32>
    %c0_109 = arith.constant 0 : index
    %c0_110 = arith.constant 0 : index
    %251 = vector.load %arg10[%c0_109, %c0_110] : memref<4x32xf32, #tpu.memory_space<vmem>>, vector<4x32xf32>
    %cst_111 = arith.constant dense<0.000000e+00> : vector<256x32xf32>
    %252 = tpu.matmul %250, %251, %cst_111 {dimension_numbers = #tpu.dot_dimension_numbers<[1], [0], [0], [1], [0, 0, 1, 1], [], []>} : vector<256x4xf32>, vector<4x32xf32>, vector<256x32xf32> -> vector<256x32xf32>
    %c0_112 = arith.constant 0 : index
    %c0_113 = arith.constant 0 : index
    %253 = vector.load %arg11[%c0_112, %c0_113] : memref<1x32xf32, #tpu.memory_space<vmem>>, vector<1x32xf32>
    %254 = vector.broadcast %253 : vector<1x32xf32> to vector<256x32xf32>
    %255 = arith.addf %252, %254 : vector<256x32xf32>
    %256 = arith.addf %249, %255 : vector<256x32xf32>
    %cst_114 = arith.constant 0.000000e+00 : f32
    %257 = vector.broadcast %cst_114 : f32 to vector<256x32xf32>
    %258 = arith.maximumf %256, %257 : vector<256x32xf32>
    %c0_115 = arith.constant 0 : index
    %c0_116 = arith.constant 0 : index
    %c0_117 = arith.constant 0 : index
    %259 = vector.load %arg12[%c0_115, %c0_116, %c0_117] : memref<1x256x32xf32, #tpu.memory_space<vmem>>, vector<1x256x32xf32>
    %260 = vector.shape_cast %259 : vector<1x256x32xf32> to vector<256x32xf32>
    %261 = vector.shape_cast %258 : vector<256x32xf32> to vector<1x256x32xf32>
    tpu.vector_store %arg12[%c0_115, %c0_116, %c0_117], %261 {strides = array<i32>} : memref<1x256x32xf32, #tpu.memory_space<vmem>>, vector<1x256x32xf32>,
    return
  }
  func.func @transform_0(%arg0: i32) -> (i32, i32, i32) {
    %c0_i32 = arith.constant 0 : i32
    %c0_i32_0 = arith.constant 0 : i32
    %c0_i32_1 = arith.constant 0 : i32
    return %arg0, %c0_i32, %c0_i32_0 : i32, i32, i32
  }
  func.func @transform_1(%arg0: i32) -> (i32, i32, i32) {
    %c0_i32 = arith.constant 0 : i32
    %c0_i32_0 = arith.constant 0 : i32
    %c0_i32_1 = arith.constant 0 : i32
    %c0_i32_2 = arith.constant 0 : i32
    return %c0_i32, %c0_i32_0, %c0_i32_1 : i32, i32, i32
  }
  func.func @transform_2(%arg0: i32) -> (i32, i32) {
    %c0_i32 = arith.constant 0 : i32
    %c0_i32_0 = arith.constant 0 : i32
    %c0_i32_1 = arith.constant 0 : i32
    return %c0_i32, %c0_i32_0 : i32, i32
  }
  func.func @transform_3(%arg0: i32) -> (i32, i32, i32) {
    %c0_i32 = arith.constant 0 : i32
    %c0_i32_0 = arith.constant 0 : i32
    %c0_i32_1 = arith.constant 0 : i32
    %c0_i32_2 = arith.constant 0 : i32
    return %c0_i32, %c0_i32_0, %c0_i32_1 : i32, i32, i32
  }
  func.func @transform_4(%arg0: i32) -> (i32, i32) {
    %c0_i32 = arith.constant 0 : i32
    %c0_i32_0 = arith.constant 0 : i32
    %c0_i32_1 = arith.constant 0 : i32
    return %c0_i32, %c0_i32_0 : i32, i32
  }
  func.func @transform_5(%arg0: i32) -> (i32, i32) {
    %c0_i32 = arith.constant 0 : i32
    %c0_i32_0 = arith.constant 0 : i32
    %c0_i32_1 = arith.constant 0 : i32
    return %c0_i32, %c0_i32_0 : i32, i32
  }
  func.func @transform_6(%arg0: i32) -> (i32, i32) {
    %c0_i32 = arith.constant 0 : i32
    %c0_i32_0 = arith.constant 0 : i32
    %c0_i32_1 = arith.constant 0 : i32
    return %c0_i32, %c0_i32_0 : i32, i32
  }
  func.func @transform_7(%arg0: i32) -> (i32, i32) {
    %c0_i32 = arith.constant 0 : i32
    %c0_i32_0 = arith.constant 0 : i32
    %c0_i32_1 = arith.constant 0 : i32
    return %c0_i32, %c0_i32_0 : i32, i32
  }
  func.func @transform_8(%arg0: i32) -> (i32, i32) {
    %c0_i32 = arith.constant 0 : i32
    %c0_i32_0 = arith.constant 0 : i32
    %c0_i32_1 = arith.constant 0 : i32
    return %c0_i32, %c0_i32_0 : i32, i32
  }
  func.func @transform_9(%arg0: i32) -> (i32, i32) {
    %c0_i32 = arith.constant 0 : i32
    %c0_i32_0 = arith.constant 0 : i32
    %c0_i32_1 = arith.constant 0 : i32
    return %c0_i32, %c0_i32_0 : i32, i32
  }
  func.func @transform_10(%arg0: i32) -> (i32, i32) {
    %c0_i32 = arith.constant 0 : i32
    %c0_i32_0 = arith.constant 0 : i32
    %c0_i32_1 = arith.constant 0 : i32
    return %c0_i32, %c0_i32_0 : i32, i32
  }
  func.func @transform_11(%arg0: i32) -> (i32, i32, i32) {
    %c0_i32 = arith.constant 0 : i32
    %c0_i32_0 = arith.constant 0 : i32
    %c0_i32_1 = arith.constant 0 : i32
    return %arg0, %c0_i32, %c0_i32_0 : i32, i32, i32
  }
}

</mosaic_0001>

<bundles_post_ra>
// kernel: res_conv_block_forward.1
= control target key start
LH: loop header
LB: loop body
LE: loop exit
PB: predicated region body
PF: predicated region fallthrough
CT: control target
= control target key end

     0   :  { %16 = vsyncpa [#allocation4], 0  ;;  %s15050_s0 = inlined_call_operand.vmem [shape: f32[2,304,4], index: 0, kind: input, shape index: {}]   ;;  %s15051_s1 = inlined_call_operand.vmem [shape: bf16[9,4,32], index: 1, kind: input, shape index: {}]   ;;  %s15052_s2 = inlined_call_operand.vmem [shape: f32[1,32], index: 2, kind: input, shape index: {}]   ;;  %s15053_s3 = inlined_call_operand.vmem [shape: bf16[9,32,128], index: 3, kind: input, shape index: {}]   ;;  %s15054_s4 = inlined_call_operand.vmem [shape: f32[1,128], index: 4, kind: input, shape index: {}]   ;;  %s15055_s5 = inlined_call_operand.vmem [shape: f32[32,32], index: 5, kind: input, shape index: {}]   ;;  %s15056_s6 = inlined_call_operand.vmem [shape: f32[1,32], index: 6, kind: input, shape index: {}]   ;;  %s15057_s7 = inlined_call_operand.vmem [shape: f32[32,128], index: 7, kind: input, shape index: {}]   ;;  %s15058_s8 = inlined_call_operand.vmem [shape: f32[1,128], index: 8, kind: input, shape index: {}]   ;;  %s15059_s9 = inlined_call_operand.vmem [shape: f32[4,32], index: 9, kind: input, shape index: {}]   ;;  %s15060_s10 = inlined_call_operand.vmem [shape: f32[1,32], index: 10, kind: input, shape index: {}]   ;;  %s15061_s11 = inlined_call_operand.hbm [shape: f32[2,256,32], index: 11, kind: output, shape index: {}]  }
   0x1   :  { %18 = vsyncpa [#allocation4 + $0x1], 0  ;;  %s10677_s17 = smov 0   ;;  %s10679_s18 = smov 0  }
   0x2   :  { %s10681_s19 = smov 0   ;;  %s10683_s20 = smov 0  }
   0x3 LB: > { %s10698_s21 = sadd.s32 4294967295, %s10606_s20   ;;  %s8443_s22 = sadd.s32 4294967294, %s10606_s20   ;;  %s10606_s20 = sphi %s10683_s20, %s16675_s20   ;;  %s10602_s19 = sphi %s10681_s19, %s16674_s19   ;;  %s10598_s18 = sphi %s10679_s18, %s16673_s18   ;;  %s10594_s17 = sphi %s10677_s17, %s16672_s17  }
   0x4   : > { %s10702_s23 = sadd.s32 1, %s10606_s20   ;;  %s267_s24 = sadd.s32 1, %s10602_s19 }
   0x5   : > { %s264_s25 = ssub.s32 %s10606_s20, %s10702_s23  ;;  %p277_p0 = scmp.ne.s32.totalorder %s10602_s19, %s10598_s18 }
   0x6   : > { %p265_p1 = scmp.eq.s32.totalorder %s264_s25, 0  ;;  %p278_p2 = scmp.eq.s32.totalorder %s10698_s21, 1 }
   0x7   : > { %p283_p3 = scmp.ne.s32.totalorder %s10598_s18, %s10594_s17  ;;  %p284_p4 = scmp.eq.s32.totalorder %s8443_s22, 1 }
   0x8   : > { %s10713_s26 = scalar_select %p265_p1, %s10602_s19, %s267_s24  }
   0x9   : > { %p10715_p5 = por %p278_p2, %p277_p0  ;;  %p10719_p6 = por %p284_p4, %p283_p3 }
   0xa   : > { %p8446_p7 = scmp.ge.s32.totalorder %s10606_s20, 1  ;;  %p340_p8 = scmp.lt.s32.totalorder %s10606_s20, 3 }
   0xc   : > { %p341_p9 = pnand %p8446_p7, %p340_p8 }
   0xe   : > { %344 = sbr.rel (%p341_p9) target bundleno = 3081 (0xc09), region = 64 }
  0x15   : > { %v8449_v0 = vld [vmem:[%s15051_s1 + $0x2] sm:$0x3]  ;;  %vm15090_vm0 = vcmask 1041408   ;;  %p380_p10 = scmp.lt.s32.totalorder %s10698_s21, 1  ;;  %v424_v2 = vlaneseq  ;;  %v1148_v3 = vld [vmem:[%s15051_s1] sm:$0x3] }
  0x16   : > { %10425 = vmatprep.subr.msk.bf16.mxu0 %vm15090_vm0, %v8449_v0  ;;  %v1218_v1 = vsel %vm15090_vm0, %v8449_v0, 0  ;;  %10426 = vmatprep.subr.msk.bf16.mxu1 %vm15090_vm0, %v8449_v0  ;;  %vm15114_vm1 = vcmask 31744   ;;  %v1430_v14 = vsel %vm15090_vm0, %v1148_v3, 0  ;;  %v10778_v16 = vld [vmem:[%s15051_s1 + $0x4] sm:$0x3]  ;;  %vm15144_vm2 = vcmask 1040384  }
  0x17   : > { %9198 = vmatpush3.bf16.msra.mxu0 %v1218_v1  ;;  %s381_s14 = scalar_select %p380_p10, %s10698_s21, 1  ;;  %9912 = vmatpush3.bf16.msra.mxu1 %v1218_v1  ;;  %v10737_v4 = vshrl.u32 %v424_v2, 7  ;;  %v15444_v26 = vmov 0  ;;  %v15451_v43 = vmov 0  ;;  %v15455_v58 = vmov 0 }
  0x18   : > { %10427 = vmatprep.subr.msk.bf16.mxu0 %vm15090_vm0, %v1148_v3  ;;  %vm15095_vm6 = vcmask 1046528   ;;  %s10609_s25 = smov 64   ;;  %s15426_s29 = smov 96  }
  0x19   : > { %s10435_s15 = smul.u32 304, %s381_s14  ;;  %15440 = vst [vmem:[#allocation6_spill] sm:$0xff] %v10737_v4  ;;  %v427_v10 = vadd.s32 16, %v10737_v4  ;;  %v461_v37 = vand.u32 15, %v10737_v4  ;;  %v429_v45 = vadd.s32 32, %v10737_v4  ;;  %v431_v57 = vadd.s32 48, %v10737_v4 }
  0x1a   : > { %v433_v60 = vadd.s32 64, %v10737_v4  ;;  %s15424_s30 = smov 32   ;;  %s16516_s16 = smov 96  }
  0x1b   : > { %s10742_s24 = scalar_lea.vmem %s15050_s0, %s10435_s15  ;;  %v475_v17 = vand.u32 15, %v427_v10  ;;  %vm10855_vm4 = vcmp.ge.s32.totalorder %v461_v37, 1  ;;  %v489_v51 = vand.u32 15, %v429_v45  ;;  %v503_v1 = vand.u32 15, %v431_v57  ;;  %s16517_s22 = smov 32  }
  0x1c   : > { %v10745_v5 = vld [vmem:[%s10742_s24 + $0x8] sm:$0xff]  ;;  %v10748_v6 = vld [vmem:[%s10742_s24 + $0x10] sm:$0xff]  ;;  %v10751_v7 = vld [vmem:[%s10742_s24 + $0x18] sm:$0xff]  ;;  %v15452_v43 = vsel %vm10855_vm4, 4294967295, %v15451_v43  ;;  %v517_v10 = vand.u32 15, %v433_v60  ;;  %s8838_s15 = sshll.u32 %s10698_s21, 12 }
  0x1d   : > { %v10754_v8 = vld [vmem:[%s10742_s24 + $0x20] sm:$0xff]  ;;  %v10757_v9 = vld [vmem:[%s10742_s24 + $0x28] sm:$0xff]  ;;  %v1149_v11 = vpack.c.bf16 %v10748_v6, %v10745_v5  ;;  %v10763_v12 = vld [vmem:[%s10742_s24 + $0x30] sm:$0xff]  ;;  %vm10805_vm3 = vcmp.ge.s32.totalorder %v475_v17, 1  ;;  %v1004_v38 = vrot.slane %v10745_v5, 7  ;;  %v1006_v42 = vrot.slane %v10748_v6, 7  ;;  %s14999_s13 = scalar_lea.hbm %s15061_s11, %s8838_s15 }
  0x1e   : > { %v10767_v13 = vpack.c.bf16 %v10754_v8, %v10751_v7  ;;  %v10772_v15 = vpack.c.bf16 %v10763_v12, %v10757_v9  ;;  %v10785_v18 = vld [vmem:[%s10742_s24 + $0x38] sm:$0xff]  ;;  %v10788_v19 = vld [vmem:[%s10742_s24 + $0x40] sm:$0xff]  ;;  %v10791_v20 = vld [vmem:[%s10742_s24 + $0x48] sm:$0xff]  ;;  %v1014_v22 = vrot.slane %v10763_v12, 7  ;;  %v15445_v26 = vsel %vm10805_vm3, 4294967295, %v15444_v26  ;;  %15453 = vst [vmem:[#allocation15_spill] sm:$0xff] %v15452_v43 }
  0x1f   : > { %9199 = vmatprep.mubr.msk.bf16.mxu0 %vm15114_vm1, %v1149_v11  ;;  %v10794_v21 = vld [vmem:[%s10742_s24 + $0x50] sm:$0xff]  ;;  %v1016_v23 = vrot.slane %v10785_v18, 7  ;;  %v1018_v24 = vrot.slane %v10788_v19, 7  ;;  %v10803_v25 = vpack.c.bf16 %v10788_v19, %v10785_v18  ;;  %15446 = vst [vmem:[#allocation10_spill] sm:$0xff] %v15445_v26  ;;  %v10830_v32 = vld [vmem:[%s10742_s24 + $0x58] sm:$0xff]  ;;  %v386_v33 = vld [vmem:[%s10742_s24] sm:$0xff]  ;;  %v1007_v49 = vsel %vm15144_vm2, %v1004_v38, %v1006_v42 }
  0x20   : > { %15441 = vst [vmem:[#allocation7_spill] sm:$0xff] %v10767_v13  ;;  %15442 = vst [vmem:[#allocation8_spill] sm:$0xff] %v10772_v15  ;;  %9200 = vmatmul.mubr.msk.bf16.vlgmr.msra.gmra.mrb[0].mxu0 %vm15114_vm1, %v10767_v13  ;;  %v10811_v27 = vpack.c.bf16 %v10794_v21, %v10791_v20  ;;  %v10836_v34 = vld [vmem:[%s10742_s24 + $0x60] sm:$0xff]  ;;  %v10839_v35 = vld [vmem:[%s10742_s24 + $0x68] sm:$0xff]  ;;  %v1003_v39 = vrot.slane %v386_v33, 7  ;;  %v1008_v48 = vrot.slane %v10751_v7, 7 }
  0x21   : > { %9232 = vmatpush3.bf16.msra.mxu0 %v1430_v14  ;;  %9203 = vmatprep.mubr.msk.bf16.mxu0 %vm15114_vm1, %v10772_v15  ;;  %15443 = vst [vmem:[#allocation9_spill] sm:$0xff] %v10803_v25  ;;  %v10814_v28 = vsel %vm15144_vm2, %v1014_v22, %v1016_v23  ;;  %v10819_v29 = vsel %vm15144_vm2, %v1016_v23, %v1018_v24  ;;  %v10842_v36 = vld [vmem:[%s10742_s24 + $0x70] sm:$0xff]  ;;  %v10866_v46 = vld [vmem:[%s10742_s24 + $0x78] sm:$0xff]  ;;  %v10869_v47 = vld [vmem:[%s10742_s24 + $0x80] sm:$0xff]  ;;  %v1012_v52 = vrot.slane %v10757_v9, 7  ;;  %v1010_v54 = vrot.slane %v10754_v8, 7 }
  0x22   : > { %10428 = vmatprep.subr.msk.bf16.mxu0 %vm15090_vm0, %v10778_v16  ;;  %15447 = vst [vmem:[#allocation11_spill] sm:$0xff] %v10811_v27  ;;  %v2863_v30 = vsel %vm10805_vm3, %v10814_v28, 0.0  ;;  %v10848_v40 = vpack.c.bf16 %v10836_v34, %v10830_v32  ;;  %v10852_v41 = vpack.c.bf16 %v10842_v36, %v10839_v35  ;;  %v1005_v44 = vsel %vm15144_vm2, %v1003_v39, %v1004_v38  ;;  %v10936_v39 = vld [vmem:[%s15051_s1 + $0x6] sm:$0x3] }
  0x23   : > { %v10825_v31 = vpack.c.bf16 %v10819_v29, %v2863_v30  ;;  %v1100_v50 = vsel %vm10855_vm4, %v1005_v44, 0.0  ;;  %v10878_v53 = vpack.c.bf16 %v10869_v47, %v10866_v46  ;;  %v10882_v56 = vsel %vm15144_vm2, %v1006_v42, %v1008_v48 }
  0x24   : > { %15449 = vst [vmem:[#allocation13_spill] sm:$0xff] %v10848_v40  ;;  %15450 = vst [vmem:[#allocation14_spill] sm:$0xff] %v10852_v41  ;;  %v1132_v55 = vpack.c.bf16 %v1007_v49, %v1100_v50  ;;  %vm10885_vm5 = vcmp.ge.s32.totalorder %v489_v51, 1  ;;  %v10890_v59 = vsel %vm15144_vm2, %v1010_v54, %v1012_v52  ;;  %v1102_v61 = vsel %vm10805_vm3, %v10882_v56, 0.0 }
  0x25   : > { %15448 = vst [vmem:[#allocation12_spill] sm:$0xff] %v10825_v31  ;;  %15454 = vst [vmem:[#allocation16_spill] sm:$0xff] %v10878_v53  ;;  %v15456_v58 = vsel %vm10885_vm5, 4294967295, %v15455_v58  ;;  %v10900_v62 = vsel %vm15144_vm2, %v1008_v48, %v1010_v54  ;;  %v10903_v63 = vsel %vm15144_vm2, %v1012_v52, %v1014_v22  ;;  %v1104_v0 = vsel %vm10885_vm5, %v10890_v59, 0.0 }
  0x26   : > { %15457 = vst [vmem:[#allocation17_spill] sm:$0xff] %v15456_v58  ;;  %v1659_v2 = vrot.slane %v10745_v5, 1  ;;  %v1660_v3 = vrot.slane %v10748_v6, 1  ;;  %v1020_v11 = vrot.slane %v10791_v20, 7  ;;  %v1133_v14 = vpack.c.bf16 %v10900_v62, %v1102_v61 }
  0x27   : > { %v1134_v17 = vpack.c.bf16 %v10903_v63, %v1104_v0  ;;  %v435_v22 = vadd.s32 80, %v10737_v4  ;;  %v1855_v23 = vsel %vm15090_vm0, %v10778_v16, 0  ;;  %vm10916_vm7 = vcmp.ge.s32.totalorder %v503_v1, 1 }
  0x28   : > { %9204 = vmatmul.mubr.msk.bf16.gmra.mrb[4].mxu0 %vm15114_vm1, %v10803_v25  ;;  %v15458_v30 = vmov 0  ;;  %v1022_v5 = vrot.slane %v10794_v21, 7  ;;  %v437_v6 = vadd.s32 96, %v10737_v4  ;;  %vm10922_vm8 = vcmp.ge.s32.totalorder %v517_v10, 1 }
  0x29   : > { %9207 = vmatprep.mubr.msk.bf16.mxu0 %vm15114_vm1, %v10811_v27  ;;  %v15459_v30 = vsel %vm10916_vm7, 4294967295, %v15458_v30  ;;  %v15461_v33 = vmov 0  ;;  %v10929_v37 = vsel %vm15144_vm2, %v1018_v24, %v1020_v11  ;;  %v426_v38 = vadd.s32 8, %v10737_v4 }
  0x2a   : > { %15460 = vst [vmem:[#allocation18_spill] sm:$0xff] %v15459_v30  ;;  %v15462_v33 = vsel %vm10922_vm8, 4294967295, %v15461_v33  ;;  %v1661_v16 = vsel %vm15095_vm6, %v1659_v2, %v1660_v3  ;;  %v15062_v42 = vrot.slane %v10751_v7, 1  ;;  %v1106_v24 = vsel %vm10916_vm7, %v10814_v28, 0.0 }
  0x2b   : > { %15463 = vst [vmem:[#allocation19_spill] sm:$0xff] %v15462_v33  ;;  %v531_v44 = vand.u32 15, %v435_v22  ;;  %v468_v45 = vand.u32 15, %v426_v38  ;;  %v10945_v48 = vsel %vm15144_vm2, %v1020_v11, %v1022_v5  ;;  %v1108_v49 = vsel %vm10922_vm8, %v10929_v37, 0.0 }
  0x2c   : > { %v1024_v50 = vrot.slane %v10830_v32, 7  ;;  %v1663_v51 = vsel %vm15095_vm6, %v1660_v3, %v15062_v42  ;;  %v545_v52 = vand.u32 15, %v437_v6  ;;  %v1028_v54 = vrot.slane %v10839_v35, 7 }
  0x2d   : > { %vm10957_vm9 = vcmp.le.s32.totalorder %v468_v45, 14  ;;  %v1135_v57 = vpack.c.bf16 %v10819_v29, %v1106_v24  ;;  %v1136_v61 = vpack.c.bf16 %v10945_v48, %v1108_v49  ;;  %v1026_v0 = vrot.slane %v10836_v34, 7  ;;  %v11004_v45 = vld [vmem:[%s10742_s24 + $0x90] sm:$0xff] }
  0x2e   : > { %v1757_v60 = vsel %vm10957_vm9, %v1663_v51, 0.0  ;;  %vm10968_vm10 = vcmp.ge.s32.totalorder %v531_v44, 1  ;;  %v15467_v2 = vmov 0  ;;  %v10973_v3 = vsel %vm15144_vm2, %v1022_v5, %v1024_v50 }
  0x2f   : > { %v10966_v1 = vpack.c.bf16 %v1757_v60, %v1661_v16  ;;  %v15468_v2 = vsel %vm10968_vm10, 4294967295, %v15467_v2  ;;  %v1030_v10 = vrot.slane %v10842_v36, 7  ;;  %v439_v11 = vadd.s32 112, %v10737_v4 }
  0x30   : > { %9208 = vmatmul.mubr.msk.bf16.gmra.mrb[8].mxu0 %vm15114_vm1, %v10848_v40  ;;  %15469 = vst [vmem:[#allocation21_spill] sm:$0xff] %v15468_v2  ;;  %vm10977_vm11 = vcmp.ge.s32.totalorder %v545_v52, 1  ;;  %v441_v22 = vadd.s32 128, %v10737_v4  ;;  %v10991_v5 = vsel %vm15144_vm2, %v1024_v50, %v1026_v0  ;;  %v1110_v6 = vsel %vm10968_vm10, %v10973_v3, 0.0 }
  0x31   : > { %9211 = vmatprep.mubr.msk.bf16.mxu0 %vm15114_vm1, %v10852_v41  ;;  %15473 = vst [vmem:[#allocation23_spill] sm:$0xff] %v10991_v5  ;;  %v10997_v38 = vsel %vm15144_vm2, %v1028_v54, %v1030_v10  ;;  %v559_v24 = vand.u32 15, %v439_v11  ;;  %v1032_v44 = vrot.slane %v10866_v46, 7  ;;  %v1137_v51 = vpack.c.bf16 %v10991_v5, %v1110_v6  ;;  %v11027_v6 = vld [vmem:[%s10742_s24 + $0x98] sm:$0xff] }
  0x32   : > { %15474 = vst [vmem:[#allocation24_spill] sm:$0xff] %v10997_v38  ;;  %v573_v49 = vand.u32 15, %v441_v22  ;;  %v15479_v11 = vmov 0  ;;  %v15485_v27 = vmov 0  ;;  %v15489_v15 = vmov 0 }
  0x33   : > { %vm11010_vm12 = vcmp.ge.s32.totalorder %v559_v24, 1  ;;  %v11015_v60 = vsel %vm15144_vm2, %v1030_v10, %v1032_v44  ;;  %v11032_v10 = vld [vmem:[%s10742_s24 + $0xa8] sm:$0xff]  ;;  %v455_v58 = vadd.s32 240, %v10737_v4 }
  0x34   : > { %15478 = vst [vmem:[#allocation26_spill] sm:$0xff] %v11015_v60  ;;  %vm11019_vm13 = vcmp.ge.s32.totalorder %v573_v49, 1  ;;  %v1114_v49 = vsel %vm11010_vm12, %v11015_v60, 0.0  ;;  %v11148_v60 = vld [vmem:[%s10742_s24 + $0xf0] sm:$0xff] }
  0x35   : > { %v15480_v11 = vsel %vm11019_vm13, 4294967295, %v15479_v11 }
  0x36   : > { %15481 = vst [vmem:[#allocation27_spill] sm:$0xff] %v15480_v11 }
  0x38   : > { %9212 = vmatmul.mubr.msk.bf16.gmra.mrb[12].mxu0 %vm15114_vm1, %v10878_v53  ;;  %v1044_v53 = vrot.slane %v11032_v10, 7 }
  0x39   : > { %9233 = vmatprep.mubr.msk.bf16.mxu0 %vm15114_vm1, %v1132_v55  ;;  %v15464_v55 = vmov 0 }
  0x3a   : > { %v15465_v55 = vsel %vm10957_vm9, 4294967295, %v15464_v55  ;;  %vm15513_vm9 = vcmask 31744  }
  0x3b   : > { %15466 = vst [vmem:[#allocation20_spill] sm:$0xff] %v15465_v55 }
  0x40   : > { %9234 = vmatmul.mubr.msk.bf16.vlgmr.msra.gmra.mrb[0].mxu0 %vm15114_vm1, %v1133_v14  ;;  %v15470_v14 = vmov 0 }
  0x41   : > { %9266 = vmatpush3.bf16.msra.mxu0 %v1855_v23  ;;  %9237 = vmatprep.mubr.msk.bf16.mxu0 %vm15114_vm1, %v1134_v17  ;;  %v15471_v14 = vsel %vm10977_vm11, 4294967295, %v15470_v14  ;;  %v10982_v17 = vsel %vm15144_vm2, %v1026_v0, %v1028_v54  ;;  %v10987_v23 = vld [vmem:[%s10742_s24 + $0x88] sm:$0xff]  ;;  %v1034_v54 = vrot.slane %v10869_v47, 7  ;;  %v443_v0 = vadd.s32 144, %v10737_v4 }
  0x42   : > { %10429 = vmatprep.subr.msk.bf16.mxu0 %vm15090_vm0, %v10936_v39  ;;  %15472 = vst [vmem:[#allocation22_spill] sm:$0xff] %v15471_v14  ;;  %v1112_v16 = vsel %vm10977_vm11, %v10982_v17, 0.0  ;;  %v1036_v50 = vrot.slane %v10987_v23, 7  ;;  %v11144_v14 = vld [vmem:[%s10742_s24 + $0xe0] sm:$0xff] }
  0x43   : > { %v1138_v52 = vpack.c.bf16 %v10997_v38, %v1112_v16  ;;  %v445_v16 = vadd.s32 160, %v10737_v4  ;;  %v11036_v24 = vsel %vm15144_vm2, %v1032_v44, %v1034_v54  ;;  %v587_v55 = vand.u32 15, %v443_v0  ;;  %v11052_v44 = vld [vmem:[%s10742_s24 + $0xb0] sm:$0xff] }
  0x44   : > { %v11024_v22 = vsel %vm15144_vm2, %v1034_v54, %v1036_v50  ;;  %15483 = vst [vmem:[#allocation29_spill] sm:$0xff] %v11036_v24  ;;  %v1139_v41 = vpack.c.bf16 %v11036_v24, %v1114_v49  ;;  %v1046_v25 = vrot.slane %v11052_v44, 7  ;;  %v11075_v49 = vld [vmem:[%s10742_s24 + $0xb8] sm:$0xff]  ;;  %v15499_v24 = vmov 0 }
  0x45   : > { %15482 = vst [vmem:[#allocation28_spill] sm:$0xff] %v11024_v22  ;;  %v1116_v31 = vsel %vm11019_vm13, %v11024_v22, 0.0  ;;  %v601_v54 = vand.u32 15, %v445_v16  ;;  %vm11058_vm14 = vcmp.ge.s32.totalorder %v587_v55, 1  ;;  %v447_v16 = vadd.s32 176, %v10737_v4 }
  0x46   : > { %v15486_v27 = vsel %vm11058_vm14, 4294967295, %v15485_v27  ;;  %v449_v55 = vadd.s32 192, %v10737_v4 }
  0x47   : > { %15487 = vst [vmem:[#allocation31_spill] sm:$0xff] %v15486_v27  ;;  %vm11067_vm15 = vcmp.ge.s32.totalorder %v601_v54, 1 }
  0x48   : > { %9238 = vmatmul.mubr.msk.bf16.gmra.mrb[4].mxu0 %vm15114_vm1, %v1135_v57  ;;  %v15475_v57 = vmov 0  ;;  %v15490_v15 = vsel %vm11067_vm15, 4294967295, %v15489_v15 }
  0x49   : > { %9241 = vmatprep.mubr.msk.bf16.mxu0 %vm15114_vm1, %v1136_v61  ;;  %v15476_v57 = vsel %vm11010_vm12, 4294967295, %v15475_v57  ;;  %v1038_v61 = vrot.slane %v11004_v45, 7  ;;  %15491 = vst [vmem:[#allocation33_spill] sm:$0xff] %v15490_v15  ;;  %v15495_v15 = vmov 0 }
  0x4a   : > { %15477 = vst [vmem:[#allocation25_spill] sm:$0xff] %v15476_v57  ;;  %v615_v57 = vand.u32 15, %v447_v16 }
  0x4b   : > { %v11042_v42 = vsel %vm15144_vm2, %v1036_v50, %v1038_v61 }
  0x4c   : > { %15484 = vst [vmem:[#allocation30_spill] sm:$0xff] %v11042_v42  ;;  %v1140_v50 = vpack.c.bf16 %v11042_v42, %v1116_v31  ;;  %v11090_v42 = vsel %vm15144_vm2, %v1044_v53, %v1046_v25  ;;  %vm11106_vm0 = vcmp.ge.s32.totalorder %v615_v57, 1  ;;  %v453_v57 = vadd.s32 224, %v10737_v4 }
  0x4d   : > { %15494 = vst [vmem:[#allocation36_spill] sm:$0xff] %v11090_v42  ;;  %v15496_v15 = vsel %vm11106_vm0, 4294967295, %v15495_v15 }
  0x4e   : > { %15497 = vst [vmem:[#allocation37_spill] sm:$0xff] %v15496_v15 }
  0x50   : > { %9242 = vmatmul.mubr.msk.bf16.gmra.mrb[8].mxu0 %vm15114_vm1, %v1137_v51  ;;  %v11048_v51 = vld [vmem:[%s10742_s24 + $0xa0] sm:$0xff] }
  0x51   : > { %9245 = vmatprep.mubr.msk.bf16.mxu0 %vm15114_vm1, %v1138_v52  ;;  %v1040_v52 = vrot.slane %v11027_v6, 7  ;;  %v1042_v40 = vrot.slane %v11048_v51, 7 }
  0x53   : > { %v11063_v0 = vsel %vm15144_vm2, %v1038_v61, %v1040_v52  ;;  %v11072_v31 = vsel %vm15144_vm2, %v1042_v40, %v1044_v53  ;;  %v11080_v61 = vld [vmem:[%s10742_s24 + $0xc8] sm:$0xff]  ;;  %v11084_v13 = vsel %vm15144_vm2, %v1040_v52, %v1042_v40  ;;  %v11100_v40 = vld [vmem:[%s10742_s24 + $0xd0] sm:$0xff]  ;;  %v629_v52 = vand.u32 15, %v449_v55 }
  0x54   : > { %15488 = vst [vmem:[#allocation32_spill] sm:$0xff] %v11063_v0  ;;  %15492 = vst [vmem:[#allocation34_spill] sm:$0xff] %v11072_v31  ;;  %v1118_v54 = vsel %vm11058_vm14, %v11063_v0, 0.0  ;;  %v1120_v11 = vsel %vm11067_vm15, %v11072_v31, 0.0  ;;  %v1052_v27 = vrot.slane %v11080_v61, 7  ;;  %v1054_v31 = vrot.slane %v11100_v40, 7 }
  0x55   : > { %15493 = vst [vmem:[#allocation35_spill] sm:$0xff] %v11084_v13  ;;  %v1141_v0 = vpack.c.bf16 %v11084_v13, %v1118_v54  ;;  %v1142_v53 = vpack.c.bf16 %v11090_v42, %v1120_v11  ;;  %v451_v55 = vadd.s32 208, %v10737_v4  ;;  %vm11115_vm6 = vcmp.ge.s32.totalorder %v629_v52, 1  ;;  %v11123_v54 = vld [vmem:[%s10742_s24 + $0xd8] sm:$0xff]  ;;  %v15652_v2 = vld [vmem:[#allocation30_spill] sm:$0xff] }
  0x56   : > { %v15500_v24 = vsel %vm11115_vm6, 4294967295, %v15499_v24  ;;  %v11138_v13 = vsel %vm15144_vm2, %v1052_v27, %v1054_v31  ;;  %v15776_v33 = vld [vmem:[#allocation30_spill] sm:$0xff] }
  0x57   : > { %15501 = vst [vmem:[#allocation39_spill] sm:$0xff] %v15500_v24  ;;  %15504 = vst [vmem:[#allocation42_spill] sm:$0xff] %v11138_v13 }
  0x58   : > { %9246 = vmatmul.mubr.msk.bf16.gmra.mrb[12].mxu0 %vm15114_vm1, %v1139_v41  ;;  %v11096_v41 = vld [vmem:[%s10742_s24 + $0xc0] sm:$0xff] }
  0x59   : > { %9249 = vmatprep.mubr.msk.bf16.mxu0 %vm15114_vm1, %v1140_v50  ;;  %v1048_v50 = vrot.slane %v11075_v49, 7  ;;  %v1050_v22 = vrot.slane %v11096_v41, 7 }
  0x5b   : > { %v11111_v16 = vsel %vm15144_vm2, %v1046_v25, %v1048_v50  ;;  %v11120_v11 = vsel %vm15144_vm2, %v1050_v22, %v1052_v27  ;;  %v11128_v25 = vld [vmem:[%s10742_s24 + $0xe8] sm:$0xff]  ;;  %v11132_v42 = vsel %vm15144_vm2, %v1048_v50, %v1050_v22  ;;  %v657_v22 = vand.u32 15, %v453_v57 }
  0x5c   : > { %15498 = vst [vmem:[#allocation38_spill] sm:$0xff] %v11111_v16  ;;  %15502 = vst [vmem:[#allocation40_spill] sm:$0xff] %v11120_v11  ;;  %v1122_v52 = vsel %vm11106_vm0, %v11111_v16, 0.0  ;;  %v1124_v38 = vsel %vm11115_vm6, %v11120_v11, 0.0  ;;  %v1060_v50 = vrot.slane %v11128_v25, 7  ;;  %v2061_v27 = vsel %vm10885_vm5, %v10814_v28, 0.0 }
  0x5d   : > { %15503 = vst [vmem:[#allocation41_spill] sm:$0xff] %v11132_v42  ;;  %v1143_v15 = vpack.c.bf16 %v11132_v42, %v1122_v52  ;;  %v1144_v24 = vpack.c.bf16 %v11138_v13, %v1124_v38  ;;  %v1058_v11 = vrot.slane %v11144_v14, 7  ;;  %v15505_v16 = vmov 0  ;;  %vm15514_vm6 = vmmov %vm15513_vm9  ;;  %v11194_v13 = vld [vmem:[%s10742_s24 + $0x100] sm:$0xff] }
  0x5e   : > { %v1062_v52 = vrot.slane %v11148_v60, 7  ;;  %vm11169_vm5 = vcmp.ge.s32.totalorder %v657_v22, 1  ;;  %v15509_v28 = vmov 0  ;;  %v671_v42 = vand.u32 15, %v455_v58 }
  0x5f   : > { %v15510_v28 = vsel %vm11169_vm5, 4294967295, %v15509_v28  ;;  %v11174_v38 = vsel %vm15144_vm2, %v1058_v11, %v1060_v50 }
  0x60   : > { %9250 = vmatmul.mubr.msk.bf16.gmra.mrb[16].mxu0 %vm15114_vm1, %v1141_v0  ;;  %v643_v0 = vand.u32 15, %v451_v55  ;;  %v11158_v55 = vpack.c.bf16 %v10819_v29, %v2061_v27  ;;  %15511 = vst [vmem:[#allocation45_spill] sm:$0xff] %v15510_v28  ;;  %15512 = vst [vmem:[#allocation46_spill] sm:$0xff] %v11174_v38  ;;  %v11177_v29 = vld [vmem:[%s10742_s24 + $0xf8] sm:$0xff]  ;;  %v11188_v22 = vsel %vm15144_vm2, %v1060_v50, %v1062_v52  ;;  %v1128_v27 = vsel %vm11169_vm5, %v11174_v38, 0.0 }
  0x61   : > { %9253 = vmatprep.mubr.msk.bf16.mxu0 %vm15114_vm1, %v1142_v53  ;;  %v1056_v53 = vrot.slane %v11123_v54, 7  ;;  %15516 = vst [vmem:[#allocation48_spill] sm:$0xff] %v11188_v22  ;;  %v428_v28 = vadd.s32 24, %v10737_v4  ;;  %v430_v38 = vadd.s32 40, %v10737_v4  ;;  %vm15520_vm5 = vmmov %vm15513_vm9 }
  0x62   : > { %vm11160_vm1 = vcmp.ge.s32.totalorder %v643_v0, 1 }
  0x63   : > { %v15506_v16 = vsel %vm11160_vm1, 4294967295, %v15505_v16  ;;  %v11165_v57 = vsel %vm15144_vm2, %v1054_v31, %v1056_v53  ;;  %v11182_v31 = vsel %vm15144_vm2, %v1056_v53, %v1058_v11  ;;  %v1146_v11 = vpack.c.bf16 %v11188_v22, %v1128_v27 }
  0x64   : > { %15507 = vst [vmem:[#allocation43_spill] sm:$0xff] %v15506_v16  ;;  %15508 = vst [vmem:[#allocation44_spill] sm:$0xff] %v11165_v57  ;;  %v1126_v0 = vsel %vm11160_vm1, %v11165_v57, 0.0  ;;  %v15143_v53 = vrot.slane %v11194_v13, 7  ;;  %v15517_v16 = vmov 0  ;;  %v482_v27 = vand.u32 15, %v428_v28 }
  0x65   : > { %15515 = vst [vmem:[#allocation47_spill] sm:$0xff] %v11182_v31  ;;  %v496_v22 = vand.u32 15, %v430_v38  ;;  %v15521_v57 = vmov 0  ;;  %vm15530_vm1 = vcmask 31744  }
  0x66   : > { %vm15531_vm0 = vmmov %vm15530_vm1 }
  0x68   : > { %9254 = vmatmul.mubr.msk.bf16.gmra.mrb[20].mxu0 %vm15513_vm9, %v1143_v15  ;;  %v1064_v15 = vrot.slane %v11177_v29, 7 }
  0x69   : > { %9257 = vmatprep.mubr.msk.bf16.mxu0 %vm15514_vm6, %v1144_v24  ;;  %v1145_v24 = vpack.c.bf16 %v11182_v31, %v1126_v0  ;;  %vm11200_vm6 = vcmp.ge.s32.totalorder %v671_v42, 1  ;;  %v1666_v0 = vrot.slane %v10757_v9, 1  ;;  %v1668_v31 = vrot.slane %v10763_v12, 1 }
  0x6a   : > { %v15518_v16 = vsel %vm11200_vm6, 4294967295, %v15517_v16  ;;  %v11205_v50 = vsel %vm15144_vm2, %v1062_v52, %v1064_v15  ;;  %v11214_v58 = vsel %vm15144_vm2, %v1064_v15, %v15143_v53  ;;  %v1664_v52 = vrot.slane %v10754_v8, 1 }
  0x6b   : > { %15519 = vst [vmem:[#allocation49_spill] sm:$0xff] %v15518_v16  ;;  %v1130_v42 = vsel %vm11200_vm6, %v11205_v50, 0.0  ;;  %v432_v53 = vadd.s32 56, %v10737_v4  ;;  %vm11232_vm2 = vcmp.le.s32.totalorder %v496_v22, 14  ;;  %v15526_v8 = vmov 0 }
  0x6c   : > { %v15527_v8 = vsel %vm11232_vm2, 4294967295, %v15526_v8  ;;  %v434_v12 = vadd.s32 72, %v10737_v4 }
  0x6d   : > { %15528 = vst [vmem:[#allocation52_spill] sm:$0xff] %v15527_v8 }
  0x70   : > { %9258 = vmatmul.mubr.msk.bf16.gmra.mrb[24].mxu0 %vm15513_vm9, %v1145_v24  ;;  %v1670_v24 = vrot.slane %v10785_v18, 1  ;;  %vm15524_vm9 = vcmask 1046528   ;;  %v15532_v18 = vrot.slane %v10751_v7, 1  ;;  %v524_v7 = vand.u32 15, %v434_v12 }
  0x71   : > { %9261 = vmatprep.mubr.msk.bf16.mxu0 %vm15520_vm5, %v1146_v11  ;;  %v1147_v11 = vpack.c.bf16 %v11214_v58, %v1130_v42  ;;  %vm11224_vm5 = vcmp.le.s32.totalorder %v482_v27, 14  ;;  %v11229_v15 = vsel %vm15524_vm9, %v1664_v52, %v1666_v0  ;;  %vm15529_vm6 = vmmov %vm15524_vm9  ;;  %v510_v27 = vand.u32 15, %v432_v53 }
  0x72   : > { %v15522_v57 = vsel %vm11224_vm5, 4294967295, %v15521_v57  ;;  %15525 = vst [vmem:[#allocation51_spill] sm:$0xff] %v11229_v15  ;;  %v11237_v9 = vsel %vm15529_vm6, %v1668_v31, %v1670_v24  ;;  %vm15533_vm9 = vmmov %vm15529_vm6  ;;  %v1759_v38 = vsel %vm11224_vm5, %v11229_v15, 0.0  ;;  %v438_v53 = vadd.s32 104, %v10737_v4 }
  0x73   : > { %15523 = vst [vmem:[#allocation50_spill] sm:$0xff] %v15522_v57  ;;  %v11246_v28 = vsel %vm15533_vm9, %v15532_v18, %v1664_v52  ;;  %vm15534_vm15 = vmmov %vm15529_vm6  ;;  %v1761_v42 = vsel %vm11232_vm2, %v11237_v9, 0.0  ;;  %v1676_v52 = vrot.slane %v10794_v21, 1  ;;  %v1678_v18 = vrot.slane %v10830_v32, 1 }
  0x74   : > { %v11252_v22 = vsel %vm15534_vm15, %v1666_v0, %v1668_v31  ;;  %v1789_v57 = vpack.c.bf16 %v1759_v38, %v11246_v28  ;;  %v15536_v0 = vmov 0  ;;  %vm15539_vm15 = vmmov %vm15529_vm6  ;;  %vm11273_vm6 = vcmp.le.s32.totalorder %v524_v7, 14 }
  0x75   : > { %v1790_v15 = vpack.c.bf16 %v1761_v42, %v11252_v22  ;;  %v15540_v21 = vmov 0  ;;  %v11278_v32 = vsel %vm15533_vm9, %v1676_v52, %v1678_v18  ;;  %vm15546_vm2 = vmmov %vm15533_vm9  ;;  %v1680_v42 = vrot.slane %v10836_v34, 1 }
  0x76   : > { %v15541_v21 = vsel %vm11273_vm6, 4294967295, %v15540_v21  ;;  %15543 = vst [vmem:[#allocation55_spill] sm:$0xff] %v11278_v32  ;;  %vm15548_vm9 = vmmov %vm15546_vm2  ;;  %v1765_v7 = vsel %vm11273_vm6, %v11278_v32, 0.0  ;;  %vm15560_vm6 = vcmask 31744  }
  0x77   : > { %15542 = vst [vmem:[#allocation54_spill] sm:$0xff] %v15541_v21  ;;  %v15556_v21 = vmov 0 }
  0x78   : > { %9262 = vmatmul.mubr.msk.bf16.gmra.mrb[28].mxu0 %vm15530_vm1, %v1147_v11  ;;  %v1672_v11 = vrot.slane %v10788_v19, 1  ;;  %vm11265_vm1 = vcmp.le.s32.totalorder %v510_v27, 14 }
  0x79   : > { %9267 = vmatprep.mubr.msk.bf16.mxu0 %vm15531_vm0, %v10966_v1  ;;  %v1674_v1 = vrot.slane %v10791_v20, 1  ;;  %vm15535_vm0 = vcmask 1041408   ;;  %v15537_v0 = vsel %vm11265_vm1, 4294967295, %v15536_v0  ;;  %v436_v20 = vadd.s32 88, %v10737_v4 }
  0x7a   : > { %v2156_v31 = vsel %vm15535_vm0, %v10936_v39, 0  ;;  %15538 = vst [vmem:[#allocation53_spill] sm:$0xff] %v15537_v0  ;;  %v11284_v39 = vld [vmem:[%s15051_s1 + $0x8] sm:$0x3]  ;;  %vm15544_vm0 = vcmask 31744   ;;  %v11289_v12 = vsel %vm15546_vm2, %v1670_v24, %v1672_v11  ;;  %v552_v24 = vand.u32 15, %v438_v53 }
  0x7b   : > { %v11270_v19 = vsel %vm15539_vm15, %v1672_v11, %v1674_v1  ;;  %vm15545_vm15 = vmmov %vm15544_vm0  ;;  %15547 = vst [vmem:[#allocation56_spill] sm:$0xff] %v11289_v12  ;;  %v11296_v27 = vsel %vm15548_vm9, %v1674_v1, %v1676_v52  ;;  %v1686_v11 = vrot.slane %v10866_v46, 1  ;;  %v15551_v52 = vmov 0 }
  0x7c   : > { %v1763_v38 = vsel %vm11265_vm1, %v11270_v19, 0.0  ;;  %15549 = vst [vmem:[#allocation57_spill] sm:$0xff] %v11296_v27  ;;  %v1792_v1 = vpack.c.bf16 %v1765_v7, %v11296_v27  ;;  %v442_v46 = vadd.s32 136, %v10737_v4  ;;  %vm15561_vm1 = vmmov %vm15560_vm6  ;;  %v1688_v27 = vrot.slane %v10869_v47, 1 }
  0x7d   : > { %v1791_v34 = vpack.c.bf16 %v1763_v38, %v11289_v12  ;;  %v444_v47 = vadd.s32 152, %v10737_v4 }
  0x80   : > { %9268 = vmatmul.mubr.msk.bf16.vlgmr.msra.gmra.mrb[0].mxu0 %vm15544_vm0, %v1789_v57  ;;  %v538_v57 = vand.u32 15, %v436_v20  ;;  %vm15550_vm0 = vcmask 1041408  }
  0x81   : > { %9300 = vmatpush3.bf16.msra.mxu0 %v2156_v31  ;;  %9271 = vmatprep.mubr.msk.bf16.mxu0 %vm15545_vm15, %v1790_v15  ;;  %v1682_v31 = vrot.slane %v10839_v35, 1  ;;  %v1684_v15 = vrot.slane %v10842_v36, 1  ;;  %vm15554_vm15 = vmmov %vm15548_vm9  ;;  %v440_v35 = vadd.s32 120, %v10737_v4  ;;  %vm11316_vm9 = vcmp.le.s32.totalorder %v552_v24, 14 }
  0x82   : > { %10430 = vmatprep.subr.msk.bf16.mxu0 %vm15550_vm0, %v11284_v39  ;;  %vm11308_vm2 = vcmp.le.s32.totalorder %v538_v57, 14  ;;  %v15557_v21 = vsel %vm11316_vm9, 4294967295, %v15556_v21  ;;  %vm15559_vm0 = vmmov %vm15554_vm15 }
  0x83   : > { %v15552_v52 = vsel %vm11308_vm2, 4294967295, %v15551_v52  ;;  %v11313_v20 = vsel %vm15554_vm15, %v1680_v42, %v1682_v31  ;;  %15558 = vst [vmem:[#allocation60_spill] sm:$0xff] %v15557_v21  ;;  %v11321_v36 = vsel %vm15559_vm0, %v1684_v15, %v1686_v11  ;;  %vm15562_vm5 = vmmov %vm15559_vm0  ;;  %v566_v24 = vand.u32 15, %v440_v35 }
  0x84   : > { %15553 = vst [vmem:[#allocation58_spill] sm:$0xff] %v15552_v52  ;;  %15555 = vst [vmem:[#allocation59_spill] sm:$0xff] %v11313_v20  ;;  %v11327_v53 = vsel %vm15562_vm5, %v1678_v18, %v1680_v42  ;;  %v1767_v38 = vsel %vm11308_vm2, %v11313_v20, 0.0  ;;  %v1769_v57 = vsel %vm11316_vm9, %v11321_v36, 0.0  ;;  %v1692_v18 = vrot.slane %v11004_v45, 1 }
  0x85   : > { %15563 = vst [vmem:[#allocation61_spill] sm:$0xff] %v11327_v53  ;;  %vm15564_vm15 = vmmov %vm15559_vm0  ;;  %v1694_v42 = vrot.slane %v11027_v6, 1  ;;  %v1793_v52 = vpack.c.bf16 %v1767_v38, %v11327_v53  ;;  %vm11344_vm5 = vcmp.le.s32.totalorder %v566_v24, 14  ;;  %v15571_v35 = vmov 0 }
  0x86   : > { %v11333_v7 = vsel %vm15564_vm15, %v1682_v31, %v1684_v15  ;;  %v15566_v31 = vmov 0  ;;  %v446_v38 = vadd.s32 168, %v10737_v4  ;;  %vm15575_vm15 = vcmask 31744   ;;  %vm15577_vm2 = vmmov %vm15559_vm0 }
  0x87   : > { %15565 = vst [vmem:[#allocation62_spill] sm:$0xff] %v11333_v7  ;;  %v1794_v20 = vpack.c.bf16 %v1769_v57, %v11333_v7  ;;  %v15567_v31 = vsel %vm11344_vm5, 4294967295, %v15566_v31  ;;  %vm15576_vm9 = vmmov %vm15575_vm15  ;;  %v11363_v57 = vsel %vm15577_vm2, %v1686_v11, %v1688_v27  ;;  %v11373_v7 = vpack.c.bf16 %v11004_v45, %v10987_v23 }
  0x88   : > { %9272 = vmatmul.mubr.msk.bf16.gmra.mrb[4].mxu0 %vm15560_vm6, %v1791_v34  ;;  %v1690_v34 = vrot.slane %v10987_v23, 1  ;;  %15568 = vst [vmem:[#allocation63_spill] sm:$0xff] %v15567_v31  ;;  %15578 = vst [vmem:[#allocation67_spill] sm:$0xff] %v11363_v57  ;;  %v594_v21 = vand.u32 15, %v444_v47  ;;  %v608_v11 = vand.u32 15, %v446_v38  ;;  %v1700_v31 = vrot.slane %v11052_v44, 1 }
  0x89   : > { %9275 = vmatprep.mubr.msk.bf16.mxu0 %vm15561_vm1, %v1792_v1  ;;  %v580_v1 = vand.u32 15, %v442_v46  ;;  %vm15569_vm1 = vmmov %vm15559_vm0  ;;  %v11357_v46 = vsel %vm15559_vm0, %v1692_v18, %v1694_v42  ;;  %v448_v47 = vadd.s32 184, %v10737_v4  ;;  %v15586_v38 = vmov 0 }
  0x8a   : > { %v11349_v15 = vsel %vm15569_vm1, %v1688_v27, %v1690_v34  ;;  %15574 = vst [vmem:[#allocation66_spill] sm:$0xff] %v11357_v46  ;;  %vm15579_vm1 = vmmov %vm15559_vm0  ;;  %v1698_v27 = vrot.slane %v11032_v10, 1 }
  0x8b   : > { %15570 = vst [vmem:[#allocation64_spill] sm:$0xff] %v11349_v15  ;;  %vm11352_vm6 = vcmp.le.s32.totalorder %v580_v1, 14  ;;  %v1771_v24 = vsel %vm11344_vm5, %v11349_v15, 0.0  ;;  %v11369_v1 = vsel %vm15579_vm1, %v1690_v34, %v1692_v18  ;;  %v1702_v15 = vrot.slane %v11075_v49, 1  ;;  %vm15581_vm2 = vmmov %vm15576_vm9 }
  0x8c   : > { %v15572_v35 = vsel %vm11352_vm6, 4294967295, %v15571_v35  ;;  %15580 = vst [vmem:[#allocation68_spill] sm:$0xff] %v11369_v1  ;;  %9215 = vmatprep.mubr.msk.bf16.mxu1 %vm15581_vm2, %v11373_v7  ;;  %v1795_v23 = vpack.c.bf16 %v1771_v24, %v11363_v57  ;;  %v15582_v34 = vmov 0  ;;  %vm15589_vm1 = vmmov %vm15559_vm0  ;;  %v450_v24 = vadd.s32 200, %v10737_v4 }
  0x8d   : > { %15573 = vst [vmem:[#allocation65_spill] sm:$0xff] %v15572_v35  ;;  %v11399_v35 = vsel %vm15589_vm1, %v1700_v31, %v1702_v15  ;;  %vm15594_vm5 = vmmov %vm15559_vm0 }
  0x8e   : > { %15590 = vst [vmem:[#allocation72_spill] sm:$0xff] %v11399_v35 }
  0x90   : > { %9276 = vmatmul.mubr.msk.bf16.gmra.mrb[8].mxu0 %vm15575_vm15, %v1793_v52  ;;  %v1773_v52 = vsel %vm11352_vm6, %v11357_v46, 0.0  ;;  %vm11394_vm15 = vcmp.le.s32.totalorder %v608_v11, 14  ;;  %vm15592_vm6 = vmmov %vm15581_vm2  ;;  %v11419_v46 = vpack.c.bf16 %v11052_v44, %v11032_v10 }
  0x91   : > { %9279 = vmatprep.mubr.msk.bf16.mxu0 %vm15576_vm9, %v1794_v20  ;;  %v1696_v20 = vrot.slane %v11048_v51, 1  ;;  %v1796_v45 = vpack.c.bf16 %v1773_v52, %v11369_v1  ;;  %vm11386_vm9 = vcmp.le.s32.totalorder %v594_v21, 14  ;;  %v15587_v38 = vsel %vm11394_vm15, 4294967295, %v15586_v38 }
  0x92   : > { %v15583_v34 = vsel %vm11386_vm9, 4294967295, %v15582_v34  ;;  %15588 = vst [vmem:[#allocation71_spill] sm:$0xff] %v15587_v38  ;;  %v11405_v21 = vpack.c.bf16 %v11048_v51, %v11027_v6  ;;  %v11415_v1 = vsel %vm15594_vm5, %v1698_v27, %v1700_v31  ;;  %15596 = vst [vmem:[#allocation76_spill] sm:$0xff] %v11419_v46  ;;  %v1777_v6 = vsel %vm11394_vm15, %v11399_v35, 0.0 }
  0x93   : > { %15584 = vst [vmem:[#allocation69_spill] sm:$0xff] %v15583_v34  ;;  %v11391_v18 = vsel %vm15559_vm0, %v1696_v20, %v1698_v27  ;;  %v11409_v52 = vsel %vm15559_vm0, %v1694_v42, %v1696_v20  ;;  %15595 = vst [vmem:[#allocation75_spill] sm:$0xff] %v11415_v1  ;;  %v622_v51 = vand.u32 15, %v448_v47  ;;  %v1706_v42 = vrot.slane %v11080_v61, 1 }
  0x94   : > { %15585 = vst [vmem:[#allocation70_spill] sm:$0xff] %v11391_v18  ;;  %15591 = vst [vmem:[#allocation73_spill] sm:$0xff] %v11405_v21  ;;  %v1775_v11 = vsel %vm11386_vm9, %v11391_v18, 0.0  ;;  %v636_v20 = vand.u32 15, %v450_v24  ;;  %v1708_v31 = vrot.slane %v11100_v40, 1  ;;  %v1710_v27 = vrot.slane %v11123_v54, 1 }
  0x95   : > { %15593 = vst [vmem:[#allocation74_spill] sm:$0xff] %v11409_v52  ;;  %vm15598_vm5 = vmmov %vm15581_vm2  ;;  %v1797_v10 = vpack.c.bf16 %v1775_v11, %v11409_v52  ;;  %v1798_v44 = vpack.c.bf16 %v1777_v6, %v11415_v1  ;;  %vm11434_vm1 = vcmp.le.s32.totalorder %v622_v51, 14  ;;  %v452_v24 = vadd.s32 216, %v10737_v4 }
  0x96   : > { %v15604_v38 = vmov 0  ;;  %v454_v11 = vadd.s32 232, %v10737_v4  ;;  %v11453_v6 = vpack.c.bf16 %v11096_v41, %v11075_v49  ;;  %vm15610_vm15 = vmmov %vm15598_vm5  ;;  %v11467_v35 = vpack.c.bf16 %v11100_v40, %v11080_v61 }
  0x98   : > { %9280 = vmatmul.mubr.msk.bf16.gmra.mrb[12].mxu0 %vm15581_vm2, %v1795_v23  ;;  %v1704_v23 = vrot.slane %v11096_v41, 1  ;;  %15609 = vst [vmem:[#allocation81_spill] sm:$0xff] %v11453_v6  ;;  %15612 = vst [vmem:[#allocation82_spill] sm:$0xff] %v11467_v35  ;;  %v650_v41 = vand.u32 15, %v452_v24 }
  0x99   : > { %9283 = vmatprep.mubr.msk.bf16.mxu0 %vm15592_vm6, %v1796_v45  ;;  %vm15597_vm6 = vmmov %vm15581_vm2  ;;  %v15599_v45 = vmov 0 }
  0x9a   : > { %9216 = vmatmul.mubr.msk.bf16.vlgmr.msra.gmra.mrb[0].mxu1 %vm15597_vm6, %v11405_v21  ;;  %v15600_v45 = vsel %vm11434_vm1, 4294967295, %v15599_v45  ;;  %vm15602_vm2 = vmmov %vm15559_vm0  ;;  %vm11442_vm0 = vcmp.le.s32.totalorder %v636_v20, 14 }
  0x9b   : > { %9219 = vmatprep.mubr.msk.bf16.mxu1 %vm15598_vm5, %v11419_v46  ;;  %15601 = vst [vmem:[#allocation77_spill] sm:$0xff] %v15600_v45  ;;  %v11439_v47 = vsel %vm15602_vm2, %v1704_v23, %v1706_v42  ;;  %v15605_v38 = vsel %vm11442_vm0, 4294967295, %v15604_v38  ;;  %vm15607_vm6 = vmmov %vm15602_vm2  ;;  %v11457_v51 = vsel %vm15602_vm2, %v1702_v15, %v1704_v23  ;;  %v1712_v15 = vrot.slane %v11144_v14, 1 }
  0x9c   : > { %15603 = vst [vmem:[#allocation78_spill] sm:$0xff] %v11439_v47  ;;  %15606 = vst [vmem:[#allocation79_spill] sm:$0xff] %v15605_v38  ;;  %v11447_v34 = vsel %vm15607_vm6, %v1708_v31, %v1710_v27  ;;  %v1779_v20 = vsel %vm11434_vm1, %v11439_v47, 0.0  ;;  %v1714_v23 = vrot.slane %v11128_v25, 1  ;;  %vm11482_vm6 = vcmp.le.s32.totalorder %v650_v41, 14 }
  0x9d   : > { %15608 = vst [vmem:[#allocation80_spill] sm:$0xff] %v11447_v34  ;;  %vm15611_vm9 = vmmov %vm15602_vm2  ;;  %v1781_v49 = vsel %vm11442_vm0, %v11447_v34, 0.0  ;;  %v1799_v61 = vpack.c.bf16 %v1779_v20, %v11457_v51  ;;  %v15619_v38 = vmov 0  ;;  %v11498_v34 = vld [vmem:[%s10742_s24 + $0x108] sm:$0xff]  ;;  %v11503_v20 = vpack.c.bf16 %v11144_v14, %v11123_v54 }
  0x9e   : > { %v11463_v1 = vsel %vm15611_vm9, %v1706_v42, %v1708_v31  ;;  %v1716_v42 = vrot.slane %v11148_v60, 1  ;;  %v1718_v31 = vrot.slane %v11177_v29, 1  ;;  %vm15614_vm9 = vmmov %vm15598_vm5 }
  0x9f   : > { %v1800_v40 = vpack.c.bf16 %v1781_v49, %v11463_v1  ;;  %15623 = vst [vmem:[#allocation85_spill] sm:$0xff] %v11503_v20  ;;  %vm15624_vm0 = vmmov %vm15614_vm9 }
  0xa0   : > { %9284 = vmatmul.mubr.msk.bf16.gmra.mrb[16].mxu0 %vm15598_vm5, %v1797_v10  ;;  %v664_v10 = vand.u32 15, %v454_v11  ;;  %v456_v11 = vadd.s32 248, %v10737_v4  ;;  %v11515_v4 = vpack.c.bf16 %v11148_v60, %v11128_v25  ;;  %v15628_v25 = vmov 0 }
  0xa1   : > { %9287 = vmatprep.mubr.msk.bf16.mxu0 %vm15610_vm15, %v1798_v44  ;;  %vm15613_vm15 = vmmov %vm15598_vm5  ;;  %v15615_v44 = vmov 0 }
  0xa2   : > { %9220 = vmatmul.mubr.msk.bf16.gmra.mrb[4].mxu1 %vm15613_vm15, %v11453_v6  ;;  %v15616_v44 = vsel %vm11482_vm6, 4294967295, %v15615_v44  ;;  %vm15618_vm5 = vmmov %vm15602_vm2  ;;  %vm11490_vm2 = vcmp.le.s32.totalorder %v664_v10, 14  ;;  %v1720_v10 = vrot.slane %v11194_v13, 1  ;;  %15625 = vst [vmem:[#allocation86_spill] sm:$0xff] %v11515_v4  ;;  %v678_v54 = vand.u32 15, %v456_v11 }
  0xa3   : > { %9223 = vmatprep.mubr.msk.bf16.mxu1 %vm15614_vm9, %v11467_v35  ;;  %15617 = vst [vmem:[#allocation83_spill] sm:$0xff] %v15616_v44  ;;  %v11487_v24 = vsel %vm15618_vm5, %v1712_v15, %v1714_v23  ;;  %v15620_v38 = vsel %vm11490_vm2, 4294967295, %v15619_v38  ;;  %vm15622_vm15 = vmmov %vm15618_vm5  ;;  %v11507_v49 = vsel %vm15618_vm5, %v1710_v27, %v1712_v15  ;;  %v15217_v27 = vrot.slane %v11498_v34, 1 }
  0xa4   : > { %15621 = vst [vmem:[#allocation84_spill] sm:$0xff] %v15620_v38  ;;  %v11495_v45 = vsel %vm15622_vm15, %v1716_v42, %v1718_v31  ;;  %v1783_v41 = vsel %vm11482_vm6, %v11487_v24, 0.0  ;;  %vm15626_vm15 = vmmov %vm15618_vm5  ;;  %vm11530_vm5 = vcmp.le.s32.totalorder %v678_v54, 14  ;;  %v8533_v54 = vld [vmem:[%s15051_s1 + $0xa] sm:$0x3] }
  0xa5   : > { %v1785_v14 = vsel %vm11490_vm2, %v11495_v45, 0.0  ;;  %v1801_v15 = vpack.c.bf16 %v1783_v41, %v11507_v49  ;;  %v15629_v25 = vsel %vm11530_vm5, 4294967295, %v15628_v25  ;;  %vm15631_vm2 = vmmov %vm15624_vm0  ;;  %v2057_v41 = vsel %vm10855_vm4, %v10882_v56, 0.0 }
  0xa6   : > { %15630 = vst [vmem:[#allocation87_spill] sm:$0xff] %v15629_v25 }
  0xa8   : > { %9288 = vmatmul.mubr.msk.bf16.gmra.mrb[20].mxu0 %vm15614_vm9, %v1799_v61  ;;  %v11518_v61 = vsel %vm15626_vm15, %v1714_v23, %v1716_v42  ;;  %vm15627_vm9 = vmmov %vm15624_vm0  ;;  %v11537_v23 = vsel %vm15626_vm15, %v1720_v10, %v15217_v27  ;;  %v11542_v42 = vpack.c.bf16 %v11194_v13, %v11177_v29  ;;  %v2089_v29 = vpack.c.bf16 %v10900_v62, %v2057_v41  ;;  %v15653_v41 = vld [vmem:[#allocation35_spill] sm:$0xff] }
  0xa9   : > { %9291 = vmatprep.mubr.msk.bf16.mxu0 %vm15624_vm0, %v1800_v40  ;;  %v1802_v60 = vpack.c.bf16 %v1785_v14, %v11518_v61  ;;  %v1787_v11 = vsel %vm11530_vm5, %v11537_v23, 0.0  ;;  %v2063_v62 = vsel %vm10916_vm7, %v10929_v37, 0.0 }
  0xaa   : > { %9224 = vmatmul.mubr.msk.bf16.gmra.mrb[8].mxu1 %vm15624_vm0, %v11503_v20  ;;  %15632 = vst [vmem:[#allocation88_spill] sm:$0xff] %v11542_v42 }
  0xab   : > { %9227 = vmatprep.mubr.msk.bf16.mxu1 %vm15627_vm9, %v11515_v4  ;;  %vm15633_vm9 = vmmov %vm15626_vm15 }
  0xac   : > { %v11546_v40 = vsel %vm15633_vm9, %v1718_v31, %v1720_v10  ;;  %vm15635_vm15 = vmmov %vm15624_vm0  ;;  %v2059_v31 = vsel %vm10805_vm3, %v10890_v59, 0.0  ;;  %vm15637_vm9 = vcmask 1041408  }
  0xad   : > { %15634 = vst [vmem:[#allocation89_spill] sm:$0xff] %v11546_v40  ;;  %v1803_v14 = vpack.c.bf16 %v1787_v11, %v11546_v40  ;;  %v2090_v10 = vpack.c.bf16 %v10903_v63, %v2059_v31  ;;  %v2358_v56 = vsel %vm15637_vm9, %v11284_v39, 0  ;;  %v2092_v39 = vpack.c.bf16 %v10945_v48, %v2063_v62  ;;  %v15643_v11 = vld [vmem:[#allocation26_spill] sm:$0xff]  ;;  %v15648_v62 = vld [vmem:[#allocation28_spill] sm:$0xff] }
  0xb0   : > { %9292 = vmatmul.mubr.msk.bf16.gmra.mrb[24].mxu0 %vm15631_vm2, %v1801_v15  ;;  %vm15636_vm2 = vmmov %vm15624_vm0  ;;  %v2065_v15 = vsel %vm10922_vm8, %v10973_v3, 0.0 }
  0xb1   : > { %9295 = vmatprep.mubr.msk.bf16.mxu0 %vm15624_vm0, %v1802_v60  ;;  %v2093_v60 = vpack.c.bf16 %v10991_v5, %v2065_v15  ;;  %v15659_v15 = vld [vmem:[#allocation33_spill] sm:$0xff] }
  0xb2   : > { %9228 = vmatmul.mubr.msk.bf16.gmra.mrb[12].mxu1 %vm15635_vm15, %v11542_v42  ;;  %vm15638_vm15 = vmmov %vm15624_vm0 }
  0xb8   : > { %9296 = vmatmul.mubr.msk.bf16.gmra.mrb[28].mxu0 %vm15636_vm2, %v1803_v14  ;;  %vm15639_vm2 = vmmov %vm15624_vm0  ;;  %v2069_v14 = vsel %vm10977_vm11, %v15643_v11, 0.0 }
  0xb9   : > { %9301 = vmatprep.mubr.msk.bf16.mxu0 %vm15624_vm0, %v2089_v29  ;;  %vm15640_vm0 = vmmov %vm15637_vm9  ;;  %v15645_v29 = vld [vmem:[#allocation24_spill] sm:$0xff] }
  0xba   : > { %vm15641_vm9 = vmmov %vm15639_vm2 }
  0xc0   : > { %9302 = vmatmul.mubr.msk.bf16.vlgmr.msra.gmra.mrb[0].mxu0 %vm15638_vm15, %v2090_v10  ;;  %vm15642_vm15 = vmmov %vm15639_vm2  ;;  %v15646_v10 = vld [vmem:[#allocation29_spill] sm:$0xff] }
  0xc1   : > { %9334 = vmatpush3.bf16.msra.mxu0 %v2358_v56  ;;  %9305 = vmatprep.mubr.msk.bf16.mxu0 %vm15639_vm2, %v11158_v55  ;;  %v2067_v55 = vsel %vm10968_vm10, %v10982_v17, 0.0  ;;  %v2095_v56 = vpack.c.bf16 %v15646_v10, %v2069_v14 }
  0xc2   : > { %10431 = vmatprep.subr.msk.bf16.mxu0 %vm15640_vm0, %v8533_v54  ;;  %v2094_v31 = vpack.c.bf16 %v15645_v29, %v2067_v55  ;;  %vm15647_vm0 = vmmov %vm15639_vm2  ;;  %v15656_v55 = vld [vmem:[#allocation34_spill] sm:$0xff] }
  0xc3   : > { %vm15663_vm3 = vmmov %vm15647_vm0 }
  0xc8   : > { %9306 = vmatmul.mubr.msk.bf16.gmra.mrb[4].mxu0 %vm15641_vm9, %v2092_v39  ;;  %v2071_v39 = vsel %vm11010_vm12, %v15648_v62, 0.0  ;;  %vm15654_vm9 = vmmov %vm15647_vm0  ;;  %v15661_v62 = vld [vmem:[#allocation36_spill] sm:$0xff] }
  0xc9   : > { %9309 = vmatprep.mubr.msk.bf16.mxu0 %vm15642_vm15, %v2093_v60  ;;  %v15650_v60 = vld [vmem:[#allocation32_spill] sm:$0xff]  ;;  %v2096_v5 = vpack.c.bf16 %v15652_v2, %v2071_v39  ;;  %vm15655_vm15 = vmmov %vm15647_vm0 }
  0xca   : > { %v2073_v26 = vsel %vm11019_vm13, %v15650_v60, 0.0  ;;  %v15662_v60 = vld [vmem:[#allocation41_spill] sm:$0xff]  ;;  %v15667_v39 = vld [vmem:[#allocation44_spill] sm:$0xff]  ;;  %vm15688_vm13 = vcmask 1041408  }
  0xcb   : > { %v2097_v11 = vpack.c.bf16 %v15653_v41, %v2073_v26  ;;  %v15664_v26 = vld [vmem:[#allocation40_spill] sm:$0xff]  ;;  %v15668_v41 = vld [vmem:[#allocation39_spill] sm:$0xff] }
  0xd0   : > { %9310 = vmatmul.mubr.msk.bf16.gmra.mrb[8].mxu0 %vm15639_vm2, %v2094_v31  ;;  %v2075_v31 = vsel %vm11058_vm14, %v15656_v55, 0.0  ;;  %vm15660_vm2 = vnez %v15659_v15  ;;  %v15670_v55 = vld [vmem:[#allocation42_spill] sm:$0xff]  ;;  %v15671_v15 = vld [vmem:[#allocation47_spill] sm:$0xff]  ;;  %vm15673_vm14 = vmmov %vm15647_vm0 }
  0xd1   : > { %9313 = vmatprep.mubr.msk.bf16.mxu0 %vm15647_vm0, %v2095_v56  ;;  %v15658_v56 = vld [vmem:[#allocation38_spill] sm:$0xff]  ;;  %v2098_v27 = vpack.c.bf16 %v15661_v62, %v2075_v31  ;;  %v15677_v31 = vld [vmem:[#allocation45_spill] sm:$0xff] }
  0xd2   : > { %v2077_v10 = vsel %vm15660_vm2, %v15658_v56, 0.0  ;;  %vm15672_vm2 = vmmov %vm15647_vm0 }
  0xd3   : > { %v2099_v29 = vpack.c.bf16 %v15662_v60, %v2077_v10  ;;  %v15674_v10 = vld [vmem:[#allocation46_spill] sm:$0xff] }
  0xd4   : > { %v11630_v60 = vld [vmem:[%s10742_s24 + $0x110] sm:$0xff] }
  0xd8   : > { %9314 = vmatmul.mubr.msk.bf16.gmra.mrb[12].mxu0 %vm15654_vm9, %v2096_v5  ;;  %v15665_v5 = vld [vmem:[#allocation37_spill] sm:$0xff] }
  0xd9   : > { %9317 = vmatprep.mubr.msk.bf16.mxu0 %vm15655_vm15, %v2097_v11  ;;  %vm15666_vm9 = vnez %v15665_v5  ;;  %vm15669_vm15 = vnez %v15668_v41  ;;  %v2051_v41 = vrot.slane %v11498_v34, 7 }
  0xda   : > { %v2079_v11 = vsel %vm15666_vm9, %v15664_v26, 0.0  ;;  %v2081_v14 = vsel %vm15669_vm15, %v15667_v39, 0.0  ;;  %v15679_v39 = vld [vmem:[#allocation48_spill] sm:$0xff]  ;;  %vm15684_vm15 = vnez %v15518_v16 }
  0xdb   : > { %v2100_v2 = vpack.c.bf16 %v15670_v55, %v2079_v11  ;;  %v2101_v56 = vpack.c.bf16 %v15671_v15, %v2081_v14 }
  0xe0   : > { %9318 = vmatmul.mubr.msk.bf16.gmra.mrb[16].mxu0 %vm15647_vm0, %v2098_v27  ;;  %v15675_v27 = vld [vmem:[#allocation43_spill] sm:$0xff] }
  0xe1   : > { %9321 = vmatprep.mubr.msk.bf16.mxu0 %vm15663_vm3, %v2099_v29  ;;  %vm15676_vm0 = vnez %v15675_v27  ;;  %vm15678_vm3 = vnez %v15677_v31 }
  0xe2   : > { %v2083_v29 = vsel %vm15676_vm0, %v15674_v10, 0.0  ;;  %v2085_v5 = vsel %vm15678_vm3, %v11205_v50, 0.0  ;;  %vm15682_vm0 = vmmov %vm15672_vm2 }
  0xe3   : > { %v2102_v11 = vpack.c.bf16 %v15679_v39, %v2083_v29  ;;  %v2103_v14 = vpack.c.bf16 %v11214_v58, %v2085_v5  ;;  %vm15685_vm9 = vmmov %vm15682_vm0 }
  0xe4   : > { %vm15701_vm12 = vmmov %vm15682_vm0 }
  0xe8   : > { %9322 = vmatmul.mubr.msk.bf16.gmra.mrb[20].mxu0 %vm15672_vm2, %v2100_v2  ;;  %v15231_v2 = vrot.slane %v11630_v60, 7 }
  0xe9   : > { %9325 = vmatprep.mubr.msk.bf16.mxu0 %vm15673_vm14, %v2101_v56  ;;  %v15680_v56 = vrot.slane %v11194_v13, 7  ;;  %vm15681_vm14 = vcmask 1040384   ;;  %v15686_v13 = vld [vmem:[#allocation7_spill] sm:$0xff] }
  0xea   : > { %vm15683_vm3 = vmmov %vm15681_vm14 }
  0xeb   : > { %v11639_v15 = vsel %vm15681_vm14, %v15680_v56, %v2051_v41  ;;  %v11646_v31 = vsel %vm15683_vm3, %v2051_v41, %v15231_v2  ;;  %vm15687_vm14 = vmmov %vm15682_vm0  ;;  %v15689_v56 = vld [vmem:[#allocation8_spill] sm:$0xff]  ;;  %v15690_v41 = vld [vmem:[#allocation9_spill] sm:$0xff] }
  0xec   : > { %v2087_v5 = vsel %vm15684_vm15, %v11639_v15, 0.0  ;;  %vm15691_vm3 = vmmov %vm15682_vm0  ;;  %v15709_v2 = vld [vmem:[#allocation20_spill] sm:$0xff] }
  0xed   : > { %v2104_v29 = vpack.c.bf16 %v11646_v31, %v2087_v5  ;;  %v15693_v5 = vld [vmem:[#allocation11_spill] sm:$0xff]  ;;  %vm15700_vm15 = vmmov %vm15682_vm0 }
  0xf0   : > { %9326 = vmatmul.mubr.msk.bf16.gmra.mrb[24].mxu0 %vm15672_vm2, %v2102_v11  ;;  %v2659_v11 = vsel %vm15688_vm13, %v8533_v54, 0  ;;  %vm15692_vm2 = vmmov %vm15688_vm13  ;;  %v15697_v54 = vld [vmem:[#allocation14_spill] sm:$0xff] }
  0xf1   : > { %9329 = vmatprep.mubr.msk.bf16.mxu0 %vm15682_vm0, %v2103_v14  ;;  %v8550_v14 = vld [vmem:[%s15051_s1 + $0xc] sm:$0x3]  ;;  %vm15698_vm13 = vmmov %vm15682_vm0 }
  0xf8   : > { %9330 = vmatmul.mubr.msk.bf16.gmra.mrb[28].mxu0 %vm15685_vm9, %v2104_v29  ;;  %vm15694_vm9 = vmmov %vm15682_vm0  ;;  %v15695_v29 = vld [vmem:[#allocation13_spill] sm:$0xff] }
  0xf9   : > { %9335 = vmatprep.mubr.msk.bf16.mxu0 %vm15687_vm14, %v15686_v13  ;;  %vm15696_vm14 = vmmov %vm15682_vm0  ;;  %v15699_v13 = vld [vmem:[#allocation16_spill] sm:$0xff] }
 0x100   : > { %9336 = vmatmul.mubr.msk.bf16.vlgmr.msra.gmra.mrb[0].mxu0 %vm15682_vm0, %v15689_v56 }
 0x101   : > { %9368 = vmatpush3.bf16.msra.mxu0 %v2659_v11  ;;  %9339 = vmatprep.mubr.msk.bf16.mxu0 %vm15691_vm3, %v15690_v41  ;;  %vm15702_vm3 = vmmov %vm15682_vm0  ;;  %v15708_v11 = vld [vmem:[#allocation51_spill] sm:$0xff] }
 0x102   : > { %10432 = vmatprep.subr.msk.bf16.mxu0 %vm15692_vm2, %v8550_v14  ;;  %vm15703_vm2 = vmmov %vm15682_vm0 }
 0x108   : > { %9340 = vmatmul.mubr.msk.bf16.gmra.mrb[4].mxu0 %vm15694_vm9, %v15693_v5  ;;  %vm15704_vm9 = vmmov %vm15682_vm0 }
 0x109   : > { %9343 = vmatprep.mubr.msk.bf16.mxu0 %vm15696_vm14, %v15695_v29  ;;  %vm15705_vm14 = vmmov %vm15682_vm0 }
 0x110   : > { %9344 = vmatmul.mubr.msk.bf16.gmra.mrb[8].mxu0 %vm15698_vm13, %v15697_v54  ;;  %vm15707_vm13 = vmmov %vm15682_vm0 }
 0x111   : > { %9347 = vmatprep.mubr.msk.bf16.mxu0 %vm15700_vm15, %v15699_v13  ;;  %vm15706_vm15 = vmmov %vm15682_vm0 }
 0x118   : > { %9348 = vmatmul.mubr.msk.bf16.gmra.mrb[12].mxu0 %vm15682_vm0, %v11373_v7 }
 0x119   : > { %9351 = vmatprep.mubr.msk.bf16.mxu0 %vm15701_vm12, %v11405_v21  ;;  %vm15710_vm12 = vnez %v15709_v2 }
 0x11a   : > { %v2561_v21 = vsel %vm15710_vm12, %v15708_v11, 0.0 }
 0x120   : > { %9352 = vmatmul.mubr.msk.bf16.gmra.mrb[16].mxu0 %vm15702_vm3, %v11419_v46  ;;  %v11693_v46 = vpack.c.bf16 %v11630_v60, %v11498_v34 }
 0x121   : > { %9355 = vmatprep.mubr.msk.bf16.mxu0 %vm15703_vm2, %v11453_v6  ;;  %v2592_v6 = vpack.c.bf16 %v2561_v21, %v11246_v28  ;;  %vm15713_vm2 = vmmov %vm15682_vm0  ;;  %v8567_v28 = vld [vmem:[%s15051_s1 + $0xe] sm:$0x3] }
 0x128   : > { %9356 = vmatmul.mubr.msk.bf16.gmra.mrb[20].mxu0 %vm15704_vm9, %v11467_v35  ;;  %vm15714_vm9 = vnez %v15527_v8  ;;  %v15720_v8 = vld [vmem:[#allocation54_spill] sm:$0xff] }
 0x129   : > { %9359 = vmatprep.mubr.msk.bf16.mxu0 %vm15705_vm14, %v11503_v20  ;;  %v15711_v20 = vld [vmem:[#allocation50_spill] sm:$0xff]  ;;  %v2565_v2 = vsel %vm15714_vm9, %v11270_v19, 0.0  ;;  %vm15715_vm14 = vcmask 1041408  }
 0x12a   : > { %vm15712_vm3 = vnez %v15711_v20  ;;  %v2960_v35 = vsel %vm15715_vm14, %v8550_v14, 0  ;;  %vm15722_vm9 = vmmov %vm15715_vm14 }
 0x130   : > { %9360 = vmatmul.mubr.msk.bf16.gmra.mrb[24].mxu0 %vm15706_vm15, %v11515_v4  ;;  %v2563_v4 = vsel %vm15712_vm3, %v11237_v9, 0.0  ;;  %vm15716_vm15 = vmmov %vm15682_vm0 }
 0x131   : > { %9363 = vmatprep.mubr.msk.bf16.mxu0 %vm15707_vm13, %v11542_v42  ;;  %v2593_v11 = vpack.c.bf16 %v2563_v4, %v11252_v22  ;;  %v2594_v42 = vpack.c.bf16 %v2565_v2, %v11289_v12  ;;  %vm15717_vm13 = vmmov %vm15682_vm0  ;;  %v15723_v2 = vld [vmem:[#allocation57_spill] sm:$0xff] }
 0x132   : > { %vm15724_vm14 = vmmov %vm15717_vm13 }
 0x138   : > { %9364 = vmatmul.mubr.msk.bf16.gmra.mrb[28].mxu0 %vm15682_vm0, %v11693_v46  ;;  %vm15718_vm0 = vnez %v15537_v0  ;;  %v15729_v0 = vld [vmem:[#allocation60_spill] sm:$0xff] }
 0x139   : > { %9369 = vmatprep.mubr.msk.bf16.mxu0 %vm15713_vm2, %v2592_v6  ;;  %v2567_v21 = vsel %vm15718_vm0, %v11278_v32, 0.0  ;;  %v15719_v6 = vld [vmem:[#allocation59_spill] sm:$0xff]  ;;  %vm15721_vm2 = vnez %v15720_v8  ;;  %vm15730_vm0 = vnez %v15729_v0  ;;  %v15731_v8 = vld [vmem:[#allocation62_spill] sm:$0xff] }
 0x13a   : > { %v2569_v4 = vsel %vm15721_vm2, %v15719_v6, 0.0  ;;  %v2595_v14 = vpack.c.bf16 %v2567_v21, %v15723_v2  ;;  %v15734_v21 = vld [vmem:[#allocation66_spill] sm:$0xff] }
 0x13b   : > { %v2596_v12 = vpack.c.bf16 %v2569_v4, %v11327_v53  ;;  %v15735_v4 = vld [vmem:[#allocation63_spill] sm:$0xff]  ;;  %v15739_v53 = vld [vmem:[#allocation68_spill] sm:$0xff] }
 0x140   : > { %9370 = vmatmul.mubr.msk.bf16.vlgmr.msra.gmra.mrb[0].mxu0 %vm15716_vm15, %v2593_v11  ;;  %vm15725_vm15 = vmmov %vm15717_vm13  ;;  %v15728_v11 = vld [vmem:[#allocation64_spill] sm:$0xff] }
 0x141   : > { %9402 = vmatpush3.bf16.msra.mxu0 %v2960_v35  ;;  %9373 = vmatprep.mubr.msk.bf16.mxu0 %vm15717_vm13, %v2594_v42  ;;  %v15726_v35 = vld [vmem:[#allocation58_spill] sm:$0xff]  ;;  %v2573_v32 = vsel %vm15730_vm0, %v15728_v11, 0.0 }
 0x142   : > { %10433 = vmatprep.subr.msk.bf16.mxu0 %vm15722_vm9, %v8567_v28  ;;  %vm15727_vm13 = vnez %v15726_v35  ;;  %v2598_v20 = vpack.c.bf16 %v2573_v32, %v11363_v57  ;;  %vm15732_vm9 = vmmov %vm15724_vm14  ;;  %v15742_v32 = vld [vmem:[#allocation72_spill] sm:$0xff]  ;;  %v15747_v57 = vld [vmem:[#allocation75_spill] sm:$0xff] }
 0x143   : > { %v2571_v42 = vsel %vm15727_vm13, %v11321_v36, 0.0  ;;  %vm15733_vm2 = vmmov %vm15732_vm9 }
 0x144   : > { %v2597_v6 = vpack.c.bf16 %v2571_v42, %v15731_v8  ;;  %vm15740_vm0 = vmmov %vm15733_vm2  ;;  %v15745_v42 = vld [vmem:[#allocation71_spill] sm:$0xff] }
 0x145   : > { %vm15741_vm13 = vmmov %vm15740_vm0 }
 0x148   : > { %9374 = vmatmul.mubr.msk.bf16.gmra.mrb[4].mxu0 %vm15724_vm14, %v2595_v14  ;;  %vm15736_vm14 = vnez %v15735_v4  ;;  %v15737_v14 = vld [vmem:[#allocation65_spill] sm:$0xff] }
 0x149   : > { %9377 = vmatprep.mubr.msk.bf16.mxu0 %vm15725_vm15, %v2596_v12  ;;  %v2575_v12 = vsel %vm15736_vm14, %v15734_v21, 0.0  ;;  %vm15738_vm15 = vnez %v15737_v14  ;;  %vm15749_vm14 = vmmov %vm15740_vm0 }
 0x14a   : > { %v2577_v35 = vsel %vm15738_vm15, %v11391_v18, 0.0  ;;  %v2599_v0 = vpack.c.bf16 %v2575_v12, %v15739_v53  ;;  %vm15748_vm15 = vmmov %vm15740_vm0  ;;  %v15752_v12 = vld [vmem:[#allocation79_spill] sm:$0xff] }
 0x14b   : > { %v2600_v11 = vpack.c.bf16 %v2577_v35, %v11409_v52  ;;  %v15750_v35 = vld [vmem:[#allocation80_spill] sm:$0xff] }
 0x150   : > { %9378 = vmatmul.mubr.msk.bf16.gmra.mrb[8].mxu0 %vm15732_vm9, %v2597_v6  ;;  %v15743_v6 = vld [vmem:[#allocation69_spill] sm:$0xff]  ;;  %vm15746_vm9 = vnez %v15745_v42 }
 0x151   : > { %9381 = vmatprep.mubr.msk.bf16.mxu0 %vm15733_vm2, %v2598_v20  ;;  %vm15744_vm2 = vnez %v15743_v6  ;;  %v2581_v4 = vsel %vm15746_vm9, %v11439_v47, 0.0  ;;  %v11763_v47 = vld [vmem:[%s10742_s24 + $0x118] sm:$0xff]  ;;  %vm15754_vm9 = vmmov %vm15741_vm13 }
 0x152   : > { %v2579_v20 = vsel %vm15744_vm2, %v15742_v32, 0.0  ;;  %v2602_v18 = vpack.c.bf16 %v2581_v4, %v11457_v51 }
 0x153   : > { %v2601_v14 = vpack.c.bf16 %v2579_v20, %v15747_v57  ;;  %v15252_v20 = vrot.slane %v11763_v47, 1 }
 0x158   : > { %9382 = vmatmul.mubr.msk.bf16.gmra.mrb[12].mxu0 %vm15740_vm0, %v2599_v0  ;;  %v15751_v0 = vld [vmem:[#allocation77_spill] sm:$0xff]  ;;  %vm15753_vm0 = vnez %v15752_v12 }
 0x159   : > { %9385 = vmatprep.mubr.msk.bf16.mxu0 %vm15741_vm13, %v2600_v11  ;;  %v2583_v11 = vsel %vm11434_vm1, %v15750_v35, 0.0  ;;  %v2585_v6 = vsel %vm15753_vm0, %v11487_v24, 0.0 }
 0x15a   : > { %v2603_v52 = vpack.c.bf16 %v2583_v11, %v11463_v1  ;;  %v2604_v42 = vpack.c.bf16 %v2585_v6, %v11507_v49 }
 0x160   : > { %9386 = vmatmul.mubr.msk.bf16.gmra.mrb[16].mxu0 %vm15748_vm15, %v2601_v14  ;;  %v2554_v14 = vrot.slane %v11630_v60, 1  ;;  %vm15756_vm15 = vcmask 1046528  }
 0x161   : > { %9389 = vmatprep.mubr.msk.bf16.mxu0 %vm15749_vm14, %v2602_v18  ;;  %v2587_v18 = vsel %vm11482_vm6, %v11495_v45, 0.0  ;;  %vm15755_vm14 = vnez %v15620_v38 }
 0x162   : > { %v2589_v4 = vsel %vm15755_vm14, %v11537_v23, 0.0  ;;  %v2605_v6 = vpack.c.bf16 %v2587_v18, %v11518_v61  ;;  %vm15759_vm14 = vmmov %vm15756_vm15 }
 0x163   : > { %v2606_v11 = vpack.c.bf16 %v2589_v4, %v11546_v40  ;;  %v2861_v4 = vsel %vm10855_vm4, %v10890_v59, 0.0  ;;  %v8584_v59 = vld [vmem:[%s15051_s1 + $0x10] sm:$0x3]  ;;  %vm15765_vm4 = vmmov %vm15754_vm9 }
 0x164   : > { %v2893_v40 = vpack.c.bf16 %v10903_v63, %v2861_v4  ;;  %v2867_v63 = vsel %vm10916_vm7, %v10973_v3, 0.0 }
 0x168   : > { %9390 = vmatmul.mubr.msk.bf16.gmra.mrb[20].mxu0 %vm15741_vm13, %v2603_v52  ;;  %v11780_v52 = vsel %vm15756_vm15, %v2554_v14, %v15252_v20  ;;  %vm15757_vm13 = vmmov %vm15754_vm9 }
 0x169   : > { %9393 = vmatprep.mubr.msk.bf16.mxu0 %vm15754_vm9, %v2604_v42  ;;  %v15758_v42 = vrot.slane %v11498_v34, 1  ;;  %v2591_v18 = vsel %vm11530_vm5, %v11780_v52, 0.0  ;;  %vm15760_vm15 = vmmov %vm15754_vm9  ;;  %v15761_v34 = vld [vmem:[#allocation17_spill] sm:$0xff] }
 0x16a   : > { %vm15766_vm5 = vmmov %vm15765_vm4 }
 0x16b   : > { %v11787_v38 = vsel %vm15759_vm14, %v15758_v42, %v2554_v14  ;;  %vm15762_vm14 = vnez %v15761_v34  ;;  %v15764_v42 = vld [vmem:[#allocation12_spill] sm:$0xff] }
 0x16c   : > { %v2607_v20 = vpack.c.bf16 %v2591_v18, %v11787_v38  ;;  %v2865_v14 = vsel %vm15762_vm14, %v10929_v37, 0.0  ;;  %v2869_v37 = vsel %vm10922_vm8, %v10982_v17, 0.0  ;;  %v15771_v18 = vld [vmem:[#allocation26_spill] sm:$0xff] }
 0x170   : > { %9394 = vmatmul.mubr.msk.bf16.gmra.mrb[24].mxu0 %vm15754_vm9, %v2605_v6  ;;  %v2895_v6 = vpack.c.bf16 %v10945_v48, %v2865_v14  ;;  %v15768_v48 = vld [vmem:[#allocation23_spill] sm:$0xff]  ;;  %v2871_v14 = vsel %vm10968_vm10, %v15771_v18, 0.0 }
 0x171   : > { %9397 = vmatprep.mubr.msk.bf16.mxu0 %vm15757_vm13, %v2606_v11  ;;  %vm15763_vm13 = vcmask 1041408   ;;  %v15785_v18 = vld [vmem:[#allocation35_spill] sm:$0xff] }
 0x172   : > { %v3162_v11 = vsel %vm15763_vm13, %v8567_v28, 0  ;;  %v15769_v28 = vld [vmem:[#allocation24_spill] sm:$0xff] }
 0x178   : > { %9398 = vmatmul.mubr.msk.bf16.gmra.mrb[28].mxu0 %vm15760_vm15, %v2607_v20  ;;  %vm15767_vm15 = vmmov %vm15763_vm13  ;;  %v2897_v20 = vpack.c.bf16 %v15769_v28, %v2869_v37  ;;  %v15780_v37 = vld [vmem:[#allocation25_spill] sm:$0xff]  ;;  %v15783_v28 = vld [vmem:[#allocation27_spill] sm:$0xff] }
 0x179   : > { %9403 = vmatprep.mubr.msk.bf16.mxu0 %vm15754_vm9, %v2893_v40  ;;  %v2896_v40 = vpack.c.bf16 %v15768_v48, %v2867_v63  ;;  %vm15770_vm9 = vmmov %vm15765_vm4  ;;  %v15779_v63 = vld [vmem:[#allocation32_spill] sm:$0xff] }
 0x17a   : > { %vm15778_vm13 = vmmov %vm15765_vm4 }
 0x180   : > { %9404 = vmatmul.mubr.msk.bf16.vlgmr.msra.gmra.mrb[0].mxu0 %vm15765_vm4, %v15764_v42  ;;  %v15775_v42 = vld [vmem:[#allocation29_spill] sm:$0xff] }
 0x181   : > { %9436 = vmatpush3.bf16.msra.mxu0 %v3162_v11  ;;  %9407 = vmatprep.mubr.msk.bf16.mxu0 %vm15766_vm5, %v2895_v6  ;;  %v15773_v6 = vld [vmem:[#allocation28_spill] sm:$0xff]  ;;  %v2898_v17 = vpack.c.bf16 %v15775_v42, %v2871_v14  ;;  %vm15777_vm5 = vmmov %vm15765_vm4  ;;  %v15788_v14 = vld [vmem:[#allocation31_spill] sm:$0xff] }
 0x182   : > { %10434 = vmatprep.subr.msk.bf16.mxu0 %vm15767_vm15, %v8584_v59  ;;  %v2873_v11 = vsel %vm10977_vm11, %v15773_v6, 0.0  ;;  %vm15781_vm15 = vnez %v15780_v37  ;;  %vm15786_vm11 = vmmov %vm15765_vm4 }
 0x183   : > { %v2899_v30 = vpack.c.bf16 %v15776_v33, %v2873_v11  ;;  %v2875_v48 = vsel %vm15781_vm15, %v15779_v63, 0.0  ;;  %v15787_v33 = vld [vmem:[#allocation38_spill] sm:$0xff]  ;;  %v15790_v11 = vld [vmem:[#allocation33_spill] sm:$0xff]  ;;  %vm15794_vm15 = vmmov %vm15765_vm4 }
 0x184   : > { %v2900_v4 = vpack.c.bf16 %v15785_v18, %v2875_v48 }
 0x188   : > { %9408 = vmatmul.mubr.msk.bf16.gmra.mrb[4].mxu0 %vm15770_vm9, %v2896_v40  ;;  %v15782_v40 = vld [vmem:[#allocation34_spill] sm:$0xff]  ;;  %vm15784_vm9 = vnez %v15783_v28 }
 0x189   : > { %9411 = vmatprep.mubr.msk.bf16.mxu0 %vm15765_vm4, %v2897_v20  ;;  %v2877_v20 = vsel %vm15784_vm9, %v15782_v40, 0.0  ;;  %vm15793_vm9 = vmmov %vm15765_vm4 }
 0x18a   : > { %v2901_v6 = vpack.c.bf16 %v15661_v62, %v2877_v20  ;;  %v15795_v62 = vld [vmem:[#allocation44_spill] sm:$0xff]  ;;  %v15798_v20 = vld [vmem:[#allocation39_spill] sm:$0xff] }
 0x190   : > { %9412 = vmatmul.mubr.msk.bf16.gmra.mrb[8].mxu0 %vm15777_vm5, %v2898_v17  ;;  %vm15789_vm5 = vnez %v15788_v14  ;;  %v15792_v17 = vld [vmem:[#allocation41_spill] sm:$0xff] }
 0x191   : > { %9415 = vmatprep.mubr.msk.bf16.mxu0 %vm15778_vm13, %v2899_v30  ;;  %v2879_v30 = vsel %vm15789_vm5, %v15787_v33, 0.0  ;;  %vm15791_vm13 = vnez %v15790_v11  ;;  %vm15802_vm5 = vmmov %vm15793_vm9 }
 0x192   : > { %v2881_v42 = vsel %vm15791_vm13, %v15664_v26, 0.0  ;;  %v2902_v63 = vpack.c.bf16 %v15792_v17, %v2879_v30  ;;  %vm15801_vm13 = vmmov %vm15793_vm9  ;;  %v15804_v30 = vld [vmem:[#allocation45_spill] sm:$0xff]  ;;  %v11868_v17 = vld [vmem:[%s10742_s24 + $0x120] sm:$0xff] }
 0x193   : > { %v2903_v40 = vpack.c.bf16 %v15670_v55, %v2881_v42 }
 0x198   : > { %9416 = vmatmul.mubr.msk.bf16.gmra.mrb[12].mxu0 %vm15765_vm4, %v2900_v4  ;;  %v15796_v4 = vld [vmem:[#allocation37_spill] sm:$0xff] }
 0x199   : > { %9419 = vmatprep.mubr.msk.bf16.mxu0 %vm15786_vm11, %v2901_v6  ;;  %vm15797_vm4 = vnez %v15796_v4  ;;  %vm15799_vm11 = vnez %v15798_v20  ;;  %v15800_v6 = vld [vmem:[#allocation47_spill] sm:$0xff] }
 0x19a   : > { %v2883_v48 = vsel %vm15797_vm4, %v15795_v62, 0.0  ;;  %v2885_v18 = vsel %vm15799_vm11, %v15674_v10, 0.0  ;;  %v2855_v10 = vrot.slane %v11763_v47, 7  ;;  %v15806_v62 = vrot.slane %v11630_v60, 7 }
 0x19b   : > { %v2904_v33 = vpack.c.bf16 %v15800_v6, %v2883_v48  ;;  %v2905_v26 = vpack.c.bf16 %v15679_v39, %v2885_v18  ;;  %v3155_v6 = vpack.c.bf16 %v11868_v17, %v11763_v47 }
 0x1a0   : > { %9420 = vmatmul.mubr.msk.bf16.gmra.mrb[16].mxu0 %vm15793_vm9, %v2902_v63  ;;  %vm15803_vm9 = vnez %v15675_v27 }
 0x1a1   : > { %9423 = vmatprep.mubr.msk.bf16.mxu0 %vm15794_vm15, %v2903_v40  ;;  %v2887_v55 = vsel %vm15803_vm9, %v11205_v50, 0.0  ;;  %vm15805_vm15 = vnez %v15804_v30  ;;  %v2857_v40 = vrot.slane %v11868_v17, 7  ;;  %vm15808_vm9 = vmmov %vm15801_vm13 }
 0x1a2   : > { %v2889_v42 = vsel %vm15805_vm15, %v11639_v15, 0.0  ;;  %v2906_v63 = vpack.c.bf16 %v11214_v58, %v2887_v55  ;;  %vm15810_vm15 = vnez %v15518_v16  ;;  %vm15811_vm4 = vmmov %vm15808_vm9  ;;  %v10483_v58 = vld [vmem:[%s15053_s3 + $0x10] sm:$0xff]   ;;  %v3367_v55 = vsel %vm15712_vm3, %v11270_v19, 0.0 }
 0x1a3   : > { %v2907_v39 = vpack.c.bf16 %v11646_v31, %v2889_v42  ;;  %vm15812_vm10 = vmmov %vm15811_vm4  ;;  %9503 = vmatprep.subr.bf16.mxu1 %v10483_v58  ;;  %v15819_v31 = vld [vmem:[#allocation73_spill] sm:$0xff]  ;;  %v15837_v42 = vld [vmem:[#allocation55_spill] sm:$0xff] }
 0x1a4   : > { %9504 = vmatpush3.bf16.msra.mxu1 %v10483_v58  ;;  %v15846_v19 = vld [vmem:[#allocation54_spill] sm:$0xff] }
 0x1a5   : > { %v15851_v58 = vld [vmem:[#allocation58_spill] sm:$0xff] }
 0x1a8   : > { %9424 = vmatmul.mubr.msk.bf16.gmra.mrb[20].mxu0 %vm15801_vm13, %v2904_v33 }
 0x1a9   : > { %9427 = vmatprep.mubr.msk.bf16.mxu0 %vm15802_vm5, %v2905_v26  ;;  %vm15807_vm5 = vcmask 1040384  }
 0x1aa   : > { %v2856_v48 = vsel %vm15807_vm5, %v15806_v62, %v2855_v10  ;;  %vm15809_vm11 = vmmov %vm15807_vm5  ;;  %vm15813_vm5 = vcmask 1041408  }
 0x1ab   : > { %v2858_v50 = vsel %vm15809_vm11, %v2855_v10, %v2857_v40  ;;  %v2891_v15 = vsel %vm15810_vm15, %v2856_v48, 0.0  ;;  %v3463_v60 = vsel %vm15813_vm5, %v8584_v59, 0  ;;  %vm15815_vm11 = vmmov %vm15811_vm4  ;;  %v3365_v59 = vsel %vm15710_vm12, %v11237_v9, 0.0  ;;  %v15838_v10 = vld [vmem:[#allocation52_spill] sm:$0xff]  ;;  %v15844_v40 = vld [vmem:[#allocation53_spill] sm:$0xff] }
 0x1ac   : > { %v2908_v18 = vpack.c.bf16 %v2858_v50, %v2891_v15  ;;  %vm15817_vm15 = vmmov %vm15811_vm4  ;;  %v3396_v33 = vpack.c.bf16 %v3365_v59, %v11252_v22  ;;  %v15843_v22 = vld [vmem:[#allocation59_spill] sm:$0xff]  ;;  %v15848_v50 = vld [vmem:[#allocation61_spill] sm:$0xff] }
 0x1ad   : > { %vm15820_vm5 = vmmov %vm15811_vm4 }
 0x1b0   : > { %9428 = vmatmul.mubr.msk.bf16.gmra.mrb[24].mxu0 %vm15801_vm13, %v2906_v63  ;;  %vm15816_vm13 = vmmov %vm15811_vm4  ;;  %v15840_v63 = vld [vmem:[#allocation56_spill] sm:$0xff] }
 0x1b1   : > { %9431 = vmatprep.mubr.msk.bf16.mxu0 %vm15808_vm9, %v2907_v39  ;;  %vm15814_vm9 = vmmov %vm15811_vm4  ;;  %v3397_v39 = vpack.c.bf16 %v3367_v55, %v15840_v63 }
 0x1b8   : > { %9432 = vmatmul.mubr.msk.bf16.gmra.mrb[28].mxu0 %vm15811_vm4, %v2908_v18 }
 0x1b9   : > { %9437 = vmatprep.mubr.msk.bf16.mxu0 %vm15812_vm10, %v15689_v56  ;;  %vm15818_vm10 = vmmov %vm15811_vm4  ;;  %v15821_v56 = vld [vmem:[#allocation76_spill] sm:$0xff] }
 0x1c0   : > { %9438 = vmatmul.mubr.msk.bf16.vlgmr.msra.gmra.mrb[0].mxu0 %vm15814_vm9, %v15690_v41  ;;  %vm15822_vm9 = vmmov %vm15811_vm4  ;;  %v15823_v41 = vld [vmem:[#allocation81_spill] sm:$0xff] }
 0x1c1   : > { %9470 = vmatpush3.bf16.msra.mxu0 %v3463_v60  ;;  %9441 = vmatprep.mubr.msk.bf16.mxu0 %vm15815_vm11, %v15693_v5  ;;  %vm15824_vm11 = vmmov %vm15811_vm4  ;;  %v15825_v5 = vld [vmem:[#allocation82_spill] sm:$0xff] }
 0x1c8   : > { %9442 = vmatmul.mubr.msk.bf16.gmra.mrb[4].mxu0 %vm15811_vm4, %v15695_v29  ;;  %v15826_v29 = vld [vmem:[#allocation85_spill] sm:$0xff] }
 0x1c9   : > { %9445 = vmatprep.mubr.msk.bf16.mxu0 %vm15816_vm13, %v15697_v54  ;;  %vm15827_vm13 = vmmov %vm15811_vm4  ;;  %v15828_v54 = vld [vmem:[#allocation86_spill] sm:$0xff] }
 0x1d0   : > { %9446 = vmatmul.mubr.msk.bf16.gmra.mrb[8].mxu0 %vm15817_vm15, %v15699_v13  ;;  %vm15829_vm15 = vmmov %vm15811_vm4  ;;  %v15830_v13 = vld [vmem:[#allocation88_spill] sm:$0xff] }
 0x1d1   : > { %9449 = vmatprep.mubr.msk.bf16.mxu0 %vm15818_vm10, %v11373_v7  ;;  %vm15831_vm10 = vmmov %vm15811_vm4 }
 0x1d8   : > { %9450 = vmatmul.mubr.msk.bf16.gmra.mrb[12].mxu0 %vm15820_vm5, %v15819_v31  ;;  %vm15832_vm5 = vmmov %vm15811_vm4  ;;  %v15853_v31 = vld [vmem:[#allocation60_spill] sm:$0xff] }
 0x1d9   : > { %9453 = vmatprep.mubr.msk.bf16.mxu0 %vm15822_vm9, %v15821_v56  ;;  %vm15834_vm9 = vmmov %vm15811_vm4 }
 0x1e0   : > { %9454 = vmatmul.mubr.msk.bf16.gmra.mrb[16].mxu0 %vm15824_vm11, %v15823_v41  ;;  %vm15836_vm11 = vmmov %vm15811_vm4  ;;  %v15855_v41 = vld [vmem:[#allocation67_spill] sm:$0xff] }
 0x1e1   : > { %9457 = vmatprep.mubr.msk.bf16.mxu0 %vm15811_vm4, %v15825_v5  ;;  %vm15839_vm4 = vnez %v15838_v10 }
 0x1e8   : > { %9458 = vmatmul.mubr.msk.bf16.gmra.mrb[20].mxu0 %vm15827_vm13, %v15826_v29  ;;  %vm15841_vm13 = vmmov %vm15832_vm5  ;;  %v15859_v29 = vld [vmem:[#allocation63_spill] sm:$0xff] }
 0x1e9   : > { %9461 = vmatprep.mubr.msk.bf16.mxu0 %vm15829_vm15, %v15828_v54  ;;  %vm15842_vm15 = vmmov %vm15832_vm5 }
 0x1f0   : > { %9462 = vmatmul.mubr.msk.bf16.gmra.mrb[24].mxu0 %vm15831_vm10, %v15830_v13  ;;  %vm15845_vm10 = vnez %v15844_v40  ;;  %v15861_v13 = vld [vmem:[#allocation65_spill] sm:$0xff] }
 0x1f1   : > { %9465 = vmatprep.mubr.msk.bf16.mxu0 %vm15832_vm5, %v11693_v46  ;;  %v3369_v46 = vsel %vm15839_vm4, %v15837_v42, 0.0  ;;  %v3371_v62 = vsel %vm15845_vm10, %v15843_v22, 0.0  ;;  %vm15847_vm5 = vnez %v15846_v19  ;;  %vm15856_vm4 = vmmov %vm15834_vm9 }
 0x1f2   : > { %v3398_v9 = vpack.c.bf16 %v3369_v46, %v15723_v2  ;;  %v3373_v48 = vsel %vm15847_vm5, %v11321_v36, 0.0  ;;  %v3399_v15 = vpack.c.bf16 %v3371_v62, %v15848_v50  ;;  %v15850_v2 = vld [vmem:[#allocation64_spill] sm:$0xff]  ;;  %vm15857_vm5 = vmmov %vm15856_vm4  ;;  %v15868_v46 = vld [vmem:[#allocation71_spill] sm:$0xff] }
 0x1f3   : > { %v3400_v18 = vpack.c.bf16 %v3373_v48, %v15731_v8  ;;  %v15858_v8 = vld [vmem:[#allocation70_spill] sm:$0xff]  ;;  %v423_v62 = vld [vmem:[%s10742_s24 + $0x128] sm:$0xff]  ;;  %v3358_v48 = vrot.slane %v11868_v17, 1  ;;  %v15271_v17 = vmov 0.0  }
 0x1f4   : > { %v15875_v50 = vld [vmem:[#allocation89_spill] sm:$0xff] }
 0x1f8   : > { %9466 = vmatmul.mubr.msk.bf16.gmra.mrb[28].mxu0 %vm15834_vm9, %v3155_v6  ;;  %v15863_v6 = vld [vmem:[#allocation74_spill] sm:$0xff] }
 0x1f9   : > { %9471 = vmatprep.mubr.msk.bf16.mxu0 %vm15836_vm11, %v3396_v33  ;;  %vm15849_vm11 = vmmov %vm15834_vm9 }
 0x200   : > { %9472 = vmatmul.mubr.msk.bf16.vlgmr.msra.gmra.mrb[0].mxu0 %vm15841_vm13, %v3397_v39  ;;  %vm15852_vm13 = vnez %v15851_v58 }
 0x201   : > { %9475 = vmatprep.mubr.msk.bf16.mxu0 %vm15842_vm15, %v3398_v9  ;;  %v3375_v60 = vsel %vm15852_vm13, %v15850_v2, 0.0  ;;  %vm15854_vm15 = vnez %v15853_v31  ;;  %vm15865_vm13 = vmmov %vm15856_vm4  ;;  %v3389_v9 = vsel %vm15753_vm0, %v11495_v45, 0.0  ;;  %v3360_v45 = vrot.slane %v423_v62, 1 }
 0x202   : > { %v3377_v56 = vsel %vm15854_vm15, %v15734_v21, 0.0  ;;  %v3401_v5 = vpack.c.bf16 %v3375_v60, %v15855_v41  ;;  %vm15864_vm15 = vmmov %vm15856_vm4  ;;  %vm15880_vm0 = vnez %v15629_v25 }
 0x203   : > { %v3402_v36 = vpack.c.bf16 %v3377_v56, %v15739_v53  ;;  %v15866_v53 = vld [vmem:[#allocation78_spill] sm:$0xff] }
 0x204   : > { %v3383_v42 = vsel %vm15744_vm2, %v15866_v53, 0.0 }
 0x205   : > { %v3405_v39 = vpack.c.bf16 %v3383_v42, %v11457_v51  ;;  %v15873_v51 = vld [vmem:[#allocation84_spill] sm:$0xff] }
 0x208   : > { %9476 = vmatmul.mubr.msk.bf16.gmra.mrb[4].mxu0 %vm15834_vm9, %v3399_v15  ;;  %vm15860_vm9 = vnez %v15859_v29 }
 0x209   : > { %9479 = vmatprep.mubr.msk.bf16.mxu0 %vm15849_vm11, %v3400_v18  ;;  %v3379_v54 = vsel %vm15860_vm9, %v15858_v8, 0.0  ;;  %vm15862_vm11 = vnez %v15861_v13  ;;  %v15878_v18 = vrot.slane %v11763_v47, 1  ;;  %v12032_v8 = vld [vmem:[%s15053_s3] sm:$0xff]  }
 0x20a   : > { %v3381_v59 = vsel %vm15862_vm11, %v15742_v32, 0.0  ;;  %v3403_v33 = vpack.c.bf16 %v3379_v54, %v15863_v6  ;;  %vm15870_vm11 = vmmov %vm15857_vm5  ;;  %v12035_v54 = vpop.f32.mrb[0].mxu1 }
 0x20b   : > { %v3404_v21 = vpack.c.bf16 %v3381_v59, %v15747_v57  ;;  %v3387_v57 = vsel %vm11434_vm1, %v11487_v24, 0.0  ;;  %vm15348_vm1 = vcmask 261120   ;;  %v12037_v59 = vpop.f32.mrb[1].mxu1 }
 0x20c   : > { %v3407_v22 = vpack.c.bf16 %v3387_v57, %v11507_v49  ;;  %3731 = vst.msk [vmem:[#allocation2 + $0x8] sm:$0xff] %vm15348_vm1, %v15271_v17  ;;  %3732 = vst.msk [vmem:[#allocation2 + $0x10] sm:$0xff] %vm15348_vm1, %v15271_v17  ;;  %v12039_v6 = vpop.f32.mrb[2].mxu1 }
 0x20d   : > { %3730 = vst.msk [vmem:[#allocation2] sm:$0xff] %vm15348_vm1, %v15271_v17  ;;  %3733 = vst.msk [vmem:[#allocation2 + $0x118] sm:$0xff] %vm15348_vm1, %v15271_v17 }
 0x20e   : > { %3734 = vst.msk [vmem:[#allocation2 + $0x120] sm:$0xff] %vm15348_vm1, %v15271_v17  ;;  %3735 = vst.msk [vmem:[#allocation2 + $0x128] sm:$0xff] %vm15348_vm1, %v15271_v17 }
 0x210   : > { %9480 = vmatmul.mubr.msk.bf16.gmra.mrb[8].mxu0 %vm15856_vm4, %v3401_v5  ;;  %vm15869_vm4 = vnez %v15868_v46 }
 0x211   : > { %9483 = vmatprep.mubr.msk.bf16.mxu0 %vm15857_vm5, %v3402_v36  ;;  %v3385_v63 = vsel %vm15869_vm4, %v15750_v35, 0.0  ;;  %v3408_v35 = vpack.c.bf16 %v3389_v9, %v11518_v61 }
 0x212   : > { %v3406_v32 = vpack.c.bf16 %v3385_v63, %v11463_v1  ;;  %v3391_v1 = vsel %vm11482_vm6, %v11537_v23, 0.0 }
 0x213   : > { %v3409_v49 = vpack.c.bf16 %v3391_v1, %v15875_v50  ;;  %v12019_v47 = vld [vmem:[#allocation2 + $0x10] sm:$0xff]  ;;  %v3769_v60 = vld [vmem:[#allocation2 + $0x8] sm:$0xff] }
 0x214   : > { %v3988_v56 = vpack.c.bf16 %v12019_v47, %v3769_v60  ;;  %v4452_v41 = vrot.slane %v3769_v60, 1  ;;  %v4453_v5 = vrot.slane %v12019_v47, 1 }
 0x216   : > { %9507 = vmatprep.mubr.msk.bf16.mxu1 %vm15348_vm1, %v3988_v56 }
 0x218   : > { %9484 = vmatmul.mubr.msk.bf16.gmra.mrb[12].mxu0 %vm15864_vm15, %v3403_v33  ;;  %vm15872_vm15 = vmmov %vm15857_vm5  ;;  %v12041_v33 = vpop.f32.mrb[3].mxu1 }
 0x219   : > { %9487 = vmatprep.mubr.msk.bf16.mxu0 %vm15865_vm13, %v3404_v21  ;;  %vm15871_vm13 = vmmov %vm15857_vm5  ;;  %v12043_v21 = vpop.f32.mrb[4].mxu1 }
 0x21a   : > { %v12045_v53 = vpop.f32.mrb[5].mxu1 }
 0x21b   : > { %v12047_v42 = vpop.f32.mrb[6].mxu1 }
 0x21c   : > { %v12049_v63 = vpop.f32.mrb[7].mxu1 }
 0x220   : > { %9488 = vmatmul.mubr.msk.bf16.gmra.mrb[16].mxu0 %vm15857_vm5, %v3405_v39  ;;  %vm15876_vm5 = vcmask 1046528   ;;  %v12051_v39 = vpop.f32.mrb[8].mxu1 }
 0x221   : > { %9491 = vmatprep.mubr.msk.bf16.mxu0 %vm15870_vm11, %v3406_v32  ;;  %vm15874_vm11 = vnez %v15873_v51  ;;  %v3361_v15 = vsel %vm15876_vm5, %v3358_v48, %v3360_v45  ;;  %vm15879_vm6 = vmmov %vm15876_vm5  ;;  %v12053_v32 = vpop.f32.mrb[9].mxu1  ;;  %v3768_v45 = vld [vmem:[#allocation2] sm:$0xff] }
 0x222   : > { %v3393_v24 = vsel %vm15874_vm11, %v11780_v52, 0.0  ;;  %v3359_v23 = vsel %vm15879_vm6, %v15878_v18, %v3358_v48  ;;  %v3395_v52 = vsel %vm15880_vm0, %v3361_v15, 0.0  ;;  %vm15881_vm11 = vmmov %vm15871_vm13  ;;  %v12055_v57 = vpop.f32.mrb[10].mxu1  ;;  %v15273_v48 = vrot.slane %v12019_v47, 7 }
 0x223   : > { %v3410_v61 = vpack.c.bf16 %v3393_v24, %v11787_v38  ;;  %v3411_v2 = vpack.c.bf16 %v3395_v52, %v3359_v23  ;;  %v10484_v38 = vld [vmem:[%s15053_s3 + $0x18] sm:$0xff]   ;;  %vm15882_vm6 = vmmov %vm15876_vm5  ;;  %v12057_v9 = vpop.f32.mrb[11].mxu1  ;;  %v3840_v24 = vrot.slane %v3769_v60, 7  ;;  %v12079_v23 = vld [vmem:[%s15052_s2] ss:$0 sm:$0xff] }
 0x224   : > { %9505 = vmatprep.subr.bf16.mxu1 %v10484_v38  ;;  %v12027_v36 = vsel %vm15882_vm6, %v4452_v41, %v4453_v5 }
 0x225   : > { %9506 = vmatpush3.bf16.msra.mxu1 %v10484_v38 }
 0x226   : > { %9539 = vmatprep.subr.bf16.mxu1 %v12032_v8 }
 0x228   : > { %9492 = vmatmul.mubr.msk.bf16.gmra.mrb[20].mxu0 %vm15871_vm13, %v3407_v22  ;;  %v12059_v22 = vpop.f32.mrb[12].mxu1 }
 0x229   : > { %9495 = vmatprep.mubr.msk.bf16.mxu0 %vm15872_vm15, %v3408_v35  ;;  %vm15877_vm15 = vmmov %vm15871_vm13  ;;  %v12061_v35 = vpop.f32.mrb[13].mxu1 }
 0x22a   : > { %v12063_v62 = vpop.f32.mrb[14].mxu1 }
 0x22b   : > { %v12065_v1 = vpop.f32.mrb[15].mxu1 }
 0x230   : > { %9496 = vmatmul.mubr.msk.bf16.gmra.mrb[24].mxu0 %vm15871_vm13, %v3409_v49  ;;  %v3839_v49 = vrot.slane %v3768_v45, 7  ;;  %vm15885_vm13 = vnez %v15452_v43 }
 0x231   : > { %9499 = vmatprep.mubr.msk.bf16.mxu0 %vm15877_vm15, %v3410_v61  ;;  %vm15888_vm15 = vmmov %vm15882_vm6 }
 0x238   : > { %9500 = vmatmul.mubr.msk.bf16.gmra.mrb[28].mxu0 %vm15881_vm11, %v3411_v2  ;;  %vm15883_vm11 = vcmask 1040384  }
 0x239   : > { %v3843_v50 = vsel %vm15883_vm11, %v3840_v24, %v15273_v48  ;;  %vm15884_vm5 = vmmov %vm15883_vm11 }
 0x23a   : > { %v3841_v61 = vsel %vm15884_vm5, %v3839_v49, %v3840_v24  ;;  %vm15894_vm11 = vmmov %vm15884_vm5 }
 0x23b   : > { %v3936_v15 = vsel %vm15885_vm13, %v3841_v61, 0.0 }
 0x23c   : > { %v12074_v18 = vpack.c.bf16 %v3843_v50, %v3936_v15 }
 0x2d3   : > { %v9473_v52 = vpop.f32.mrb[0].mxu0 }
 0x2d4   : > { %v3667_v2 = vadd.f32 %v9473_v52, %v12079_v23  ;;  %v3499_v38 = vpop.f32.mrb[1].mxu0 }
 0x2d5   : > { %v3665_v60 = vadd.f32 %v12079_v23, %v3499_v38  ;;  %v9474_v56 = vpop.f32.mrb[2].mxu0 }
 0x2d6   : > { %v3699_v41 = vmax.f32 %v3667_v2, 0.0  ;;  %v3668_v24 = vadd.f32 %v9474_v56, %v12079_v23  ;;  %v3502_v45 = vpop.f32.mrb[3].mxu0 }
 0x2d7   : > { %v3697_v49 = vmax.f32 %v3665_v60, 0.0  ;;  %v3666_v50 = vadd.f32 %v12079_v23, %v3502_v45 }
 0x2d8   : > { %3738 = vst.msk [vmem:[#allocation2 + $0x28] sm:$0xff] %vm15348_vm1, %v3699_v41  ;;  %v3700_v61 = vmax.f32 %v3668_v24, 0.0 }
 0x2d9   : > { %3736 = vst.msk [vmem:[#allocation2 + $0x18] sm:$0xff] %vm15348_vm1, %v3697_v49  ;;  %v3698_v15 = vmax.f32 %v3666_v50, 0.0 }
 0x2da   : > { %3739 = vst.msk [vmem:[#allocation2 + $0x30] sm:$0xff] %vm15348_vm1, %v3700_v61 }
 0x2db   : > { %3737 = vst.msk [vmem:[#allocation2 + $0x20] sm:$0xff] %vm15348_vm1, %v3698_v15  ;;  %v9477_v52 = vpop.f32.mrb[4].mxu0 }
 0x2dc   : > { %v3671_v38 = vadd.f32 %v9477_v52, %v12079_v23  ;;  %v3515_v2 = vpop.f32.mrb[5].mxu0 }
 0x2dd   : > { %v3669_v56 = vadd.f32 %v12079_v23, %v3515_v2  ;;  %v9478_v17 = vpop.f32.mrb[6].mxu0 }
 0x2de   : > { %v3703_v60 = vmax.f32 %v3671_v38, 0.0  ;;  %v3672_v45 = vadd.f32 %v9478_v17, %v12079_v23  ;;  %v3518_v48 = vpop.f32.mrb[7].mxu0 }
 0x2df   : > { %v3701_v41 = vmax.f32 %v3669_v56, 0.0  ;;  %v3670_v24 = vadd.f32 %v12079_v23, %v3518_v48  ;;  %v12096_v61 = vld [vmem:[#allocation2 + $0x28] sm:$0xff] }
 0x2e0   : > { %3742 = vst.msk [vmem:[#allocation2 + $0x48] sm:$0xff] %vm15348_vm1, %v3703_v60  ;;  %v3704_v49 = vmax.f32 %v3672_v45, 0.0  ;;  %v12094_v50 = vld [vmem:[#allocation2 + $0x18] sm:$0xff]  ;;  %v10486_v45 = vld [vmem:[%s15053_s3 + $0x8] sm:$0xff]   ;;  %v15889_v10 = vrot.slane %v12096_v61, 1 }
 0x2e1   : > { %3740 = vst.msk [vmem:[#allocation2 + $0x38] sm:$0xff] %vm15348_vm1, %v3701_v41  ;;  %v3702_v15 = vmax.f32 %v3670_v24, 0.0  ;;  %v12099_v52 = vld [vmem:[#allocation2 + $0x30] sm:$0xff]  ;;  %v15277_v38 = vrot.slane %v12094_v50, 1 }
 0x2e2   : > { %3743 = vst.msk [vmem:[#allocation2 + $0x50] sm:$0xff] %vm15348_vm1, %v3704_v49  ;;  %v12103_v17 = vld [vmem:[#allocation2 + $0x20] sm:$0xff]  ;;  %v12118_v49 = vpack.c.bf16 %v12099_v52, %v12096_v61  ;;  %v4461_v28 = vrot.slane %v12099_v52, 1 }
 0x2e3   : > { %3741 = vst.msk [vmem:[#allocation2 + $0x40] sm:$0xff] %vm15348_vm1, %v3702_v15  ;;  %v9481_v48 = vpop.f32.mrb[8].mxu0  ;;  %v12108_v2 = vpack.c.bf16 %v12103_v17, %v12094_v50  ;;  %v4457_v56 = vrot.slane %v12103_v17, 1  ;;  %v4456_v15 = vsel %vm15888_vm15, %v4453_v5, %v15277_v38  ;;  %v12141_v38 = vld [vmem:[%s15053_s3 + $0x20] sm:$0xff]   ;;  %vm15899_vm15 = vmmov %vm15894_vm11 }
 0x2e4   : > { %v3675_v41 = vadd.f32 %v9481_v48, %v12079_v23  ;;  %v3531_v24 = vpop.f32.mrb[9].mxu0  ;;  %15887 = vst [vmem:[#allocation40_spill] sm:$0xff] %v12118_v49  ;;  %15891 = vst [vmem:[#allocation46_spill] sm:$0xff] %v12141_v38 }
 0x2e5   : > { %15886 = vst [vmem:[#allocation36_spill] sm:$0xff] %v12108_v2  ;;  %v3673_v16 = vadd.f32 %v12079_v23, %v3531_v24  ;;  %v9482_v60 = vpop.f32.mrb[10].mxu0  ;;  %9508 = vmatmul.mubr.msk.bf16.vlgmr.msra.gmra.mrb[16].mxu1 %vm15348_vm1, %v12108_v2  ;;  %v12131_v48 = vsel %vm15882_vm6, %v4457_v56, %v15889_v10 }
 0x2e6   : > { %15890 = vst [vmem:[#allocation42_spill] sm:$0xff] %v12131_v48  ;;  %v3707_v30 = vmax.f32 %v3675_v41, 0.0  ;;  %v3676_v27 = vadd.f32 %v9482_v60, %v12079_v23  ;;  %v3534_v20 = vpop.f32.mrb[11].mxu0  ;;  %9511 = vmatprep.mubr.msk.bf16.mxu1 %vm15348_vm1, %v12118_v49  ;;  %9540 = vmatpush3.bf16.msra.mxu1 %v12032_v8  ;;  %v3844_v48 = vrot.slane %v12094_v50, 7 }
 0x2e7   : > { %v3705_v5 = vmax.f32 %v3673_v16, 0.0  ;;  %v3674_v24 = vadd.f32 %v12079_v23, %v3534_v20  ;;  %9541 = vmatprep.subr.bf16.mxu1 %v10486_v45  ;;  %v12162_v49 = vld [vmem:[#allocation2 + $0x48] sm:$0xff] }
 0x2e8   : > { %3746 = vst.msk [vmem:[#allocation2 + $0x68] sm:$0xff] %vm15348_vm1, %v3707_v30  ;;  %v3708_v10 = vmax.f32 %v3676_v27, 0.0  ;;  %v12144_v41 = vld [vmem:[#allocation2 + $0x38] sm:$0xff]  ;;  %v4550_v30 = vsel %vm15710_vm12, %v4456_v15, 0.0 }
 0x2e9   : > { %3744 = vst.msk [vmem:[#allocation2 + $0x58] sm:$0xff] %vm15348_vm1, %v3705_v5  ;;  %v3706_v60 = vmax.f32 %v3674_v24, 0.0  ;;  %v3852_v16 = vrot.slane %v12144_v41, 7  ;;  %v12149_v8 = vld [vmem:[#allocation2 + $0x50] sm:$0xff]  ;;  %v12188_v14 = vpack.c.bf16 %v4550_v30, %v12027_v36  ;;  %v3846_v30 = vrot.slane %v12103_v17, 7 }
 0x2ea   : > { %3747 = vst.msk [vmem:[#allocation2 + $0x70] sm:$0xff] %vm15348_vm1, %v3708_v10  ;;  %v12152_v20 = vld [vmem:[#allocation2 + $0x40] sm:$0xff]  ;;  %9542 = vmatpush3.bf16.msra.mxu1 %v10486_v45  ;;  %v15893_v10 = vrot.slane %v12099_v52, 7  ;;  %v15896_v5 = vld [vmem:[#allocation10_spill] sm:$0xff] }
 0x2eb   : > { %3745 = vst.msk [vmem:[#allocation2 + $0x60] sm:$0xff] %vm15348_vm1, %v3706_v60  ;;  %v9485_v27 = vpop.f32.mrb[12].mxu0  ;;  %v12160_v24 = vpack.c.bf16 %v12152_v20, %v12144_v41  ;;  %9575 = vmatprep.subr.bf16.mxu1 %v12141_v38  ;;  %v12173_v60 = vpack.c.bf16 %v12149_v8, %v12162_v49  ;;  %vm15897_vm5 = vnez %v15896_v5  ;;  %15900 = vst [vmem:[#allocation8_spill] sm:$0xff] %v12188_v14 }
 0x2ec   : > { %v12168_v45 = vsel %vm15894_vm11, %v15893_v10, %v3852_v16  ;;  %v3679_v15 = vadd.f32 %v9485_v27, %v12079_v23  ;;  %v3547_v7 = vpop.f32.mrb[13].mxu0  ;;  %v15898_v10 = vrot.slane %v12152_v20, 7 }
 0x2ed   : > { %15892 = vst [vmem:[#allocation48_spill] sm:$0xff] %v12160_v24  ;;  %15895 = vst [vmem:[#allocation7_spill] sm:$0xff] %v12173_v60  ;;  %v5704_v2 = vsel %vm15897_vm5, %v12168_v45, 0.0  ;;  %v3677_v4 = vadd.f32 %v12079_v23, %v3547_v7  ;;  %v9486_v11 = vpop.f32.mrb[14].mxu0  ;;  %9512 = vmatmul.mubr.msk.bf16.gmra.mrb[20].mxu1 %vm15348_vm1, %v12160_v24 }
 0x2ee   : > { %v12185_v27 = vsel %vm15899_vm15, %v3852_v16, %v15898_v10  ;;  %v3711_v37 = vmax.f32 %v3679_v15, 0.0  ;;  %v3680_v38 = vadd.f32 %v9486_v11, %v12079_v23  ;;  %v3550_v3 = vpop.f32.mrb[15].mxu0  ;;  %9515 = vmatprep.mubr.msk.bf16.mxu1 %vm15348_vm1, %v12173_v60  ;;  %v15902_v16 = vrot.slane %v12094_v50, 1  ;;  %vm15907_vm15 = vmmov %vm15882_vm6 }
 0x2ef   : > { %v12195_v7 = vpack.c.bf16 %v12185_v27, %v5704_v2  ;;  %v3709_v24 = vmax.f32 %v3677_v4, 0.0  ;;  %v3678_v25 = vadd.f32 %v12079_v23, %v3550_v3  ;;  %v15292_v15 = vrot.slane %v12144_v41, 1 }
 0x2f0   : > { %v12201_v36 = vsel %vm15882_vm6, %v15902_v16, %v4457_v56  ;;  %3750 = vst.msk [vmem:[#allocation2 + $0x88] sm:$0xff] %vm15348_vm1, %v3711_v37  ;;  %v3712_v11 = vmax.f32 %v3680_v38, 0.0  ;;  %v15904_v4 = vrot.slane %v12019_v47, 7  ;;  %v3848_v50 = vrot.slane %v12096_v61, 7  ;;  %v12216_v17 = vld [vmem:[#allocation2 + $0x58] sm:$0xff]  ;;  %v12232_v16 = vld [vmem:[#allocation2 + $0x68] sm:$0xff]  ;;  %vm15912_vm6 = vmmov %vm15894_vm11 }
 0x2f1   : > { %15901 = vst [vmem:[#allocation9_spill] sm:$0xff] %v12195_v7  ;;  %15903 = vst [vmem:[#allocation11_spill] sm:$0xff] %v12201_v36  ;;  %v3710_v10 = vmax.f32 %v3678_v25, 0.0  ;;  %v12207_v2 = vld [vmem:[#allocation2 + $0x70] sm:$0xff]  ;;  %v15906_v38 = vrot.slane %v12096_v61, 1  ;;  %v12225_v25 = vld [vmem:[#allocation2 + $0x118] sm:$0xff] }
 0x2f2   : > { %3748 = vst.msk [vmem:[#allocation2 + $0x78] sm:$0xff] %vm15348_vm1, %v3709_v24  ;;  %v12212_v3 = vsel %vm15894_vm11, %v15904_v4, %v3844_v48  ;;  %3751 = vst.msk [vmem:[#allocation2 + $0x90] sm:$0xff] %vm15348_vm1, %v3712_v11  ;;  %v12218_v37 = vld [vmem:[#allocation2 + $0x60] sm:$0xff]  ;;  %v12237_v61 = vpack.c.bf16 %v12207_v2, %v12232_v16 }
 0x2f3   : > { %15905 = vst [vmem:[#allocation13_spill] sm:$0xff] %v12216_v17  ;;  %v12223_v56 = vsel %vm15907_vm15, %v15906_v38, %v4461_v28  ;;  %15909 = vst [vmem:[#allocation16_spill] sm:$0xff] %v12225_v25  ;;  %v9489_v47 = vpop.f32.mrb[16].mxu0  ;;  %v12230_v24 = vpack.c.bf16 %v12218_v37, %v12216_v17  ;;  %v12240_v38 = vsel %vm15912_vm6, %v3846_v30, %v3848_v50  ;;  %v3938_v7 = vsel %vm15897_vm5, %v12212_v3, 0.0 }
 0x2f4   : > { %15908 = vst [vmem:[#allocation14_spill] sm:$0xff] %v12223_v56  ;;  %3749 = vst.msk [vmem:[#allocation2 + $0x80] sm:$0xff] %vm15348_vm1, %v3710_v10  ;;  %v9913_v11 = vadd.f32 %v9489_v47, %v12035_v54  ;;  %v3563_v4 = vpop.f32.mrb[17].mxu0  ;;  %v3856_v56 = vrot.slane %v12162_v49, 7 }
 0x2f5   : > { %15910 = vst [vmem:[#allocation51_spill] sm:$0xff] %v12230_v24  ;;  %15911 = vst [vmem:[#allocation57_spill] sm:$0xff] %v12237_v61  ;;  %v9914_v60 = vadd.f32 %v3563_v4, %v12037_v59  ;;  %v9490_v54 = vpop.f32.mrb[18].mxu0  ;;  %9516 = vmatmul.mubr.msk.bf16.gmra.mrb[24].mxu1 %vm15348_vm1, %v12230_v24  ;;  %v15917_v24 = vrot.slane %v12099_v52, 7 }
 0x2f6   : > { %15913 = vst [vmem:[#allocation62_spill] sm:$0xff] %v12240_v38  ;;  %vm15914_vm11 = vmmov %vm15907_vm15  ;;  %v3683_v36 = vadd.f32 %v9913_v11, %v12079_v23  ;;  %v9915_v14 = vadd.f32 %v9490_v54, %v12039_v6  ;;  %9519 = vmatprep.mubr.msk.bf16.mxu1 %vm15348_vm1, %v12237_v61  ;;  %v3940_v6 = vsel %vm15762_vm14, %v12240_v38, 0.0  ;;  %v3858_v11 = vrot.slane %v12149_v8, 7 }
 0x2f7   : > { %v12245_v10 = vsel %vm15914_vm11, %v4461_v28, %v15292_v15  ;;  %v3566_v28 = vpop.f32.mrb[19].mxu0  ;;  %vm15916_vm15 = vmmov %vm15912_vm6  ;;  %v3681_v59 = vadd.f32 %v9914_v60, %v12079_v23  ;;  %v12267_v47 = vsel %vm15912_vm6, %v3848_v50, %v15917_v24 }
 0x2f8   : > { %15915 = vst [vmem:[#allocation66_spill] sm:$0xff] %v12245_v10  ;;  %v12260_v15 = vsel %vm15916_vm15, %v3844_v48, %v3846_v30  ;;  %v9916_v4 = vadd.f32 %v3566_v28, %v12041_v33  ;;  %15918 = vst [vmem:[#allocation68_spill] sm:$0xff] %v12267_v47  ;;  %v3715_v54 = vmax.f32 %v3683_v36, 0.0  ;;  %v3684_v61 = vadd.f32 %v9915_v14, %v12079_v23 }
 0x2f9   : > { %v15919_v48 = vrot.slane %v12152_v20, 7  ;;  %vm15920_vm11 = vmmov %vm15912_vm6  ;;  %v3713_v52 = vmax.f32 %v3681_v59, 0.0  ;;  %v12281_v50 = vld [vmem:[#allocation2 + $0x90] sm:$0xff]  ;;  %v12284_v24 = vpack.c.bf16 %v12260_v15, %v3938_v7  ;;  %v12288_v36 = vld [vmem:[#allocation2 + $0x78] sm:$0xff]  ;;  %v3864_v10 = vrot.slane %v12232_v16, 7 }
 0x2fa   : > { %v3682_v30 = vadd.f32 %v9916_v4, %v12079_v23  ;;  %3754 = vst.msk [vmem:[#allocation2 + $0xa8] sm:$0xff] %vm15348_vm1, %v3715_v54  ;;  %v3716_v14 = vmax.f32 %v3684_v61, 0.0  ;;  %v3942_v4 = vsel %vm10916_vm7, %v12168_v45, 0.0  ;;  %v12304_v54 = vld [vmem:[#allocation2 + $0x88] sm:$0xff]  ;;  %vm15926_vm15 = vmmov %vm15912_vm6 }
 0x2fb   : > { %v12277_v60 = vsel %vm15920_vm11, %v15919_v48, %v3856_v56  ;;  %v12290_v5 = vld [vmem:[#allocation2 + $0x80] sm:$0xff]  ;;  %v12293_v48 = vpack.c.bf16 %v12267_v47, %v3940_v6  ;;  %3752 = vst.msk [vmem:[#allocation2 + $0x98] sm:$0xff] %vm15348_vm1, %v3713_v52  ;;  %v9493_v28 = vpop.f32.mrb[20].mxu0  ;;  %v4465_v47 = vrot.slane %v12152_v20, 1  ;;  %v12317_v7 = vsel %vm15926_vm15, %v3856_v56, %v3858_v11 }
 0x2fc   : > { %15921 = vst [vmem:[#allocation72_spill] sm:$0xff] %v12277_v60  ;;  %v3714_v33 = vmax.f32 %v3682_v30, 0.0  ;;  %v12302_v61 = vpack.c.bf16 %v12290_v5, %v12288_v36  ;;  %v3944_v6 = vsel %vm10922_vm8, %v12277_v60, 0.0  ;;  %3755 = vst.msk [vmem:[#allocation2 + $0xb0] sm:$0xff] %vm15348_vm1, %v3716_v14  ;;  %v9917_v52 = vadd.f32 %v9493_v28, %v12043_v21  ;;  %v3579_v59 = vpop.f32.mrb[21].mxu0 }
 0x2fd   : > { %v12314_v30 = vpack.c.bf16 %v12281_v50, %v12304_v54  ;;  %15927 = vst [vmem:[#allocation77_spill] sm:$0xff] %v12317_v7  ;;  %v9918_v20 = vadd.f32 %v3579_v59, %v12045_v53  ;;  %v9494_v25 = vpop.f32.mrb[22].mxu0  ;;  %v12326_v21 = vpack.c.bf16 %v12185_v27, %v3942_v4  ;;  %v12334_v60 = vpack.c.bf16 %v12317_v7, %v3944_v6 }
 0x2fe   : > { %15923 = vst [vmem:[#allocation75_spill] sm:$0xff] %v12302_v61  ;;  %3753 = vst.msk [vmem:[#allocation2 + $0xa0] sm:$0xff] %vm15348_vm1, %v3714_v33  ;;  %9520 = vmatmul.mubr.msk.bf16.gmra.mrb[28].mxu1 %vm15348_vm1, %v12302_v61  ;;  %v3687_v56 = vadd.f32 %v9917_v52, %v12079_v23  ;;  %v9919_v14 = vadd.f32 %v9494_v25, %v12047_v42  ;;  %v3582_v33 = vpop.f32.mrb[23].mxu0  ;;  %v15930_v61 = vrot.slane %v12216_v17, 7  ;;  %v15932_v25 = vrot.slane %v12144_v41, 1 }
 0x2ff   : > { %15925 = vst [vmem:[#allocation80_spill] sm:$0xff] %v12314_v30  ;;  %15928 = vst [vmem:[#allocation79_spill] sm:$0xff] %v12326_v21  ;;  %9523 = vmatprep.mubr.msk.bf16.mxu1 %vm15348_vm1, %v12314_v30  ;;  %v3685_v59 = vadd.f32 %v9918_v20, %v12079_v23  ;;  %v9920_v4 = vadd.f32 %v3582_v33, %v12049_v63  ;;  %vm15933_vm11 = vcmask 1046528   ;;  %v15935_v6 = vrot.slane %v12162_v49, 1 }
 0x300   : > { %15929 = vst [vmem:[#allocation12_spill] sm:$0xff] %v12334_v60  ;;  %v12342_v28 = vsel %vm15912_vm6, %v3858_v11, %v15930_v61  ;;  %v3719_v52 = vmax.f32 %v3687_v56, 0.0  ;;  %v3688_v42 = vadd.f32 %v9919_v14, %v12079_v23  ;;  %v12348_v30 = vsel %vm15933_vm11, %v15932_v25, %v4465_v47  ;;  %vm15936_vm15 = vmmov %vm15933_vm11 }
 0x301   : > { %15931 = vst [vmem:[#allocation23_spill] sm:$0xff] %v12342_v28  ;;  %15934 = vst [vmem:[#allocation24_spill] sm:$0xff] %v12348_v30  ;;  %v12353_v53 = vsel %vm15936_vm15, %v4465_v47, %v15935_v6  ;;  %v3717_v20 = vmax.f32 %v3685_v59, 0.0  ;;  %v3686_v63 = vadd.f32 %v9920_v4, %v12079_v23  ;;  %v15939_v6 = vld [vmem:[#allocation21_spill] sm:$0xff]  ;;  %vm15943_vm11 = vcmask 1040384  }
 0x302   : > { %15937 = vst [vmem:[#allocation26_spill] sm:$0xff] %v12353_v53  ;;  %v4556_v11 = vsel %vm15845_vm10, %v12353_v53, 0.0  ;;  %v6232_v61 = vsel %vm15712_vm3, %v12353_v53, 0.0  ;;  %3758 = vst.msk [vmem:[#allocation2 + $0xc8] sm:$0xff] %vm15348_vm1, %v3719_v52  ;;  %v3720_v14 = vmax.f32 %v3688_v42, 0.0  ;;  %vm15940_vm6 = vnez %v15939_v6  ;;  %v12381_v33 = vld [vmem:[#allocation2 + $0x98] sm:$0xff] }
 0x303   : > { %v12366_v47 = vpack.c.bf16 %v4556_v11, %v12348_v30  ;;  %3756 = vst.msk [vmem:[#allocation2 + $0xb8] sm:$0xff] %vm15348_vm1, %v3717_v20  ;;  %v3718_v59 = vmax.f32 %v3686_v63, 0.0  ;;  %v9497_v4 = vpop.f32.mrb[24].mxu0  ;;  %v12370_v25 = vld [vmem:[#allocation2 + $0xb0] sm:$0xff]  ;;  %v12376_v56 = vpack.c.bf16 %v6232_v61, %v12348_v30  ;;  %v3872_v52 = vrot.slane %v12304_v54, 7  ;;  %vm15945_vm15 = vmmov %vm15943_vm11 }
 0x304   : > { %3759 = vst.msk [vmem:[#allocation2 + $0xd0] sm:$0xff] %vm15348_vm1, %v3720_v14  ;;  %v9921_v42 = vadd.f32 %v9497_v4, %v12051_v39  ;;  %v3595_v11 = vpop.f32.mrb[25].mxu0  ;;  %v15942_v63 = vrot.slane %v12218_v37, 7  ;;  %v15944_v41 = vrot.slane %v12207_v2, 7  ;;  %v3868_v14 = vrot.slane %v12288_v36, 7  ;;  %vm15953_vm12 = vmmov %vm15943_vm11 }
 0x305   : > { %15938 = vst [vmem:[#allocation28_spill] sm:$0xff] %v12366_v47  ;;  %15941 = vst [vmem:[#allocation29_spill] sm:$0xff] %v12376_v56  ;;  %v12383_v20 = vld [vmem:[#allocation2 + $0xa0] sm:$0xff]  ;;  %v3874_v39 = vrot.slane %v12281_v50, 7  ;;  %v9922_v4 = vadd.f32 %v3595_v11, %v12053_v32  ;;  %v9498_v56 = vpop.f32.mrb[26].mxu0  ;;  %v3870_v26 = vrot.slane %v12290_v5, 7 }
 0x306   : > { %v12388_v7 = vsel %vm15943_vm11, %v15942_v63, %v3864_v10  ;;  %v12393_v61 = vsel %vm15945_vm15, %v3864_v10, %v15944_v41  ;;  %3757 = vst.msk [vmem:[#allocation2 + $0xc0] sm:$0xff] %vm15348_vm1, %v3718_v59  ;;  %v12401_v47 = vpack.c.bf16 %v12383_v20, %v12381_v33  ;;  %v12403_v63 = vld [vmem:[#allocation2 + $0xa8] sm:$0xff]  ;;  %v3691_v10 = vadd.f32 %v9921_v42, %v12079_v23  ;;  %v3598_v38 = vpop.f32.mrb[27].mxu0  ;;  %vm15954_vm7 = vmmov %vm15943_vm11 }
 0x307   : > { %v9923_v41 = vadd.f32 %v9498_v56, %v12055_v57  ;;  %v12410_v59 = vpack.c.bf16 %v12370_v25, %v12403_v63  ;;  %v3689_v28 = vadd.f32 %v9922_v4, %v12079_v23  ;;  %v9924_v60 = vadd.f32 %v3598_v38, %v12057_v9  ;;  %vm15956_vm5 = vmmov %vm15954_vm7 }
 0x308   : > { %15946 = vst [vmem:[#allocation30_spill] sm:$0xff] %v12401_v47  ;;  %9524 = vmatmul.mubr.msk.bf16.gmra.mrb[32].mxu1 %vm15348_vm1, %v12401_v47  ;;  %v3723_v56 = vmax.f32 %v3691_v10, 0.0  ;;  %v15948_v4 = vrot.slane %v12207_v2, 7  ;;  %v15949_v38 = vrot.slane %v12149_v8, 1  ;;  %v15950_v42 = vrot.slane %v12162_v49, 1 }
 0x309   : > { %15947 = vst [vmem:[#allocation32_spill] sm:$0xff] %v12410_v59  ;;  %v3692_v21 = vadd.f32 %v9923_v41, %v12079_v23  ;;  %9527 = vmatprep.mubr.msk.bf16.mxu1 %vm15348_vm1, %v12410_v59  ;;  %v3721_v32 = vmax.f32 %v3689_v28, 0.0  ;;  %v3690_v11 = vadd.f32 %v9924_v60, %v12079_v23  ;;  %vm15951_vm15 = vcmask 1046528  }
 0x30a   : > { %v12427_v9 = vsel %vm15943_vm11, %v15948_v4, %v3868_v14  ;;  %v12434_v57 = vsel %vm15951_vm15, %v15950_v42, %v15949_v38  ;;  %3762 = vst.msk [vmem:[#allocation2 + $0xe8] sm:$0xff] %vm15348_vm1, %v3723_v56  ;;  %v12438_v41 = vsel %vm15953_vm12, %v3868_v14, %v3870_v26  ;;  %v12441_v60 = vsel %vm15954_vm7, %v3870_v26, %v3872_v52  ;;  %vm15960_vm12 = vmmov %vm15951_vm15  ;;  %v12463_v30 = vld [vmem:[#allocation2 + $0xb8] sm:$0xff] }
 0x30b   : > { %15952 = vst [vmem:[#allocation34_spill] sm:$0xff] %v12434_v57  ;;  %v3724_v10 = vmax.f32 %v3692_v21, 0.0  ;;  %15955 = vst [vmem:[#allocation35_spill] sm:$0xff] %v12441_v60  ;;  %v12444_v28 = vsel %vm15956_vm5, %v3872_v52, %v3874_v39  ;;  %v3722_v4 = vmax.f32 %v3690_v11, 0.0  ;;  %v3876_v49 = vrot.slane %v12381_v33, 7  ;;  %v9501_v38 = vpop.f32.mrb[28].mxu0 }
 0x30c   : > { %15957 = vst [vmem:[#allocation38_spill] sm:$0xff] %v12444_v28  ;;  %3760 = vst.msk [vmem:[#allocation2 + $0xd8] sm:$0xff] %vm15348_vm1, %v3721_v32  ;;  %v3882_v42 = vrot.slane %v12370_v25, 7  ;;  %v12449_v59 = vld [vmem:[#allocation2 + $0xd0] sm:$0xff]  ;;  %v15958_v21 = vrot.slane %v12216_v17, 1  ;;  %v15959_v14 = vrot.slane %v12149_v8, 1  ;;  %v9925_v56 = vadd.f32 %v9501_v38, %v12059_v22 }
 0x30d   : > { %3763 = vst.msk [vmem:[#allocation2 + $0xf0] sm:$0xff] %vm15348_vm1, %v3724_v10  ;;  %v3880_v32 = vrot.slane %v12403_v63, 7  ;;  %v3611_v47 = vpop.f32.mrb[29].mxu0  ;;  %v12465_v40 = vld [vmem:[#allocation2 + $0xc0] sm:$0xff]  ;;  %3761 = vst.msk [vmem:[#allocation2 + $0xe0] sm:$0xff] %vm15348_vm1, %v3722_v4  ;;  %v3878_v8 = vrot.slane %v12383_v20, 7  ;;  %vm15965_vm11 = vnez %v15846_v19 }
 0x30e   : > { %v12456_v26 = vsel %vm15960_vm12, %v15959_v14, %v15958_v21  ;;  %v9926_v10 = vadd.f32 %v3611_v47, %v12061_v35  ;;  %v9502_v14 = vpop.f32.mrb[30].mxu0  ;;  %v12473_v52 = vpack.c.bf16 %v12465_v40, %v12463_v30  ;;  %v12475_v11 = vld [vmem:[#allocation2 + $0xc8] sm:$0xff]  ;;  %v3695_v38 = vadd.f32 %v9925_v56, %v12079_v23  ;;  %vm15964_vm7 = vmmov %vm15956_vm5 }
 0x30f   : > { %15961 = vst [vmem:[#allocation41_spill] sm:$0xff] %v12456_v26  ;;  %v9927_v53 = vadd.f32 %v9502_v14, %v12063_v62  ;;  %v3614_v4 = vpop.f32.mrb[31].mxu0  ;;  %v12482_v28 = vpack.c.bf16 %v12449_v59, %v12475_v11  ;;  %v12489_v21 = vsel %vm15964_vm7, %v3874_v39, %v3876_v49  ;;  %v12492_v22 = vsel %vm15956_vm5, %v3880_v32, %v3882_v42  ;;  %vm15966_vm15 = vmmov %vm15956_vm5 }
 0x310   : > { %15962 = vst [vmem:[#allocation44_spill] sm:$0xff] %v12473_v52  ;;  %v3693_v35 = vadd.f32 %v9926_v10, %v12079_v23  ;;  %v9928_v47 = vadd.f32 %v3614_v4, %v12065_v1  ;;  %9528 = vmatmul.mubr.msk.bf16.gmra.mrb[36].mxu1 %vm15348_vm1, %v12473_v52  ;;  %v3727_v56 = vmax.f32 %v3695_v38, 0.0  ;;  %v3884_v14 = vrot.slane %v12463_v30, 7  ;;  %vm15967_vm12 = vmmov %vm15956_vm5 }
 0x311   : > { %15963 = vst [vmem:[#allocation47_spill] sm:$0xff] %v12482_v28  ;;  %v3696_v62 = vadd.f32 %v9927_v53, %v12079_v23  ;;  %9531 = vmatprep.mubr.msk.bf16.mxu1 %vm15348_vm1, %v12482_v28  ;;  %v3886_v4 = vrot.slane %v12465_v40, 7  ;;  %v4558_v39 = vsel %vm15965_vm11, %v12456_v26, 0.0  ;;  %v3888_v53 = vrot.slane %v12475_v11, 7  ;;  %v12515_v28 = vld [vmem:[#allocation2 + $0xe8] sm:$0xff]  ;;  %vm15970_vm7 = vmmov %vm15956_vm5 }
 0x312   : > { %v3725_v1 = vmax.f32 %v3693_v35, 0.0  ;;  %v3694_v10 = vadd.f32 %v9928_v47, %v12079_v23  ;;  %3766 = vst.msk [vmem:[#allocation2 + $0x108] sm:$0xff] %vm15348_vm1, %v3727_v56  ;;  %v12507_v52 = vsel %vm15966_vm15, %v3876_v49, %v3878_v8  ;;  %v12510_v60 = vsel %vm15967_vm12, %v3878_v8, %v3880_v32  ;;  %vm15976_vm15 = vmmov %vm15970_vm7 }
 0x313   : > { %v3728_v38 = vmax.f32 %v3696_v62, 0.0  ;;  %15968 = vst [vmem:[#allocation73_spill] sm:$0xff] %v12510_v60  ;;  %v4495_v35 = vrot.slane %v12463_v30, 1  ;;  %v12520_v56 = vpack.c.bf16 %v4558_v39, %v12434_v57  ;;  %v4497_v49 = vrot.slane %v12465_v40, 1  ;;  %v12525_v8 = vld [vmem:[#allocation2 + $0xd8] sm:$0xff]  ;;  %vm15977_vm12 = vmmov %vm15970_vm7 }
 0x314   : > { %3764 = vst.msk [vmem:[#allocation2 + $0xf8] sm:$0xff] %vm15348_vm1, %v3725_v1  ;;  %v3726_v23 = vmax.f32 %v3694_v10, 0.0  ;;  %v12517_v19 = vld [vmem:[#allocation2 + $0xf0] sm:$0xff]  ;;  %v4501_v32 = vrot.slane %v12449_v59, 1  ;;  %v12527_v62 = vld [vmem:[#allocation2 + $0xe0] sm:$0xff]  ;;  %v12530_v30 = vsel %vm15970_vm7, %v3882_v42, %v3884_v14  ;;  %v15972_v1 = vrot.slane %v12218_v37, 1 }
 0x315   : > { %15969 = vst [vmem:[#allocation76_spill] sm:$0xff] %v12520_v56  ;;  %3767 = vst.msk [vmem:[#allocation2 + $0x110] sm:$0xff] %vm15348_vm1, %v3728_v38  ;;  %v15973_v10 = vrot.slane %v12216_v17, 1  ;;  %vm15974_vm5 = vcmask 1046528   ;;  %v12542_v40 = vpack.c.bf16 %v12527_v62, %v12525_v8  ;;  %v12545_v38 = vsel %vm15976_vm15, %v3884_v14, %v3886_v4 }
 0x316   : > { %15971 = vst [vmem:[#allocation81_spill] sm:$0xff] %v12530_v30  ;;  %3765 = vst.msk [vmem:[#allocation2 + $0x100] sm:$0xff] %vm15348_vm1, %v3726_v23  ;;  %v12548_v47 = vsel %vm15977_vm12, %v3886_v4, %v3888_v53  ;;  %v15978_v42 = vrot.slane %v12449_v59, 7  ;;  %v12558_v23 = vpack.c.bf16 %v12517_v19, %v12515_v28  ;;  %v15981_v57 = vmov %v15972_v1 }
 0x317   : > { %v12537_v39 = vsel %vm15974_vm5, %v15973_v10, %v15972_v1  ;;  %15975 = vst [vmem:[#allocation82_spill] sm:$0xff] %v12542_v40  ;;  %v15980_v10 = vrot.slane %v12232_v16, 1  ;;  %v15983_v4 = vrot.slane %v12207_v2, 1  ;;  %vm15985_vm15 = vmmov %vm15974_vm5  ;;  %v4507_v1 = vrot.slane %v12515_v28, 1 }
 0x318   : > { %v12553_v56 = vsel %vm15970_vm7, %v3888_v53, %v15978_v42  ;;  %15979 = vst [vmem:[#allocation85_spill] sm:$0xff] %v12558_v23  ;;  %v3892_v42 = vrot.slane %v12525_v8, 7  ;;  %9532 = vmatmul.mubr.msk.bf16.gmra.mrb[40].mxu1 %vm15348_vm1, %v12542_v40  ;;  %vm15987_vm12 = vnez %v15851_v58  ;;  %vm15990_vm7 = vmmov %vm15974_vm5 }
 0x319   : > { %v12565_v14 = vsel %vm15974_vm5, %v15981_v57, %v15980_v10  ;;  %v15984_v26 = vmov %v15980_v10  ;;  %v15988_v57 = vrot.slane %v12288_v36, 1  ;;  %v15989_v10 = vmov %v15983_v4  ;;  %9535 = vmatprep.mubr.msk.bf16.mxu1 %vm15348_vm1, %v12558_v23  ;;  %vm16001_vm1 = vmmov %vm15990_vm7 }
 0x31a   : > { %15982 = vst [vmem:[#allocation86_spill] sm:$0xff] %v12565_v14  ;;  %v12572_v53 = vsel %vm15985_vm15, %v15984_v26, %v15983_v4  ;;  %v4560_v17 = vsel %vm15987_vm12, %v12565_v14, 0.0  ;;  %v4503_v26 = vrot.slane %v12525_v8, 1  ;;  %vm15992_vm5 = vnez %v15853_v31  ;;  %vm15996_vm15 = vmmov %vm15990_vm7 }
 0x31b   : > { %15986 = vst [vmem:[#allocation88_spill] sm:$0xff] %v12572_v53  ;;  %v12586_v16 = vsel %vm15990_vm7, %v15989_v10, %v15988_v57  ;;  %v12593_v40 = vpack.c.bf16 %v4560_v17, %v12537_v39  ;;  %v4509_v14 = vrot.slane %v12517_v19, 1  ;;  %v15994_v57 = vrot.slane %v12290_v5, 1 }
 0x31c   : > { %v4562_v58 = vsel %vm15992_vm5, %v12586_v16, 0.0  ;;  %v15995_v8 = vrot.slane %v12288_v36, 1  ;;  %v15997_v4 = vrot.slane %v12304_v54, 1  ;;  %v3894_v31 = vrot.slane %v12527_v62, 7 }
 0x31d   : > { %15991 = vst [vmem:[#allocation55_spill] sm:$0xff] %v12593_v40  ;;  %v12600_v2 = vpack.c.bf16 %v4562_v58, %v12572_v53  ;;  %v15998_v17 = vmov %v15994_v57  ;;  %v3799_v40 = vld [vmem:[#allocation2 + $0xf8] sm:$0xff]  ;;  %v4505_v54 = vrot.slane %v12527_v62, 1  ;;  %v16014_v62 = vrot.slane %v12370_v25, 1 }
 0x31e   : > { %v12607_v10 = vsel %vm15996_vm15, %v15995_v8, %v15994_v57  ;;  %v12614_v23 = vsel %vm15990_vm7, %v15998_v17, %v15997_v4  ;;  %v16000_v53 = vmov %v15997_v4  ;;  %v16002_v57 = vrot.slane %v12381_v33, 1  ;;  %vm16004_vm15 = vmmov %vm16001_vm1 }
 0x31f   : > { %15993 = vst [vmem:[#allocation56_spill] sm:$0xff] %v12600_v2  ;;  %v4564_v58 = vsel %vm15860_vm9, %v12614_v23, 0.0  ;;  %v15999_v2 = vrot.slane %v12281_v50, 1  ;;  %v16005_v4 = vrot.slane %v12383_v20, 1  ;;  %vm16007_vm7 = vmmov %vm16001_vm1  ;;  %v16011_v33 = vrot.slane %v12403_v63, 1 }
 0x320   : > { %v16006_v17 = vmov %v16002_v57  ;;  %vm16017_vm3 = vmmov %vm16007_vm7  ;;  %v16019_v20 = vrot.slane %v12449_v59, 7  ;;  %v16023_v63 = vrot.slane %v12515_v28, 7  ;;  %v4511_v25 = vrot.slane %v3799_v40, 1 }
 0x321   : > { %v12624_v36 = vsel %vm16001_vm1, %v16000_v53, %v15999_v2  ;;  %v16003_v8 = vmov %v15999_v2  ;;  %v12638_v29 = vsel %vm16007_vm7, %v16006_v17, %v16005_v4  ;;  %v12643_v53 = vpack.c.bf16 %v4564_v58, %v12607_v10  ;;  %v12648_v2 = vld [vmem:[#allocation2 + $0x100] sm:$0xff] }
 0x322   : > { %v12631_v5 = vsel %vm16004_vm15, %v16003_v8, %v16002_v57  ;;  %vm16009_vm1 = vnez %v15861_v13  ;;  %v16012_v8 = vmov %v16005_v4  ;;  %vm16013_vm15 = vmmov %vm16007_vm7  ;;  %v16015_v58 = vmov %v16011_v33 }
 0x323   : > { %16008 = vst [vmem:[#allocation59_spill] sm:$0xff] %v12643_v53  ;;  %v4566_v50 = vsel %vm16009_vm1, %v12631_v5, 0.0  ;;  %v12658_v4 = vsel %vm16013_vm15, %v16012_v8, %v16011_v33  ;;  %v12665_v17 = vsel %vm16007_vm7, %v16015_v58, %v16014_v62  ;;  %v16016_v53 = vmov %v16014_v62 }
 0x324   : > { %v12651_v57 = vpack.c.bf16 %v4566_v50, %v12624_v36  ;;  %v12670_v13 = vsel %vm16017_vm3, %v16016_v53, %v4495_v35  ;;  %v3900_v50 = vrot.slane %v3799_v40, 7  ;;  %vm16020_vm15 = vcmask 1040384  }
 0x325   : > { %v12678_v33 = vsel %vm16020_vm15, %v16019_v20, %v3892_v42  ;;  %v16022_v8 = vrot.slane %v12517_v19, 7  ;;  %vm16024_vm7 = vmmov %vm16020_vm15  ;;  %v4568_v53 = vsel %vm15744_vm2, %v12658_v4, 0.0  ;;  %v4570_v58 = vsel %vm15869_vm4, %v12670_v13, 0.0 }
 0x326   : > { %16010 = vst [vmem:[#allocation61_spill] sm:$0xff] %v12651_v57  ;;  %v12673_v57 = vpack.c.bf16 %v12648_v2, %v3799_v40  ;;  %16021 = vst [vmem:[#allocation67_spill] sm:$0xff] %v12678_v33  ;;  %v12694_v59 = vsel %vm16017_vm3, %v4495_v35, %v4497_v49  ;;  %vm16026_vm15 = vcmask 261120   ;;  %v4513_v20 = vrot.slane %v12648_v2, 1 }
 0x327   : > { %v12685_v62 = vsel %vm16024_vm7, %v16023_v63, %v16022_v8  ;;  %v12700_v8 = vpack.c.bf16 %v4568_v53, %v12638_v29  ;;  %v12703_v40 = vpack.c.bf16 %v4570_v58, %v12665_v17  ;;  %v16029_v63 = vrot.slane %v12475_v11, 1  ;;  %vm16030_vm7 = vmmov %vm16017_vm3 }
 0x328   : > { %16018 = vst [vmem:[#allocation64_spill] sm:$0xff] %v12673_v57  ;;  %16025 = vst [vmem:[#allocation70_spill] sm:$0xff] %v12685_v62  ;;  %9536 = vmatmul.mubr.msk.bf16.gmra.mrb[44].mxu1 %vm16026_vm15, %v12673_v57 }
 0x329   : > { %16027 = vst [vmem:[#allocation74_spill] sm:$0xff] %v12700_v8  ;;  %16028 = vst [vmem:[#allocation78_spill] sm:$0xff] %v12703_v40  ;;  %v12708_v55 = vsel %vm16030_vm7, %v4497_v49, %v16029_v63  ;;  %v16033_v53 = vmov %v16029_v63  ;;  %v12724_v40 = vld [vmem:[#allocation2 + $0x108] sm:$0xff] }
 0x32a   : > { %vm16031_vm3 = vmmov %vm16026_vm15  ;;  %vm16032_vm15 = vnez %v15751_v0 }
 0x32b   : > { %9543 = vmatprep.mubr.msk.bf16.mxu1 %vm16031_vm3, %v12074_v18  ;;  %v4572_v35 = vsel %vm16032_vm15, %v12708_v55, 0.0  ;;  %vm16034_vm8 = vmmov %vm16030_vm7 }
 0x32c   : > { %v12719_v57 = vsel %vm16034_vm8, %v16033_v53, %v4501_v32  ;;  %vm16035_vm4 = vmmov %vm16030_vm7  ;;  %v12727_v49 = vpack.c.bf16 %v4572_v35, %v12694_v59  ;;  %vm16037_vm7 = vnez %v15752_v12  ;;  %vm16041_vm8 = vnez %v15616_v44 }
 0x32d   : > { %v12722_v58 = vsel %vm16035_vm4, %v4501_v32, %v4503_v26  ;;  %vm16038_vm3 = vmmov %vm16035_vm4 }
 0x32e   : > { %16036 = vst [vmem:[#allocation89_spill] sm:$0xff] %v12727_v49  ;;  %v4574_v18 = vsel %vm16037_vm7, %v12722_v58, 0.0  ;;  %v12733_v63 = vsel %vm16038_vm3, %v4503_v26, %v4505_v54  ;;  %vm16039_vm15 = vmmov %vm16038_vm3  ;;  %vm16047_vm7 = vcmask 1040384  }
 0x32f   : > { %v12736_v11 = vsel %vm16039_vm15, %v4505_v54, %v4507_v1  ;;  %v12739_v53 = vpack.c.bf16 %v4574_v18, %v12719_v57  ;;  %vm16042_vm4 = vmmov %vm16038_vm3  ;;  %vm16045_vm15 = vnez %v15873_v51  ;;  %v16049_v18 = vrot.slane %v12515_v28, 7  ;;  %v16060_v28 = vld [vmem:[#allocation87_spill] sm:$0xff] }
 0x330   : > { %v4576_v32 = vsel %vm16041_vm8, %v12736_v11, 0.0  ;;  %v12745_v35 = vsel %vm16042_vm4, %v4507_v1, %v4509_v14  ;;  %vm16043_vm2 = vmmov %vm16038_vm3  ;;  %v16151_v51 = vld [vmem:[#allocation19_spill] sm:$0xff] }
 0x331   : > { %16040 = vst [vmem:[#allocation21_spill] sm:$0xff] %v12739_v53  ;;  %v12748_v46 = vsel %vm16043_vm2, %v4509_v14, %v4511_v25  ;;  %v12751_v49 = vpack.c.bf16 %v4576_v32, %v12733_v63  ;;  %vm16046_vm3 = vmmov %vm16043_vm2  ;;  %v12761_v53 = vsel %vm16047_vm7, %v3892_v42, %v3894_v31  ;;  %v4862_v14 = vsel %vm15885_vm13, %v12212_v3, 0.0 }
 0x332   : > { %v4578_v26 = vsel %vm16045_vm15, %v12748_v46, 0.0  ;;  %v12757_v54 = vsel %vm16046_vm3, %v4511_v25, %v4513_v20  ;;  %v4866_v32 = vsel %vm15762_vm14, %v12168_v45, 0.0  ;;  %v10488_v25 = vld [vmem:[%s15053_s3 + $0x28] sm:$0xff]   ;;  %vm16050_vm2 = vmmov %vm16047_vm7  ;;  %v12786_v3 = vpack.c.bf16 %v12260_v15, %v4862_v14 }
 0x333   : > { %16044 = vst [vmem:[#allocation90_spill] sm:$0xff] %v12751_v49  ;;  %v12764_v1 = vpack.c.bf16 %v4578_v26, %v12745_v35  ;;  %v12778_v42 = vsel %vm16050_vm2, %v3894_v31, %v16049_v18  ;;  %v16052_v26 = vrot.slane %v12724_v40, 1  ;;  %vm16053_vm7 = vmmov %vm16046_vm3  ;;  %v12789_v34 = vpack.c.bf16 %v12185_v27, %v4866_v32  ;;  %v16061_v18 = vld [vmem:[#allocation22_spill] sm:$0xff] }
 0x334   : > { %16051 = vst [vmem:[#allocation92_spill] sm:$0xff] %v12778_v42  ;;  %16055 = vst [vmem:[#allocation94_spill] sm:$0xff] %v12786_v3  ;;  %v16057_v45 = vrot.slane %v12517_v19, 7  ;;  %vm16062_vm3 = vnez %v16061_v18  ;;  %v16064_v19 = vrot.slane %v12648_v2, 7 }
 0x335   : > { %16048 = vst [vmem:[#allocation91_spill] sm:$0xff] %v12764_v1  ;;  %v12783_v1 = vsel %vm16053_vm7, %v4513_v20, %v16052_v26  ;;  %16056 = vst [vmem:[#allocation95_spill] sm:$0xff] %v12789_v34  ;;  %v4872_v20 = vsel %vm15940_vm6, %v12388_v7, 0.0  ;;  %v4874_v15 = vsel %vm16062_vm3, %v12427_v9, 0.0  ;;  %v16073_v34 = vld [vmem:[#allocation25_spill] sm:$0xff] }
 0x336   : > { %16054 = vst [vmem:[#allocation93_spill] sm:$0xff] %v12783_v1  ;;  %vm16058_vm4 = vmmov %vm16050_vm2  ;;  %v4580_v31 = vsel %vm15880_vm0, %v12783_v1, 0.0  ;;  %vm16063_vm2 = vcmask 261120   ;;  %v12816_v32 = vpack.c.bf16 %v12393_v61, %v4872_v20  ;;  %v12819_v26 = vpack.c.bf16 %v12438_v41, %v4874_v15  ;;  %v16079_v15 = vld [vmem:[#allocation33_spill] sm:$0xff] }
 0x337   : > { %v12794_v43 = vsel %vm16058_vm4, %v16057_v45, %v3900_v50  ;;  %9544 = vmatmul.mubr.msk.bf16.vlgmr.msra.gmra.mrb[16].mxu1 %vm16063_vm2, %v12284_v24  ;;  %vm16065_vm7 = vmmov %vm16058_vm4  ;;  %v12813_v14 = vpack.c.bf16 %v4580_v31, %v12757_v54  ;;  %v16070_v45 = vld [vmem:[#allocation46_spill] sm:$0xff]  ;;  %v16072_v24 = vld [vmem:[#allocation35_spill] sm:$0xff]  ;;  %vm16080_vm13 = vnez %v16079_v15 }
 0x338   : > { %16059 = vst [vmem:[#allocation96_spill] sm:$0xff] %v12794_v43  ;;  %v12810_v27 = vsel %vm16065_vm7, %v3900_v50, %v16064_v19  ;;  %16068 = vst [vmem:[#allocation98_spill] sm:$0xff] %v12816_v32  ;;  %9576 = vmatpush3.bf16.msra.mxu1 %v16070_v45  ;;  %v16075_v50 = vld [vmem:[#allocation27_spill] sm:$0xff]  ;;  %v16082_v45 = vld [vmem:[#allocation38_spill] sm:$0xff] }
 0x339   : > { %16066 = vst [vmem:[#allocation22_spill] sm:$0xff] %v12810_v27  ;;  %16067 = vst [vmem:[#allocation97_spill] sm:$0xff] %v12813_v14  ;;  %vm16076_vm7 = vnez %v16075_v50  ;;  %v16077_v19 = vld [vmem:[#allocation31_spill] sm:$0xff]  ;;  %9577 = vmatprep.subr.bf16.mxu1 %v10488_v25  ;;  %v12853_v15 = vld [vmem:[#allocation2 + $0x110] sm:$0xff] }
 0x33a   : > { %16069 = vst [vmem:[#allocation99_spill] sm:$0xff] %v12819_v26  ;;  %vm16071_vm4 = vmmov %vm16063_vm2  ;;  %vm16074_vm2 = vnez %v16073_v34  ;;  %v4878_v31 = vsel %vm16076_vm7, %v12489_v21, 0.0  ;;  %vm16078_vm14 = vnez %v16077_v19  ;;  %v4882_v26 = vsel %vm16080_vm13, %v12530_v30, 0.0  ;;  %v16088_v19 = vld [vmem:[#allocation37_spill] sm:$0xff] }
 0x33b   : > { %9547 = vmatprep.mubr.msk.bf16.mxu1 %vm16071_vm4, %v12293_v48  ;;  %v4876_v3 = vsel %vm16074_vm2, %v16072_v24, 0.0  ;;  %v4880_v20 = vsel %vm16078_vm14, %v12510_v60, 0.0  ;;  %v12839_v48 = vld [vmem:[%s15053_s3 + $0x30] sm:$0xff]   ;;  %v12845_v14 = vpack.c.bf16 %v12507_v52, %v4878_v31  ;;  %v12851_v8 = vpack.c.bf16 %v12545_v38, %v4882_v26  ;;  %16087 = vst [vmem:[#allocation100_spill] sm:$0xff] %v12853_v15  ;;  %v16090_v60 = vld [vmem:[#allocation39_spill] sm:$0xff] }
 0x33c   : > { %16081 = vst [vmem:[#allocation46_spill] sm:$0xff] %v12839_v48  ;;  %v12842_v32 = vpack.c.bf16 %v16082_v45, %v4876_v3  ;;  %v12848_v49 = vpack.c.bf16 %v12492_v22, %v4880_v20  ;;  %vm16089_vm4 = vnez %v16088_v19  ;;  %vm16091_vm13 = vnez %v16090_v60  ;;  %v16094_v20 = vld [vmem:[#allocation45_spill] sm:$0xff]  ;;  %9578 = vmatpush3.bf16.msra.mxu1 %v10488_v25  ;;  %v16120_v25 = vld [vmem:[#allocation79_spill] sm:$0xff] }
 0x33d   : > { %16084 = vst [vmem:[#allocation25_spill] sm:$0xff] %v12845_v14  ;;  %16086 = vst [vmem:[#allocation38_spill] sm:$0xff] %v12851_v8  ;;  %v4884_v30 = vsel %vm16089_vm4, %v12548_v47, 0.0  ;;  %v4886_v3 = vsel %vm16091_vm13, %v12678_v33, 0.0  ;;  %vm16095_vm0 = vnez %v16094_v20  ;;  %v16100_v19 = vrot.slane %v12218_v37, 7  ;;  %9611 = vmatprep.subr.bf16.mxu1 %v12839_v48  ;;  %v16106_v37 = vld [vmem:[#allocation26_spill] sm:$0xff] }
 0x33e   : > { %16083 = vst [vmem:[#allocation35_spill] sm:$0xff] %v12842_v32  ;;  %16085 = vst [vmem:[#allocation27_spill] sm:$0xff] %v12848_v49  ;;  %v16092_v32 = vld [vmem:[#allocation43_spill] sm:$0xff]  ;;  %v4890_v49 = vsel %vm16095_vm0, %v12794_v43, 0.0  ;;  %v12868_v26 = vpack.c.bf16 %v12553_v56, %v4884_v30  ;;  %v12871_v8 = vpack.c.bf16 %v12761_v53, %v4886_v3  ;;  %v4856_v30 = vrot.slane %v12724_v40, 7 }
 0x33f   : > { %vm16093_vm14 = vnez %v16092_v32  ;;  %v12877_v60 = vpack.c.bf16 %v12810_v27, %v4890_v49  ;;  %v16101_v32 = vld [vmem:[#allocation13_spill] sm:$0xff]  ;;  %v12890_v3 = vpack.c.bf16 %v12853_v15, %v12724_v40  ;;  %v3948_v49 = vsel %vm16062_vm3, %v12388_v7, 0.0  ;;  %v16116_v27 = vld [vmem:[#allocation24_spill] sm:$0xff] }
 0x340   : > { %v4888_v31 = vsel %vm16093_vm14, %v12778_v42, 0.0  ;;  %16096 = vst [vmem:[#allocation101_spill] sm:$0xff] %v12868_v26  ;;  %16097 = vst [vmem:[#allocation102_spill] sm:$0xff] %v12871_v8  ;;  %v16102_v42 = vrot.slane %v16101_v32, 7  ;;  %vm16103_vm14 = vcmask 1040384   ;;  %v16107_v32 = vld [vmem:[#allocation52_spill] sm:$0xff] }
 0x341   : > { %v12874_v14 = vpack.c.bf16 %v12685_v62, %v4888_v31  ;;  %16099 = vst [vmem:[#allocation104_spill] sm:$0xff] %v12877_v60  ;;  %16105 = vst [vmem:[#allocation105_spill] sm:$0xff] %v12890_v3  ;;  %vm16108_vm0 = vnez %v16107_v32  ;;  %v16111_v60 = vld [vmem:[#allocation86_spill] sm:$0xff]  ;;  %v16113_v3 = vrot.slane %v12648_v2, 7  ;;  %v16114_v20 = vrot.slane %v12853_v15, 7  ;;  %v16122_v26 = vld [vmem:[#allocation49_spill] sm:$0xff] }
 0x342   : > { %v12884_v33 = vsel %vm16103_vm14, %v16102_v42, %v16100_v19  ;;  %v5394_v42 = vsel %vm16108_vm0, %v16106_v37, 0.0  ;;  %v16109_v19 = vld [vmem:[#allocation41_spill] sm:$0xff]  ;;  %vm16115_vm13 = vmmov %vm16103_vm14  ;;  %v16118_v37 = vld [vmem:[#allocation34_spill] sm:$0xff] }
 0x343   : > { %16098 = vst [vmem:[#allocation103_spill] sm:$0xff] %v12874_v14  ;;  %16104 = vst [vmem:[#allocation13_spill] sm:$0xff] %v12884_v33  ;;  %v5396_v31 = vsel %vm15845_vm10, %v16109_v19, 0.0  ;;  %v5398_v14 = vsel %vm15965_vm11, %v16111_v60, 0.0  ;;  %v12908_v8 = vsel %vm16103_vm14, %v16113_v3, %v4856_v30  ;;  %v4859_v48 = vsel %vm16115_vm13, %v4856_v30, %v16114_v20 }
 0x344   : > { %v12914_v32 = vpack.c.bf16 %v5394_v42, %v16116_v27  ;;  %v12917_v62 = vpack.c.bf16 %v5396_v31, %v16118_v37  ;;  %vm16121_vm10 = vcmask 261120   ;;  %vm16123_vm11 = vnez %v16122_v26  ;;  %v16127_v42 = vld [vmem:[#allocation12_spill] sm:$0xff] }
 0x345   : > { %9548 = vmatmul.mubr.msk.bf16.gmra.mrb[20].mxu1 %vm16121_vm10, %v16120_v25  ;;  %v4892_v2 = vsel %vm16123_vm11, %v12908_v8, 0.0  ;;  %v12925_v3 = vpack.c.bf16 %v5398_v14, %v12537_v39  ;;  %v5400_v20 = vsel %vm15987_vm12, %v12586_v16, 0.0  ;;  %v5402_v30 = vsel %vm15992_vm5, %v12614_v23, 0.0  ;;  %vm16128_vm13 = vmmov %vm16121_vm10  ;;  %v16130_v25 = vld [vmem:[#allocation88_spill] sm:$0xff] }
 0x346   : > { %16117 = vst [vmem:[#allocation26_spill] sm:$0xff] %v12914_v32  ;;  %16119 = vst [vmem:[#allocation41_spill] sm:$0xff] %v12917_v62  ;;  %9551 = vmatprep.mubr.msk.bf16.mxu1 %vm16128_vm13, %v16127_v42  ;;  %v12935_v31 = vpack.c.bf16 %v4859_v48, %v4892_v2  ;;  %v12938_v62 = vpack.c.bf16 %v5400_v20, %v16130_v25  ;;  %v12941_v32 = vpack.c.bf16 %v5402_v30, %v12607_v10  ;;  %v16136_v2 = vld [vmem:[#allocation69_spill] sm:$0xff]  ;;  %v16138_v20 = vld [vmem:[#allocation71_spill] sm:$0xff] }
 0x347   : > { %16124 = vst [vmem:[#allocation24_spill] sm:$0xff] %v12925_v3  ;;  %v5404_v3 = vsel %vm15860_vm9, %v12631_v5, 0.0  ;;  %v5406_v60 = vsel %vm16009_vm1, %v12658_v4, 0.0  ;;  %vm16137_vm10 = vnez %v16136_v2  ;;  %vm16139_vm14 = vnez %v16138_v20 }
 0x348   : > { %16129 = vst [vmem:[#allocation34_spill] sm:$0xff] %v12935_v31  ;;  %16131 = vst [vmem:[#allocation79_spill] sm:$0xff] %v12938_v62  ;;  %v12947_v26 = vpack.c.bf16 %v5404_v3, %v12624_v36  ;;  %v5408_v42 = vsel %vm16137_vm10, %v12670_v13, 0.0  ;;  %v5410_v30 = vsel %vm16139_vm14, %v12708_v55, 0.0  ;;  %vm16143_vm13 = vnez %v15751_v0 }
 0x349   : > { %16132 = vst [vmem:[#allocation12_spill] sm:$0xff] %v12941_v32  ;;  %v12959_v32 = vpack.c.bf16 %v5406_v60, %v12638_v29  ;;  %v12962_v62 = vpack.c.bf16 %v5408_v42, %v12665_v17  ;;  %v12965_v3 = vpack.c.bf16 %v5410_v30, %v12694_v59  ;;  %vm16145_vm11 = vnez %v15752_v12 }
 0x34a   : > { %16134 = vst [vmem:[#allocation88_spill] sm:$0xff] %v12947_v26  ;;  %v5412_v26 = vsel %vm16143_vm13, %v12722_v58, 0.0  ;;  %v5414_v20 = vsel %vm16145_vm11, %v12736_v11, 0.0  ;;  %v5416_v60 = vsel %vm16041_vm8, %v12748_v46, 0.0  ;;  %v5418_v42 = vsel %vm16045_vm15, %v12783_v1, 0.0 }
 0x34b   : > { %16140 = vst [vmem:[#allocation63_spill] sm:$0xff] %v12959_v32  ;;  %16141 = vst [vmem:[#allocation65_spill] sm:$0xff] %v12962_v62  ;;  %v12971_v31 = vpack.c.bf16 %v5412_v26, %v12719_v57  ;;  %v12983_v30 = vpack.c.bf16 %v5414_v20, %v12733_v63  ;;  %v12989_v26 = vpack.c.bf16 %v5418_v42, %v12757_v54  ;;  %v16149_v62 = vld [vmem:[#allocation23_spill] sm:$0xff]  ;;  %vm16152_vm15 = vnez %v16151_v51  ;;  %v16189_v51 = vld [vmem:[#allocation52_spill] sm:$0xff] }
 0x34c   : > { %16142 = vst [vmem:[#allocation69_spill] sm:$0xff] %v12965_v3  ;;  %v12986_v3 = vpack.c.bf16 %v5416_v60, %v12745_v35  ;;  %v16150_v32 = vsel %vm15940_vm6, %v16149_v62, 0.0  ;;  %v5710_v1 = vsel %vm16152_vm15, %v12388_v7, 0.0  ;;  %v3974_v20 = vpack.c.bf16 %v12393_v61, %v3948_v49 }
 0x34d   : > { %16144 = vst [vmem:[#allocation106_spill] sm:$0xff] %v12971_v31  ;;  %16146 = vst [vmem:[#allocation107_spill] sm:$0xff] %v12983_v30  ;;  %v5383_v31 = vrot.slane %v12853_v15, 1  ;;  %v3973_v44 = vpack.c.bf16 %v12884_v33, %v16150_v32  ;;  %v3950_v60 = vsel %vm16074_vm2, %v12427_v9, 0.0  ;;  %v16153_v42 = vrot.slane %v12724_v40, 1 }
 0x34e   : > { %16147 = vst [vmem:[#allocation108_spill] sm:$0xff] %v12986_v3  ;;  %16148 = vst [vmem:[#allocation109_spill] sm:$0xff] %v12989_v26  ;;  %vm16154_vm8 = vcmask 1046528   ;;  %v16155_v26 = vld [vmem:[#allocation16_spill] sm:$0xff]  ;;  %vm16158_vm13 = vcmask 261120   ;;  %v3952_v7 = vsel %vm16076_vm7, %v16072_v24, 0.0  ;;  %vm16159_vm15 = vnez %v16060_v28 }
 0x34f   : > { %v5384_v15 = vsel %vm16154_vm8, %v16153_v42, %v5383_v31  ;;  %v16156_v3 = vrot.slane %v16155_v26, 1  ;;  %vm16157_vm11 = vmmov %vm16154_vm8  ;;  %9552 = vmatmul.mubr.msk.bf16.gmra.mrb[24].mxu1 %vm16158_vm13, %v3973_v44  ;;  %v13017_v32 = vpack.c.bf16 %v12393_v61, %v5710_v1  ;;  %v5712_v40 = vsel %vm15940_vm6, %v12427_v9, 0.0  ;;  %v16166_v9 = vld [vmem:[#allocation73_spill] sm:$0xff] }
 0x350   : > { %vm16161_vm8 = vmmov %vm16158_vm13  ;;  %v13026_v44 = vpack.c.bf16 %v12438_v41, %v5712_v40  ;;  %v5716_v61 = vsel %vm16074_vm2, %v12489_v21, 0.0  ;;  %v6234_v62 = vsel %vm16108_vm0, %v16109_v19, 0.0 }
 0x351   : > { %v5386_v30 = vsel %vm16157_vm11, %v5383_v31, %v16156_v3  ;;  %16160 = vst [vmem:[#allocation110_spill] sm:$0xff] %v13017_v32  ;;  %9555 = vmatprep.mubr.msk.bf16.mxu1 %vm16161_vm8, %v3974_v20  ;;  %v5714_v31 = vsel %vm16062_vm3, %v16072_v24, 0.0  ;;  %v13038_v6 = vpack.c.bf16 %v12507_v52, %v5716_v61  ;;  %v5718_v3 = vsel %vm16076_vm7, %v16166_v9, 0.0  ;;  %v16167_v20 = vld [vmem:[#allocation81_spill] sm:$0xff]  ;;  %v16174_v61 = vld [vmem:[#allocation67_spill] sm:$0xff]  ;;  %vm16195_vm0 = vmmov %vm16161_vm8 }
 0x352   : > { %v5420_v49 = vsel %vm16159_vm15, %v5386_v30, 0.0  ;;  %16163 = vst [vmem:[#allocation112_spill] sm:$0xff] %v13026_v44  ;;  %v13035_v1 = vpack.c.bf16 %v16082_v45, %v5714_v31  ;;  %v13047_v18 = vpack.c.bf16 %v12492_v22, %v5718_v3  ;;  %v16172_v24 = vld [vmem:[#allocation33_spill] sm:$0xff]  ;;  %v5724_v26 = vsel %vm16089_vm4, %v16174_v61, 0.0  ;;  %v16179_v3 = vld [vmem:[#allocation39_spill] sm:$0xff]  ;;  %v16183_v44 = vld [vmem:[#allocation70_spill] sm:$0xff] }
 0x353   : > { %v13023_v42 = vpack.c.bf16 %v5420_v49, %v5384_v15  ;;  %16165 = vst [vmem:[#allocation114_spill] sm:$0xff] %v13038_v6  ;;  %v16168_v49 = vld [vmem:[#allocation31_spill] sm:$0xff]  ;;  %vm16173_vm11 = vnez %v16172_v24  ;;  %v13062_v6 = vpack.c.bf16 %v12761_v53, %v5724_v26  ;;  %vm16180_vm3 = vnez %v16179_v3 }
 0x354   : > { %16164 = vst [vmem:[#allocation113_spill] sm:$0xff] %v13035_v1  ;;  %vm16169_vm6 = vnez %v16168_v49  ;;  %16170 = vst [vmem:[#allocation73_spill] sm:$0xff] %v13047_v18  ;;  %v5722_v31 = vsel %vm16173_vm11, %v12548_v47, 0.0  ;;  %v16178_v1 = vld [vmem:[#allocation92_spill] sm:$0xff]  ;;  %v3975_v26 = vpack.c.bf16 %v12438_v41, %v3950_v60  ;;  %v16223_v24 = vld [vmem:[#allocation11_spill] sm:$0xff] }
 0x355   : > { %16162 = vst [vmem:[#allocation111_spill] sm:$0xff] %v13023_v42  ;;  %v5720_v40 = vsel %vm16169_vm6, %v16167_v20, 0.0  ;;  %v13059_v50 = vpack.c.bf16 %v12553_v56, %v5722_v31  ;;  %16177 = vst [vmem:[#allocation33_spill] sm:$0xff] %v13062_v6  ;;  %v5726_v18 = vsel %vm16180_vm3, %v16178_v1, 0.0  ;;  %v16185_v42 = vld [vmem:[#allocation22_spill] sm:$0xff]  ;;  %v16187_v31 = vld [vmem:[#allocation45_spill] sm:$0xff] }
 0x356   : > { %v13050_v34 = vpack.c.bf16 %v12545_v38, %v5720_v40  ;;  %v16181_v40 = vld [vmem:[#allocation43_spill] sm:$0xff]  ;;  %v13071_v32 = vpack.c.bf16 %v16183_v44, %v5726_v18  ;;  %vm16188_vm7 = vnez %v16187_v31  ;;  %v13087_v18 = vpack.c.bf16 %v6234_v62, %v16118_v37  ;;  %v16228_v31 = vld [vmem:[#allocation28_spill] sm:$0xff]  ;;  %v16242_v37 = vld [vmem:[#allocation78_spill] sm:$0xff] }
 0x357   : > { %16176 = vst [vmem:[#allocation31_spill] sm:$0xff] %v13059_v50  ;;  %vm16182_vm2 = vnez %v16181_v40  ;;  %v5730_v50 = vsel %vm16188_vm7, %v12908_v8, 0.0  ;;  %9556 = vmatmul.mubr.msk.bf16.gmra.mrb[28].mxu1 %vm16161_vm8, %v3975_v26  ;;  %v3954_v41 = vsel %vm16169_vm6, %v12489_v21, 0.0  ;;  %v3956_v62 = vsel %vm16173_vm11, %v16166_v9, 0.0  ;;  %v16216_v9 = vld [vmem:[#allocation8_spill] sm:$0xff]  ;;  %v16226_v40 = vld [vmem:[#allocation46_spill] sm:$0xff] }
 0x358   : > { %16171 = vst [vmem:[#allocation81_spill] sm:$0xff] %v13050_v34  ;;  %v5728_v34 = vsel %vm16182_vm2, %v12794_v43, 0.0  ;;  %16184 = vst [vmem:[#allocation67_spill] sm:$0xff] %v13071_v32  ;;  %v13080_v6 = vpack.c.bf16 %v4859_v48, %v5730_v50  ;;  %v3976_v43 = vpack.c.bf16 %v16082_v45, %v3952_v7  ;;  %v16190_v32 = vld [vmem:[#allocation86_spill] sm:$0xff]  ;;  %v6240_v21 = vsel %vm15987_vm12, %v12614_v23, 0.0  ;;  %v10490_v50 = vld [vmem:[%s15053_s3 + $0x38] sm:$0xff]  }
 0x359   : > { %v13074_v33 = vpack.c.bf16 %v16185_v42, %v5728_v34  ;;  %v16191_v34 = vld [vmem:[#allocation53_spill] sm:$0xff]  ;;  %v16193_v48 = vld [vmem:[#allocation54_spill] sm:$0xff]  ;;  %v13116_v60 = vpack.c.bf16 %v6240_v21, %v12607_v10  ;;  %v6248_v10 = vsel %vm16137_vm10, %v12708_v55, 0.0  ;;  %v3964_v28 = vsel %vm16188_vm7, %v16178_v1, 0.0  ;;  %v16230_v26 = vld [vmem:[#allocation76_spill] sm:$0xff] }
 0x35a   : > { %vm16192_vm13 = vnez %v16191_v34  ;;  %vm16194_vm15 = vnez %v16193_v48  ;;  %9559 = vmatprep.mubr.msk.bf16.mxu1 %vm16195_vm0, %v3976_v43  ;;  %vm16199_vm0 = vnez %v15751_v0  ;;  %v3977_v0 = vpack.c.bf16 %v12507_v52, %v3954_v41  ;;  %v16218_v1 = vld [vmem:[#allocation42_spill] sm:$0xff]  ;;  %v16232_v34 = vld [vmem:[#allocation55_spill] sm:$0xff]  ;;  %v16234_v41 = vld [vmem:[#allocation56_spill] sm:$0xff] }
 0x35b   : > { %16186 = vst [vmem:[#allocation37_spill] sm:$0xff] %v13074_v33  ;;  %v6236_v33 = vsel %vm16192_vm13, %v16190_v32, 0.0  ;;  %v6238_v45 = vsel %vm16194_vm15, %v12586_v16, 0.0  ;;  %v6244_v16 = vsel %vm15860_vm9, %v12658_v4, 0.0  ;;  %v13140_v4 = vpack.c.bf16 %v6248_v10, %v12694_v59  ;;  %v16202_v59 = vld [vmem:[#allocation83_spill] sm:$0xff]  ;;  %v16244_v21 = vld [vmem:[#allocation89_spill] sm:$0xff] }
 0x35c   : > { %v13097_v8 = vpack.c.bf16 %v6236_v33, %v12537_v39  ;;  %v13107_v19 = vpack.c.bf16 %v6238_v45, %v16130_v25  ;;  %v6242_v33 = vsel %vm15992_vm5, %v12631_v5, 0.0  ;;  %v6246_v25 = vsel %vm16009_vm1, %v12670_v13, 0.0  ;;  %vm16206_vm1 = vmmov %vm16161_vm8  ;;  %v16236_v48 = vld [vmem:[#allocation59_spill] sm:$0xff]  ;;  %v16238_v45 = vld [vmem:[#allocation61_spill] sm:$0xff] }
 0x35d   : > { %v13119_v43 = vpack.c.bf16 %v6242_v33, %v12624_v36  ;;  %v13128_v23 = vpack.c.bf16 %v6244_v16, %v12638_v29  ;;  %v13131_v7 = vpack.c.bf16 %v6246_v25, %v12665_v17  ;;  %v6250_v5 = vsel %vm16139_vm14, %v12722_v58, 0.0  ;;  %v16201_v58 = vld [vmem:[#allocation93_spill] sm:$0xff]  ;;  %vm16207_vm15 = vmmov %vm16206_vm1  ;;  %v16248_v33 = vld [vmem:[#allocation90_spill] sm:$0xff] }
 0x35e   : > { %v13143_v27 = vpack.c.bf16 %v6250_v5, %v12719_v57  ;;  %v6252_v29 = vsel %vm16199_vm0, %v12736_v11, 0.0  ;;  %vm16200_vm9 = vnez %v15752_v12  ;;  %vm16203_vm12 = vnez %v16202_v59  ;;  %v16204_v57 = vld [vmem:[#allocation84_spill] sm:$0xff]  ;;  %vm16208_vm10 = vmmov %vm16206_vm1  ;;  %v16246_v39 = vld [vmem:[#allocation21_spill] sm:$0xff] }
 0x35f   : > { %v6254_v13 = vsel %vm16200_vm9, %v12748_v46, 0.0  ;;  %v13152_v55 = vpack.c.bf16 %v6252_v29, %v12733_v63  ;;  %v6256_v14 = vsel %vm16203_vm12, %v16201_v58, 0.0  ;;  %vm16205_vm5 = vnez %v16204_v57  ;;  %9560 = vmatmul.mubr.msk.bf16.gmra.mrb[32].mxu1 %vm16206_vm1, %v3977_v0  ;;  %vm16209_vm14 = vmmov %vm16206_vm1  ;;  %v16250_v16 = vld [vmem:[#allocation91_spill] sm:$0xff]  ;;  %v16252_v25 = vld [vmem:[#allocation97_spill] sm:$0xff] }
 0x360   : > { %v13155_v17 = vpack.c.bf16 %v6254_v13, %v12745_v35  ;;  %v6258_v2 = vsel %vm16205_vm5, %v5386_v30, 0.0  ;;  %v13164_v11 = vpack.c.bf16 %v6256_v14, %v12757_v54  ;;  %v3978_v46 = vpack.c.bf16 %v12492_v22, %v3956_v62  ;;  %vm16211_vm6 = vmmov %vm16206_vm1  ;;  %v16240_v62 = vld [vmem:[#allocation74_spill] sm:$0xff]  ;;  %v16258_v13 = vld [vmem:[#allocation68_spill] sm:$0xff] }
 0x361   : > { %v13166_v12 = vpack.c.bf16 %v6258_v2, %v5384_v15  ;;  %v3958_v63 = vsel %vm16089_vm4, %v16167_v20, 0.0  ;;  %v3960_v35 = vsel %vm16180_vm3, %v12548_v47, 0.0  ;;  %v3962_v22 = vsel %vm16182_vm2, %v16174_v61, 0.0  ;;  %vm16210_vm4 = vmmov %vm16206_vm1  ;;  %v16219_v20 = vld [vmem:[#allocation50_spill] sm:$0xff]  ;;  %v10492_v59 = vld [vmem:[%s15053_s3 + $0x48] sm:$0xff]  }
 0x362   : > { %9563 = vmatprep.mubr.msk.bf16.mxu1 %vm16207_vm15, %v3978_v46  ;;  %v3979_v52 = vpack.c.bf16 %v12545_v38, %v3958_v63  ;;  %v3980_v54 = vpack.c.bf16 %v12553_v56, %v3960_v35  ;;  %v3981_v15 = vpack.c.bf16 %v12761_v53, %v3962_v22  ;;  %v3982_v47 = vpack.c.bf16 %v16183_v44, %v3964_v28  ;;  %v16212_v56 = vld [vmem:[#allocation96_spill] sm:$0xff]  ;;  %v16213_v38 = vld [vmem:[#allocation49_spill] sm:$0xff]  ;;  %vm16215_vm3 = vmmov %vm16206_vm1 }
 0x363   : > { %vm16214_vm11 = vnez %v16213_v38  ;;  %vm16217_vm2 = vmmov %vm16206_vm1  ;;  %vm16220_vm7 = vnez %v16219_v20  ;;  %v16221_v44 = vld [vmem:[#allocation66_spill] sm:$0xff]  ;;  %vm16222_vm13 = vnez %v16189_v51  ;;  %v10491_v51 = vld [vmem:[%s15053_s3 + $0x40] sm:$0xff]  }
 0x364   : > { %v3966_v30 = vsel %vm16214_vm11, %v16212_v56, 0.0  ;;  %v4552_v53 = vsel %vm16220_vm7, %v16218_v1, 0.0  ;;  %v4554_v49 = vsel %vm16222_vm13, %v16221_v44, 0.0  ;;  %vm16225_vm8 = vmmov %vm16206_vm1  ;;  %v16254_v10 = vld [vmem:[#allocation94_spill] sm:$0xff]  ;;  %v16260_v14 = vld [vmem:[#allocation95_spill] sm:$0xff] }
 0x365   : > { %v3983_v32 = vpack.c.bf16 %v16185_v42, %v3966_v30  ;;  %v4582_v61 = vpack.c.bf16 %v4552_v53, %v16223_v24  ;;  %v16224_v42 = vld [vmem:[#allocation14_spill] sm:$0xff]  ;;  %vm16227_vm0 = vmmov %vm16206_vm1  ;;  %v16262_v2 = vld [vmem:[#allocation72_spill] sm:$0xff] }
 0x366   : > { %v4583_v3 = vpack.c.bf16 %v4554_v49, %v16224_v42  ;;  %vm16229_vm9 = vmmov %vm16227_vm0  ;;  %v16255_v36 = vld [vmem:[#allocation62_spill] sm:$0xff]  ;;  %v16265_v63 = vld [vmem:[#allocation23_spill] sm:$0xff] }
 0x367   : > { %9564 = vmatmul.mubr.msk.bf16.gmra.mrb[36].mxu1 %vm16208_vm10, %v3979_v52  ;;  %vm16231_vm12 = vmmov %vm16227_vm0  ;;  %v16256_v5 = vld [vmem:[#allocation10_spill] sm:$0xff]  ;;  %v16266_v35 = vld [vmem:[#allocation19_spill] sm:$0xff] }
 0x368   : > { %9567 = vmatprep.mubr.msk.bf16.mxu1 %vm16209_vm14, %v3980_v54  ;;  %vm16233_vm5 = vmmov %vm16227_vm0  ;;  %v10493_v57 = vld [vmem:[%s15053_s3 + $0x50] sm:$0xff]   ;;  %v16268_v54 = vld [vmem:[#allocation77_spill] sm:$0xff] }
 0x369   : > { %vm16235_vm1 = vmmov %vm16227_vm0  ;;  %v16263_v0 = vld [vmem:[#allocation18_spill] sm:$0xff]  ;;  %v16269_v28 = vld [vmem:[#allocation13_spill] sm:$0xff] }
 0x36a   : > { %vm16237_vm15 = vmmov %vm16227_vm0  ;;  %v16274_v56 = vld [vmem:[#allocation99_spill] sm:$0xff]  ;;  %v16282_v53 = vld [vmem:[#allocation38_spill] sm:$0xff] }
 0x36b   : > { %vm16239_vm10 = vmmov %vm16227_vm0  ;;  %v16276_v30 = vld [vmem:[#allocation35_spill] sm:$0xff]  ;;  %v16284_v49 = vld [vmem:[#allocation101_spill] sm:$0xff] }
 0x36c   : > { %vm16241_vm14 = vmmov %vm16227_vm0  ;;  %v16330_v20 = vld [vmem:[#allocation41_spill] sm:$0xff] }
 0x36d   : > { %vm16251_vm13 = vmmov %vm16227_vm0 }
 0x36f   : > { %9568 = vmatmul.mubr.msk.bf16.gmra.mrb[40].mxu1 %vm16210_vm4, %v3981_v15  ;;  %vm16243_vm4 = vmmov %vm16227_vm0 }
 0x370   : > { %9571 = vmatprep.mubr.msk.bf16.mxu1 %vm16211_vm6, %v3982_v47  ;;  %vm16245_vm6 = vmmov %vm16227_vm0  ;;  %v16272_v47 = vld [vmem:[#allocation98_spill] sm:$0xff] }
 0x377   : > { %9572 = vmatmul.mubr.msk.bf16.gmra.mrb[44].mxu1 %vm16215_vm3, %v3983_v32  ;;  %vm16247_vm3 = vmmov %vm16227_vm0  ;;  %v16278_v32 = vld [vmem:[#allocation25_spill] sm:$0xff] }
 0x378   : > { %9579 = vmatprep.mubr.msk.bf16.mxu1 %vm16217_vm2, %v16216_v9  ;;  %vm16249_vm2 = vmmov %vm16227_vm0  ;;  %v16280_v9 = vld [vmem:[#allocation27_spill] sm:$0xff] }
 0x37f   : > { %9580 = vmatmul.mubr.msk.bf16.vlgmr.msra.gmra.mrb[16].mxu1 %vm16225_vm8, %v4582_v61  ;;  %vm16253_vm8 = vmmov %vm16227_vm0  ;;  %v16285_v61 = vld [vmem:[#allocation102_spill] sm:$0xff] }
 0x380   : > { %9612 = vmatpush3.bf16.msra.mxu1 %v16226_v40  ;;  %9583 = vmatprep.mubr.msk.bf16.mxu1 %vm16227_vm0, %v4583_v3  ;;  %v16289_v3 = vld [vmem:[#allocation104_spill] sm:$0xff]  ;;  %v16291_v40 = vld [vmem:[#allocation34_spill] sm:$0xff] }
 0x381   : > { %9613 = vmatprep.subr.bf16.mxu1 %v10490_v50 }
 0x384   : > { %9614 = vmatpush3.bf16.msra.mxu1 %v10490_v50  ;;  %v16287_v50 = vld [vmem:[#allocation103_spill] sm:$0xff] }
 0x385   : > { %9647 = vmatprep.subr.bf16.mxu1 %v10491_v51 }
 0x387   : > { %9584 = vmatmul.mubr.msk.bf16.gmra.mrb[20].mxu1 %vm16229_vm9, %v16228_v31  ;;  %vm16257_vm9 = vnez %v16256_v5  ;;  %v10494_v31 = vld [vmem:[%s15053_s3 + $0x58] sm:$0xff]   ;;  %v16318_v5 = vld [vmem:[#allocation85_spill] sm:$0xff] }
 0x388   : > { %9587 = vmatprep.mubr.msk.bf16.mxu1 %vm16231_vm12, %v16230_v26  ;;  %v4864_v29 = vsel %vm16257_vm9, %v16255_v36, 0.0  ;;  %vm16259_vm12 = vmmov %vm16227_vm0  ;;  %v16295_v26 = vld [vmem:[#allocation40_spill] sm:$0xff] }
 0x389   : > { %v4895_v58 = vpack.c.bf16 %v16258_v13, %v4864_v29  ;;  %vm16286_vm9 = vmmov %vm16227_vm0  ;;  %v16320_v29 = vld [vmem:[#allocation64_spill] sm:$0xff] }
 0x38f   : > { %9588 = vmatmul.mubr.msk.bf16.gmra.mrb[24].mxu1 %vm16233_vm5, %v16232_v34  ;;  %vm16261_vm5 = vmmov %vm16227_vm0  ;;  %v16297_v34 = vld [vmem:[#allocation48_spill] sm:$0xff] }
 0x390   : > { %9591 = vmatprep.mubr.msk.bf16.mxu1 %vm16235_vm1, %v16234_v41  ;;  %vm16264_vm1 = vnez %v16263_v0  ;;  %v10495_v41 = vld [vmem:[%s15053_s3 + $0x60] sm:$0xff]   ;;  %v16372_v0 = vld [vmem:[#allocation73_spill] sm:$0xff] }
 0x391   : > { %v4868_v46 = vsel %vm16264_vm1, %v16262_v2, 0.0 }
 0x392   : > { %v4897_v22 = vpack.c.bf16 %v16268_v54, %v4868_v46  ;;  %v5392_v46 = vsel %vm16220_vm7, %v16221_v44, 0.0  ;;  %vm16331_vm7 = vmmov %vm16227_vm0 }
 0x397   : > { %9592 = vmatmul.mubr.msk.bf16.gmra.mrb[28].mxu1 %vm16237_vm15, %v16236_v48  ;;  %vm16267_vm15 = vnez %v16266_v35  ;;  %v16299_v48 = vld [vmem:[#allocation7_spill] sm:$0xff]  ;;  %v5422_v35 = vpack.c.bf16 %v5392_v46, %v16224_v42 }
 0x398   : > { %9595 = vmatprep.mubr.msk.bf16.mxu1 %vm16239_vm10, %v16238_v45  ;;  %v4870_v52 = vsel %vm16267_vm15, %v16265_v63, 0.0  ;;  %vm16270_vm10 = vmmov %vm16227_vm0  ;;  %v16301_v45 = vld [vmem:[#allocation51_spill] sm:$0xff] }
 0x399   : > { %v4898_v15 = vpack.c.bf16 %v16269_v28, %v4870_v52  ;;  %vm16292_vm15 = vmmov %vm16227_vm0  ;;  %v10496_v52 = vld [vmem:[%s15053_s3 + $0x68] sm:$0xff]  }
 0x39f   : > { %9596 = vmatmul.mubr.msk.bf16.gmra.mrb[32].mxu1 %vm16241_vm14, %v16240_v62  ;;  %vm16271_vm14 = vmmov %vm16227_vm0  ;;  %v16303_v62 = vld [vmem:[#allocation57_spill] sm:$0xff] }
 0x3a0   : > { %9599 = vmatprep.mubr.msk.bf16.mxu1 %vm16243_vm4, %v16242_v37  ;;  %vm16273_vm4 = vmmov %vm16227_vm0  ;;  %v16305_v37 = vld [vmem:[#allocation75_spill] sm:$0xff] }
 0x3a7   : > { %9600 = vmatmul.mubr.msk.bf16.gmra.mrb[36].mxu1 %vm16245_vm6, %v16244_v21  ;;  %vm16275_vm6 = vmmov %vm16227_vm0  ;;  %v16307_v21 = vld [vmem:[#allocation80_spill] sm:$0xff] }
 0x3a8   : > { %9603 = vmatprep.mubr.msk.bf16.mxu1 %vm16247_vm3, %v16246_v39  ;;  %vm16277_vm3 = vmmov %vm16227_vm0  ;;  %v16309_v39 = vld [vmem:[#allocation30_spill] sm:$0xff] }
 0x3af   : > { %9604 = vmatmul.mubr.msk.bf16.gmra.mrb[40].mxu1 %vm16249_vm2, %v16248_v33  ;;  %vm16279_vm2 = vmmov %vm16227_vm0  ;;  %v16310_v33 = vld [vmem:[#allocation32_spill] sm:$0xff] }
 0x3b0   : > { %9607 = vmatprep.mubr.msk.bf16.mxu1 %vm16251_vm13, %v16250_v16  ;;  %vm16281_vm13 = vmmov %vm16227_vm0  ;;  %v16312_v16 = vld [vmem:[#allocation44_spill] sm:$0xff] }
 0x3b7   : > { %9608 = vmatmul.mubr.msk.bf16.gmra.mrb[44].mxu1 %vm16253_vm8, %v16252_v25  ;;  %vm16283_vm8 = vmmov %vm16227_vm0  ;;  %v16314_v25 = vld [vmem:[#allocation47_spill] sm:$0xff] }
 0x3b8   : > { %9615 = vmatprep.mubr.msk.bf16.mxu1 %vm16227_vm0, %v16254_v10  ;;  %v16316_v10 = vld [vmem:[#allocation82_spill] sm:$0xff] }
 0x3bf   : > { %9616 = vmatmul.mubr.msk.bf16.vlgmr.msra.gmra.mrb[16].mxu1 %vm16259_vm12, %v4895_v58  ;;  %vm16288_vm12 = vmmov %vm16227_vm0  ;;  %v16322_v58 = vld [vmem:[#allocation20_spill] sm:$0xff] }
 0x3c0   : > { %9648 = vmatpush3.bf16.msra.mxu1 %v10491_v51  ;;  %9619 = vmatprep.mubr.msk.bf16.mxu1 %vm16261_vm5, %v16260_v14  ;;  %vm16290_vm5 = vmmov %vm16227_vm0  ;;  %v16293_v51 = vld [vmem:[#allocation36_spill] sm:$0xff] }
 0x3c1   : > { %9649 = vmatprep.subr.bf16.mxu1 %v10492_v59 }
 0x3c4   : > { %9650 = vmatpush3.bf16.msra.mxu1 %v10492_v59 }
 0x3c5   : > { %9683 = vmatprep.subr.bf16.mxu1 %v10493_v57 }
 0x3c7   : > { %9620 = vmatmul.mubr.msk.bf16.gmra.mrb[20].mxu1 %vm16270_vm10, %v4897_v22  ;;  %vm16294_vm10 = vmmov %vm16227_vm0  ;;  %v16332_v22 = vld [vmem:[#allocation24_spill] sm:$0xff] }
 0x3c8   : > { %9623 = vmatprep.mubr.msk.bf16.mxu1 %vm16271_vm14, %v4898_v15  ;;  %vm16296_vm14 = vmmov %vm16227_vm0  ;;  %v16334_v15 = vld [vmem:[#allocation79_spill] sm:$0xff] }
 0x3cf   : > { %9624 = vmatmul.mubr.msk.bf16.gmra.mrb[24].mxu1 %vm16273_vm4, %v16272_v47  ;;  %vm16298_vm4 = vmmov %vm16227_vm0  ;;  %v16335_v47 = vld [vmem:[#allocation12_spill] sm:$0xff] }
 0x3d0   : > { %9627 = vmatprep.mubr.msk.bf16.mxu1 %vm16275_vm6, %v16274_v56  ;;  %vm16300_vm6 = vmmov %vm16227_vm0  ;;  %v16337_v56 = vld [vmem:[#allocation88_spill] sm:$0xff] }
 0x3d7   : > { %9628 = vmatmul.mubr.msk.bf16.gmra.mrb[28].mxu1 %vm16277_vm3, %v16276_v30  ;;  %vm16302_vm3 = vmmov %vm16227_vm0  ;;  %v16339_v30 = vld [vmem:[#allocation63_spill] sm:$0xff] }
 0x3d8   : > { %9631 = vmatprep.mubr.msk.bf16.mxu1 %vm16279_vm2, %v16278_v32  ;;  %vm16304_vm2 = vmmov %vm16227_vm0  ;;  %v16341_v32 = vld [vmem:[#allocation65_spill] sm:$0xff] }
 0x3df   : > { %9632 = vmatmul.mubr.msk.bf16.gmra.mrb[32].mxu1 %vm16281_vm13, %v16280_v9  ;;  %vm16306_vm13 = vmmov %vm16227_vm0  ;;  %v16343_v9 = vld [vmem:[#allocation69_spill] sm:$0xff] }
 0x3e0   : > { %9635 = vmatprep.mubr.msk.bf16.mxu1 %vm16283_vm8, %v16282_v53  ;;  %vm16308_vm8 = vmmov %vm16227_vm0  ;;  %v16345_v53 = vld [vmem:[#allocation106_spill] sm:$0xff] }
 0x3e7   : > { %9636 = vmatmul.mubr.msk.bf16.gmra.mrb[36].mxu1 %vm16227_vm0, %v16284_v49  ;;  %v16347_v49 = vld [vmem:[#allocation107_spill] sm:$0xff] }
 0x3e8   : > { %9639 = vmatprep.mubr.msk.bf16.mxu1 %vm16286_vm9, %v16285_v61  ;;  %vm16311_vm9 = vmmov %vm16227_vm0  ;;  %v16349_v61 = vld [vmem:[#allocation108_spill] sm:$0xff] }
 0x3ef   : > { %9640 = vmatmul.mubr.msk.bf16.gmra.mrb[40].mxu1 %vm16288_vm12, %v16287_v50  ;;  %vm16313_vm12 = vmmov %vm16227_vm0  ;;  %v16351_v50 = vld [vmem:[#allocation109_spill] sm:$0xff] }
 0x3f0   : > { %9643 = vmatprep.mubr.msk.bf16.mxu1 %vm16290_vm5, %v16289_v3  ;;  %vm16315_vm5 = vmmov %vm16227_vm0  ;;  %v16353_v3 = vld [vmem:[#allocation15_spill] sm:$0xff] }
 0x3f7   : > { %9644 = vmatmul.mubr.msk.bf16.gmra.mrb[44].mxu1 %vm16292_vm15, %v16291_v40  ;;  %vm16317_vm15 = vmmov %vm16227_vm0 }
 0x3f8   : > { %9651 = vmatprep.mubr.msk.bf16.mxu1 %vm16294_vm10, %v16293_v51  ;;  %vm16319_vm10 = vmmov %vm16227_vm0 }
 0x3ff   : > { %9652 = vmatmul.mubr.msk.bf16.vlgmr.msra.gmra.mrb[16].mxu1 %vm16296_vm14, %v16295_v26  ;;  %vm16321_vm14 = vmmov %vm16227_vm0 }
 0x400   : > { %9684 = vmatpush3.bf16.msra.mxu1 %v10493_v57  ;;  %9655 = vmatprep.mubr.msk.bf16.mxu1 %vm16298_vm4, %v16297_v34  ;;  %vm16323_vm4 = vnez %v16322_v58  ;;  %v16324_v57 = vld [vmem:[#allocation105_spill] sm:$0xff] }
 0x401   : > { %9685 = vmatprep.subr.bf16.mxu1 %v10494_v31  ;;  %v5390_v59 = vsel %vm16323_vm4, %v16218_v1, 0.0  ;;  %v16328_v1 = vld [vmem:[#allocation26_spill] sm:$0xff]  ;;  %v6230_v38 = vsel %vm16323_vm4, %v16221_v44, 0.0 }
 0x402   : > { %v5421_v14 = vpack.c.bf16 %v5390_v59, %v16223_v24  ;;  %v10497_v24 = vld [vmem:[%s15053_s3 + $0x70] sm:$0xff]  }
 0x404   : > { %9686 = vmatpush3.bf16.msra.mxu1 %v10494_v31  ;;  %v16355_v31 = vld [vmem:[#allocation111_spill] sm:$0xff] }
 0x405   : > { %9719 = vmatprep.subr.bf16.mxu1 %v10495_v41 }
 0x407   : > { %9656 = vmatmul.mubr.msk.bf16.gmra.mrb[20].mxu1 %vm16300_vm6, %v16299_v48  ;;  %vm16325_vm6 = vmmov %vm16227_vm0 }
 0x408   : > { %9659 = vmatprep.mubr.msk.bf16.mxu1 %vm16302_vm3, %v16301_v45  ;;  %vm16326_vm3 = vmmov %vm16227_vm0 }
 0x40f   : > { %9660 = vmatmul.mubr.msk.bf16.gmra.mrb[24].mxu1 %vm16304_vm2, %v16303_v62  ;;  %vm16327_vm2 = vmmov %vm16227_vm0 }
 0x410   : > { %9663 = vmatprep.mubr.msk.bf16.mxu1 %vm16306_vm13, %v16305_v37  ;;  %vm16329_vm13 = vmmov %vm16227_vm0 }
 0x417   : > { %9664 = vmatmul.mubr.msk.bf16.gmra.mrb[28].mxu1 %vm16308_vm8, %v16307_v21  ;;  %vm16333_vm8 = vmmov %vm16227_vm0 }
 0x418   : > { %9667 = vmatprep.mubr.msk.bf16.mxu1 %vm16227_vm0, %v16309_v39 }
 0x41f   : > { %9668 = vmatmul.mubr.msk.bf16.gmra.mrb[32].mxu1 %vm16311_vm9, %v16310_v33  ;;  %vm16336_vm9 = vmmov %vm16227_vm0 }
 0x420   : > { %9671 = vmatprep.mubr.msk.bf16.mxu1 %vm16313_vm12, %v16312_v16  ;;  %vm16338_vm12 = vmmov %vm16227_vm0 }
 0x427   : > { %9672 = vmatmul.mubr.msk.bf16.gmra.mrb[36].mxu1 %vm16315_vm5, %v16314_v25  ;;  %vm16340_vm5 = vmmov %vm16227_vm0 }
 0x428   : > { %9675 = vmatprep.mubr.msk.bf16.mxu1 %vm16317_vm15, %v16316_v10  ;;  %vm16342_vm15 = vmmov %vm16227_vm0 }
 0x42f   : > { %9676 = vmatmul.mubr.msk.bf16.gmra.mrb[40].mxu1 %vm16319_vm10, %v16318_v5  ;;  %vm16344_vm10 = vmmov %vm16227_vm0 }
 0x430   : > { %9679 = vmatprep.mubr.msk.bf16.mxu1 %vm16321_vm14, %v16320_v29  ;;  %vm16346_vm14 = vmmov %vm16227_vm0 }
 0x437   : > { %9680 = vmatmul.mubr.msk.bf16.gmra.mrb[44].mxu1 %vm16325_vm6, %v16324_v57  ;;  %vm16348_vm6 = vmmov %vm16227_vm0 }
 0x438   : > { %9687 = vmatprep.mubr.msk.bf16.mxu1 %vm16326_vm3, %v5421_v14  ;;  %vm16350_vm3 = vmmov %vm16227_vm0  ;;  %v10498_v14 = vld [vmem:[%s15053_s3 + $0x78] sm:$0xff]  }
 0x43f   : > { %9688 = vmatmul.mubr.msk.bf16.vlgmr.msra.gmra.mrb[16].mxu1 %vm16327_vm2, %v5422_v35  ;;  %vm16352_vm2 = vmmov %vm16227_vm0  ;;  %v16360_v35 = vld [vmem:[#allocation9_spill] sm:$0xff] }
 0x440   : > { %9720 = vmatpush3.bf16.msra.mxu1 %v10495_v41  ;;  %9691 = vmatprep.mubr.msk.bf16.mxu1 %vm16329_vm13, %v16328_v1  ;;  %vm16354_vm13 = vnez %v16353_v3  ;;  %v16358_v41 = vld [vmem:[#allocation17_spill] sm:$0xff] }
 0x441   : > { %9721 = vmatprep.subr.bf16.mxu1 %v10496_v52  ;;  %v5702_v40 = vsel %vm16354_vm13, %v16255_v36, 0.0  ;;  %v10499_v36 = vld [vmem:[%s15053_s3 + $0x80] sm:$0xff]   ;;  %v16368_v1 = vld [vmem:[#allocation113_spill] sm:$0xff] }
 0x442   : > { %v5734_v51 = vpack.c.bf16 %v16258_v13, %v5702_v40  ;;  %v5708_v13 = vsel %vm16264_vm1, %v16265_v63, 0.0  ;;  %vm16373_vm1 = vmmov %vm16352_vm2  ;;  %v16374_v63 = vld [vmem:[#allocation81_spill] sm:$0xff] }
 0x443   : > { %vm16379_vm13 = vmmov %vm16373_vm1  ;;  %v10500_v40 = vld [vmem:[%s15053_s3 + $0x88] sm:$0xff]  }
 0x444   : > { %9722 = vmatpush3.bf16.msra.mxu1 %v10496_v52  ;;  %v16366_v52 = vld [vmem:[#allocation112_spill] sm:$0xff] }
 0x445   : > { %9755 = vmatprep.subr.bf16.mxu1 %v10497_v24 }
 0x447   : > { %9692 = vmatmul.mubr.msk.bf16.gmra.mrb[20].mxu1 %vm16331_vm7, %v16330_v20  ;;  %vm16356_vm7 = vmmov %vm16227_vm0  ;;  %v16378_v20 = vld [vmem:[#allocation33_spill] sm:$0xff] }
 0x448   : > { %9695 = vmatprep.mubr.msk.bf16.mxu1 %vm16333_vm8, %v16332_v22  ;;  %vm16357_vm8 = vmmov %vm16227_vm0  ;;  %v16380_v22 = vld [vmem:[#allocation67_spill] sm:$0xff] }
 0x44f   : > { %9696 = vmatmul.mubr.msk.bf16.gmra.mrb[24].mxu1 %vm16227_vm0, %v16334_v15  ;;  %vm16359_vm0 = vnez %v16358_v41  ;;  %v3804_v15 = vld [vmem:[#allocation2 + $0x120] sm:$0xff] }
 0x450   : > { %9699 = vmatprep.mubr.msk.bf16.mxu1 %vm16336_vm9, %v16335_v47  ;;  %v5706_v59 = vsel %vm16359_vm0, %v16262_v2, 0.0  ;;  %vm16361_vm9 = vmmov %vm16352_vm2  ;;  %v5737_v2 = vpack.c.bf16 %v16269_v28, %v5708_v13  ;;  %v16376_v28 = vld [vmem:[#allocation31_spill] sm:$0xff]  ;;  %vm16386_vm0 = vcmask 1040384  }
 0x451   : > { %v5736_v46 = vpack.c.bf16 %v16268_v54, %v5706_v59  ;;  %v16364_v54 = vld [vmem:[#allocation110_spill] sm:$0xff]  ;;  %v10511_v47 = vld [vmem:[#allocation2 + $0x118] sm:$0xff] }
 0x457   : > { %9700 = vmatmul.mubr.msk.bf16.gmra.mrb[28].mxu1 %vm16338_vm12, %v16337_v56  ;;  %vm16362_vm12 = vmmov %vm16352_vm2  ;;  %v5696_v56 = vrot.slane %v10511_v47, 7 }
 0x458   : > { %9703 = vmatprep.mubr.msk.bf16.mxu1 %vm16340_vm5, %v16339_v30  ;;  %vm16363_vm5 = vmmov %vm16352_vm2  ;;  %v5698_v30 = vrot.slane %v3804_v15, 7 }
 0x45f   : > { %9704 = vmatmul.mubr.msk.bf16.gmra.mrb[32].mxu1 %vm16342_vm15, %v16341_v32  ;;  %vm16365_vm15 = vmmov %vm16352_vm2  ;;  %v16382_v32 = vld [vmem:[#allocation37_spill] sm:$0xff] }
 0x460   : > { %9707 = vmatprep.mubr.msk.bf16.mxu1 %vm16344_vm10, %v16343_v9  ;;  %vm16367_vm10 = vmmov %vm16352_vm2  ;;  %v16384_v9 = vld [vmem:[#allocation100_spill] sm:$0xff] }
 0x467   : > { %9708 = vmatmul.mubr.msk.bf16.gmra.mrb[36].mxu1 %vm16346_vm14, %v16345_v53  ;;  %vm16369_vm14 = vmmov %vm16352_vm2  ;;  %v16385_v53 = vrot.slane %v16384_v9, 7 }
 0x468   : > { %9711 = vmatprep.mubr.msk.bf16.mxu1 %vm16348_vm6, %v16347_v49  ;;  %vm16371_vm6 = vmmov %vm16352_vm2 }
 0x469   : > { %v5697_v49 = vsel %vm16386_vm0, %v16385_v53, %v5696_v56 }
 0x46f   : > { %9712 = vmatmul.mubr.msk.bf16.gmra.mrb[40].mxu1 %vm16350_vm3, %v16349_v61  ;;  %vm16375_vm3 = vmmov %vm16373_vm1 }
 0x470   : > { %9715 = vmatprep.mubr.msk.bf16.mxu1 %vm16352_vm2, %v16351_v50  ;;  %vm16377_vm2 = vmmov %vm16373_vm1  ;;  %v5732_v50 = vsel %vm16214_vm11, %v5697_v49, 0.0 }
 0x471   : > { %vm16393_vm11 = vmmov %vm16373_vm1 }
 0x477   : > { %9716 = vmatmul.mubr.msk.bf16.gmra.mrb[44].mxu1 %vm16356_vm7, %v16355_v31  ;;  %vm16381_vm7 = vmmov %vm16373_vm1 }
 0x478   : > { %9723 = vmatprep.mubr.msk.bf16.mxu1 %vm16357_vm8, %v5734_v51  ;;  %vm16383_vm8 = vmmov %vm16373_vm1 }
 0x47f   : > { %9724 = vmatmul.mubr.msk.bf16.vlgmr.msra.gmra.mrb[16].mxu1 %vm16361_vm9, %v16360_v35  ;;  %vm16387_vm9 = vmmov %vm16373_vm1 }
 0x480   : > { %9756 = vmatpush3.bf16.msra.mxu1 %v10497_v24  ;;  %9727 = vmatprep.mubr.msk.bf16.mxu1 %vm16362_vm12, %v5736_v46  ;;  %v16370_v24 = vld [vmem:[#allocation114_spill] sm:$0xff]  ;;  %vm16388_vm12 = vmmov %vm16386_vm0 }
 0x481   : > { %9757 = vmatprep.subr.bf16.mxu1 %v10498_v14  ;;  %v5699_v61 = vsel %vm16388_vm12, %v5696_v56, %v5698_v30  ;;  %vm16400_vm0 = vmmov %vm16373_vm1 }
 0x482   : > { %v5749_v3 = vpack.c.bf16 %v5699_v61, %v5732_v50  ;;  %vm16402_vm12 = vmmov %vm16400_vm0 }
 0x483   : > { %vm16411_vm4 = vmmov %vm16400_vm0 }
 0x484   : > { %9758 = vmatpush3.bf16.msra.mxu1 %v10498_v14 }
 0x485   : > { %9791 = vmatprep.subr.bf16.mxu1 %v10499_v36 }
 0x487   : > { %9728 = vmatmul.mubr.msk.bf16.gmra.mrb[20].mxu1 %vm16363_vm5, %v5737_v2  ;;  %vm16389_vm5 = vmmov %vm16373_vm1 }
 0x488   : > { %9731 = vmatprep.mubr.msk.bf16.mxu1 %vm16365_vm15, %v16364_v54  ;;  %vm16390_vm15 = vmmov %vm16373_vm1 }
 0x48f   : > { %9732 = vmatmul.mubr.msk.bf16.gmra.mrb[24].mxu1 %vm16367_vm10, %v16366_v52  ;;  %vm16391_vm10 = vmmov %vm16373_vm1 }
 0x490   : > { %9735 = vmatprep.mubr.msk.bf16.mxu1 %vm16369_vm14, %v16368_v1  ;;  %vm16392_vm14 = vmmov %vm16373_vm1 }
 0x497   : > { %9736 = vmatmul.mubr.msk.bf16.gmra.mrb[28].mxu1 %vm16371_vm6, %v16370_v24  ;;  %vm16394_vm6 = vmmov %vm16373_vm1 }
 0x498   : > { %9739 = vmatprep.mubr.msk.bf16.mxu1 %vm16373_vm1, %v16372_v0 }
 0x49f   : > { %9740 = vmatmul.mubr.msk.bf16.gmra.mrb[32].mxu1 %vm16375_vm3, %v16374_v63  ;;  %vm16395_vm3 = vmmov %vm16373_vm1 }
 0x4a0   : > { %9743 = vmatprep.mubr.msk.bf16.mxu1 %vm16377_vm2, %v16376_v28  ;;  %vm16396_vm2 = vmmov %vm16373_vm1 }
 0x4a7   : > { %9744 = vmatmul.mubr.msk.bf16.gmra.mrb[36].mxu1 %vm16379_vm13, %v16378_v20  ;;  %vm16397_vm13 = vmmov %vm16373_vm1 }
 0x4a8   : > { %9747 = vmatprep.mubr.msk.bf16.mxu1 %vm16381_vm7, %v16380_v22  ;;  %vm16398_vm7 = vmmov %vm16373_vm1 }
 0x4af   : > { %9748 = vmatmul.mubr.msk.bf16.gmra.mrb[40].mxu1 %vm16383_vm8, %v16382_v32  ;;  %vm16399_vm8 = vmmov %vm16373_vm1 }
 0x4b0   : > { %9751 = vmatprep.mubr.msk.bf16.mxu1 %vm16387_vm9, %v13080_v6  ;;  %vm16401_vm9 = vmmov %vm16400_vm0  ;;  %v6008_v6 = vpack.c.bf16 %v3804_v15, %v10511_v47 }
 0x4b7   : > { %9752 = vmatmul.mubr.msk.bf16.gmra.mrb[44].mxu1 %vm16389_vm5, %v5749_v3  ;;  %vm16403_vm5 = vmmov %vm16400_vm0 }
 0x4b8   : > { %9759 = vmatprep.mubr.msk.bf16.mxu1 %vm16390_vm15, %v16295_v26  ;;  %v6261_v26 = vpack.c.bf16 %v6230_v38, %v16224_v42  ;;  %vm16404_vm15 = vmmov %vm16400_vm0 }
 0x4bf   : > { %9760 = vmatmul.mubr.msk.bf16.vlgmr.msra.gmra.mrb[16].mxu1 %vm16391_vm10, %v16297_v34  ;;  %vm16405_vm10 = vmmov %vm16400_vm0  ;;  %v16406_v34 = vld [vmem:[#allocation29_spill] sm:$0xff] }
 0x4c0   : > { %9792 = vmatpush3.bf16.msra.mxu1 %v10499_v36  ;;  %9763 = vmatprep.mubr.msk.bf16.mxu1 %vm16392_vm14, %v16299_v48  ;;  %vm16407_vm14 = vmmov %vm16400_vm0 }
 0x4c1   : > { %9793 = vmatprep.subr.bf16.mxu1 %v10500_v40 }
 0x4c4   : > { %9794 = vmatpush3.bf16.msra.mxu1 %v10500_v40 }
 0x4c7   : > { %9764 = vmatmul.mubr.msk.bf16.gmra.mrb[20].mxu1 %vm16393_vm11, %v16301_v45  ;;  %vm16408_vm11 = vmmov %vm16400_vm0 }
 0x4c8   : > { %9767 = vmatprep.mubr.msk.bf16.mxu1 %vm16394_vm6, %v16303_v62  ;;  %vm16409_vm6 = vmmov %vm16400_vm0 }
 0x4cf   : > { %9768 = vmatmul.mubr.msk.bf16.gmra.mrb[24].mxu1 %vm16373_vm1, %v16305_v37  ;;  %vm16410_vm1 = vmmov %vm16400_vm0 }
 0x4d0   : > { %9771 = vmatprep.mubr.msk.bf16.mxu1 %vm16395_vm3, %v16307_v21  ;;  %vm16412_vm3 = vmmov %vm16400_vm0 }
 0x4d7   : > { %9772 = vmatmul.mubr.msk.bf16.gmra.mrb[28].mxu1 %vm16396_vm2, %v16309_v39  ;;  %vm16413_vm2 = vmmov %vm16400_vm0 }
 0x4d8   : > { %9775 = vmatprep.mubr.msk.bf16.mxu1 %vm16397_vm13, %v16310_v33  ;;  %vm16414_vm13 = vmmov %vm16400_vm0 }
 0x4df   : > { %9776 = vmatmul.mubr.msk.bf16.gmra.mrb[32].mxu1 %vm16398_vm7, %v16312_v16  ;;  %vm16415_vm7 = vmmov %vm16400_vm0 }
 0x4e0   : > { %9779 = vmatprep.mubr.msk.bf16.mxu1 %vm16399_vm8, %v16314_v25  ;;  %vm16416_vm8 = vmmov %vm16400_vm0 }
 0x4e7   : > { %9780 = vmatmul.mubr.msk.bf16.gmra.mrb[36].mxu1 %vm16400_vm0, %v16316_v10 }
 0x4e8   : > { %9783 = vmatprep.mubr.msk.bf16.mxu1 %vm16401_vm9, %v16318_v5  ;;  %vm16417_vm9 = vmmov %vm16400_vm0 }
 0x4ef   : > { %9784 = vmatmul.mubr.msk.bf16.gmra.mrb[40].mxu1 %vm16402_vm12, %v16320_v29  ;;  %vm16418_vm12 = vcmask 1046528  }
 0x4f0   : > { %9787 = vmatprep.mubr.msk.bf16.mxu1 %vm16403_vm5, %v16324_v57  ;;  %vm16419_vm5 = vmmov %vm16400_vm0 }
 0x4f7   : > { %9788 = vmatmul.mubr.msk.bf16.gmra.mrb[44].mxu1 %vm16404_vm15, %v6008_v6  ;;  %vm16420_vm15 = vmmov %vm16400_vm0 }
 0x4f8   : > { %9795 = vmatprep.mubr.msk.bf16.mxu1 %vm16405_vm10, %v6261_v26  ;;  %vm16423_vm10 = vmmov %vm16418_vm12 }
 0x4ff   : > { %9796 = vmatmul.mubr.msk.bf16.vlgmr.msra.gmra.mrb[16].mxu1 %vm16407_vm14, %v16406_v34 }
 0x500   : > { %9799 = vmatprep.mubr.msk.bf16.mxu1 %vm16408_vm11, %v13087_v18  ;;  %v3805_v18 = vld [vmem:[#allocation2 + $0x128] sm:$0xff]  ;;  %vm16426_vm11 = vmmov %vm16400_vm0 }
 0x507   : > { %9800 = vmatmul.mubr.msk.bf16.gmra.mrb[20].mxu1 %vm16409_vm6, %v13097_v8  ;;  %v6223_v8 = vrot.slane %v3804_v15, 1  ;;  %vm10613_vm6 = vmmov 0  }
 0x508   : > { %9803 = vmatprep.mubr.msk.bf16.mxu1 %vm16410_vm1, %v13107_v19  ;;  %v6225_v19 = vrot.slane %v3805_v18, 1  ;;  %vm16457_vm1 = vmmov %vm16400_vm0 }
 0x50f   : > { %9804 = vmatmul.mubr.msk.bf16.gmra.mrb[24].mxu1 %vm16411_vm4, %v13116_v60  ;;  %v6226_v60 = vsel %vm16418_vm12, %v6223_v8, %v6225_v19  ;;  %vm16458_vm4 = vmmov %vm16400_vm0 }
 0x510   : > { %9807 = vmatprep.mubr.msk.bf16.mxu1 %vm16412_vm3, %v13119_v43  ;;  %v16421_v43 = vld [vmem:[#allocation16_spill] sm:$0xff]  ;;  %vm16459_vm3 = vmmov %vm16400_vm0 }
 0x511   : > { %vm16465_vm12 = vmmov %vm16400_vm0 }
 0x517   : > { %9808 = vmatmul.mubr.msk.bf16.gmra.mrb[28].mxu1 %vm16413_vm2, %v13128_v23  ;;  %v16422_v23 = vrot.slane %v16421_v43, 1  ;;  %vm16460_vm2 = vmmov %vm16400_vm0 }
 0x518   : > { %9811 = vmatprep.mubr.msk.bf16.mxu1 %vm16414_vm13, %v13131_v7  ;;  %vm16461_vm13 = vmmov %vm16400_vm0 }
 0x519   : > { %v6224_v7 = vsel %vm16423_vm10, %v16422_v23, %v6223_v8  ;;  %vm16471_vm10 = vmmov %vm16400_vm0 }
 0x51f   : > { %9812 = vmatmul.mubr.msk.bf16.gmra.mrb[32].mxu1 %vm16415_vm7, %v13140_v4  ;;  %v16424_v4 = vld [vmem:[#allocation87_spill] sm:$0xff]  ;;  %vm16462_vm7 = vmmov %vm16400_vm0 }
 0x520   : > { %9815 = vmatprep.mubr.msk.bf16.mxu1 %vm16416_vm8, %v13143_v27  ;;  %vm16425_vm14 = vnez %v16424_v4  ;;  %vm16463_vm8 = vmmov %vm16400_vm0 }
 0x521   : > { %v6260_v27 = vsel %vm16425_vm14, %v6226_v60, 0.0  ;;  %vm16473_vm14 = vmmov %vm16400_vm0 }
 0x527   : > { %9816 = vmatmul.mubr.msk.bf16.gmra.mrb[36].mxu1 %vm16400_vm0, %v13152_v55  ;;  %v6276_v55 = vpack.c.bf16 %v6260_v27, %v6224_v7 }
 0x528   : > { %9819 = vmatprep.mubr.msk.bf16.mxu1 %vm16417_vm9, %v13155_v17  ;;  %v13499_v17 = vld [vmem:[%s15054_s4] ss:$0 sm:$0xff]  ;;  %vm16464_vm9 = vmmov %vm16400_vm0 }
 0x52f   : > { %9820 = vmatmul.mubr.msk.bf16.gmra.mrb[40].mxu1 %vm16419_vm5, %v13164_v11  ;;  %vm16466_vm5 = vmmov %vm16400_vm0 }
 0x530   : > { %9823 = vmatprep.mubr.msk.bf16.mxu1 %vm16420_vm15, %v13166_v12  ;;  %vm16468_vm15 = vmmov %vm16400_vm0 }
 0x537   : > { %9824 = vmatmul.mubr.msk.bf16.gmra.mrb[44].mxu1 %vm16426_vm11, %v6276_v55  ;;  %vm16480_vm11 = vmmov %vm16400_vm0 }
 0x5d2   : > { %v9797_v44 = vpop.f32.mrb[16].mxu1 }
 0x5d3   : > { %v6544_v11 = vadd.f32 %v9797_v44, %v13499_v17  ;;  %v6376_v42 = vpop.f32.mrb[17].mxu1 }
 0x5d4   : > { %v9798_v12 = vpop.f32.mrb[18].mxu1  ;;  %v6542_v45 = vadd.f32 %v13499_v17, %v6376_v42 }
 0x5d5   : > { %v13502_v48 = vmax.f32 %v6544_v11, 0.0  ;;  %v6379_v62 = vpop.f32.mrb[19].mxu1  ;;  %v6545_v21 = vadd.f32 %v9798_v12, %v13499_v17 }
 0x5d6   : > { %v13509_v37 = vmax.f32 %v6542_v45, 0.0  ;;  %v6543_v5 = vadd.f32 %v13499_v17, %v6379_v62 }
 0x5d7   : > { %16427 = vst [vmem:[#allocation92_spill] sm:$0xff] %v13502_v48  ;;  %6770 = vrot.lane.b32.xlu0 %v13502_v48, %s10609_s25  ;;  %6642 = vrot.lane.b32.xlu1 %v13502_v48, %s15426_s29  ;;  %v13516_v25 = vmax.f32 %v6545_v21, 0.0 }
 0x5d8   : > { %v13529_v51 = vmax.f32 %v6543_v5, 0.0 }
 0x5da   : > { %v9801_v39 = vpop.f32.mrb[20].mxu1  ;;  %16428 = vst [vmem:[#allocation39_spill] sm:$0xff] %v13529_v51 }
 0x5db   : > { %6898 = vrot.lane.b32.xlu1 %v13502_v48, %s15424_s30  ;;  %6638 = vrot.lane.b32.xlu0 %v13509_v37, %s15426_s29  ;;  %v6392_v33 = vpop.f32.mrb[21].mxu1  ;;  %v6548_v31 = vadd.f32 %v9801_v39, %v13499_v17 }
 0x5dc   : > { %v9802_v16 = vpop.f32.mrb[22].mxu1  ;;  %v6546_v0 = vadd.f32 %v13499_v17, %v6392_v33 }
 0x5dd   : > { %v6395_v10 = vpop.f32.mrb[23].mxu1  ;;  %v13539_v14 = vmax.f32 %v6548_v31, 0.0  ;;  %v6549_v54 = vadd.f32 %v9802_v16, %v13499_v17 }
 0x5de   : > { %v13575_v56 = vmax.f32 %v6546_v0, 0.0  ;;  %v6547_v53 = vadd.f32 %v13499_v17, %v6395_v10 }
 0x5df   : > { %6766 = vrot.lane.b32.xlu1 %v13509_v37, %s10609_s25  ;;  %6772 = vrot.lane.b32.xlu0 %v13516_v25, %s10609_s25  ;;  %v13563_v63 = vmax.f32 %v6549_v54, 0.0 }
 0x5e0   : > { %v13598_v6 = vmax.f32 %v6547_v53, 0.0  ;;  %v7092_v53 = vld [vmem:[%s15055_s5] sm:$0xff] }
 0x5e2   : > { %v9805_v29 = vpop.f32.mrb[24].mxu1 }
 0x5e3   : > { %6894 = vrot.lane.b32.xlu1 %v13509_v37, %s15424_s30  ;;  %6900 = vrot.lane.b32.xlu0 %v13516_v25, %s15424_s30  ;;  %v13527_v58 = vpop.f32.mrb[25].mxu1  ;;  %v6552_v38 = vadd.f32 %v9805_v29, %v13499_v17 }
 0x5e4   : > { %v9806_v57 = vpop.f32.mrb[26].mxu1  ;;  %v6550_v11 = vadd.f32 %v13499_v17, %v13527_v58 }
 0x5e5   : > { %v6411_v41 = vpop.f32.mrb[27].mxu1  ;;  %v13611_v8 = vmax.f32 %v6552_v38, 0.0  ;;  %v6553_v4 = vadd.f32 %v9806_v57, %v13499_v17 }
 0x5e6   : > { %v13533_v59 = vadd.f32 %v13499_v17, %v6411_v41  ;;  %v13648_v33 = vmax.f32 %v6550_v11, 0.0 }
 0x5e7   : > { %6644 = vrot.lane.b32.xlu1 %v13516_v25, %s15426_s29  ;;  %6640 = vrot.lane.b32.xlu0 %v13529_v51, %s15426_s29  ;;  %v13636_v42 = vmax.f32 %v6553_v4, 0.0 }
 0x5e8   : > { %v13665_v29 = vmax.f32 %v13533_v59, 0.0 }
 0x5ea   : > { %v9809_v46 = vpop.f32.mrb[28].mxu1 }
 0x5eb   : > { %v13542_v35 = vadd.f32 %v9809_v46, %v13499_v17  ;;  %6768 = vrot.lane.b32.xlu0 %v13529_v51, %s10609_s25  ;;  %6650 = vrot.lane.b32.xlu1 %v13539_v14, %s15426_s29  ;;  %v6424_v36 = vpop.f32.mrb[29].mxu1 }
 0x5ec   : > { %v13549_v13 = vadd.f32 %v13499_v17, %v6424_v36  ;;  %v9810_v2 = vpop.f32.mrb[30].mxu1 }
 0x5ed   : > { %v13553_v52 = vadd.f32 %v9810_v2, %v13499_v17  ;;  %v6427_v1 = vpop.f32.mrb[31].mxu1 }
 0x5ee   : > { %v13556_v24 = vadd.f32 %v13499_v17, %v6427_v1  ;;  %v13690_v57 = vmax.f32 %v13549_v13, 0.0 }
 0x5ef   : > { %6896 = vrot.lane.b32.xlu0 %v13529_v51, %s15424_s30  ;;  %6778 = vrot.lane.b32.xlu1 %v13539_v14, %s10609_s25  ;;  %v13683_v58 = vmax.f32 %v13553_v52, 0.0 }
 0x5f0   : > { %v13701_v31 = vmax.f32 %v13556_v24, 0.0 }
 0x5f1   : > { %16430 = vst [vmem:[#allocation70_spill] sm:$0xff] %v13683_v58 }
 0x5f2   : > { %v9813_v28 = vpop.f32.mrb[32].mxu1 }
 0x5f3   : > { %v13566_v20 = vadd.f32 %v9813_v28, %v13499_v17  ;;  %6906 = vrot.lane.b32.xlu1 %v13539_v14, %s15424_s30  ;;  %6652 = vrot.lane.b32.xlu0 %v13563_v63, %s15426_s29  ;;  %v6440_v22 = vpop.f32.mrb[33].mxu1 }
 0x5f4   : > { %v13573_v15 = vadd.f32 %v13499_v17, %v6440_v22  ;;  %v9814_v47 = vpop.f32.mrb[34].mxu1 }
 0x5f5   : > { %v13578_v30 = vadd.f32 %v9814_v47, %v13499_v17  ;;  %v6443_v32 = vpop.f32.mrb[35].mxu1  ;;  %v13708_v41 = vmax.f32 %v13566_v20, 0.0 }
 0x5f6   : > { %v13581_v9 = vadd.f32 %v13499_v17, %v6443_v32  ;;  %v13726_v46 = vmax.f32 %v13573_v15, 0.0 }
 0x5f7   : > { %6646 = vrot.lane.b32.xlu1 %v13575_v56, %s15426_s29  ;;  %6780 = vrot.lane.b32.xlu0 %v13563_v63, %s10609_s25  ;;  %16431 = vst [vmem:[#allocation22_spill] sm:$0xff] %v13708_v41  ;;  %v13719_v59 = vmax.f32 %v13578_v30, 0.0 }
 0x5f8   : > { %16433 = vst [vmem:[#allocation52_spill] sm:$0xff] %v13726_v46 }
 0x5f9   : > { %16432 = vst [vmem:[#allocation45_spill] sm:$0xff] %v13719_v59 }
 0x5fa   : > { %v9817_v49 = vpop.f32.mrb[36].mxu1 }
 0x5fb   : > { %v13589_v61 = vadd.f32 %v9817_v49, %v13499_v17  ;;  %6774 = vrot.lane.b32.xlu1 %v13575_v56, %s10609_s25  ;;  %6908 = vrot.lane.b32.xlu0 %v13563_v63, %s15424_s30  ;;  %v6456_v50 = vpop.f32.mrb[37].mxu1  ;;  %v7093_v49 = vld [vmem:[%s15055_s5 + $0x8] sm:$0xff] }
 0x5fc   : > { %v13596_v3 = vadd.f32 %v13499_v17, %v6456_v50  ;;  %v9818_v40 = vpop.f32.mrb[38].mxu1  ;;  %v9900_v50 = vpack.c.bf16 %v7093_v49, %v7092_v53  ;;  %v7095_v53 = vld [vmem:[%s15055_s5 + $0x18] sm:$0xff] }
 0x5fd   : > { %v13602_v26 = vadd.f32 %v9818_v40, %v13499_v17  ;;  %v6459_v34 = vpop.f32.mrb[39].mxu1  ;;  %v13744_v36 = vmax.f32 %v13589_v61, 0.0  ;;  %v15393_v61 = vmov 0.0|0.0  }
 0x5fe   : > { %v13605_v18 = vadd.f32 %v13499_v17, %v6459_v34  ;;  %v13774_v28 = vmax.f32 %v13596_v3, 0.0  ;;  %9899 = vmatprep.subr.bf16.mxu0 %v15393_v61  ;;  %9905 = vmatprep.subr.bf16.mxu1 %v15393_v61 }
 0x5ff   : > { %6902 = vrot.lane.b32.xlu1 %v13575_v56, %s15424_s30  ;;  %6648 = vrot.lane.b32.xlu0 %v13598_v6, %s15426_s29  ;;  %16435 = vst [vmem:[#allocation53_spill] sm:$0xff] %v13744_v36  ;;  %v13763_v1 = vmax.f32 %v13602_v26, 0.0 }
 0x600   : > { %16437 = vst [vmem:[#allocation58_spill] sm:$0xff] %v13774_v28  ;;  %v13793_v30 = vmax.f32 %v13605_v18, 0.0  ;;  %9901 = vmatpush3.bf16.msra.mxu0 %v9900_v50 }
 0x601   : > { %16436 = vst [vmem:[#allocation54_spill] sm:$0xff] %v13763_v1  ;;  %9902 = vmatprep.subr.bf16.mxu0 %v15393_v61 }
 0x602   : > { %v9821_v19 = vpop.f32.mrb[40].mxu1  ;;  %16438 = vst [vmem:[#allocation60_spill] sm:$0xff] %v13793_v30 }
 0x603   : > { %v13614_v60 = vadd.f32 %v9821_v19, %v13499_v17  ;;  %6776 = vrot.lane.b32.xlu0 %v13598_v6, %s10609_s25  ;;  %6658 = vrot.lane.b32.xlu1 %v13611_v8, %s15426_s29  ;;  %v6472_v43 = vpop.f32.mrb[41].mxu1 }
 0x604   : > { %v13621_v23 = vadd.f32 %v13499_v17, %v6472_v43  ;;  %v9822_v7 = vpop.f32.mrb[42].mxu1 }
 0x605   : > { %v13625_v27 = vadd.f32 %v9822_v7, %v13499_v17  ;;  %v6475_v55 = vpop.f32.mrb[43].mxu1  ;;  %v13812_v3 = vmax.f32 %v13614_v60, 0.0 }
 0x606   : > { %v13628_v44 = vadd.f32 %v13499_v17, %v6475_v55  ;;  %v13843_v43 = vmax.f32 %v13621_v23, 0.0 }
 0x607   : > { %6904 = vrot.lane.b32.xlu0 %v13598_v6, %s15424_s30  ;;  %6786 = vrot.lane.b32.xlu1 %v13611_v8, %s10609_s25  ;;  %16439 = vst [vmem:[#allocation71_spill] sm:$0xff] %v13812_v3  ;;  %v13832_v18 = vmax.f32 %v13625_v27, 0.0 }
 0x608   : > { %16441 = vst [vmem:[#allocation83_spill] sm:$0xff] %v13843_v43  ;;  %v13862_v23 = vmax.f32 %v13628_v44, 0.0  ;;  %v7094_v44 = vld [vmem:[%s15055_s5 + $0x10] sm:$0xff] }
 0x609   : > { %16440 = vst [vmem:[#allocation93_spill] sm:$0xff] %v13832_v18 }
 0x60a   : > { %v9825_v12 = vpop.f32.mrb[44].mxu1  ;;  %16442 = vst [vmem:[#allocation84_spill] sm:$0xff] %v13862_v23 }
 0x60b   : > { %v13639_v45 = vadd.f32 %v9825_v12, %v13499_v17  ;;  %6914 = vrot.lane.b32.xlu1 %v13611_v8, %s15424_s30  ;;  %6660 = vrot.lane.b32.xlu0 %v13636_v42, %s15426_s29  ;;  %v6488_v62 = vpop.f32.mrb[45].mxu1 }
 0x60c   : > { %v13646_v21 = vadd.f32 %v13499_v17, %v6488_v62  ;;  %v9826_v39 = vpop.f32.mrb[46].mxu1 }
 0x60d   : > { %v13651_v16 = vadd.f32 %v9826_v39, %v13499_v17  ;;  %v6491_v10 = vpop.f32.mrb[47].mxu1  ;;  %v13873_v62 = vmax.f32 %v13639_v45, 0.0  ;;  %v9903_v45 = vpack.c.bf16 %v7095_v53, %v7094_v44 }
 0x60e   : > { %v13654_v5 = vadd.f32 %v13499_v17, %v6491_v10  ;;  %v13672_v17 = vmax.f32 %v13542_v35, 0.0  ;;  %v13737_v35 = vmax.f32 %v13581_v9, 0.0  ;;  %v13898_v61 = vmax.f32 %v13646_v21, 0.0 }
 0x60f   : > { %6654 = vrot.lane.b32.xlu1 %v13648_v33, %s15426_s29  ;;  %6788 = vrot.lane.b32.xlu0 %v13636_v42, %s10609_s25  ;;  %16443 = vst [vmem:[#allocation96_spill] sm:$0xff] %v13873_v62 }
 0x610   : > { %16429 = vst [vmem:[#allocation43_spill] sm:$0xff] %v13672_v17  ;;  %16434 = vst [vmem:[#allocation86_spill] sm:$0xff] %v13737_v35  ;;  %9904 = vmatpush3.bf16.msra.mxu0 %v9903_v45  ;;  %v13912_v53 = vmax.f32 %v13654_v5, 0.0 }
 0x611   : > { %16444 = vst [vmem:[#allocation49_spill] sm:$0xff] %v13898_v61 }
 0x612   : > { %16446 = vst [vmem:[#allocation42_spill] sm:$0xff] %v13912_v53 }
 0x613   : > { %6782 = vrot.lane.b32.xlu1 %v13648_v33, %s10609_s25  ;;  %6916 = vrot.lane.b32.xlu0 %v13636_v42, %s15424_s30 }
 0x617   : > { %6910 = vrot.lane.b32.xlu1 %v13648_v33, %s15424_s30  ;;  %6656 = vrot.lane.b32.xlu0 %v13665_v29, %s15426_s29 }
 0x61b   : > { %6784 = vrot.lane.b32.xlu0 %v13665_v29, %s10609_s25  ;;  %6666 = vrot.lane.b32.xlu1 %v13672_v17, %s15426_s29 }
 0x61f   : > { %6912 = vrot.lane.b32.xlu0 %v13665_v29, %s15424_s30  ;;  %6794 = vrot.lane.b32.xlu1 %v13672_v17, %s10609_s25 }
 0x623   : > { %6922 = vrot.lane.b32.xlu1 %v13672_v17, %s15424_s30  ;;  %6668 = vrot.lane.b32.xlu0 %v13683_v58, %s15426_s29 }
 0x627   : > { %6662 = vrot.lane.b32.xlu1 %v13690_v57, %s15426_s29  ;;  %6796 = vrot.lane.b32.xlu0 %v13683_v58, %s10609_s25 }
 0x62b   : > { %6790 = vrot.lane.b32.xlu1 %v13690_v57, %s10609_s25  ;;  %6924 = vrot.lane.b32.xlu0 %v13683_v58, %s15424_s30  ;;  %v16455_v58 = vmov 0.0|0.0  }
 0x62f   : > { %6918 = vrot.lane.b32.xlu1 %v13690_v57, %s15424_s30  ;;  %6664 = vrot.lane.b32.xlu0 %v13701_v31, %s15426_s29 }
 0x633   : > { %6792 = vrot.lane.b32.xlu0 %v13701_v31, %s10609_s25  ;;  %6674 = vrot.lane.b32.xlu1 %v13708_v41, %s15426_s29 }
 0x637   : > { %6920 = vrot.lane.b32.xlu0 %v13701_v31, %s15424_s30  ;;  %6802 = vrot.lane.b32.xlu1 %v13708_v41, %s10609_s25 }
 0x63b   : > { %6930 = vrot.lane.b32.xlu1 %v13708_v41, %s15424_s30  ;;  %6676 = vrot.lane.b32.xlu0 %v13719_v59, %s15426_s29  ;;  %v7173_v41 = vld [vmem:[%s15057_s7 + $0x10] sm:$0xff] }
 0x63f   : > { %6670 = vrot.lane.b32.xlu1 %v13726_v46, %s15426_s29  ;;  %6804 = vrot.lane.b32.xlu0 %v13719_v59, %s10609_s25 }
 0x643   : > { %6798 = vrot.lane.b32.xlu1 %v13726_v46, %s10609_s25  ;;  %6932 = vrot.lane.b32.xlu0 %v13719_v59, %s15424_s30 }
 0x647   : > { %6926 = vrot.lane.b32.xlu1 %v13726_v46, %s15424_s30  ;;  %6672 = vrot.lane.b32.xlu0 %v13737_v35, %s15426_s29 }
 0x649   : > { %v13746_v13 = vpop.permute.xlu0 %6770  ;;  %v13748_v2 = vpop.permute.xlu1 %6642 }
 0x64b   : > { %6800 = vrot.lane.b32.xlu0 %v13737_v35, %s10609_s25  ;;  %6682 = vrot.lane.b32.xlu1 %v13744_v36, %s15426_s29 }
 0x64d   : > { %v13754_v54 = vpop.permute.xlu1 %6898  ;;  %v13756_v52 = vpop.permute.xlu0 %6638 }
 0x64f   : > { %6928 = vrot.lane.b32.xlu0 %v13737_v35, %s15424_s30  ;;  %6810 = vrot.lane.b32.xlu1 %v13744_v36, %s10609_s25 }
 0x651   : > { %v13765_v24 = vpop.permute.xlu1 %6766  ;;  %v13767_v0 = vpop.permute.xlu0 %6772 }
 0x653   : > { %6938 = vrot.lane.b32.xlu1 %v13744_v36, %s15424_s30  ;;  %6684 = vrot.lane.b32.xlu0 %v13763_v1, %s15426_s29 }
 0x655   : > { %v13776_v20 = vpop.permute.xlu1 %6894  ;;  %v13778_v22 = vpop.permute.xlu0 %6900 }
 0x657   : > { %6678 = vrot.lane.b32.xlu1 %v13774_v28, %s15426_s29  ;;  %6812 = vrot.lane.b32.xlu0 %v13763_v1, %s10609_s25 }
 0x659   : > { %v13784_v15 = vpop.permute.xlu1 %6644  ;;  %v13786_v47 = vpop.permute.xlu0 %6640 }
 0x65b   : > { %6806 = vrot.lane.b32.xlu1 %v13774_v28, %s10609_s25  ;;  %6940 = vrot.lane.b32.xlu0 %v13763_v1, %s15424_s30 }
 0x65d   : > { %v13795_v32 = vpop.permute.xlu0 %6768  ;;  %v13797_v9 = vpop.permute.xlu1 %6650 }
 0x65f   : > { %6934 = vrot.lane.b32.xlu1 %v13774_v28, %s15424_s30  ;;  %6680 = vrot.lane.b32.xlu0 %v13793_v30, %s15426_s29 }
 0x661   : > { %v13814_v40 = vpop.permute.xlu0 %6896  ;;  %v13816_v38 = vpop.permute.xlu1 %6778 }
 0x663   : > { %6808 = vrot.lane.b32.xlu0 %v13793_v30, %s10609_s25  ;;  %6690 = vrot.lane.b32.xlu1 %v13812_v3, %s15426_s29 }
 0x665   : > { %v13823_v26 = vpop.permute.xlu1 %6906  ;;  %v13825_v34 = vpop.permute.xlu0 %6652 }
 0x667   : > { %6936 = vrot.lane.b32.xlu0 %v13793_v30, %s15424_s30  ;;  %6818 = vrot.lane.b32.xlu1 %v13812_v3, %s10609_s25 }
 0x669   : > { %v13834_v19 = vpop.permute.xlu1 %6646  ;;  %v13836_v60 = vpop.permute.xlu0 %6780 }
 0x66b   : > { %6946 = vrot.lane.b32.xlu1 %v13812_v3, %s15424_s30  ;;  %6692 = vrot.lane.b32.xlu0 %v13832_v18, %s15426_s29 }
 0x66d   : > { %v13845_v7 = vpop.permute.xlu1 %6774  ;;  %v13847_v4 = vpop.permute.xlu0 %6908 }
 0x66f   : > { %6686 = vrot.lane.b32.xlu1 %v13843_v43, %s15426_s29  ;;  %6820 = vrot.lane.b32.xlu0 %v13832_v18, %s10609_s25 }
 0x671   : > { %v13853_v27 = vpop.permute.xlu1 %6902  ;;  %v13855_v55 = vpop.permute.xlu0 %6648 }
 0x673   : > { %6814 = vrot.lane.b32.xlu1 %v13843_v43, %s10609_s25  ;;  %6948 = vrot.lane.b32.xlu0 %v13832_v18, %s15424_s30  ;;  %v13901_v18 = vmax.f32 %v13651_v16, 0.0 }
 0x675   : > { %v13864_v11 = vpop.permute.xlu0 %6776  ;;  %v13866_v12 = vpop.permute.xlu1 %6658  ;;  %16445 = vst [vmem:[#allocation8_spill] sm:$0xff] %v13901_v18 }
 0x677   : > { %6942 = vrot.lane.b32.xlu1 %v13843_v43, %s15424_s30  ;;  %6688 = vrot.lane.b32.xlu0 %v13862_v23, %s15426_s29 }
 0x679   : > { %v13875_v39 = vpop.permute.xlu0 %6904  ;;  %v13877_v10 = vpop.permute.xlu1 %6786 }
 0x67b   : > { %6816 = vrot.lane.b32.xlu0 %v13862_v23, %s10609_s25  ;;  %6698 = vrot.lane.b32.xlu1 %v13873_v62, %s15426_s29 }
 0x67d   : > { %v13889_v49 = vpop.permute.xlu1 %6914  ;;  %v13891_v50 = vpop.permute.xlu0 %6660 }
 0x67f   : > { %6944 = vrot.lane.b32.xlu0 %v13862_v23, %s15424_s30  ;;  %6826 = vrot.lane.b32.xlu1 %v13873_v62, %s10609_s25 }
 0x681   : > { %v13903_v3 = vpop.permute.xlu1 %6654  ;;  %v13905_v44 = vpop.permute.xlu0 %6788 }
 0x683   : > { %6694 = vrot.lane.b32.xlu1 %v13898_v61, %s15426_s29  ;;  %6700 = vrot.lane.b32.xlu0 %v13901_v18, %s15426_s29 }
 0x685   : > { %v13914_v45 = vpop.permute.xlu1 %6782  ;;  %v13916_v21 = vpop.permute.xlu0 %6916 }
 0x686   : > { %16447 = vst [vmem:[#allocation50_spill] sm:$0xff] %v13916_v21 }
 0x687   : > { %6822 = vrot.lane.b32.xlu1 %v13898_v61, %s10609_s25  ;;  %6696 = vrot.lane.b32.xlu0 %v13912_v53, %s15426_s29  ;;  %s377_s29 = sand.u32 1, %s10598_s18  }
 0x688   : > { %s15009_s21 = scalar_lea.sflag [#allocation4], %s377_s29 }
 0x689   : > { %v13922_v16 = vpop.permute.xlu1 %6910  ;;  %v13924_v23 = vpop.permute.xlu0 %6656 }
 0x68b   : > { %6950 = vrot.lane.b32.xlu1 %v13898_v61, %s15424_s30  ;;  %6824 = vrot.lane.b32.xlu0 %v13912_v53, %s10609_s25 }
 0x68d   : > { %v13930_v5 = vpop.permute.xlu0 %6784  ;;  %v13932_v43 = vpop.permute.xlu1 %6666 }
 0x68e   : > { %16448 = vst [vmem:[#allocation66_spill] sm:$0xff] %v13932_v43 }
 0x68f   : > { %6828 = vrot.lane.b32.xlu1 %v13901_v18, %s10609_s25  ;;  %6952 = vrot.lane.b32.xlu0 %v13912_v53, %s15424_s30  ;;  %v16453_v53 = vmov 0.0  }
 0x690   : > { %9835 = vmatprep.mubr.msk.f32.mxu0 %vm10613_vm6, %v16453_v53  ;;  %9846 = vmatprep.mubr.msk.f32.mxu1 %vm10613_vm6, %v16453_v53  ;;  %vm16482_vm6 = vmmov %vm16400_vm0 }
 0x691   : > { %v13938_v1 = vpop.permute.xlu0 %6912  ;;  %v13940_v36 = vpop.permute.xlu1 %6794 }
 0x692   : > { %16449 = vst [vmem:[#allocation11_spill] sm:$0xff] %v13940_v36 }
 0x693   : > { %6956 = vrot.lane.b32.xlu1 %v13901_v18, %s15424_s30  ;;  %6954 = vrot.lane.b32.xlu0 %v13873_v62, %s15424_s30  ;;  %v7171_v18 = vld [vmem:[%s15057_s7] sm:$0xff]  ;;  %v7172_v62 = vld [vmem:[%s15057_s7 + $0x8] sm:$0xff]  ;;  %s8447_s30 = sshll.u32 %s377_s29, 8 }
 0x694   : > { %v9906_v35 = vpack.c.bf16 %v7172_v62, %v7171_v18  ;;  %v6735_v62 = vadd.f32 %v13786_v47, %v13529_v51  ;;  %s14828_s14 = scalar_lea.vmem [#allocation3], %s8447_s30 }
 0x695   : > { %v13946_v61 = vpop.permute.xlu1 %6922  ;;  %v13948_v30 = vpop.permute.xlu0 %6668 }
 0x696   : > { %16450 = vst [vmem:[#allocation14_spill] sm:$0xff] %v13946_v61  ;;  %16451 = vst [vmem:[#allocation46_spill] sm:$0xff] %v13948_v30  ;;  %9907 = vmatpush3.bf16.msra.mxu1 %v9906_v35 }
 0x697   : > { %9908 = vmatprep.subr.bf16.mxu1 %v16455_v58  ;;  %v6734_v58 = vadd.f32 %v13756_v52, %v13509_v37 }
 0x699   : > { %v13950_v28 = vpop.permute.xlu1 %6662  ;;  %v13952_v59 = vpop.permute.xlu0 %6796  ;;  %v6862_v35 = vadd.f32 %v13765_v24, %v6734_v58 }
 0x69a   : > { %16452 = vst [vmem:[#allocation28_spill] sm:$0xff] %v13952_v59  ;;  %v7174_v59 = vld [vmem:[%s15057_s7 + $0x18] sm:$0xff] }
 0x69b   : > { %v9909_v30 = vpack.c.bf16 %v7174_v59, %v7173_v41  ;;  %v6736_v41 = vadd.f32 %v13748_v2, %v13502_v48  ;;  %v6863_v59 = vadd.f32 %v13795_v32, %v6735_v62  ;;  %v6990_v51 = vadd.f32 %v13776_v20, %v6862_v35 }
 0x69c   : > { %v6737_v2 = vadd.f32 %v13784_v15, %v13516_v25  ;;  %v6739_v15 = vadd.f32 %v13855_v55, %v13598_v6  ;;  %v6740_v55 = vadd.f32 %v13797_v9, %v13539_v14  ;;  %v6742_v9 = vadd.f32 %v13903_v3, %v13648_v33 }
 0x69d   : > { %v13968_v46 = vpop.permute.xlu1 %6790  ;;  %v13970_v53 = vpop.permute.xlu0 %6924  ;;  %9910 = vmatpush3.bf16.msra.mxu1 %v9909_v30  ;;  %v6991_v30 = vadd.f32 %v13814_v40, %v6863_v59  ;;  %v6864_v47 = vadd.f32 %v13746_v13, %v6736_v41  ;;  %v7022_v40 = vsel %vm16458_vm4, %v6990_v51, 0.0  ;;  %v6738_v13 = vadd.f32 %v13834_v19, %v13575_v56  ;;  %vm16486_vm4 = vmmov %vm16400_vm0 }
 0x69e   : > { %16454 = vst [vmem:[#allocation76_spill] sm:$0xff] %v13970_v53  ;;  %v6865_v62 = vadd.f32 %v13767_v0, %v6737_v2  ;;  %v6867_v0 = vadd.f32 %v13864_v11, %v6739_v15  ;;  %v6743_v15 = vadd.f32 %v13924_v23, %v13665_v29 }
 0x69f   : > { %v7023_v48 = vsel %vm16457_vm1, %v6991_v30, 0.0  ;;  %v6992_v24 = vadd.f32 %v13754_v54, %v6864_v47  ;;  %v6866_v20 = vadd.f32 %v13845_v7, %v6738_v13  ;;  %v6741_v13 = vadd.f32 %v13825_v34, %v13563_v63  ;;  %vm16485_vm1 = vmmov %vm16400_vm0 }
 0x6a0   : > { %v7024_v41 = vadd.f32 %v7023_v48, %v7022_v40  ;;  %v6993_v54 = vadd.f32 %v13778_v22, %v6865_v62  ;;  %v6995_v48 = vadd.f32 %v13875_v39, %v6867_v0  ;;  %v6868_v22 = vadd.f32 %v13816_v38, %v6740_v55 }
 0x6a1   : > { %v13973_v61 = vpop.permute.xlu1 %6918  ;;  %v13975_v36 = vpop.permute.xlu0 %6664  ;;  %v7025_v35 = vsel %vm16459_vm3, %v6992_v24, 0.0  ;;  %v6994_v51 = vadd.f32 %v13853_v27, %v6866_v20  ;;  %v6869_v20 = vadd.f32 %v13836_v60, %v6741_v13  ;;  %v6870_v38 = vadd.f32 %v13914_v45, %v6742_v9  ;;  %vm16490_vm3 = vmmov %vm16400_vm0 }
 0x6a2   : > { %v7026_v30 = vadd.f32 %v7025_v35, %v7024_v41  ;;  %v7027_v47 = vsel %vm16460_vm2, %v6993_v54, 0.0  ;;  %v7031_v27 = vsel %vm16462_vm7, %v6995_v48, 0.0  ;;  %v6996_v62 = vadd.f32 %v13823_v26, %v6868_v22  ;;  %vm16491_vm2 = vmmov %vm16400_vm0 }
 0x6a3   : > { %v7029_v2 = vsel %vm16461_vm13, %v6994_v51, 0.0  ;;  %v6997_v26 = vadd.f32 %v13847_v4, %v6869_v20  ;;  %v6998_v34 = vadd.f32 %v13922_v16, %v6870_v38  ;;  %v6871_v0 = vadd.f32 %v13930_v5, %v6743_v15  ;;  %vm16493_vm13 = vmmov %vm16400_vm0 }
 0x6a4   : > { %v7028_v24 = vadd.f32 %v7027_v47, %v7026_v30  ;;  %v7033_v51 = vsel %vm16463_vm8, %v6996_v62, 0.0  ;;  %v6744_v48 = vadd.f32 %v13866_v12, %v13611_v8  ;;  %v6745_v22 = vadd.f32 %v13891_v50, %v13636_v42  ;;  %vm16494_vm7 = vmmov %vm16400_vm0 }
 0x6a5   : > { %v13977_v43 = vpop.permute.xlu0 %6792  ;;  %v13979_v18 = vpop.permute.xlu1 %6674  ;;  %v6999_v30 = vadd.f32 %v13938_v1, %v6871_v0  ;;  %v7035_v23 = vsel %vm16400_vm0, %v6997_v26, 0.0  ;;  %v7037_v55 = vsel %vm16464_vm9, %v6998_v34, 0.0  ;;  %v16469_v26 = vld [vmem:[#allocation43_spill] sm:$0xff]  ;;  %vm16498_vm8 = vmmov %vm16400_vm0 }
 0x6a6   : > { %16456 = vst [vmem:[#allocation55_spill] sm:$0xff] %v13979_v18  ;;  %v7030_v11 = vadd.f32 %v7029_v2, %v7028_v24  ;;  %v6872_v4 = vadd.f32 %v13877_v10, %v6744_v48  ;;  %v6747_v10 = vadd.f32 %v13975_v36, %v13701_v31  ;;  %v16470_v36 = vld [vmem:[#allocation66_spill] sm:$0xff]  ;;  %vm16500_vm9 = vmmov %vm16400_vm0 }
 0x6a7   : > { %v7039_v16 = vsel %vm16465_vm12, %v6999_v30, 0.0  ;;  %v6748_v34 = vadd.f32 %v16470_v36, %v16469_v26  ;;  %v16472_v30 = vld [vmem:[#allocation11_spill] sm:$0xff]  ;;  %vm16501_vm12 = vmmov %vm16400_vm0 }
 0x6a8   : > { %v7032_v41 = vadd.f32 %v7031_v27, %v7030_v11  ;;  %v7000_v1 = vadd.f32 %v13889_v49, %v6872_v4  ;;  %v6746_v27 = vadd.f32 %v13950_v28, %v13690_v57  ;;  %v6873_v11 = vadd.f32 %v13905_v44, %v6745_v22  ;;  %v16467_v49 = vld [vmem:[#allocation50_spill] sm:$0xff] }
 0x6a9   : > { %v13983_v17 = vpop.permute.xlu0 %6920  ;;  %v13985_v21 = vpop.permute.xlu1 %6802  ;;  %v6875_v38 = vadd.f32 %v13977_v43, %v6747_v10  ;;  %v16475_v4 = vld [vmem:[#allocation70_spill] sm:$0xff] }
 0x6aa   : > { %v7034_v3 = vadd.f32 %v7033_v51, %v7032_v41  ;;  %v6874_v62 = vadd.f32 %v13968_v46, %v6746_v27  ;;  %v7041_v41 = vsel %vm16466_vm5, %v7000_v1, 0.0  ;;  %v7001_v20 = vadd.f32 %v16467_v49, %v6873_v11  ;;  %v16477_v1 = vld [vmem:[#allocation52_spill] sm:$0xff]  ;;  %v16479_v10 = vld [vmem:[#allocation86_spill] sm:$0xff]  ;;  %vm16504_vm5 = vmmov %vm16400_vm0 }
 0x6ab   : > { %v7003_v15 = vadd.f32 %v13983_v17, %v6875_v38  ;;  %v16481_v38 = vld [vmem:[#allocation76_spill] sm:$0xff] }
 0x6ac   : > { %v7036_v47 = vadd.f32 %v7035_v23, %v7034_v3  ;;  %v7002_v50 = vadd.f32 %v13973_v61, %v6874_v62  ;;  %v7043_v46 = vsel %vm16468_vm15, %v7001_v20, 0.0  ;;  %v6876_v23 = vadd.f32 %v16472_v30, %v6748_v34  ;;  %vm16506_vm15 = vmmov %vm16400_vm0 }
 0x6ad   : > { %v13994_v18 = vpop.permute.xlu1 %6930  ;;  %v13996_v53 = vpop.permute.xlu0 %6676  ;;  %v7047_v48 = vsel %vm16473_vm14, %v7003_v15, 0.0  ;;  %vm16510_vm14 = vmmov %vm16400_vm0 }
 0x6ae   : > { %v7038_v5 = vadd.f32 %v7037_v55, %v7036_v47  ;;  %v7045_v0 = vsel %vm16471_vm10, %v7002_v50, 0.0  ;;  %v16474_v47 = vld [vmem:[#allocation14_spill] sm:$0xff]  ;;  %vm16509_vm10 = vmmov %vm16400_vm0 }
 0x6af   : > { %v7004_v17 = vadd.f32 %v16474_v47, %v6876_v23 }
 0x6b0   : > { %v7040_v12 = vadd.f32 %v7039_v16, %v7038_v5  ;;  %v16476_v16 = vld [vmem:[#allocation46_spill] sm:$0xff] }
 0x6b1   : > { %v14003_v52 = vpop.permute.xlu1 %6670  ;;  %v14005_v32 = vpop.permute.xlu0 %6804  ;;  %v6749_v5 = vadd.f32 %v16476_v16, %v16475_v4  ;;  %v7049_v50 = vsel %vm16480_vm11, %v7004_v17, 0.0  ;;  %v16487_v16 = vld [vmem:[#allocation45_spill] sm:$0xff]  ;;  %vm16511_vm11 = vmmov %vm16400_vm0 }
 0x6b2   : > { %v7042_v28 = vadd.f32 %v7041_v41, %v7040_v12  ;;  %v6750_v22 = vadd.f32 %v14003_v52, %v16477_v1  ;;  %v16478_v12 = vld [vmem:[#allocation28_spill] sm:$0xff] }
 0x6b3   : > { %v6877_v11 = vadd.f32 %v16478_v12, %v6749_v5  ;;  %v6753_v5 = vadd.f32 %v13996_v53, %v16487_v16 }
 0x6b4   : > { %v7044_v3 = vadd.f32 %v7043_v46, %v7042_v28 }
 0x6b5   : > { %v14015_v58 = vpop.permute.xlu1 %6798  ;;  %v14017_v59 = vpop.permute.xlu0 %6932  ;;  %v7005_v28 = vadd.f32 %v16481_v38, %v6877_v11  ;;  %v6881_v11 = vadd.f32 %v14005_v32, %v6753_v5 }
 0x6b6   : > { %v7046_v61 = vadd.f32 %v7045_v0, %v7044_v3  ;;  %v6878_v62 = vadd.f32 %v14015_v58, %v6750_v22  ;;  %v16483_v3 = vld [vmem:[#allocation22_spill] sm:$0xff] }
 0x6b7   : > { %v7051_v58 = vsel %vm16482_vm6, %v7005_v28, 0.0  ;;  %v16488_v22 = vld [vmem:[#allocation58_spill] sm:$0xff]  ;;  %vm16512_vm6 = vmmov %vm16400_vm0 }
 0x6b8   : > { %v7048_v27 = vadd.f32 %v7047_v48, %v7046_v61 }
 0x6b9   : > { %v14024_v19 = vpop.permute.xlu1 %6926  ;;  %v14026_v7 = vpop.permute.xlu0 %6672 }
 0x6ba   : > { %v6751_v41 = vadd.f32 %v14026_v7, %v16479_v10  ;;  %v7006_v15 = vadd.f32 %v14024_v19, %v6878_v62  ;;  %v7050_v52 = vadd.f32 %v7049_v50, %v7048_v27  ;;  %v16484_v7 = vld [vmem:[#allocation55_spill] sm:$0xff] }
 0x6bb   : > { %v6752_v30 = vadd.f32 %v16484_v7, %v16483_v3  ;;  %v16492_v7 = vld [vmem:[#allocation53_spill] sm:$0xff] }
 0x6bc   : > { %v7053_v23 = vsel %vm16485_vm1, %v7006_v15, 0.0  ;;  %v7052_v48 = vadd.f32 %v7051_v58, %v7050_v52  ;;  %v7009_v15 = vadd.f32 %v14017_v59, %v6881_v11  ;;  %vm16513_vm1 = vmmov %vm16400_vm0 }
 0x6bd   : > { %v14034_v40 = vpop.permute.xlu0 %6800  ;;  %v14036_v39 = vpop.permute.xlu1 %6682  ;;  %v6880_v61 = vadd.f32 %v13985_v21, %v6752_v30 }
 0x6be   : > { %v6879_v46 = vadd.f32 %v14034_v40, %v6751_v41  ;;  %v7054_v19 = vadd.f32 %v7053_v23, %v7052_v48  ;;  %v16489_v41 = vld [vmem:[#allocation60_spill] sm:$0xff]  ;;  %v6756_v32 = vadd.f32 %v14036_v39, %v16492_v7 }
 0x6c1   : > { %v6929_v35 = vpop.permute.xlu0 %6928  ;;  %v14047_v54 = vpop.permute.xlu1 %6810 }
 0x6c2   : > { %v7007_v36 = vadd.f32 %v6929_v35, %v6879_v46  ;;  %v7008_v35 = vadd.f32 %v13994_v18, %v6880_v61  ;;  %v6884_v30 = vadd.f32 %v14047_v54, %v6756_v32  ;;  %v16502_v32 = vld [vmem:[#allocation93_spill] sm:$0xff] }
 0x6c4   : > { %v7055_v47 = vsel %vm16486_vm4, %v7007_v36, 0.0  ;;  %v7057_v28 = vsel %vm16490_vm3, %v7008_v35, 0.0  ;;  %vm16514_vm4 = vcmask 31744   ;;  %vm16515_vm3 = vmmov %vm16400_vm0 }
 0x6c5   : > { %v14054_v60 = vpop.permute.xlu1 %6938  ;;  %v14056_v45 = vpop.permute.xlu0 %6684  ;;  %v7056_v12 = vadd.f32 %v7055_v47, %v7054_v19  ;;  %v16496_v47 = vld [vmem:[#allocation83_spill] sm:$0xff] }
 0x6c7   : > { %v7058_v18 = vadd.f32 %v7057_v28, %v7056_v12 }
 0x6c9   : > { %v6679_v2 = vpop.permute.xlu1 %6678  ;;  %v14064_v24 = vpop.permute.xlu0 %6812 }
 0x6ca   : > { %v6754_v27 = vadd.f32 %v6679_v2, %v16488_v22  ;;  %v7059_v2 = vsel %vm16491_vm2, %v7009_v15, 0.0  ;;  %vm8042_vm2 = vcmask 1043456  }
 0x6cd   : > { %v6807_v13 = vpop.permute.xlu1 %6806  ;;  %v14075_v9 = vpop.permute.xlu0 %6940 }
 0x6ce   : > { %v6882_v62 = vadd.f32 %v6807_v13, %v6754_v27  ;;  %v16497_v27 = vld [vmem:[#allocation84_spill] sm:$0xff] }
 0x6d1   : > { %v6935_v44 = vpop.permute.xlu1 %6934  ;;  %v6681_v51 = vpop.permute.xlu0 %6680 }
 0x6d2   : > { %v6755_v50 = vadd.f32 %v6681_v51, %v16489_v41  ;;  %v7010_v46 = vadd.f32 %v6935_v44, %v6882_v62  ;;  %v7060_v51 = vadd.f32 %v7059_v2, %v7058_v18  ;;  %v16499_v18 = vld [vmem:[#allocation71_spill] sm:$0xff] }
 0x6d4   : > { %v7061_v13 = vsel %vm16493_vm13, %v7010_v46, 0.0  ;;  %vm16518_vm13 = vmmov %vm16514_vm4 }
 0x6d5   : > { %v6809_v55 = vpop.permute.xlu0 %6808  ;;  %v14088_v43 = vpop.permute.xlu1 %6690  ;;  %v7062_v48 = vadd.f32 %v7061_v13, %v7060_v51 }
 0x6d6   : > { %v6883_v52 = vadd.f32 %v6809_v55, %v6755_v50  ;;  %v7012_v55 = vadd.f32 %v14054_v60, %v6884_v30 }
 0x6d8   : > { %v7065_v62 = vsel %vm16498_vm8, %v7012_v55, 0.0  ;;  %vm16520_vm8 = vmmov %vm16514_vm4 }
 0x6d9   : > { %v6937_v49 = vpop.permute.xlu0 %6936  ;;  %v14099_v20 = vpop.permute.xlu1 %6818 }
 0x6da   : > { %v7011_v36 = vadd.f32 %v6937_v49, %v6883_v52  ;;  %v16495_v49 = vld [vmem:[#allocation54_spill] sm:$0xff] }
 0x6db   : > { %v6757_v61 = vadd.f32 %v14056_v45, %v16495_v49 }
 0x6dc   : > { %v7063_v23 = vsel %vm16494_vm7, %v7011_v36, 0.0  ;;  %vm16519_vm7 = vmmov %vm16514_vm4 }
 0x6dd   : > { %v14105_v34 = vpop.permute.xlu1 %6946  ;;  %v6693_v0 = vpop.permute.xlu0 %6692  ;;  %v7064_v35 = vadd.f32 %v7063_v23, %v7062_v48  ;;  %v6885_v39 = vadd.f32 %v14064_v24, %v6757_v61  ;;  %v6760_v24 = vadd.f32 %v14088_v43, %v16499_v18  ;;  %v16503_v23 = vld [vmem:[#allocation49_spill] sm:$0xff] }
 0x6df   : > { %v7013_v50 = vadd.f32 %v14075_v9, %v6885_v39  ;;  %v7066_v60 = vadd.f32 %v7065_v62, %v7064_v35  ;;  %v6761_v9 = vadd.f32 %v6693_v0, %v16502_v32 }
 0x6e1   : > { %v6687_v17 = vpop.permute.xlu1 %6686  ;;  %v6821_v40 = vpop.permute.xlu0 %6820 }
 0x6e2   : > { %v6758_v19 = vadd.f32 %v6687_v17, %v16496_v47  ;;  %v7067_v17 = vsel %vm16400_vm0, %v7013_v50, 0.0  ;;  %vm16521_vm0 = vmmov %vm16514_vm4 }
 0x6e3   : > { %v7068_v36 = vadd.f32 %v7067_v17, %v7066_v60  ;;  %v16508_v60 = vld [vmem:[#allocation8_spill] sm:$0xff] }
 0x6e5   : > { %v6815_v38 = vpop.permute.xlu1 %6814  ;;  %v6949_v21 = vpop.permute.xlu0 %6948 }
 0x6e6   : > { %v6886_v5 = vadd.f32 %v6815_v38, %v6758_v19 }
 0x6e9   : > { %v6943_v58 = vpop.permute.xlu1 %6942  ;;  %v6689_v53 = vpop.permute.xlu0 %6688 }
 0x6ea   : > { %v6759_v12 = vadd.f32 %v6689_v53, %v16497_v27  ;;  %v7014_v28 = vadd.f32 %v6943_v58, %v6886_v5  ;;  %v6888_v53 = vadd.f32 %v14099_v20, %v6760_v24  ;;  %v16505_v20 = vld [vmem:[#allocation42_spill] sm:$0xff] }
 0x6ec   : > { %v7069_v38 = vsel %vm16500_vm9, %v7014_v28, 0.0  ;;  %v7016_v30 = vadd.f32 %v14105_v34, %v6888_v53  ;;  %v16507_v34 = vld [vmem:[#allocation96_spill] sm:$0xff]  ;;  %vm16522_vm9 = vmmov %vm16521_vm0 }
 0x6ed   : > { %v6817_v59 = vpop.permute.xlu0 %6816  ;;  %v6699_v44 = vpop.permute.xlu1 %6698  ;;  %v7070_v58 = vadd.f32 %v7069_v38, %v7068_v36 }
 0x6ee   : > { %v6887_v15 = vadd.f32 %v6817_v59, %v6759_v12  ;;  %v6889_v59 = vadd.f32 %v6821_v40, %v6761_v9  ;;  %v7073_v39 = vsel %vm16504_vm5, %v7016_v30, 0.0  ;;  %vm16524_vm5 = vmmov %vm16521_vm0 }
 0x6f0   : > { %v7017_v43 = vadd.f32 %v6949_v21, %v6889_v59 }
 0x6f1   : > { %v6945_v11 = vpop.permute.xlu0 %6944  ;;  %v6827_v54 = vpop.permute.xlu1 %6826 }
 0x6f2   : > { %v7015_v46 = vadd.f32 %v6945_v11, %v6887_v15  ;;  %v7075_v62 = vsel %vm16506_vm15, %v7017_v43, 0.0  ;;  %v6764_v15 = vadd.f32 %v6699_v44, %v16507_v34  ;;  %vm16525_vm15 = vmmov %vm16521_vm0 }
 0x6f4   : > { %v7071_v2 = vsel %vm16501_vm12, %v7015_v46, 0.0  ;;  %v6892_v17 = vadd.f32 %v6827_v54, %v6764_v15  ;;  %vm16523_vm12 = vmmov %vm16521_vm0 }
 0x6f5   : > { %v6695_v52 = vpop.permute.xlu1 %6694  ;;  %v6701_v45 = vpop.permute.xlu0 %6700  ;;  %v7072_v55 = vadd.f32 %v7071_v2, %v7070_v58 }
 0x6f6   : > { %v6762_v48 = vadd.f32 %v6695_v52, %v16503_v23  ;;  %v6765_v40 = vadd.f32 %v6701_v45, %v16508_v60 }
 0x6f7   : > { %v7074_v11 = vadd.f32 %v7073_v39, %v7072_v55  ;;  %v7096_v39 = vld [vmem:[%s15056_s6] sm:$0x1] }
 0x6f9   : > { %v6823_v13 = vpop.permute.xlu1 %6822  ;;  %v6697_v51 = vpop.permute.xlu0 %6696  ;;  %v7076_v52 = vadd.f32 %v7075_v62, %v7074_v11  ;;  %v7175_v62 = vld [vmem:[%s15058_s8] sm:$0x1] }
 0x6fa   : > { %v6890_v61 = vadd.f32 %v6823_v13, %v6762_v48  ;;  %v6763_v5 = vadd.f32 %v6697_v51, %v16505_v20 }
 0x6fd   : > { %v6951_v19 = vpop.permute.xlu1 %6950  ;;  %v6825_v35 = vpop.permute.xlu0 %6824 }
 0x6fe   : > { %v7018_v12 = vadd.f32 %v6951_v19, %v6890_v61  ;;  %v6891_v0 = vadd.f32 %v6825_v35, %v6763_v5  ;;  %v10512_v35 = vld [vmem:[%s10742_s24 + $0x18] sm:$0xff] }
 0x700   : > { %v7077_v46 = vsel %vm16509_vm10, %v7018_v12, 0.0  ;;  %vm16526_vm10 = vmmov %vm16521_vm0 }
 0x701   : > { %v6829_v50 = vpop.permute.xlu1 %6828  ;;  %v6953_v28 = vpop.permute.xlu0 %6952  ;;  %v7078_v36 = vadd.f32 %v7077_v46, %v7076_v52 }
 0x702   : > { %v7019_v21 = vadd.f32 %v6953_v28, %v6891_v0  ;;  %v6893_v24 = vadd.f32 %v6829_v50, %v6765_v40 }
 0x704   : > { %v7079_v38 = vsel %vm16510_vm14, %v7019_v21, 0.0  ;;  %vm16527_vm14 = vmmov %vm16521_vm0 }
 0x705   : > { %v6957_v53 = vpop.permute.xlu1 %6956  ;;  %v6955_v2 = vpop.permute.xlu0 %6954  ;;  %v7080_v13 = vadd.f32 %v7079_v38, %v7078_v36 }
 0x706   : > { %v7021_v9 = vadd.f32 %v6957_v53, %v6893_v24  ;;  %v7020_v58 = vadd.f32 %v6955_v2, %v6892_v17 }
 0x708   : > { %v7081_v51 = vsel %vm16511_vm11, %v7020_v58, 0.0  ;;  %v7083_v45 = vsel %vm16512_vm6, %v7021_v9, 0.0  ;;  %vm16528_vm11 = vmmov %vm16521_vm0 }
 0x709   : > { %v7082_v44 = vadd.f32 %v7081_v51, %v7080_v13  ;;  %vm16529_vm6 = vmmov %vm16521_vm0 }
 0x70b   : > { %v7084_v30 = vadd.f32 %v7083_v45, %v7082_v44 }
 0x70d   : > { %v7085_v48 = vrot.slane %v7084_v30, 4 }
 0x70f   : > { %v7086_v59 = vadd.f32 %v7085_v48, %v7084_v30 }
 0x711   : > { %v7087_v55 = vrot.slane %v7086_v59, 2 }
 0x713   : > { %v7088_v54 = vadd.f32 %v7087_v55, %v7086_v59 }
 0x715   : > { %v7089_v61 = vrot.slane %v7088_v54, 1 }
 0x717   : > { %v7090_v43 = vadd.f32 %v7089_v61, %v7088_v54 }
 0x719   : > { %v7091_v19 = vmul.f32 0.00390625, %v7090_v43 }
 0x71b   : > { %9836 = vmatmul.mubr.msk.f32.vlgmr.msra.gmra.mrb[32].mxu0 %vm16513_vm1, %v7091_v19  ;;  %vm16530_vm1 = vmmov %vm16521_vm0 }
 0x71c   : > { %9851 = vmatprep.mubr.msk.f32.mxu0 %vm16514_vm4, %v10512_v35  ;;  %vm16531_vm4 = vmmov %vm16521_vm0 }
 0x7ee   : > { %v7166_v5 = vpop.f32.mrb[32].mxu0 }
 0x7ef   : > { %v7167_v12 = vadd.f32 %v7166_v5, %v7096_v39  ;;  %v9837_v11 = vpop.f32.mrb[33].mxu0 }
 0x7f1   : > { %v7170_v0 = vmax.f32 %v7167_v12, 0.0 }
 0x7f3   : > { %9847 = vmatmul.mubr.msk.f32.vlgmr.msra.gmra.mrb[48].mxu1 %vm16515_vm3, %v7170_v0  ;;  %v7970_v0 = vld [vmem:[%s15059_s9] sm:$0xf]  ;;  %vm16532_vm3 = vmmov %vm16521_vm0 }
 0x7f4   : > { %9849 = vmatprep.subr.msk.mxu0 %vm8042_vm2, %v7970_v0 }
 0x7f5   : > { %9850 = vmatpush3.msk.msra.mxu0 %vm8042_vm2, %v7970_v0  ;;  %vm16533_vm2 = vmmov %vm16521_vm0  ;;  %v10542_v0 = vld [vmem:[%s10742_s24 + $0x108] sm:$0xff] }
 0x8c6   : > { %v7245_v50 = vpop.f32.mrb[48].mxu1 }
 0x8c7   : > { %v7246_v28 = vadd.f32 %v7245_v50, %v7175_v62  ;;  %v9848_v15 = vpop.f32.mrb[49].mxu1  ;;  %v10513_v62 = vld [vmem:[%s10742_s24 + $0x20] sm:$0xff]  ;;  %v10514_v50 = vld [vmem:[%s10742_s24 + $0x28] sm:$0xff] }
 0x8c8   : > { %9852 = vmatmul.mubr.msk.f32.vlgmr.msra.gmra.mrb[34].mxu0 %vm16518_vm13, %v10513_v62  ;;  %v10516_v15 = vld [vmem:[%s10742_s24 + $0x38] sm:$0xff]  ;;  %vm16534_vm13 = vmmov %vm16521_vm0  ;;  %v10543_v62 = vld [vmem:[%s10742_s24 + $0x110] sm:$0xff] }
 0x8c9   : > { %7254 = vrot.lane.b32.xlu1 %v7246_v28, %s10609_s25  ;;  %7250 = vrot.lane.b32.xlu0 %v7246_v28, %s16516_s16 }
 0x8ca   : > { %9854 = vmatprep.mubr.msk.f32.mxu0 %vm16519_vm7, %v10514_v50  ;;  %vm16535_vm7 = vmmov %vm16521_vm0 }
 0x8cd   : > { %7258 = vrot.lane.b32.xlu0 %v7246_v28, %s16517_s22 }
 0x93b   : > { %v7251_v40 = vpop.permute.xlu0 %7250  ;;  %v7255_v21 = vpop.permute.xlu1 %7254 }
 0x93c   : > { %v7253_v46 = vmax.f32 %v7246_v28, %v7251_v40  ;;  %v10517_v40 = vld [vmem:[%s10742_s24 + $0x40] sm:$0xff] }
 0x93e   : > { %v7257_v52 = vmax.f32 %v7253_v46, %v7255_v21  ;;  %v10518_v46 = vld [vmem:[%s10742_s24 + $0x48] sm:$0xff]  ;;  %v10519_v21 = vld [vmem:[%s10742_s24 + $0x50] sm:$0xff] }
 0x93f   : > { %v7259_v17 = vpop.permute.xlu0 %7258 }
 0x940   : > { %v7261_v24 = vmax.f32 %v7257_v52, %v7259_v17  ;;  %v10520_v52 = vld [vmem:[%s10742_s24 + $0x58] sm:$0xff]  ;;  %v10521_v17 = vld [vmem:[%s10742_s24 + $0x60] sm:$0xff] }
 0x942   : > { %7272 = vrot.lane.b32.xlu0 %v7261_v24, %s10609_s25  ;;  %7266 = vrot.lane.b32.xlu1 %v7261_v24, %s16517_s22  ;;  %v7262_v59 = vsub.f32 %v7246_v28, %v7261_v24 }
 0x944   : > { %v7263_v55 = vmul.f32 1.442695, %v7262_v59  ;;  %v10532_v59 = vld [vmem:[%s10742_s24 + $0xb8] sm:$0xff] }
 0x946   : > { %7278 = vrot.lane.b32.xlu1 %v7261_v24, %s16516_s16  ;;  %v10522_v24 = vld [vmem:[%s10742_s24 + $0x68] sm:$0xff] }
 0x9b4   : > { %v7273_v38 = vpop.permute.xlu0 %7272  ;;  %v7267_v36 = vpop.permute.xlu1 %7266 }
 0x9b5   : > { %v7275_v53 = vsub.f32 %v7246_v28, %v7273_v38  ;;  %v7269_v2 = vsub.f32 %v7246_v28, %v7267_v36  ;;  %v10523_v38 = vld [vmem:[%s10742_s24 + $0x70] sm:$0xff]  ;;  %v10524_v36 = vld [vmem:[%s10742_s24 + $0x78] sm:$0xff] }
 0x9b7   : > { %v7276_v9 = vmul.f32 1.442695, %v7275_v53  ;;  %v7270_v58 = vmul.f32 1.442695, %v7269_v2  ;;  %v10525_v53 = vld [vmem:[%s10742_s24 + $0x80] sm:$0xff]  ;;  %v10526_v2 = vld [vmem:[%s10742_s24 + $0x88] sm:$0xff] }
 0x9b8   : > { %v7279_v13 = vpop.permute.xlu1 %7278 }
 0x9b9   : > { %10501 = vpow2.f32 %v7276_v9  ;;  %v7281_v51 = vsub.f32 %v7246_v28, %v7279_v13  ;;  %v10515_v28 = vld [vmem:[%s10742_s24 + $0x30] sm:$0xff]  ;;  %v10529_v13 = vld [vmem:[%s10742_s24 + $0xa0] sm:$0xff] }
 0x9ba   : > { %10503 = vpow2.f32 %v7270_v58  ;;  %9855 = vmatmul.mubr.msk.f32.gmra.mrb[36].mxu0 %vm16520_vm8, %v10515_v28  ;;  %v10527_v9 = vld [vmem:[%s10742_s24 + $0x90] sm:$0xff]  ;;  %v10528_v58 = vld [vmem:[%s10742_s24 + $0x98] sm:$0xff]  ;;  %vm16536_vm8 = vmmov %vm16521_vm0 }
 0x9bb   : > { %v7282_v44 = vmul.f32 1.442695, %v7281_v51  ;;  %9857 = vmatprep.mubr.msk.f32.mxu0 %vm16521_vm0, %v10516_v15  ;;  %v10530_v51 = vld [vmem:[%s10742_s24 + $0xa8] sm:$0xff]  ;;  %v16548_v28 = vld [vmem:[#allocation6_spill] sm:$0xff] }
 0x9bc   : > { %v14252_v15 = vsub.s32 0, %v16548_v28 }
 0x9bd   : > { %10505 = vpow2.f32 %v7282_v44  ;;  %v10531_v44 = vld [vmem:[%s10742_s24 + $0xb0] sm:$0xff] }
 0x9be   : > { %10507 = vpow2.f32 %v7263_v55  ;;  %9858 = vmatmul.mubr.msk.f32.gmra.mrb[38].mxu0 %vm16522_vm9, %v10517_v40  ;;  %v10533_v55 = vld [vmem:[%s10742_s24 + $0xc0] sm:$0xff]  ;;  %vm16537_vm9 = vmmov %vm16521_vm0 }
 0x9bf   : > { %9860 = vmatprep.mubr.msk.f32.mxu0 %vm16523_vm12, %v10518_v46  ;;  %vm16538_vm12 = vmmov %vm16521_vm0 }
 0x9c2   : > { %9861 = vmatmul.mubr.msk.f32.gmra.mrb[40].mxu0 %vm16524_vm5, %v10519_v21  ;;  %vm16539_vm5 = vmmov %vm16521_vm0  ;;  %v16549_v21 = vld [vmem:[#allocation39_spill] sm:$0xff] }
 0x9c3   : > { %v14169_v45 = vpop.eup %10501  ;;  %9863 = vmatprep.mubr.msk.f32.mxu0 %vm16525_vm15, %v10520_v52  ;;  %vm16540_vm15 = vmmov %vm16521_vm0 }
 0x9c4   : > { %v14171_v30 = vpop.eup %10503  ;;  %7290 = vrot.lane.b32.xlu1 %v14169_v45, %s10609_s25 }
 0x9c5   : > { %7285 = vrot.lane.b32.xlu0 %v14171_v30, %s16516_s16 }
 0x9c6   : > { %9864 = vmatmul.mubr.msk.f32.gmra.mrb[42].mxu0 %vm16526_vm10, %v10521_v17  ;;  %vm16541_vm10 = vmmov %vm16521_vm0 }
 0x9c7   : > { %v14177_v48 = vpop.eup %10505  ;;  %9866 = vmatprep.mubr.msk.f32.mxu0 %vm16527_vm14, %v10522_v24  ;;  %vm16542_vm14 = vmmov %vm16521_vm0 }
 0x9c8   : > { %v10508_v54 = vpop.eup %10507 }
 0x9c9   : > { %7295 = vrot.lane.b32.xlu0 %v14177_v48, %s16517_s22 }
 0x9ca   : > { %9867 = vmatmul.mubr.msk.f32.gmra.mrb[44].mxu0 %vm16528_vm11, %v10523_v38  ;;  %vm16543_vm11 = vmmov %vm16521_vm0  ;;  %v16550_v38 = vld [vmem:[#allocation92_spill] sm:$0xff] }
 0x9cb   : > { %9869 = vmatprep.mubr.msk.f32.mxu0 %vm16529_vm6, %v10524_v36  ;;  %vm16544_vm6 = vmmov %vm16521_vm0 }
 0x9ce   : > { %9870 = vmatmul.mubr.msk.f32.gmra.mrb[46].mxu0 %vm16530_vm1, %v10525_v53  ;;  %vm16545_vm1 = vmmov %vm16521_vm0 }
 0x9cf   : > { %9872 = vmatprep.mubr.msk.f32.mxu0 %vm16531_vm4, %v10526_v2  ;;  %vm16546_vm4 = vmmov %vm16521_vm0 }
 0x9d2   : > { %9873 = vmatmul.mubr.msk.f32.gmra.mrb[48].mxu0 %vm16532_vm3, %v10527_v9  ;;  %vm16547_vm3 = vmmov %vm16521_vm0 }
 0x9d3   : > { %9875 = vmatprep.mubr.msk.f32.mxu0 %vm16533_vm2, %v10528_v58  ;;  %vm16596_vm2 = vcmask 261120  }
 0x9d6   : > { %9876 = vmatmul.mubr.msk.f32.gmra.mrb[50].mxu0 %vm16534_vm13, %v10529_v13  ;;  %vm16597_vm13 = vmmov %vm16596_vm2 }
 0x9d7   : > { %9878 = vmatprep.mubr.msk.f32.mxu0 %vm16535_vm7, %v10530_v51  ;;  %vm16598_vm7 = vmmov %vm16596_vm2 }
 0x9da   : > { %9879 = vmatmul.mubr.msk.f32.gmra.mrb[52].mxu0 %vm16536_vm8, %v10531_v44  ;;  %vm16599_vm8 = vmmov %vm16596_vm2 }
 0x9db   : > { %9881 = vmatprep.mubr.msk.f32.mxu0 %vm16521_vm0, %v10532_v59  ;;  %vm16600_vm0 = vmmov %vm16596_vm2 }
 0x9de   : > { %9882 = vmatmul.mubr.msk.f32.gmra.mrb[54].mxu0 %vm16537_vm9, %v10533_v55  ;;  %vm16601_vm9 = vmmov %vm16600_vm0 }
 0xa36   : > { %v7291_v19 = vpop.permute.xlu1 %7290 }
 0xa37   : > { %v7286_v61 = vpop.permute.xlu0 %7285 }
 0xa38   : > { %v7288_v43 = vadd.f32 %v10508_v54, %v7286_v61  ;;  %v10535_v61 = vld [vmem:[%s10742_s24 + $0xd0] sm:$0xff] }
 0xa3a   : > { %v7293_v35 = vadd.f32 %v7291_v19, %v7288_v43  ;;  %v10536_v43 = vld [vmem:[%s10742_s24 + $0xd8] sm:$0xff]  ;;  %v10537_v19 = vld [vmem:[%s10742_s24 + $0xe0] sm:$0xff] }
 0xa3b   : > { %v7296_v39 = vpop.permute.xlu0 %7295 }
 0xa3c   : > { %v7298_v5 = vadd.f32 %v7296_v39, %v7293_v35  ;;  %v10538_v35 = vld [vmem:[%s10742_s24 + $0xe8] sm:$0xff]  ;;  %v10539_v39 = vld [vmem:[%s10742_s24 + $0xf0] sm:$0xff] }
 0xa3e   : > { %10509 = vrcp.f32 %v7298_v5  ;;  %v10540_v5 = vld [vmem:[%s10742_s24 + $0xf8] sm:$0xff] }
 0xa48   : > { %v10510_v12 = vpop.eup %10509 }
 0xa49   : > { %v14181_v11 = vmul.f32 %v10510_v12, %v10508_v54  ;;  %7538 = vrot.lane.b32.xlu0 %v10510_v12, %s10609_s25  ;;  %7338 = vrot.lane.b32.xlu1 %v10510_v12, %s16517_s22  ;;  %v10534_v54 = vld [vmem:[%s10742_s24 + $0xc8] sm:$0xff] }
 0xa4a   : > { %9884 = vmatprep.mubr.msk.f32.mxu0 %vm16538_vm12, %v10534_v54  ;;  %vm16602_vm12 = vmmov %vm16600_vm0 }
 0xa4b   : > { %9885 = vmatmul.mubr.msk.f32.gmra.mrb[56].mxu0 %vm16539_vm5, %v10535_v61  ;;  %vm16603_vm5 = vmmov %vm16600_vm0 }
 0xa4c   : > { %9887 = vmatprep.mubr.msk.f32.mxu0 %vm16540_vm15, %v10536_v43  ;;  %vm16604_vm15 = vmmov %vm16600_vm0 }
 0xa4d   : > { %7738 = vrot.lane.b32.xlu1 %v10510_v12, %s16516_s16  ;;  %v10541_v12 = vld [vmem:[%s10742_s24 + $0x100] sm:$0xff] }
 0xa4f   : > { %9888 = vmatmul.mubr.msk.f32.gmra.mrb[58].mxu0 %vm16541_vm10, %v10537_v19  ;;  %vm16605_vm10 = vmmov %vm16600_vm0 }
 0xa50   : > { %9890 = vmatprep.mubr.msk.f32.mxu0 %vm16542_vm14, %v10538_v35  ;;  %vm16607_vm14 = vmmov %vm16600_vm0 }
 0xa53   : > { %9891 = vmatmul.mubr.msk.f32.gmra.mrb[60].mxu0 %vm16543_vm11, %v10539_v39  ;;  %vm16608_vm11 = vmmov %vm16600_vm0 }
 0xa54   : > { %9893 = vmatprep.mubr.msk.f32.mxu0 %vm16544_vm6, %v10540_v5  ;;  %vm16611_vm6 = vmmov %vm16600_vm0 }
 0xa57   : > { %9894 = vmatmul.mubr.msk.f32.gmra.mrb[62].mxu0 %vm16545_vm1, %v10541_v12  ;;  %vm16612_vm1 = vmmov %vm16600_vm0 }
 0xa58   : > { %9896 = vmatprep.mubr.msk.f32.mxu0 %vm16546_vm4, %v10542_v0  ;;  %vm16619_vm4 = vmmov %vm16600_vm0 }
 0xa5b   : > { %9897 = vmatmul.mubr.msk.f32.gmra.mrb[64].mxu0 %vm16547_vm3, %v10543_v62  ;;  %vm16620_vm3 = vmmov %vm16600_vm0 }
 0xabb   : > { %v7339_v50 = vpop.permute.xlu1 %7338 }
 0xabc   : > { %v7341_v40 = vmul.f32 %v14171_v30, %v7339_v50 }
 0xabe   : > { %v14256_v46 = vrot.slane %v7341_v40, %v14252_v15 }
 0xac0   : > { %v7347_v52 = vmul.f32 %v14256_v46, %v16549_v21  ;;  %v7346_v17 = vmul.f32 %v14256_v46, %v13509_v37  ;;  %v7349_v24 = vmul.f32 %v14256_v46, %v13516_v25  ;;  %v7348_v36 = vmul.f32 %v14256_v46, %v16550_v38 }
 0xac1   : > { %v7351_v30 = vmul.f32 %v14256_v46, %v13598_v6  ;;  %v7350_v53 = vmul.f32 %v14256_v46, %v13575_v56  ;;  %v7353_v2 = vmul.f32 %v14256_v46, %v13563_v63  ;;  %v7352_v9 = vmul.f32 %v14256_v46, %v13539_v14 }
 0xac2   : > { %7412 = vrot.lane.b32.xlu1 %v7347_v52, %s16516_s16  ;;  %7410 = vrot.lane.b32.xlu0 %v7346_v17, %s16516_s16  ;;  %v7355_v58 = vmul.f32 %v14256_v46, %v13665_v29  ;;  %v7354_v13 = vmul.f32 %v14256_v46, %v13648_v33  ;;  %v7357_v51 = vmul.f32 %v14256_v46, %v13636_v42  ;;  %v7539_v17 = vpop.permute.xlu0 %7538 }
 0xac3   : > { %v7356_v44 = vmul.f32 %v14256_v46, %v13611_v8  ;;  %v7359_v59 = vmul.f32 %v14256_v46, %v13701_v31  ;;  %v7358_v55 = vmul.f32 %v14256_v46, %v13690_v57  ;;  %v7361_v54 = vmul.f32 %v14256_v46, %v16475_v4 }
 0xac4   : > { %v7360_v61 = vmul.f32 %v14256_v46, %v16469_v26  ;;  %v7363_v43 = vmul.f32 %v14256_v46, %v16479_v10  ;;  %v7362_v19 = vmul.f32 %v14256_v46, %v16477_v1  ;;  %v7365_v35 = vmul.f32 %v14256_v46, %v16487_v16 }
 0xac5   : > { %v7364_v39 = vmul.f32 %v14256_v46, %v16483_v3  ;;  %v7367_v5 = vmul.f32 %v14256_v46, %v16489_v41  ;;  %v7366_v12 = vmul.f32 %v14256_v46, %v16488_v22  ;;  %v7369_v0 = vmul.f32 %v14256_v46, %v16495_v49 }
 0xac6   : > { %7416 = vrot.lane.b32.xlu1 %v7349_v24, %s16516_s16  ;;  %7414 = vrot.lane.b32.xlu0 %v7348_v36, %s16516_s16  ;;  %v7368_v62 = vmul.f32 %v14256_v46, %v16492_v7  ;;  %v7371_v50 = vmul.f32 %v14256_v46, %v16497_v27  ;;  %v7370_v28 = vmul.f32 %v14256_v46, %v16496_v47 }
 0xac7   : > { %v7373_v40 = vmul.f32 %v14256_v46, %v16502_v32  ;;  %v7372_v52 = vmul.f32 %v14256_v46, %v16499_v18  ;;  %v7541_v24 = vmul.f32 %v14169_v45, %v7539_v17  ;;  %v7375_v36 = vmul.f32 %v14256_v46, %v16505_v20 }
 0xaca   : > { %7420 = vrot.lane.b32.xlu1 %v7351_v30, %s16516_s16  ;;  %7418 = vrot.lane.b32.xlu0 %v7350_v53, %s16516_s16  ;;  %v7374_v30 = vmul.f32 %v14256_v46, %v16503_v23  ;;  %v14350_v53 = vrot.slane %v7541_v24, %v14252_v15 }
 0xacc   : > { %v7547_v45 = vmul.f32 %v14350_v53, %v16549_v21  ;;  %v7569_v17 = vmul.f32 %v14350_v53, %v16495_v49  ;;  %v7568_v24 = vmul.f32 %v14350_v53, %v16492_v7 }
 0xace   : > { %7424 = vrot.lane.b32.xlu1 %v7353_v2, %s16516_s16  ;;  %7422 = vrot.lane.b32.xlu0 %v7352_v9, %s16516_s16  ;;  %v7377_v2 = vmul.f32 %v14256_v46, %v16508_v60  ;;  %v7376_v9 = vmul.f32 %v14256_v46, %v16507_v34  ;;  %v7548_v46 = vmul.f32 %v14350_v53, %v16550_v38 }
 0xad2   : > { %7428 = vrot.lane.b32.xlu1 %v7355_v58, %s16516_s16  ;;  %7426 = vrot.lane.b32.xlu0 %v7354_v13, %s16516_s16  ;;  %v7546_v58 = vmul.f32 %v14350_v53, %v13509_v37  ;;  %v7549_v13 = vmul.f32 %v14350_v53, %v13516_v25 }
 0xad6   : > { %7432 = vrot.lane.b32.xlu1 %v7357_v51, %s16516_s16  ;;  %7430 = vrot.lane.b32.xlu0 %v7356_v44, %s16516_s16  ;;  %v7551_v51 = vmul.f32 %v14350_v53, %v13598_v6  ;;  %v7550_v44 = vmul.f32 %v14350_v53, %v13575_v56 }
 0xada   : > { %7436 = vrot.lane.b32.xlu1 %v7359_v59, %s16516_s16  ;;  %7434 = vrot.lane.b32.xlu0 %v7358_v55, %s16516_s16  ;;  %v7553_v59 = vmul.f32 %v14350_v53, %v13563_v63  ;;  %v7552_v55 = vmul.f32 %v14350_v53, %v13539_v14 }
 0xade   : > { %7440 = vrot.lane.b32.xlu1 %v7361_v54, %s16516_s16  ;;  %7438 = vrot.lane.b32.xlu0 %v7360_v61, %s16516_s16  ;;  %v7555_v54 = vmul.f32 %v14350_v53, %v13665_v29  ;;  %v7554_v61 = vmul.f32 %v14350_v53, %v13648_v33 }
 0xae2   : > { %7444 = vrot.lane.b32.xlu1 %v7363_v43, %s16516_s16  ;;  %7442 = vrot.lane.b32.xlu0 %v7362_v19, %s16516_s16  ;;  %v7557_v43 = vmul.f32 %v14350_v53, %v13636_v42  ;;  %v7556_v19 = vmul.f32 %v14350_v53, %v13611_v8 }
 0xae6   : > { %7448 = vrot.lane.b32.xlu1 %v7365_v35, %s16516_s16  ;;  %7446 = vrot.lane.b32.xlu0 %v7364_v39, %s16516_s16  ;;  %v7559_v35 = vmul.f32 %v14350_v53, %v13701_v31  ;;  %v7558_v39 = vmul.f32 %v14350_v53, %v13690_v57 }
 0xaea   : > { %7452 = vrot.lane.b32.xlu1 %v7367_v5, %s16516_s16  ;;  %7450 = vrot.lane.b32.xlu0 %v7366_v12, %s16516_s16  ;;  %v7561_v5 = vmul.f32 %v14350_v53, %v16475_v4  ;;  %v7560_v12 = vmul.f32 %v14350_v53, %v16469_v26 }
 0xaee   : > { %7456 = vrot.lane.b32.xlu1 %v7369_v0, %s16516_s16  ;;  %7454 = vrot.lane.b32.xlu0 %v7368_v62, %s16516_s16  ;;  %v7563_v0 = vmul.f32 %v14350_v53, %v16479_v10  ;;  %v7562_v62 = vmul.f32 %v14350_v53, %v16477_v1 }
 0xaf2   : > { %7460 = vrot.lane.b32.xlu1 %v7371_v50, %s16516_s16  ;;  %7458 = vrot.lane.b32.xlu0 %v7370_v28, %s16516_s16  ;;  %v7565_v50 = vmul.f32 %v14350_v53, %v16487_v16  ;;  %v7564_v28 = vmul.f32 %v14350_v53, %v16483_v3 }
 0xaf6   : > { %7464 = vrot.lane.b32.xlu1 %v7373_v40, %s16516_s16  ;;  %7462 = vrot.lane.b32.xlu0 %v7372_v52, %s16516_s16  ;;  %v7567_v40 = vmul.f32 %v14350_v53, %v16489_v41  ;;  %v7566_v52 = vmul.f32 %v14350_v53, %v16488_v22 }
 0xafa   : > { %7468 = vrot.lane.b32.xlu1 %v7375_v36, %s16516_s16  ;;  %7466 = vrot.lane.b32.xlu0 %v7374_v30, %s16516_s16  ;;  %v14432_v36 = vrot.slane %v14181_v11, %v14252_v15  ;;  %v7739_v30 = vpop.permute.xlu1 %7738 }
 0xafe   : > { %7472 = vrot.lane.b32.xlu1 %v7377_v2, %s16516_s16  ;;  %7470 = vrot.lane.b32.xlu0 %v7376_v9, %s16516_s16  ;;  %v7571_v2 = vmul.f32 %v14350_v53, %v16497_v27  ;;  %v7570_v9 = vmul.f32 %v14350_v53, %v16496_v47  ;;  %s8381_s16 = sshll.u32 %s14828_s14, 4  ;;  %s15001_s16 = int_to_ptr.vmem [resolvable:$true] %s8381_s16 }
 0xaff   : > { %s10544_s24 = scalar_lea.vmem %s15001_s16, 4096 }
 0xb00   : > { %p10545_p11 = scmp.ne.s32.totalorder %s15001_s16, %s10544_s24 }
 0xb02   : > { %7612 = vrot.lane.b32.xlu1 %v7547_v45, %s10609_s25  ;;  %7610 = vrot.lane.b32.xlu0 %v7546_v58, %s10609_s25  ;;  %v7305_v45 = vmul.f32 %v14432_v36, %v13509_v37  ;;  %v7306_v58 = vmul.f32 %v14432_v36, %v16549_v21  ;;  %p10546_p12 = pnand %p10545_p11, %p10715_p5 }
 0xb04   : > { %p10547_p13 = pneg %p10546_p12 }
 0xb06   : > { %7616 = vrot.lane.b32.xlu1 %v7549_v13, %s10609_s25  ;;  %7614 = vrot.lane.b32.xlu0 %v7548_v46, %s10609_s25  ;;  %v7573_v46 = vmul.f32 %v14350_v53, %v16502_v32 }
 0xb0a   : > { %7620 = vrot.lane.b32.xlu1 %v7551_v51, %s10609_s25  ;;  %7618 = vrot.lane.b32.xlu0 %v7550_v44, %s10609_s25  ;;  %v7572_v51 = vmul.f32 %v14350_v53, %v16499_v18 }
 0xb0e   : > { %7624 = vrot.lane.b32.xlu1 %v7553_v59, %s10609_s25  ;;  %7622 = vrot.lane.b32.xlu0 %v7552_v55, %s10609_s25  ;;  %v7307_v55 = vmul.f32 %v14432_v36, %v16550_v38 }
 0xb12   : > { %7628 = vrot.lane.b32.xlu1 %v7555_v54, %s10609_s25  ;;  %7626 = vrot.lane.b32.xlu0 %v7554_v61, %s10609_s25  ;;  %v7308_v54 = vmul.f32 %v14432_v36, %v13516_v25  ;;  %v14458_v61 = vpop.f32.mrb[34].mxu0 }
 0xb16   : > { %7632 = vrot.lane.b32.xlu1 %v7557_v43, %s10609_s25  ;;  %7630 = vrot.lane.b32.xlu0 %v7556_v19, %s10609_s25  ;;  %v7741_v43 = vmul.f32 %v14177_v48, %v7739_v30  ;;  %v7310_v48 = vmul.f32 %v14432_v36, %v13598_v6 }
 0xb1a   : > { %7636 = vrot.lane.b32.xlu1 %v7559_v35, %s10609_s25  ;;  %7634 = vrot.lane.b32.xlu0 %v7558_v39, %s10609_s25  ;;  %v7575_v39 = vmul.f32 %v14350_v53, %v16505_v20 }
 0xb1e   : > { %7640 = vrot.lane.b32.xlu1 %v7561_v5, %s10609_s25  ;;  %7638 = vrot.lane.b32.xlu0 %v7560_v12, %s10609_s25  ;;  %v7574_v5 = vmul.f32 %v14350_v53, %v16503_v23 }
 0xb22   : > { %7644 = vrot.lane.b32.xlu1 %v7563_v0, %s10609_s25  ;;  %7642 = vrot.lane.b32.xlu0 %v7562_v62, %s10609_s25  ;;  %v7309_v62 = vmul.f32 %v14432_v36, %v13575_v56 }
 0xb26   : > { %7648 = vrot.lane.b32.xlu1 %v7565_v50, %s10609_s25  ;;  %7646 = vrot.lane.b32.xlu0 %v7564_v28, %s10609_s25  ;;  %v14476_v50 = vrot.slane %v7741_v43, %v14252_v15  ;;  %v7313_v43 = vmul.f32 %v14432_v36, %v13648_v33 }
 0xb2a   : > { %7652 = vrot.lane.b32.xlu1 %v7567_v40, %s10609_s25  ;;  %7650 = vrot.lane.b32.xlu0 %v7566_v52, %s10609_s25  ;;  %v7577_v52 = vmul.f32 %v14350_v53, %v16508_v60 }
 0xb2e   : > { %7656 = vrot.lane.b32.xlu1 %v7569_v17, %s10609_s25  ;;  %7654 = vrot.lane.b32.xlu0 %v7568_v24, %s10609_s25  ;;  %v7576_v17 = vmul.f32 %v14350_v53, %v16507_v34 }
 0xb32   : > { %7660 = vrot.lane.b32.xlu1 %v7571_v2, %s10609_s25  ;;  %7658 = vrot.lane.b32.xlu0 %v7570_v9, %s10609_s25  ;;  %v14486_v2 = vpop.f32.mrb[35].mxu0  ;;  %v7311_v9 = vmul.f32 %v14432_v36, %v13539_v14 }
 0xb33   : > { %v14490_v15 = vpop.f32.mrb[36].mxu0 }
 0xb34   : > { %v7411_v13 = vpop.permute.xlu0 %7410  ;;  %v7413_v11 = vpop.permute.xlu1 %7412 }
 0xb35   : > { %v14448_v44 = vadd.f32 %v7411_v13, %v7305_v45  ;;  %v14450_v59 = vadd.f32 %v7413_v11, %v7306_v58  ;;  %v7312_v45 = vmul.f32 %v14432_v36, %v13563_v63  ;;  %v7747_v13 = vmul.f32 %v14476_v50, %v16549_v21 }
 0xb36   : > { %7664 = vrot.lane.b32.xlu1 %v7573_v46, %s10609_s25  ;;  %7662 = vrot.lane.b32.xlu0 %v7572_v51, %s10609_s25  ;;  %v7746_v11 = vmul.f32 %v14476_v50, %v13509_v37  ;;  %v7314_v21 = vmul.f32 %v14432_v36, %v13665_v29 }
 0xb38   : > { %v7415_v19 = vpop.permute.xlu0 %7414  ;;  %v7417_v35 = vpop.permute.xlu1 %7416 }
 0xb39   : > { %v14465_v12 = vadd.f32 %v7415_v19, %v7307_v55  ;;  %v14467_v0 = vadd.f32 %v7417_v35, %v7308_v54  ;;  %v14504_v55 = vpop.f32.mrb[37].mxu0  ;;  %v7749_v35 = vmul.f32 %v14476_v50, %v13516_v25  ;;  %v7316_v25 = vmul.f32 %v14432_v36, %v13636_v42 }
 0xb3a   : > { %7668 = vrot.lane.b32.xlu1 %v7575_v39, %s10609_s25  ;;  %7666 = vrot.lane.b32.xlu0 %v7574_v5, %s10609_s25  ;;  %v14508_v54 = vpop.f32.mrb[38].mxu0  ;;  %v7748_v39 = vmul.f32 %v14476_v50, %v16550_v38 }
 0xb3c   : > { %v7419_v28 = vpop.permute.xlu0 %7418  ;;  %v7421_v40 = vpop.permute.xlu1 %7420 }
 0xb3d   : > { %v14482_v24 = vadd.f32 %v7419_v28, %v7309_v62  ;;  %v14484_v30 = vadd.f32 %v7421_v40, %v7310_v48  ;;  %v14522_v48 = vpop.f32.mrb[39].mxu0  ;;  %v7315_v40 = vmul.f32 %v14432_v36, %v13611_v8 }
 0xb3e   : > { %7672 = vrot.lane.b32.xlu1 %v7577_v52, %s10609_s25  ;;  %7670 = vrot.lane.b32.xlu0 %v7576_v17, %s10609_s25  ;;  %v14526_v28 = vpop.f32.mrb[40].mxu0  ;;  %v7751_v17 = vmul.f32 %v14476_v50, %v13598_v6  ;;  %v7318_v6 = vmul.f32 %v14432_v36, %v13701_v31  ;;  %s10614_s25 = smov [#allocation3]  }
 0xb3f   : > { %s10548_s30 = sshll.u32 %s10614_s25, 4  ;;  %s10549_s30 = int_to_ptr.vmem [resolvable:$false] %s10548_s30 }
 0xb40   : > { %v7423_v58 = vpop.permute.xlu0 %7422  ;;  %v7425_v53 = vpop.permute.xlu1 %7424  ;;  %s10550_s15 = scalar_lea.vmem %s10549_s30, 8192  ;;  %p10551_p0 = scmp.lt.s32.totalorder %s15001_s16, %s10549_s30 }
 0xb41   : > { %v14500_v46 = vadd.f32 %v7423_v58, %v7311_v9  ;;  %v14502_v51 = vadd.f32 %v7425_v53, %v7312_v45  ;;  %v7750_v9 = vmul.f32 %v14476_v50, %v13575_v56  ;;  %v14540_v53 = vpop.f32.mrb[41].mxu0  ;;  %p10552_p1 = scmp.lt.s32.totalorder %s10550_s15, %s10544_s24 }
 0xb42   : > { %7812 = vrot.lane.b32.xlu1 %v7747_v13, %s16517_s22  ;;  %7810 = vrot.lane.b32.xlu0 %v7746_v11, %s16517_s22  ;;  %v14544_v13 = vpop.f32.mrb[42].mxu0  ;;  %v7317_v11 = vmul.f32 %v14432_v36, %v13690_v57 }
 0xb43   : > { %p10553_p2 = por %p10552_p1, %p10551_p0 }
 0xb44   : > { %v7427_v19 = vpop.permute.xlu0 %7426  ;;  %v7429_v37 = vpop.permute.xlu1 %7428 }
 0xb45   : > { %v14518_v5 = vadd.f32 %v7427_v19, %v7313_v43  ;;  %v14520_v62 = vadd.f32 %v7429_v37, %v7314_v21  ;;  %v7753_v21 = vmul.f32 %v14476_v50, %v13563_v63  ;;  %v7752_v19 = vmul.f32 %v14476_v50, %v13539_v14  ;;  %p10554_p3 = pnand %p10553_p2, %p10547_p13 }
 0xb46   : > { %7816 = vrot.lane.b32.xlu1 %v7749_v35, %s16517_s22  ;;  %7814 = vrot.lane.b32.xlu0 %v7748_v39, %s16517_s22  ;;  %v14558_v39 = vpop.f32.mrb[43].mxu0  ;;  %v7320_v63 = vmul.f32 %v14432_v36, %v16475_v4 }
 0xb48   : > { %v7431_v52 = vpop.permute.xlu0 %7430  ;;  %v7433_v38 = vpop.permute.xlu1 %7432 }
 0xb49   : > { %v14536_v45 = vadd.f32 %v7431_v52, %v7315_v40  ;;  %v14538_v58 = vadd.f32 %v7433_v38, %v7316_v25  ;;  %v14562_v40 = vpop.f32.mrb[44].mxu0  ;;  %v7319_v25 = vmul.f32 %v14432_v36, %v16469_v26  ;;  %v7755_v38 = vmul.f32 %v14476_v50, %v13665_v29 }
 0xb4a   : > { %7820 = vrot.lane.b32.xlu1 %v7751_v17, %s16517_s22  ;;  %7818 = vrot.lane.b32.xlu0 %v7750_v9, %s16517_s22  ;;  %v7754_v17 = vmul.f32 %v14476_v50, %v13648_v33  ;;  %v7322_v29 = vmul.f32 %v14432_v36, %v16479_v10 }
 0xb4c   : > { %v7435_v43 = vpop.permute.xlu0 %7434  ;;  %v7437_v56 = vpop.permute.xlu1 %7436 }
 0xb4d   : > { %v14554_v37 = vadd.f32 %v7435_v43, %v7317_v11  ;;  %v14556_v35 = vadd.f32 %v7437_v56, %v7318_v6  ;;  %v14576_v6 = vpop.f32.mrb[45].mxu0  ;;  %v7321_v56 = vmul.f32 %v14432_v36, %v16477_v1 }
 0xb4e   : > { %7824 = vrot.lane.b32.xlu1 %v7753_v21, %s16517_s22  ;;  %7822 = vrot.lane.b32.xlu0 %v7752_v19, %s16517_s22  ;;  %v14580_v43 = vpop.f32.mrb[46].mxu0  ;;  %v7757_v19 = vmul.f32 %v14476_v50, %v13636_v42  ;;  %v7324_v42 = vmul.f32 %v14432_v36, %v16487_v16 }
 0xb50   : > { %v7439_v52 = vpop.permute.xlu0 %7438  ;;  %v7441_v14 = vpop.permute.xlu1 %7440 }
 0xb51   : > { %v14572_v9 = vadd.f32 %v7439_v52, %v7319_v25  ;;  %v14574_v11 = vadd.f32 %v7441_v14, %v7320_v63  ;;  %v7756_v25 = vmul.f32 %v14476_v50, %v13611_v8  ;;  %v14594_v14 = vpop.f32.mrb[47].mxu0 }
 0xb52   : > { %7828 = vrot.lane.b32.xlu1 %v7755_v38, %s16517_s22  ;;  %7826 = vrot.lane.b32.xlu0 %v7754_v17, %s16517_s22  ;;  %v14598_v38 = vpop.f32.mrb[48].mxu0  ;;  %v7323_v17 = vmul.f32 %v14432_v36, %v16483_v3 }
 0xb53   : > { %16551 = vst [vmem:[#allocation56_spill] sm:$0xff] %v14574_v11 }
 0xb54   : > { %v7443_v21 = vpop.permute.xlu0 %7442  ;;  %v7445_v33 = vpop.permute.xlu1 %7444 }
 0xb55   : > { %v14590_v63 = vadd.f32 %v7443_v21, %v7321_v56  ;;  %v14592_v52 = vadd.f32 %v7445_v33, %v7322_v29  ;;  %v7759_v56 = vmul.f32 %v14476_v50, %v13701_v31  ;;  %v7758_v29 = vmul.f32 %v14476_v50, %v13690_v57 }
 0xb56   : > { %7832 = vrot.lane.b32.xlu1 %v7757_v19, %s16517_s22  ;;  %7830 = vrot.lane.b32.xlu0 %v7756_v25, %s16517_s22  ;;  %v14612_v19 = vpop.f32.mrb[49].mxu0  ;;  %v7326_v31 = vmul.f32 %v14432_v36, %v16489_v41 }
 0xb57   : > { %16552 = vst [vmem:[#allocation59_spill] sm:$0xff] %v14590_v63  ;;  %16553 = vst [vmem:[#allocation61_spill] sm:$0xff] %v14592_v52  ;;  %v14616_v25 = vpop.f32.mrb[50].mxu0  ;;  %v7325_v52 = vmul.f32 %v14432_v36, %v16488_v22 }
 0xb58   : > { %v7447_v11 = vpop.permute.xlu0 %7446  ;;  %v7449_v8 = vpop.permute.xlu1 %7448 }
 0xb59   : > { %v14608_v21 = vadd.f32 %v7447_v11, %v7323_v17  ;;  %v14610_v33 = vadd.f32 %v7449_v8, %v7324_v42  ;;  %v7761_v11 = vmul.f32 %v14476_v50, %v16475_v4  ;;  %v7760_v17 = vmul.f32 %v14476_v50, %v16469_v26 }
 0xb5a   : > { %7836 = vrot.lane.b32.xlu1 %v7759_v56, %s16517_s22  ;;  %7834 = vrot.lane.b32.xlu0 %v7758_v29, %s16517_s22  ;;  %v14630_v56 = vpop.f32.mrb[51].mxu0  ;;  %v7328_v4 = vmul.f32 %v14432_v36, %v16495_v49 }
 0xb5b   : > { %16554 = vst [vmem:[#allocation74_spill] sm:$0xff] %v14608_v21  ;;  %16555 = vst [vmem:[#allocation78_spill] sm:$0xff] %v14610_v33  ;;  %v14634_v29 = vpop.f32.mrb[52].mxu0  ;;  %v7327_v33 = vmul.f32 %v14432_v36, %v16492_v7 }
 0xb5c   : > { %v7451_v63 = vpop.permute.xlu0 %7450  ;;  %v7453_v57 = vpop.permute.xlu1 %7452  ;;  %16558 = vst [vmem:[#allocation90_spill] sm:$0xff] %v14634_v29 }
 0xb5d   : > { %v14626_v42 = vadd.f32 %v7451_v63, %v7325_v52  ;;  %v14628_v8 = vadd.f32 %v7453_v57, %v7326_v31  ;;  %v7763_v63 = vmul.f32 %v14476_v50, %v16479_v10  ;;  %v7762_v52 = vmul.f32 %v14476_v50, %v16477_v1 }
 0xb5e   : > { %7840 = vrot.lane.b32.xlu1 %v7761_v11, %s16517_s22  ;;  %7838 = vrot.lane.b32.xlu0 %v7760_v17, %s16517_s22  ;;  %v14648_v11 = vpop.f32.mrb[53].mxu0  ;;  %v7330_v10 = vmul.f32 %v14432_v36, %v16497_v27 }
 0xb5f   : > { %16556 = vst [vmem:[#allocation89_spill] sm:$0xff] %v14626_v42  ;;  %16557 = vst [vmem:[#allocation21_spill] sm:$0xff] %v14628_v8  ;;  %v14652_v17 = vpop.f32.mrb[54].mxu0  ;;  %v7329_v8 = vmul.f32 %v14432_v36, %v16496_v47 }
 0xb60   : > { %v7455_v21 = vpop.permute.xlu0 %7454  ;;  %v7457_v26 = vpop.permute.xlu1 %7456  ;;  %16561 = vst [vmem:[#allocation94_spill] sm:$0xff] %v14648_v11  ;;  %16562 = vst [vmem:[#allocation62_spill] sm:$0xff] %v14652_v17 }
 0xb61   : > { %v14644_v31 = vadd.f32 %v7455_v21, %v7327_v33  ;;  %v14646_v57 = vadd.f32 %v7457_v26, %v7328_v4  ;;  %v7765_v21 = vmul.f32 %v14476_v50, %v16487_v16  ;;  %v7764_v33 = vmul.f32 %v14476_v50, %v16483_v3 }
 0xb62   : > { %7844 = vrot.lane.b32.xlu1 %v7763_v63, %s16517_s22  ;;  %7842 = vrot.lane.b32.xlu0 %v7762_v52, %s16517_s22  ;;  %v14666_v63 = vpop.f32.mrb[55].mxu0  ;;  %v7332_v16 = vmul.f32 %v14432_v36, %v16502_v32 }
 0xb63   : > { %16559 = vst [vmem:[#allocation91_spill] sm:$0xff] %v14644_v31  ;;  %16560 = vst [vmem:[#allocation97_spill] sm:$0xff] %v14646_v57  ;;  %v14670_v52 = vpop.f32.mrb[56].mxu0  ;;  %v7331_v57 = vmul.f32 %v14432_v36, %v16499_v18 }
 0xb64   : > { %v7459_v42 = vpop.permute.xlu0 %7458  ;;  %v7461_v1 = vpop.permute.xlu1 %7460  ;;  %16565 = vst [vmem:[#allocation95_spill] sm:$0xff] %v14666_v63  ;;  %16566 = vst [vmem:[#allocation72_spill] sm:$0xff] %v14670_v52 }
 0xb65   : > { %v14662_v4 = vadd.f32 %v7459_v42, %v7329_v8  ;;  %v14664_v26 = vadd.f32 %v7461_v1, %v7330_v10  ;;  %v7767_v42 = vmul.f32 %v14476_v50, %v16489_v41  ;;  %v7766_v8 = vmul.f32 %v14476_v50, %v16488_v22 }
 0xb66   : > { %7848 = vrot.lane.b32.xlu1 %v7765_v21, %s16517_s22  ;;  %7846 = vrot.lane.b32.xlu0 %v7764_v33, %s16517_s22  ;;  %v14684_v21 = vpop.f32.mrb[57].mxu0  ;;  %v7334_v41 = vmul.f32 %v14432_v36, %v16505_v20 }
 0xb67   : > { %16563 = vst [vmem:[#allocation10_spill] sm:$0xff] %v14662_v4  ;;  %16564 = vst [vmem:[#allocation68_spill] sm:$0xff] %v14664_v26  ;;  %v14688_v33 = vpop.f32.mrb[58].mxu0  ;;  %v7333_v26 = vmul.f32 %v14432_v36, %v16503_v23 }
 0xb68   : > { %v7463_v31 = vpop.permute.xlu0 %7462  ;;  %v7465_v3 = vpop.permute.xlu1 %7464  ;;  %16569 = vst [vmem:[#allocation19_spill] sm:$0xff] %v14684_v21  ;;  %16570 = vst [vmem:[#allocation77_spill] sm:$0xff] %v14688_v33 }
 0xb69   : > { %v14680_v10 = vadd.f32 %v7463_v31, %v7331_v57  ;;  %v14682_v1 = vadd.f32 %v7465_v3, %v7332_v16  ;;  %v7769_v31 = vmul.f32 %v14476_v50, %v16495_v49  ;;  %v7768_v57 = vmul.f32 %v14476_v50, %v16492_v7 }
 0xb6a   : > { %7852 = vrot.lane.b32.xlu1 %v7767_v42, %s16517_s22  ;;  %7850 = vrot.lane.b32.xlu0 %v7766_v8, %s16517_s22  ;;  %v14702_v42 = vpop.f32.mrb[59].mxu0  ;;  %v7336_v49 = vmul.f32 %v14432_v36, %v16508_v60 }
 0xb6b   : > { %16567 = vst [vmem:[#allocation18_spill] sm:$0xff] %v14680_v10  ;;  %16568 = vst [vmem:[#allocation23_spill] sm:$0xff] %v14682_v1  ;;  %v14706_v8 = vpop.f32.mrb[60].mxu0  ;;  %v7335_v1 = vmul.f32 %v14432_v36, %v16507_v34 }
 0xb6c   : > { %v7467_v4 = vpop.permute.xlu0 %7466  ;;  %v7469_v22 = vpop.permute.xlu1 %7468  ;;  %16573 = vst [vmem:[#allocation99_spill] sm:$0xff] %v14702_v42  ;;  %16574 = vst [vmem:[#allocation35_spill] sm:$0xff] %v14706_v8 }
 0xb6d   : > { %v14698_v16 = vadd.f32 %v7467_v4, %v7333_v26  ;;  %v14700_v3 = vadd.f32 %v7469_v22, %v7334_v41  ;;  %v7771_v4 = vmul.f32 %v14476_v50, %v16497_v27  ;;  %v7770_v26 = vmul.f32 %v14476_v50, %v16496_v47 }
 0xb6e   : > { %7856 = vrot.lane.b32.xlu1 %v7769_v31, %s16517_s22  ;;  %7854 = vrot.lane.b32.xlu0 %v7768_v57, %s16517_s22  ;;  %v14720_v31 = vpop.f32.mrb[61].mxu0  ;;  %v7773_v27 = vmul.f32 %v14476_v50, %v16502_v32  ;;  %v7772_v47 = vmul.f32 %v14476_v50, %v16499_v18 }
 0xb6f   : > { %16571 = vst [vmem:[#allocation13_spill] sm:$0xff] %v14698_v16  ;;  %16572 = vst [vmem:[#allocation98_spill] sm:$0xff] %v14700_v3  ;;  %v14724_v57 = vpop.f32.mrb[62].mxu0 }
 0xb70   : > { %v7471_v10 = vpop.permute.xlu0 %7470  ;;  %v7473_v7 = vpop.permute.xlu1 %7472  ;;  %16577 = vst [vmem:[#allocation38_spill] sm:$0xff] %v14720_v31  ;;  %16578 = vst [vmem:[#allocation101_spill] sm:$0xff] %v14724_v57 }
 0xb71   : > { %v14716_v41 = vadd.f32 %v7471_v10, %v7335_v1  ;;  %v14718_v22 = vadd.f32 %v7473_v7, %v7336_v49  ;;  %v14730_v10 = vpop.f32.mrb[63].mxu0 }
 0xb72   : > { %7860 = vrot.lane.b32.xlu1 %v7771_v4, %s16517_s22  ;;  %7858 = vrot.lane.b32.xlu0 %v7770_v26, %s16517_s22  ;;  %16579 = vst [vmem:[#allocation102_spill] sm:$0xff] %v14730_v10  ;;  %v14734_v1 = vpop.f32.mrb[64].mxu0  ;;  %v7775_v4 = vmul.f32 %v14476_v50, %v16505_v20  ;;  %v7774_v26 = vmul.f32 %v14476_v50, %v16503_v23 }
 0xb73   : > { %16575 = vst [vmem:[#allocation25_spill] sm:$0xff] %v14716_v41  ;;  %16576 = vst [vmem:[#allocation27_spill] sm:$0xff] %v14718_v22  ;;  %v14740_v32 = vpop.f32.mrb[65].mxu0 }
 0xb74   : > { %v7611_v36 = vpop.permute.xlu0 %7610  ;;  %v7613_v3 = vpop.permute.xlu1 %7612  ;;  %16580 = vst [vmem:[#allocation103_spill] sm:$0xff] %v14734_v1  ;;  %16581 = vst [vmem:[#allocation104_spill] sm:$0xff] %v14740_v32  ;;  %v7776_v1 = vmul.f32 %v14476_v50, %v16507_v34 }
 0xb76   : > { %7864 = vrot.lane.b32.xlu1 %v7773_v27, %s16517_s22  ;;  %7862 = vrot.lane.b32.xlu0 %v7772_v47, %s16517_s22  ;;  %v7777_v47 = vmul.f32 %v14476_v50, %v16508_v60 }
 0xb78   : > { %v7615_v49 = vpop.permute.xlu0 %7614  ;;  %v7617_v7 = vpop.permute.xlu1 %7616 }
 0xb79   : > { %v7709_v29 = vadd.f32 %v7617_v7, %v14467_v0 }
 0xb7a   : > { %7868 = vrot.lane.b32.xlu1 %v7775_v4, %s16517_s22  ;;  %7866 = vrot.lane.b32.xlu0 %v7774_v26, %s16517_s22 }
 0xb7c   : > { %v7619_v18 = vpop.permute.xlu0 %7618  ;;  %v7621_v27 = vpop.permute.xlu1 %7620 }
 0xb7d   : > { %v7711_v0 = vadd.f32 %v7621_v27, %v14484_v30 }
 0xb7e   : > { %7872 = vrot.lane.b32.xlu1 %v7777_v47, %s16517_s22  ;;  %7870 = vrot.lane.b32.xlu0 %v7776_v1, %s16517_s22 }
 0xb80   : > { %v14750_v20 = vpop.permute.xlu0 %7622  ;;  %v14752_v23 = vpop.permute.xlu1 %7624 }
 0xb84   : > { %v14754_v32 = vpop.permute.xlu0 %7626  ;;  %v14756_v4 = vpop.permute.xlu1 %7628 }
 0xb88   : > { %v14758_v26 = vpop.permute.xlu0 %7630  ;;  %v14760_v22 = vpop.permute.xlu1 %7632 }
 0xb8c   : > { %v14762_v60 = vpop.permute.xlu0 %7634  ;;  %v14764_v41 = vpop.permute.xlu1 %7636 }
 0xb90   : > { %v14766_v34 = vpop.permute.xlu0 %7638  ;;  %v14768_v50 = vpop.permute.xlu1 %7640 }
 0xb94   : > { %v14770_v1 = vpop.permute.xlu0 %7642  ;;  %v14772_v47 = vpop.permute.xlu1 %7644 }
 0xb98   : > { %v14774_v10 = vpop.permute.xlu0 %7646  ;;  %v14776_v57 = vpop.permute.xlu1 %7648 }
 0xb99   : > { %16582 = vst [vmem:[#allocation34_spill] sm:$0xff] %v14774_v10  ;;  %16583 = vst [vmem:[#allocation36_spill] sm:$0xff] %v14776_v57 }
 0xb9c   : > { %v14778_v16 = vpop.permute.xlu0 %7650  ;;  %v14780_v31 = vpop.permute.xlu1 %7652 }
 0xb9d   : > { %16584 = vst [vmem:[#allocation40_spill] sm:$0xff] %v14778_v16  ;;  %16585 = vst [vmem:[#allocation48_spill] sm:$0xff] %v14780_v31 }
 0xba0   : > { %v14782_v8 = vpop.permute.xlu0 %7654  ;;  %v14784_v42 = vpop.permute.xlu1 %7656 }
 0xba1   : > { %16586 = vst [vmem:[#allocation7_spill] sm:$0xff] %v14782_v8  ;;  %16587 = vst [vmem:[#allocation51_spill] sm:$0xff] %v14784_v42  ;;  %v14805_v42 = vld [vmem:[%s15060_s10] ss:$0 sm:$0xff] }
 0xba4   : > { %v14786_v33 = vpop.permute.xlu0 %7658  ;;  %v14788_v21 = vpop.permute.xlu1 %7660 }
 0xba5   : > { %16588 = vst [vmem:[#allocation57_spill] sm:$0xff] %v14786_v33  ;;  %16589 = vst [vmem:[#allocation75_spill] sm:$0xff] %v14788_v21  ;;  %v7706_v21 = vadd.f32 %v7611_v36, %v14448_v44 }
 0xba8   : > { %v14790_v52 = vpop.permute.xlu0 %7662  ;;  %v14792_v63 = vpop.permute.xlu1 %7664 }
 0xba9   : > { %16590 = vst [vmem:[#allocation80_spill] sm:$0xff] %v14790_v52  ;;  %16591 = vst [vmem:[#allocation30_spill] sm:$0xff] %v14792_v63  ;;  %v7707_v52 = vadd.f32 %v7613_v3, %v14450_v59 }
 0xbac   : > { %v14794_v17 = vpop.permute.xlu0 %7666  ;;  %v14796_v11 = vpop.permute.xlu1 %7668 }
 0xbad   : > { %16592 = vst [vmem:[#allocation32_spill] sm:$0xff] %v14794_v17  ;;  %16593 = vst [vmem:[#allocation44_spill] sm:$0xff] %v14796_v11  ;;  %v7708_v11 = vadd.f32 %v7615_v49, %v14465_v12  ;;  %v7710_v12 = vadd.f32 %v7619_v18, %v14482_v24 }
 0xbb0   : > { %v14798_v16 = vpop.permute.xlu0 %7670  ;;  %v14800_v31 = vpop.permute.xlu1 %7672 }
 0xbb1   : > { %16594 = vst [vmem:[#allocation47_spill] sm:$0xff] %v14798_v16  ;;  %16595 = vst [vmem:[#allocation82_spill] sm:$0xff] %v14800_v31  ;;  %v8118_v16 = vadd.f32 %v14458_v61, %v14805_v42  ;;  %v8113_v31 = vadd.f32 %v14805_v42, %v14486_v2 }
 0xbb4   : > { %v7811_v33 = vpop.permute.xlu0 %7810  ;;  %v7813_v63 = vpop.permute.xlu1 %7812 }
 0xbb5   : > { %v7906_v17 = vadd.f32 %v7811_v33, %v7706_v21  ;;  %v7907_v8 = vadd.f32 %v7813_v63, %v7707_v52  ;;  %v8128_v21 = vadd.f32 %v14490_v15, %v14805_v42  ;;  %v8123_v63 = vadd.f32 %v14805_v42, %v14504_v55 }
 0xbb6   : > { %v8138_v15 = vadd.f32 %v14508_v54, %v14805_v42  ;;  %v8133_v55 = vadd.f32 %v14805_v42, %v14522_v48  ;;  %v7712_v54 = vadd.f32 %v14750_v20, %v14500_v46  ;;  %v7713_v48 = vadd.f32 %v14752_v23, %v14502_v51 }
 0xbb7   : > { %v7938_v57 = vmax.f32 %v7906_v17, 0.0  ;;  %v7939_v10 = vmax.f32 %v7907_v8, 0.0 }
 0xbb8   : > { %v7815_v44 = vpop.permute.xlu0 %7814  ;;  %v7817_v59 = vpop.permute.xlu1 %7816 }
 0xbb9   : > { %v8272_v61 = vadd.f32 %v8118_v16, %v7939_v10  ;;  %v8271_v52 = vadd.f32 %v8113_v31, %v7938_v57  ;;  %v7908_v33 = vadd.f32 %v7815_v44, %v7708_v11  ;;  %v7909_v2 = vadd.f32 %v7817_v59, %v7709_v29 }
 0xbba   : > { %v8148_v44 = vadd.f32 %v14526_v28, %v14805_v42  ;;  %v8143_v59 = vadd.f32 %v14805_v42, %v14540_v53 }
 0xbbb   : > { %v8304_v17 = vmax.f32 %v8272_v61, 0.0  ;;  %v8303_v3 = vmax.f32 %v8271_v52, 0.0  ;;  %v7940_v8 = vmax.f32 %v7908_v33, 0.0  ;;  %v7941_v36 = vmax.f32 %v7909_v2, 0.0 }
 0xbbc   : > { %v7819_v49 = vpop.permute.xlu0 %7818  ;;  %v7821_v7 = vpop.permute.xlu1 %7820 }
 0xbbd   : > { %8336 = vst.msk [vmem:[%s14828_s14 + $0x8] sm:$0xff] %vm16596_vm2, %v8304_v17  ;;  %v8274_v24 = vadd.f32 %v8128_v21, %v7941_v36  ;;  %v8273_v30 = vadd.f32 %v8123_v63, %v7940_v8  ;;  %v7910_v29 = vadd.f32 %v7819_v49, %v7710_v12  ;;  %v7911_v11 = vadd.f32 %v7821_v7, %v7711_v0  ;;  %vm16627_vm2 = vmmov %vm16600_vm0 }
 0xbbe   : > { %8335 = vst.msk [vmem:[%s14828_s14] sm:$0xff] %vm16597_vm13, %v8303_v3  ;;  %v7714_v21 = vadd.f32 %v14754_v32, %v14518_v5  ;;  %v7715_v63 = vadd.f32 %v14756_v4, %v14520_v62  ;;  %v8158_v12 = vadd.f32 %v14544_v13, %v14805_v42  ;;  %v8153_v0 = vadd.f32 %v14805_v42, %v14558_v39  ;;  %vm16628_vm13 = vmmov %vm16600_vm0 }
 0xbbf   : > { %v8306_v16 = vmax.f32 %v8274_v24, 0.0  ;;  %v8305_v31 = vmax.f32 %v8273_v30, 0.0  ;;  %v7942_v57 = vmax.f32 %v7910_v29, 0.0  ;;  %v7943_v10 = vmax.f32 %v7911_v11, 0.0 }
 0xbc0   : > { %v7823_v18 = vpop.permute.xlu0 %7822  ;;  %v7825_v27 = vpop.permute.xlu1 %7824  ;;  %v7716_v17 = vadd.f32 %v14758_v26, %v14536_v45  ;;  %v7717_v3 = vadd.f32 %v14760_v22, %v14538_v58  ;;  %v7718_v24 = vadd.f32 %v14762_v60, %v14554_v37  ;;  %v7719_v30 = vadd.f32 %v14764_v41, %v14556_v35 }
 0xbc1   : > { %8338 = vst.msk [vmem:[%s14828_s14 + $0x18] sm:$0xff] %vm16598_vm7, %v8306_v16  ;;  %v8276_v46 = vadd.f32 %v8138_v15, %v7943_v10  ;;  %v8275_v51 = vadd.f32 %v8133_v55, %v7942_v57  ;;  %v7912_v20 = vadd.f32 %v7823_v18, %v7712_v54  ;;  %v7913_v23 = vadd.f32 %v7825_v27, %v7713_v48  ;;  %v16606_v10 = vld [vmem:[#allocation56_spill] sm:$0xff]  ;;  %vm16635_vm7 = vmmov %vm16600_vm0 }
 0xbc2   : > { %8337 = vst.msk [vmem:[%s14828_s14 + $0x10] sm:$0xff] %vm16599_vm8, %v8305_v31  ;;  %v8168_v15 = vadd.f32 %v14562_v40, %v14805_v42  ;;  %v8163_v55 = vadd.f32 %v14805_v42, %v14576_v6  ;;  %v8178_v16 = vadd.f32 %v14580_v43, %v14805_v42  ;;  %v8173_v31 = vadd.f32 %v14805_v42, %v14594_v14  ;;  %vm16636_vm8 = vmmov %vm16600_vm0 }
 0xbc3   : > { %v8308_v28 = vmax.f32 %v8276_v46, 0.0  ;;  %v8307_v61 = vmax.f32 %v8275_v51, 0.0  ;;  %v7944_v52 = vmax.f32 %v7912_v20, 0.0  ;;  %v7945_v53 = vmax.f32 %v7913_v23, 0.0 }
 0xbc4   : > { %v7827_v33 = vpop.permute.xlu0 %7826  ;;  %v7829_v2 = vpop.permute.xlu1 %7828  ;;  %v7720_v57 = vadd.f32 %v14766_v34, %v14572_v9  ;;  %v7721_v18 = vadd.f32 %v14768_v50, %v16606_v10  ;;  %v8188_v51 = vadd.f32 %v14598_v38, %v14805_v42  ;;  %v8183_v20 = vadd.f32 %v14805_v42, %v14612_v19 }
 0xbc5   : > { %8340 = vst.msk [vmem:[%s14828_s14 + $0x28] sm:$0xff] %vm16600_vm0, %v8308_v28  ;;  %v8278_v5 = vadd.f32 %v8148_v44, %v7945_v53  ;;  %v8277_v62 = vadd.f32 %v8143_v59, %v7944_v52  ;;  %v7914_v32 = vadd.f32 %v7827_v33, %v7714_v21  ;;  %v7915_v4 = vadd.f32 %v7829_v2, %v7715_v63  ;;  %v16609_v21 = vld [vmem:[#allocation59_spill] sm:$0xff]  ;;  %v16610_v28 = vld [vmem:[#allocation61_spill] sm:$0xff] }
 0xbc6   : > { %8339 = vst.msk [vmem:[%s14828_s14 + $0x20] sm:$0xff] %vm16601_vm9, %v8307_v61  ;;  %v7722_v63 = vadd.f32 %v14770_v1, %v16609_v21  ;;  %v7723_v61 = vadd.f32 %v14772_v47, %v16610_v28  ;;  %vm16643_vm9 = vmmov %vm16600_vm0 }
 0xbc7   : > { %v8310_v13 = vmax.f32 %v8278_v5, 0.0  ;;  %v8309_v8 = vmax.f32 %v8277_v62, 0.0  ;;  %v7946_v36 = vmax.f32 %v7914_v32, 0.0  ;;  %v7947_v39 = vmax.f32 %v7915_v4, 0.0  ;;  %v16613_v32 = vld [vmem:[#allocation74_spill] sm:$0xff] }
 0xbc8   : > { %v7831_v49 = vpop.permute.xlu0 %7830  ;;  %v7833_v7 = vpop.permute.xlu1 %7832  ;;  %v16614_v4 = vld [vmem:[#allocation34_spill] sm:$0xff] }
 0xbc9   : > { %8342 = vst.msk [vmem:[%s14828_s14 + $0x38] sm:$0xff] %vm16602_vm12, %v8310_v13  ;;  %v8280_v45 = vadd.f32 %v8158_v12, %v7947_v39  ;;  %v8279_v58 = vadd.f32 %v8153_v0, %v7946_v36  ;;  %v7916_v22 = vadd.f32 %v7831_v49, %v7716_v17  ;;  %v7917_v26 = vadd.f32 %v7833_v7, %v7717_v3  ;;  %v16615_v3 = vld [vmem:[#allocation78_spill] sm:$0xff]  ;;  %v16616_v13 = vld [vmem:[#allocation36_spill] sm:$0xff]  ;;  %vm16650_vm12 = vmmov %vm16600_vm0 }
 0xbca   : > { %8341 = vst.msk [vmem:[%s14828_s14 + $0x30] sm:$0xff] %vm16603_vm5, %v8309_v8  ;;  %v8198_v12 = vadd.f32 %v14616_v25, %v14805_v42  ;;  %v8193_v0 = vadd.f32 %v14805_v42, %v14630_v56  ;;  %v7724_v17 = vadd.f32 %v16614_v4, %v16613_v32  ;;  %v7725_v8 = vadd.f32 %v16616_v13, %v16615_v3  ;;  %v16639_v32 = vld [vmem:[#allocation68_spill] sm:$0xff]  ;;  %v16640_v4 = vld [vmem:[#allocation75_spill] sm:$0xff]  ;;  %vm16651_vm5 = vmmov %vm16600_vm0 }
 0xbcb   : > { %v8312_v40 = vmax.f32 %v8280_v45, 0.0  ;;  %v8311_v29 = vmax.f32 %v8279_v58, 0.0  ;;  %v7948_v11 = vmax.f32 %v7916_v22, 0.0  ;;  %v7949_v6 = vmax.f32 %v7917_v26, 0.0  ;;  %v16618_v45 = vld [vmem:[#allocation94_spill] sm:$0xff] }
 0xbcc   : > { %v7835_v54 = vpop.permute.xlu0 %7834  ;;  %v7837_v48 = vpop.permute.xlu1 %7836  ;;  %v8203_v58 = vadd.f32 %v14805_v42, %v16618_v45 }
 0xbcd   : > { %8344 = vst.msk [vmem:[%s14828_s14 + $0x48] sm:$0xff] %vm16604_vm15, %v8312_v40  ;;  %v8282_v37 = vadd.f32 %v8168_v15, %v7949_v6  ;;  %v8281_v35 = vadd.f32 %v8163_v55, %v7948_v11  ;;  %v7918_v41 = vadd.f32 %v7835_v54, %v7718_v24  ;;  %v7919_v60 = vadd.f32 %v7837_v48, %v7719_v30  ;;  %v16617_v15 = vld [vmem:[#allocation90_spill] sm:$0xff]  ;;  %v16621_v40 = vld [vmem:[#allocation89_spill] sm:$0xff]  ;;  %v16624_v54 = vld [vmem:[#allocation48_spill] sm:$0xff] }
 0xbce   : > { %8343 = vst.msk [vmem:[%s14828_s14 + $0x40] sm:$0xff] %vm16605_vm10, %v8311_v29  ;;  %v8208_v55 = vadd.f32 %v16617_v15, %v14805_v42  ;;  %v16622_v29 = vld [vmem:[#allocation40_spill] sm:$0xff]  ;;  %v16623_v6 = vld [vmem:[#allocation21_spill] sm:$0xff]  ;;  %vm16658_vm15 = vmmov %vm16600_vm0 }
 0xbcf   : > { %v8314_v43 = vmax.f32 %v8282_v37, 0.0  ;;  %v8313_v27 = vmax.f32 %v8281_v35, 0.0  ;;  %v7950_v44 = vmax.f32 %v7918_v41, 0.0  ;;  %v7951_v14 = vmax.f32 %v7919_v60, 0.0  ;;  %vm16659_vm10 = vmmov %vm16600_vm0 }
 0xbd0   : > { %v7839_v59 = vpop.permute.xlu0 %7838  ;;  %v7841_v46 = vpop.permute.xlu1 %7840  ;;  %v7726_v11 = vadd.f32 %v16622_v29, %v16621_v40  ;;  %v7727_v48 = vadd.f32 %v16624_v54, %v16623_v6  ;;  %v16646_v40 = vld [vmem:[#allocation23_spill] sm:$0xff]  ;;  %v16647_v29 = vld [vmem:[#allocation30_spill] sm:$0xff] }
 0xbd1   : > { %8346 = vst.msk [vmem:[%s14828_s14 + $0x58] sm:$0xff] %vm16607_vm14, %v8314_v43  ;;  %v8284_v9 = vadd.f32 %v8178_v16, %v7951_v14  ;;  %v8283_v34 = vadd.f32 %v8173_v31, %v7950_v44  ;;  %v7920_v50 = vadd.f32 %v7839_v59, %v7720_v57  ;;  %v7921_v23 = vadd.f32 %v7841_v46, %v7721_v18  ;;  %v16625_v57 = vld [vmem:[#allocation62_spill] sm:$0xff]  ;;  %v16626_v18 = vld [vmem:[#allocation95_spill] sm:$0xff]  ;;  %vm16666_vm14 = vmmov %vm16600_vm0 }
 0xbd2   : > { %8345 = vst.msk [vmem:[%s14828_s14 + $0x50] sm:$0xff] %vm16608_vm11, %v8313_v27  ;;  %v8218_v10 = vadd.f32 %v16625_v57, %v14805_v42  ;;  %v8213_v43 = vadd.f32 %v14805_v42, %v16626_v18  ;;  %v16629_v46 = vld [vmem:[#allocation91_spill] sm:$0xff]  ;;  %vm16667_vm11 = vmmov %vm16600_vm0 }
 0xbd3   : > { %v8316_v38 = vmax.f32 %v8284_v9, 0.0  ;;  %v8315_v52 = vmax.f32 %v8283_v34, 0.0  ;;  %v7952_v53 = vmax.f32 %v7920_v50, 0.0  ;;  %v7953_v19 = vmax.f32 %v7921_v23, 0.0  ;;  %v16631_v9 = vld [vmem:[#allocation97_spill] sm:$0xff]  ;;  %v16632_v34 = vld [vmem:[#allocation51_spill] sm:$0xff] }
 0xbd4   : > { %v7843_v33 = vpop.permute.xlu0 %7842  ;;  %v7845_v2 = vpop.permute.xlu1 %7844  ;;  %v7729_v50 = vadd.f32 %v16632_v34, %v16631_v9 }
 0xbd5   : > { %8348 = vst.msk [vmem:[%s14828_s14 + $0x68] sm:$0xff] %vm16611_vm6, %v8316_v38  ;;  %v8286_v1 = vadd.f32 %v8188_v51, %v7953_v19  ;;  %v8285_v47 = vadd.f32 %v8183_v20, %v7952_v53  ;;  %v7922_v5 = vadd.f32 %v7843_v33, %v7722_v63  ;;  %v7923_v62 = vadd.f32 %v7845_v2, %v7723_v61  ;;  %v16630_v51 = vld [vmem:[#allocation7_spill] sm:$0xff]  ;;  %vm16668_vm6 = vmmov %vm16600_vm0 }
 0xbd6   : > { %8347 = vst.msk [vmem:[%s14828_s14 + $0x60] sm:$0xff] %vm16612_vm1, %v8315_v52  ;;  %v7728_v20 = vadd.f32 %v16630_v51, %v16629_v46  ;;  %v16633_v52 = vld [vmem:[#allocation72_spill] sm:$0xff]  ;;  %v16634_v19 = vld [vmem:[#allocation19_spill] sm:$0xff]  ;;  %v16654_v46 = vld [vmem:[#allocation98_spill] sm:$0xff] }
 0xbd7   : > { %v8318_v25 = vmax.f32 %v8286_v1, 0.0  ;;  %v8317_v36 = vmax.f32 %v8285_v47, 0.0  ;;  %v7954_v39 = vmax.f32 %v7922_v5, 0.0  ;;  %v7955_v56 = vmax.f32 %v7923_v62, 0.0  ;;  %v16637_v47 = vld [vmem:[#allocation10_spill] sm:$0xff]  ;;  %v16638_v5 = vld [vmem:[#allocation57_spill] sm:$0xff]  ;;  %vm16669_vm1 = vmmov %vm16600_vm0 }
 0xbd8   : > { %v7847_v49 = vpop.permute.xlu0 %7846  ;;  %v7849_v7 = vpop.permute.xlu1 %7848  ;;  %v8228_v53 = vadd.f32 %v16633_v52, %v14805_v42  ;;  %v8223_v33 = vadd.f32 %v14805_v42, %v16634_v19  ;;  %v7730_v62 = vadd.f32 %v16638_v5, %v16637_v47  ;;  %v16655_v51 = vld [vmem:[#allocation44_spill] sm:$0xff]  ;;  %v16662_v47 = vld [vmem:[#allocation27_spill] sm:$0xff]  ;;  %v16663_v5 = vld [vmem:[#allocation82_spill] sm:$0xff] }
 0xbd9   : > { %8350 = vst.msk [vmem:[%s14828_s14 + $0x78] sm:$0xff] %vm16619_vm4, %v8318_v25  ;;  %v8288_v22 = vadd.f32 %v8198_v12, %v7955_v56  ;;  %v8287_v26 = vadd.f32 %v8193_v0, %v7954_v39  ;;  %v7924_v24 = vadd.f32 %v7847_v49, %v7724_v17  ;;  %v7925_v30 = vadd.f32 %v7849_v7, %v7725_v8  ;;  %v16641_v56 = vld [vmem:[#allocation77_spill] sm:$0xff]  ;;  %v16642_v7 = vld [vmem:[#allocation99_spill] sm:$0xff]  ;;  %vm16670_vm4 = vmmov %vm16600_vm0 }
 0xbda   : > { %8349 = vst.msk [vmem:[%s14828_s14 + $0x70] sm:$0xff] %vm16620_vm3, %v8317_v36  ;;  %v7731_v17 = vadd.f32 %v16640_v4, %v16639_v32  ;;  %v8238_v49 = vadd.f32 %v16641_v56, %v14805_v42  ;;  %v8233_v15 = vadd.f32 %v14805_v42, %v16642_v7  ;;  %vm16671_vm3 = vmmov %vm16600_vm0 }
 0xbdb   : > { %v8320_v16 = vmax.f32 %v8288_v22, 0.0  ;;  %v8319_v31 = vmax.f32 %v8287_v26, 0.0  ;;  %v7956_v37 = vmax.f32 %v7924_v24, 0.0  ;;  %v7957_v35 = vmax.f32 %v7925_v30, 0.0  ;;  %v16644_v26 = vld [vmem:[#allocation18_spill] sm:$0xff]  ;;  %v16645_v24 = vld [vmem:[#allocation80_spill] sm:$0xff] }
 0xbdc   : > { %v7851_v41 = vpop.permute.xlu0 %7850  ;;  %v7853_v60 = vpop.permute.xlu1 %7852  ;;  %v7732_v30 = vadd.f32 %v16645_v24, %v16644_v26 }
 0xbdd   : > { %8352 = vst.msk [vmem:[%s14828_s14 + $0x88] sm:$0xff] %vm16627_vm2, %v8320_v16  ;;  %v8290_v27 = vadd.f32 %v8208_v55, %v7957_v35  ;;  %v8289_v44 = vadd.f32 %v8203_v58, %v7956_v37  ;;  %v7926_v14 = vadd.f32 %v7851_v41, %v7726_v11  ;;  %v7927_v59 = vadd.f32 %v7853_v60, %v7727_v48  ;;  %v16648_v35 = vld [vmem:[#allocation35_spill] sm:$0xff]  ;;  %v16649_v60 = vld [vmem:[#allocation38_spill] sm:$0xff] }
 0xbde   : > { %8351 = vst.msk [vmem:[%s14828_s14 + $0x80] sm:$0xff] %vm16628_vm13, %v8319_v31  ;;  %v7733_v11 = vadd.f32 %v16647_v29, %v16646_v40  ;;  %v8248_v41 = vadd.f32 %v16648_v35, %v14805_v42  ;;  %v8243_v57 = vadd.f32 %v14805_v42, %v16649_v60 }
 0xbdf   : > { %v8322_v23 = vmax.f32 %v8290_v27, 0.0  ;;  %v8321_v21 = vmax.f32 %v8289_v44, 0.0  ;;  %v7958_v63 = vmax.f32 %v7926_v14, 0.0  ;;  %v7959_v28 = vmax.f32 %v7927_v59, 0.0  ;;  %v16652_v44 = vld [vmem:[#allocation13_spill] sm:$0xff]  ;;  %v16653_v14 = vld [vmem:[#allocation32_spill] sm:$0xff] }
 0xbe0   : > { %v7855_v61 = vpop.permute.xlu0 %7854  ;;  %v7857_v38 = vpop.permute.xlu1 %7856  ;;  %v7734_v59 = vadd.f32 %v16653_v14, %v16652_v44 }
 0xbe1   : > { %8354 = vst.msk [vmem:[%s14828_s14 + $0x98] sm:$0xff] %vm16635_vm7, %v8322_v23  ;;  %v8292_v2 = vadd.f32 %v8218_v10, %v7959_v28  ;;  %v8291_v12 = vadd.f32 %v8213_v43, %v7958_v63  ;;  %v7928_v0 = vadd.f32 %v7855_v61, %v7728_v20  ;;  %v7929_v1 = vadd.f32 %v7857_v38, %v7729_v50  ;;  %v16656_v28 = vld [vmem:[#allocation101_spill] sm:$0xff]  ;;  %v16657_v38 = vld [vmem:[#allocation102_spill] sm:$0xff] }
 0xbe2   : > { %8353 = vst.msk [vmem:[%s14828_s14 + $0x90] sm:$0xff] %vm16636_vm8, %v8321_v21  ;;  %v7735_v20 = vadd.f32 %v16655_v51, %v16654_v46  ;;  %v8258_v61 = vadd.f32 %v16656_v28, %v14805_v42  ;;  %v8253_v52 = vadd.f32 %v14805_v42, %v16657_v38 }
 0xbe3   : > { %v8324_v3 = vmax.f32 %v8292_v2, 0.0  ;;  %v8323_v13 = vmax.f32 %v8291_v12, 0.0  ;;  %v7960_v8 = vmax.f32 %v7928_v0, 0.0  ;;  %v7961_v25 = vmax.f32 %v7929_v1, 0.0  ;;  %v16660_v12 = vld [vmem:[#allocation25_spill] sm:$0xff]  ;;  %v16661_v0 = vld [vmem:[#allocation47_spill] sm:$0xff] }
 0xbe4   : > { %v7859_v36 = vpop.permute.xlu0 %7858  ;;  %v7861_v39 = vpop.permute.xlu1 %7860  ;;  %v7736_v1 = vadd.f32 %v16661_v0, %v16660_v12 }
 0xbe5   : > { %8356 = vst.msk [vmem:[%s14828_s14 + $0xa8] sm:$0xff] %vm16600_vm0, %v8324_v3  ;;  %v8294_v55 = vadd.f32 %v8228_v53, %v7961_v25  ;;  %v8293_v45 = vadd.f32 %v8223_v33, %v7960_v8  ;;  %v7930_v58 = vadd.f32 %v7859_v36, %v7730_v62  ;;  %v7931_v22 = vadd.f32 %v7861_v39, %v7731_v17  ;;  %v16664_v25 = vld [vmem:[#allocation103_spill] sm:$0xff]  ;;  %v16665_v39 = vld [vmem:[#allocation104_spill] sm:$0xff] }
 0xbe6   : > { %8355 = vst.msk [vmem:[%s14828_s14 + $0xa0] sm:$0xff] %vm16643_vm9, %v8323_v13  ;;  %v7737_v62 = vadd.f32 %v16663_v5, %v16662_v47  ;;  %v8268_v36 = vadd.f32 %v16664_v25, %v14805_v42  ;;  %v8263_v56 = vadd.f32 %v14805_v42, %v16665_v39 }
 0xbe7   : > { %v8326_v6 = vmax.f32 %v8294_v55, 0.0  ;;  %v8325_v54 = vmax.f32 %v8293_v45, 0.0  ;;  %v7962_v48 = vmax.f32 %v7930_v58, 0.0  ;;  %v7963_v16 = vmax.f32 %v7931_v22, 0.0 }
 0xbe8   : > { %v7863_v31 = vpop.permute.xlu0 %7862  ;;  %v7865_v37 = vpop.permute.xlu1 %7864 }
 0xbe9   : > { %8358 = vst.msk [vmem:[%s14828_s14 + $0xb8] sm:$0xff] %vm16650_vm12, %v8326_v6  ;;  %v8296_v10 = vadd.f32 %v8238_v49, %v7963_v16  ;;  %v8295_v18 = vadd.f32 %v8233_v15, %v7962_v48  ;;  %v7932_v43 = vadd.f32 %v7863_v31, %v7732_v30  ;;  %v7933_v27 = vadd.f32 %v7865_v37, %v7733_v11 }
 0xbea   : > { %8357 = vst.msk [vmem:[%s14828_s14 + $0xb0] sm:$0xff] %vm16651_vm5, %v8325_v54 }
 0xbeb   : > { %v8328_v9 = vmax.f32 %v8296_v10, 0.0  ;;  %v8327_v34 = vmax.f32 %v8295_v18, 0.0  ;;  %v7964_v50 = vmax.f32 %v7932_v43, 0.0  ;;  %v7965_v23 = vmax.f32 %v7933_v27, 0.0 }
 0xbec   : > { %v7867_v21 = vpop.permute.xlu0 %7866  ;;  %v7869_v63 = vpop.permute.xlu1 %7868 }
 0xbed   : > { %8360 = vst.msk [vmem:[%s14828_s14 + $0xc8] sm:$0xff] %vm16658_vm15, %v8328_v9  ;;  %v8298_v53 = vadd.f32 %v8248_v41, %v7965_v23  ;;  %v8297_v19 = vadd.f32 %v8243_v57, %v7964_v50  ;;  %v7934_v33 = vadd.f32 %v7867_v21, %v7734_v59  ;;  %v7935_v2 = vadd.f32 %v7869_v63, %v7735_v20 }
 0xbee   : > { %8359 = vst.msk [vmem:[%s14828_s14 + $0xc0] sm:$0xff] %vm16659_vm10, %v8327_v34 }
 0xbef   : > { %v8330_v32 = vmax.f32 %v8298_v53, 0.0  ;;  %v8329_v4 = vmax.f32 %v8297_v19, 0.0  ;;  %v7966_v17 = vmax.f32 %v7934_v33, 0.0  ;;  %v7967_v3 = vmax.f32 %v7935_v2, 0.0 }
 0xbf0   : > { %v7871_v13 = vpop.permute.xlu0 %7870  ;;  %v7873_v8 = vpop.permute.xlu1 %7872 }
 0xbf1   : > { %8362 = vst.msk [vmem:[%s14828_s14 + $0xd8] sm:$0xff] %vm16666_vm14, %v8330_v32  ;;  %v8300_v49 = vadd.f32 %v8258_v61, %v7967_v3  ;;  %v8299_v7 = vadd.f32 %v8253_v52, %v7966_v17  ;;  %v7936_v15 = vadd.f32 %v7871_v13, %v7736_v1  ;;  %v7937_v55 = vadd.f32 %v7873_v8, %v7737_v62 }
 0xbf2   : > { %8361 = vst.msk [vmem:[%s14828_s14 + $0xd0] sm:$0xff] %vm16667_vm11, %v8329_v4 }
 0xbf3   : > { %v8332_v45 = vmax.f32 %v8300_v49, 0.0  ;;  %v8331_v58 = vmax.f32 %v8299_v7, 0.0  ;;  %v7968_v22 = vmax.f32 %v7936_v15, 0.0  ;;  %v7969_v26 = vmax.f32 %v7937_v55, 0.0 }
 0xbf5   : > { %8364 = vst.msk [vmem:[%s14828_s14 + $0xe8] sm:$0xff] %vm16668_vm6, %v8332_v45  ;;  %v8302_v42 = vadd.f32 %v8268_v36, %v7969_v26  ;;  %v8301_v24 = vadd.f32 %v8263_v56, %v7968_v22 }
 0xbf6   : > { %8363 = vst.msk [vmem:[%s14828_s14 + $0xe0] sm:$0xff] %vm16669_vm1, %v8331_v58 }
 0xbf7   : > { %v8334_v30 = vmax.f32 %v8302_v42, 0.0  ;;  %v8333_v40 = vmax.f32 %v8301_v24, 0.0 }
 0xbf9   : > { %8366 = vst.msk [vmem:[%s14828_s14 + $0xf8] sm:$0xff] %vm16670_vm4, %v8334_v30 }
 0xbfa   : > { %8365 = vst.msk [vmem:[%s14828_s14 + $0xf0] sm:$0xff] %vm16671_vm3, %v8333_v40 }
 0xbfb   : > { %10557 = shalt.err (!%p10554_p3)
}
 0xbfc   : > { %s10558_s29 = scalar_lea.hbm %s14999_s13, 4096  ;;  %s10562_s12 = scalar_lea.hbm %s15061_s11, 8192 }
 0xbfd   : > { %p10559_p4 = scmp.ne.s32.totalorder %s14999_s13, %s10558_s29  ;;  %p10563_p9 = scmp.lt.u32.totalorder %s14999_s13, %s15061_s11 }
 0xbfe   : > { %p10564_p10 = scmp.lt.u32.totalorder %s10562_s12, %s10558_s29  ;;  %p10566_p12 = scmp.lt.u32.totalorder %s10558_s29, %s14999_s13 }
 0xbff   : > { %p10560_p7 = pnand %p10559_p4, %p10715_p5 }
 0xc00   : > { %p10565_p11 = por %p10564_p10, %p10563_p9 }
 0xc01   : > { %p10561_p8 = pneg %p10560_p7 }
 0xc02   : > { %p10567_p13 = por %p10566_p12, %p10565_p11 }
 0xc04   : > { %p10568_p0 = pnand %p10567_p13, %p10561_p8 }
 0xc06   : > { %10571 = shalt.err (!%p10568_p0)
}
 0xc07   : > { %s10615_s24 = smov 128   ;;  %s10616_s15 = smov 8  }
 0xc08   : > { %10436 = dma.vmem_to_hbm [thread:$0]  (%p10715_p5), %s15001_s16, 4096, %s14999_s13, %s15009_s21, %s10615_s24, %s10615_s24, %s10616_s15  }
 0xc09 PF: > { %p10442_p1 = scmp.ge.s32.totalorder %s10606_s20, 2  ;;  %s8396_s14 = sand.u32 1, %s10594_s17  }
 0xc0a   : > { %s8397_s29 = scalar_lea.sflag [#allocation4], %s8396_s14 }
 0xc0b   : > { %p10439_p2 = pnand %p10442_p1, %p10719_p6 }
 0xc0d   : > { %10589 = dma.done.wait (!%p10439_p2), %s8397_s29, 4096  }
 0xc0e   : > { %10591 = vsyncadd (!%p10439_p2), %s8397_s29, 4294963200  ;;  %p21_p3 = scmp.ge.s32.totalorder %s10702_s23, 4   ;;  %s16672_s17 = smov %s10598_s18 }
 0xc0f   : > { %s16673_s18 = smov %s10602_s19  ;;  %s16674_s19 = smov %s10713_s26 }
 0xc10   : > { %s16675_s20 = smov %s10702_s23  ;;  %23 = sbr.rel (!%p21_p3) target bundleno = 3 (0x3), region = 115 }
 0xc17   :  { %8402 = vsyncpa [#allocation4], 1 }
 0xc18   :  { %8404 = vsyncpa [#allocation4 + $0x1], 1 }

</bundles_post_ra>
